<compile_context>
chip_gen: v5e
topology: v5e:2x2
jax: 0.10.0
libtpu: 0.0.40
codegen_flags: <defaults>
</compile_context>

<pallas_src>
import math
from functools import partial
from typing import NamedTuple

import jax
import jax.numpy as jnp
from jax.experimental import pallas as pl
from jax.experimental.pallas import tpu as pltpu  # noqa: F401  (kept for optional CompilerParams tuning)


# ----------------------------------------------------------------------------
# Config (a scaled-down t5-small)
# ----------------------------------------------------------------------------
class T5Config(NamedTuple):
    vocab: int = 128
    d_model: int = 64
    n_heads: int = 4
    d_kv: int = 16          # head dim; inner dim = n_heads * d_kv = d_model
    d_ff: int = 128
    n_layers: int = 2
    rel_buckets: int = 32
    rel_max_distance: int = 128
    move_vocab: int = 32


NEG_INF = -1e9   # stands in for torch.finfo(float32).min in the extended masks
LANE = 128       # lane width: move-head and loss-pack outputs are padded to 128 columns


# ----------------------------------------------------------------------------
# In-kernel helpers
# ----------------------------------------------------------------------------
def _rms(x, w):
    var = jnp.mean(x * x, axis=-1, keepdims=True)
    return x * jax.lax.rsqrt(var + 1e-6) * w


# ----------------------------------------------------------------------------
# The fused Chessformer kernel (single pallas_call, no grid: everything in VMEM)
# ----------------------------------------------------------------------------
def _chessformer_kernel(
    # data
    x_enc_ref, x_dec_ref, enc_bias_ref, dec_bias_ref, cross_bias_ref, labels_ref,
    # encoder weights (stacked over layers along the leading axis)
    e_ln_ref, e_wqkv_ref, e_wo_ref, e_wi_ref, e_wof_ref,
    # decoder weights
    d_ln_ref, d_wqkv_ref, d_wo_ref, d_cwqkv_ref, d_cwo_ref, d_wi_ref, d_wof_ref,
    # final norms / tied embedding / move head
    enc_fln_ref, dec_fln_ref, emb_ref, move_w_ref, move_b_ref,
    # outputs
    move_out_ref, loss_out_ref,
    *, n_layers, n_heads, d_model, d_ff, batch, enc_len):

    H, D, F = n_heads, d_model, d_ff
    f32, bf16 = jnp.float32, jnp.bfloat16

    def bmm(a, b, dims):
        # batched matmul over leading head axis, f32 accumulation on the MXU
        return jax.lax.dot_general(a, b, (dims, ((0,), (0,))), preferred_element_type=f32)

    def attention(nq, nk, wqkv_ref, qkv_off, wo_ref, wo_off, bias):
        # head-batched attention.  nq:(Nq,D) bf16 (normed), nk:(Nk,D) bf16.
        # wqkv_ref rows [qkv_off, qkv_off+3H) hold per-head-stacked Wq|Wk|Wv of shape (H,D,dkv);
        # wo_ref rows [wo_off, wo_off+H) hold the per-head output projection (H,dkv,D).
        # bias: (H, Nq, Nk) f32 additive (rel-pos bias + padding + block-diagonal batch mask).
        Nq, Nk = nq.shape[0], nk.shape[0]
        wq = wqkv_ref[qkv_off:qkv_off + H]
        wk = wqkv_ref[qkv_off + H:qkv_off + 2 * H]
        wv = wqkv_ref[qkv_off + 2 * H:qkv_off + 3 * H]
        wo = wo_ref[wo_off:wo_off + H]
        qi = jnp.broadcast_to(nq[None], (H, Nq, D))
        ki = jnp.broadcast_to(nk[None], (H, Nk, D))
        q = bmm(qi, wq, ((2,), (1,)))                                   # (H, Nq, dkv) f32
        k = bmm(ki, wk, ((2,), (1,)))                                   # (H, Nk, dkv)
        v = bmm(ki, wv, ((2,), (1,)))                                   # (H, Nk, dkv)
        # T5 attention: NO 1/sqrt(d_kv) scaling of the scores.
        s = bmm(q.astype(bf16), k.astype(bf16), ((2,), (2,))) + bias    # (H, Nq, Nk) f32
        m = jnp.max(s, axis=-1, keepdims=True)
        p = jnp.exp(s - m)
        p = p * pl.reciprocal(jnp.sum(p, axis=-1, keepdims=True), approx=True)
        ctx = bmm(p.astype(bf16), v.astype(bf16), ((2,), (1,)))         # (H, Nq, dkv)
        oh = bmm(ctx.astype(bf16), wo, ((2,), (1,)))                    # (H, Nq, D)
        return jnp.sum(oh, axis=0)                                      # (Nq, D) f32

    def ffn(x, ln, wi, wo_ff):
        n = _rms(x, ln).astype(bf16)
        hmid = jnp.dot(n, wi, preferred_element_type=f32)
        hmid = jnp.maximum(hmid, 0.0).astype(bf16)
        return x + jnp.dot(hmid, wo_ff, preferred_element_type=f32)

    # ---------------- encoder ----------------
    h = x_enc_ref[...].astype(f32)                                      # (B*Le, D)
    eb = enc_bias_ref[...]                                              # (H, B*Le, B*Le)
    for l in range(n_layers):
        n1 = _rms(h, e_ln_ref[2 * l:2 * l + 1, :]).astype(bf16)
        h = h + attention(n1, n1, e_wqkv_ref, 3 * H * l, e_wo_ref, H * l, eb)
        h = ffn(h, e_ln_ref[2 * l + 1:2 * l + 2, :],
                e_wi_ref[l * D:(l + 1) * D, :], e_wof_ref[l * F:(l + 1) * F, :])
    enc_out = _rms(h, enc_fln_ref[...])                                 # encoder_last_hidden_state

    # move head on the per-batch CLS rows (row b*Le), fused here so the encoder slab never
    # leaves VMEM; output padded to a lane-dense 128-column slab.
    cls = jnp.concatenate([enc_out[b * enc_len:b * enc_len + 1, :] for b in range(batch)], axis=0)
    move_out_ref[...] = (jnp.dot(cls.astype(bf16), move_w_ref[...],
                                 preferred_element_type=f32) + move_b_ref[...])

    # ---------------- decoder ----------------
    d = x_dec_ref[...].astype(f32)                                      # (B*Ld, D)
    db = dec_bias_ref[...]                                              # (H, B*Ld, B*Ld)
    cb = cross_bias_ref[...]                                            # (H, B*Ld, B*Le)
    enc_kv = enc_out.astype(bf16)                                       # cross-attn K/V input
    for l in range(n_layers):
        n1 = _rms(d, d_ln_ref[3 * l:3 * l + 1, :]).astype(bf16)
        d = d + attention(n1, n1, d_wqkv_ref, 3 * H * l, d_wo_ref, H * l, db)
        n2 = _rms(d, d_ln_ref[3 * l + 1:3 * l + 2, :]).astype(bf16)
        d = d + attention(n2, enc_kv, d_cwqkv_ref, 3 * H * l, d_cwo_ref, H * l, cb)
        d = ffn(d, d_ln_ref[3 * l + 2:3 * l + 3, :],
                d_wi_ref[l * D:(l + 1) * D, :], d_wof_ref[l * F:(l + 1) * F, :])

    # decoder final RMSNorm + d_model**-0.5 rescale + tied lm_head + masked CE, reduced
    # in-kernel to (loss_sum, valid_count) packed into one lane-dense (1, 128) output.
    # TODO(synk): at real T5-small scale (vocab=32128, seq=512) this tail needs an
    # (M-tile, vocab-tile) grid with VMEM LSE accumulators (vocab tile ~4096 on v7x /
    # ~8192 on v6e) and an explicit vmem_limit_bytes; at this toy config one block is optimal.
    dn = (_rms(d, dec_fln_ref[...]) * (d_model ** -0.5)).astype(bf16)
    logits = jax.lax.dot_general(dn, emb_ref[...], (((1,), (1,)), ((), ())),
                                 preferred_element_type=f32)            # (B*Ld, V)
    labels = labels_ref[...]                                            # (B*Ld, 1) int32
    m = jnp.max(logits, axis=-1, keepdims=True)
    lse = m + jnp.log(jnp.sum(jnp.exp(logits - m), axis=-1, keepdims=True))
    iota = jax.lax.broadcasted_iota(jnp.int32, logits.shape, 1)
    tgt = jnp.sum(jnp.where(iota == labels, logits, 0.0), axis=-1, keepdims=True)
    valid = (labels != -100).astype(f32)
    per = (lse - tgt) * valid
    ls = jnp.sum(per, axis=0, keepdims=True)                            # (1, 1)
    ct = jnp.sum(valid, axis=0, keepdims=True)                          # (1, 1)
    lane = jax.lax.broadcasted_iota(jnp.int32, (1, LANE), 1)
    loss_out_ref[...] = jnp.where(lane == 0, ls, 0.0) + jnp.where(lane == 1, ct, 0.0)


# ----------------------------------------------------------------------------
# T5 glue (index / mask math only, stays in plain JAX)
# ----------------------------------------------------------------------------
def relative_position_bucket(relative_position, bidirectional, num_buckets, max_distance):
    relative_buckets = jnp.zeros_like(relative_position)
    if bidirectional:
        num_buckets //= 2
        relative_buckets += (relative_position > 0).astype(jnp.int32) * num_buckets
        relative_position = jnp.abs(relative_position)
    else:
        relative_position = -jnp.minimum(relative_position, 0)
    max_exact = num_buckets // 2
    is_small = relative_position < max_exact
    rp = jnp.maximum(relative_position, 1).astype(jnp.float32)
    rel_if_large = max_exact + (
        jnp.log(rp / max_exact) / math.log(max_distance / max_exact) * (num_buckets - max_exact)
    ).astype(jnp.int32)
    rel_if_large = jnp.minimum(rel_if_large, num_buckets - 1)
    relative_buckets += jnp.where(is_small, relative_position, rel_if_large)
    return relative_buckets


def compute_position_bias(rel_emb, q_len, k_len, bidirectional, cfg):
    ctx = jnp.arange(q_len)[:, None]
    mem = jnp.arange(k_len)[None, :]
    rel = mem - ctx
    buckets = relative_position_bucket(rel, bidirectional, cfg.rel_buckets, cfg.rel_max_distance)
    values = rel_emb[buckets]                          # (q, k, H)
    return jnp.transpose(values, (2, 0, 1))            # (H, q, k)


def build_attention_biases(params, attention_mask, B, Le, Ld, cfg):
    """Combined additive biases on flattened (B*L) rows: rel-pos bias + causal + key padding
    + block-diagonal batch mask, so a single flattened attention matches per-batch attention."""
    H = cfg.n_heads
    pad_e = (1.0 - attention_mask.reshape(-1).astype(jnp.float32)) * NEG_INF      # (B*Le,)
    be = jnp.repeat(jnp.arange(B), Le)
    bd = jnp.repeat(jnp.arange(B), Ld)
    blk_e = jnp.where(be[:, None] == be[None, :], 0.0, NEG_INF)                    # (B*Le, B*Le)
    blk_d = jnp.where(bd[:, None] == bd[None, :], 0.0, NEG_INF)                    # (B*Ld, B*Ld)
    blk_x = jnp.where(bd[:, None] == be[None, :], 0.0, NEG_INF)                    # (B*Ld, B*Le)

    enc_pos = compute_position_bias(params["enc_rel_bias"], Le, Le, True, cfg)     # (H, Le, Le)
    enc_bias = jnp.tile(enc_pos, (1, B, B)) + (blk_e + pad_e[None, :])[None]

    dec_pos = compute_position_bias(params["dec_rel_bias"], Ld, Ld, False, cfg)    # (H, Ld, Ld)
    causal = jnp.where(jnp.arange(Ld)[None, :] <= jnp.arange(Ld)[:, None], 0.0, NEG_INF)
    dec_bias = jnp.tile(dec_pos + causal[None], (1, B, B)) + blk_d[None]

    cross = blk_x + pad_e[None, :]
    cross_bias = jnp.broadcast_to(cross[None], (H, B * Ld, B * Le))
    return (enc_bias.astype(jnp.float32), dec_bias.astype(jnp.float32),
            cross_bias.astype(jnp.float32))


# ----------------------------------------------------------------------------
# Parameter init (synthetic, deterministic; matmul weights in bf16 for the MXU).
# Per-layer weights are stacked along the leading axis so the kernel takes few, rank<=3 refs.
# ----------------------------------------------------------------------------
def init_params(key, cfg):
    keys = iter(jax.random.split(key, 256))
    D, H, dkv, F, nl = cfg.d_model, cfg.n_heads, cfg.d_kv, cfg.d_ff, cfg.n_layers

    def nrm(shape, dtype=jnp.bfloat16, scale=0.02):
        return (scale * jax.random.normal(next(keys), shape)).astype(dtype)

    def attn_weights():
        # per-head stacked Q|K|V (3*H, D, dkv) and output projection (H, dkv, D)
        return nrm((3 * H, D, dkv)), nrm((H, dkv, D))

    e_wqkv, e_wo, e_wi, e_wof = [], [], [], []
    for _ in range(nl):
        wqkv, wo = attn_weights()
        e_wqkv.append(wqkv); e_wo.append(wo)
        e_wi.append(nrm((D, F))); e_wof.append(nrm((F, D)))

    d_wqkv, d_wo, d_cwqkv, d_cwo, d_wi, d_wof = [], [], [], [], [], []
    for _ in range(nl):
        wqkv, wo = attn_weights(); d_wqkv.append(wqkv); d_wo.append(wo)
        cwqkv, cwo = attn_weights(); d_cwqkv.append(cwqkv); d_cwo.append(cwo)
        d_wi.append(nrm((D, F))); d_wof.append(nrm((F, D)))

    # move head padded to 128 lane-dense output columns (zero-padded -> identical first 32 logits)
    move_core = (0.02 * jax.random.normal(next(keys), (D, cfg.move_vocab))).astype(jnp.float32)
    move_w = jnp.zeros((D, LANE), jnp.float32).at[:, :cfg.move_vocab].set(move_core)

    return dict(
        shared_emb=nrm((cfg.vocab, D)),                                  # tied embedding / lm_head
        enc_rel_bias=nrm((cfg.rel_buckets, H), dtype=jnp.float32),
        dec_rel_bias=nrm((cfg.rel_buckets, H), dtype=jnp.float32),
        e_ln=jnp.ones((nl * 2, D), jnp.float32),
        e_wqkv=jnp.concatenate(e_wqkv, axis=0),      # (nl*3*H, D, dkv)
        e_wo=jnp.concatenate(e_wo, axis=0),          # (nl*H, dkv, D)
        e_wi=jnp.concatenate(e_wi, axis=0),          # (nl*D, d_ff)
        e_wof=jnp.concatenate(e_wof, axis=0),        # (nl*d_ff, D)
        d_ln=jnp.ones((nl * 3, D), jnp.float32),
        d_wqkv=jnp.concatenate(d_wqkv, axis=0),
        d_wo=jnp.concatenate(d_wo, axis=0),
        d_cwqkv=jnp.concatenate(d_cwqkv, axis=0),
        d_cwo=jnp.concatenate(d_cwo, axis=0),
        d_wi=jnp.concatenate(d_wi, axis=0),
        d_wof=jnp.concatenate(d_wof, axis=0),
        enc_final_ln=jnp.ones((1, D), jnp.float32),
        dec_final_ln=jnp.ones((1, D), jnp.float32),
        move_w=move_w.astype(jnp.bfloat16),
        move_b=jnp.zeros((1, LANE), jnp.float32),
    )


# ----------------------------------------------------------------------------
# Full Chessformer forward: one fused pallas_call
# ----------------------------------------------------------------------------
def chessformer_forward(params, input_ids, attention_mask, decoder_input_ids,
                        explanation_labels, move_label, cfg):
    # TODO(synk): move_label is accepted but unused by the reference forward; kept for signature parity.
    del move_label
    B, Le = input_ids.shape
    Ld = decoder_input_ids.shape[1]
    D = cfg.d_model
    emb = params["shared_emb"]

    # TODO(synk): embedding gather and relative-position-bucket / mask construction stay in
    # plain JAX glue (integer bookkeeping, no clean Pallas equivalent at this scale).
    x_enc = emb[input_ids].reshape(B * Le, D)            # bf16 (B*Le, D)
    x_dec = emb[decoder_input_ids].reshape(B * Ld, D)    # bf16 (B*Ld, D)
    enc_bias, dec_bias, cross_bias = build_attention_biases(params, attention_mask, B, Le, Ld, cfg)
    labels = explanation_labels.reshape(B * Ld, 1).astype(jnp.int32)

    kernel = partial(_chessformer_kernel, n_layers=cfg.n_layers, n_heads=cfg.n_heads,
                     d_model=D, d_ff=cfg.d_ff, batch=B, enc_len=Le)
    # Single fused kernel: no grid, all operands resident in VMEM (well under the scoped
    # limit on v5e/v6e/v7x).  TODO(synk): when scaled up, add an M/vocab grid and shard an
    # M-row axis across v7x's 2 TensorCores via dimension_semantics.
    move_pack, loss_pack = pl.pallas_call(
        kernel,
        out_shape=(jax.ShapeDtypeStruct((B, LANE), jnp.float32),
                   jax.ShapeDtypeStruct((1, LANE), jnp.float32)),
    )(x_enc, x_dec, enc_bias, dec_bias, cross_bias, labels,
      params["e_ln"], params["e_wqkv"], params["e_wo"], params["e_wi"], params["e_wof"],
      params["d_ln"], params["d_wqkv"], params["d_wo"], params["d_cwqkv"], params["d_cwo"],
      params["d_wi"], params["d_wof"],
      params["enc_final_ln"], params["dec_final_ln"], emb,
      params["move_w"], params["move_b"])

    move_logits = move_pack[:, :cfg.move_vocab]
    loss = loss_pack[0, 0] / jnp.maximum(loss_pack[0, 1], 1.0)
    return move_logits, loss


# ----------------------------------------------------------------------------
# Main
# ----------------------------------------------------------------------------
if __name__ == "__main__":
    cfg = T5Config()
    key = jax.random.PRNGKey(0)
    k_param, k_in, k_dec, k_lab = jax.random.split(key, 4)

    B, Le, Ld = 2, 8, 8
    params = init_params(k_param, cfg)

    input_ids = jax.random.randint(k_in, (B, Le), 0, cfg.vocab, dtype=jnp.int32)
    attention_mask = jnp.ones((B, Le), jnp.int32).at[1, -1].set(0)       # one padded position
    decoder_input_ids = jax.random.randint(k_dec, (B, Ld), 0, cfg.vocab, dtype=jnp.int32)
    explanation_labels = jax.random.randint(k_lab, (B, Ld), 0, cfg.vocab, dtype=jnp.int32)
    explanation_labels = explanation_labels.at[0, -1].set(-100)          # exercise ignore_index
    move_label = jnp.zeros((B,), jnp.int32)

    fwd = jax.jit(partial(chessformer_forward, cfg=cfg))
    move_logits, loss = fwd(params, input_ids, attention_mask,
                            decoder_input_ids, explanation_labels, move_label)
    jax.block_until_ready((move_logits, loss))

    assert move_logits.shape == (B, cfg.move_vocab)
    assert loss.shape == ()
    assert bool(jnp.isfinite(loss))
    print("KERNEL_OK")
</pallas_src>

<mosaic_0001>
module attributes {stable_mosaic.version = 11 : i64} {
  func.func @_chessformer_kernel(%arg0: memref<16x64xbf16, #tpu.memory_space<vmem>>, %arg1: memref<16x64xbf16, #tpu.memory_space<vmem>>, %arg2: memref<4x16x16xf32, #tpu.memory_space<vmem>>, %arg3: memref<4x16x16xf32, #tpu.memory_space<vmem>>, %arg4: memref<4x16x16xf32, #tpu.memory_space<vmem>>, %arg5: memref<16x1xi32, #tpu.memory_space<vmem>>, %arg6: memref<4x64xf32, #tpu.memory_space<vmem>>, %arg7: memref<24x64x16xbf16, #tpu.memory_space<vmem>>, %arg8: memref<8x16x64xbf16, #tpu.memory_space<vmem>>, %arg9: memref<128x128xbf16, #tpu.memory_space<vmem>>, %arg10: memref<256x64xbf16, #tpu.memory_space<vmem>>, %arg11: memref<6x64xf32, #tpu.memory_space<vmem>>, %arg12: memref<24x64x16xbf16, #tpu.memory_space<vmem>>, %arg13: memref<8x16x64xbf16, #tpu.memory_space<vmem>>, %arg14: memref<24x64x16xbf16, #tpu.memory_space<vmem>>, %arg15: memref<8x16x64xbf16, #tpu.memory_space<vmem>>, %arg16: memref<128x128xbf16, #tpu.memory_space<vmem>>, %arg17: memref<256x64xbf16, #tpu.memory_space<vmem>>, %arg18: memref<1x64xf32, #tpu.memory_space<vmem>>, %arg19: memref<1x64xf32, #tpu.memory_space<vmem>>, %arg20: memref<128x64xbf16, #tpu.memory_space<vmem>>, %arg21: memref<64x128xbf16, #tpu.memory_space<vmem>>, %arg22: memref<1x128xf32, #tpu.memory_space<vmem>>, %arg23: memref<2x128xf32, #tpu.memory_space<vmem>>, %arg24: memref<1x128xf32, #tpu.memory_space<vmem>>) attributes {dimension_semantics = [], scalar_prefetch = 0 : i64, scratch_operands = 0 : i64, tpu.core_type = #tpu.core_type<tc>} {
    %c0 = arith.constant 0 : index
    %c0_0 = arith.constant 0 : index
    %0 = vector.load %arg0[%c0, %c0_0] : memref<16x64xbf16, #tpu.memory_space<vmem>>, vector<16x64xbf16>
    %1 = arith.extf %0 : vector<16x64xbf16> to vector<16x64xf32>
    %c0_1 = arith.constant 0 : index
    %c0_2 = arith.constant 0 : index
    %c0_3 = arith.constant 0 : index
    %2 = vector.load %arg2[%c0_1, %c0_2, %c0_3] : memref<4x16x16xf32, #tpu.memory_space<vmem>>, vector<4x16x16xf32>
    %c0_4 = arith.constant 0 : index
    %c0_5 = arith.constant 0 : index
    %3 = vector.load %arg6[%c0_4, %c0_5] : memref<4x64xf32, #tpu.memory_space<vmem>>, vector<1x64xf32>
    %4 = arith.mulf %1, %1 : vector<16x64xf32>
    %cst = arith.constant dense<0.000000e+00> : vector<16xf32>
    %5 = vector.multi_reduction <add>, %4, %cst [1] : vector<16x64xf32> to vector<16xf32>
    %6 = vector.shape_cast %5 : vector<16xf32> to vector<16x1xf32>
    %cst_6 = arith.constant 6.400000e+01 : f32
    %7 = vector.broadcast %cst_6 : f32 to vector<16x1xf32>
    %8 = arith.divf %6, %7 : vector<16x1xf32>
    %cst_7 = arith.constant 9.99999997E-7 : f32
    %9 = vector.broadcast %cst_7 : f32 to vector<16x1xf32>
    %10 = arith.addf %8, %9 : vector<16x1xf32>
    %11 = math.rsqrt %10 : vector<16x1xf32>
    %12 = vector.broadcast %11 : vector<16x1xf32> to vector<16x64xf32>
    %13 = arith.mulf %1, %12 : vector<16x64xf32>
    %14 = vector.broadcast %3 : vector<1x64xf32> to vector<16x64xf32>
    %15 = arith.mulf %13, %14 : vector<16x64xf32>
    %16 = arith.truncf %15 : vector<16x64xf32> to vector<16x64xbf16>
    %c0_8 = arith.constant 0 : index
    %c0_9 = arith.constant 0 : index
    %c0_10 = arith.constant 0 : index
    %17 = vector.load %arg7[%c0_8, %c0_9, %c0_10] : memref<24x64x16xbf16, #tpu.memory_space<vmem>>, vector<4x64x16xbf16>
    %c4 = arith.constant 4 : index
    %c0_11 = arith.constant 0 : index
    %c0_12 = arith.constant 0 : index
    %18 = vector.load %arg7[%c4, %c0_11, %c0_12] : memref<24x64x16xbf16, #tpu.memory_space<vmem>>, vector<4x64x16xbf16>
    %c8 = arith.constant 8 : index
    %c0_13 = arith.constant 0 : index
    %c0_14 = arith.constant 0 : index
    %19 = vector.load %arg7[%c8, %c0_13, %c0_14] : memref<24x64x16xbf16, #tpu.memory_space<vmem>>, vector<4x64x16xbf16>
    %c0_15 = arith.constant 0 : index
    %c0_16 = arith.constant 0 : index
    %c0_17 = arith.constant 0 : index
    %20 = vector.load %arg8[%c0_15, %c0_16, %c0_17] : memref<8x16x64xbf16, #tpu.memory_space<vmem>>, vector<4x16x64xbf16>
    %21 = vector.shape_cast %16 : vector<16x64xbf16> to vector<1x16x64xbf16>
    %22 = vector.shape_cast %21 : vector<1x16x64xbf16> to vector<1x16x64xbf16>
    %23 = vector.broadcast %22 : vector<1x16x64xbf16> to vector<4x16x64xbf16>
    %24 = vector.shape_cast %16 : vector<16x64xbf16> to vector<1x16x64xbf16>
    %25 = vector.shape_cast %24 : vector<1x16x64xbf16> to vector<1x16x64xbf16>
    %26 = vector.broadcast %25 : vector<1x16x64xbf16> to vector<4x16x64xbf16>
    %cst_18 = arith.constant dense<0.000000e+00> : vector<4x16x16xf32>
    %27 = tpu.matmul %23, %17, %cst_18 {dimension_numbers = #tpu.dot_dimension_numbers<[2], [1], [1], [2], [0, 0, 0, 1, 1, 2], [0], [0]>} : vector<4x16x64xbf16>, vector<4x64x16xbf16>, vector<4x16x16xf32> -> vector<4x16x16xf32>
    %cst_19 = arith.constant dense<0.000000e+00> : vector<4x16x16xf32>
    %28 = tpu.matmul %26, %18, %cst_19 {dimension_numbers = #tpu.dot_dimension_numbers<[2], [1], [1], [2], [0, 0, 0, 1, 1, 2], [0], [0]>} : vector<4x16x64xbf16>, vector<4x64x16xbf16>, vector<4x16x16xf32> -> vector<4x16x16xf32>
    %cst_20 = arith.constant dense<0.000000e+00> : vector<4x16x16xf32>
    %29 = tpu.matmul %26, %19, %cst_20 {dimension_numbers = #tpu.dot_dimension_numbers<[2], [1], [1], [2], [0, 0, 0, 1, 1, 2], [0], [0]>} : vector<4x16x64xbf16>, vector<4x64x16xbf16>, vector<4x16x16xf32> -> vector<4x16x16xf32>
    %30 = arith.truncf %27 : vector<4x16x16xf32> to vector<4x16x16xbf16>
    %31 = arith.truncf %28 : vector<4x16x16xf32> to vector<4x16x16xbf16>
    %cst_21 = arith.constant dense<0.000000e+00> : vector<4x16x16xf32>
    %32 = tpu.matmul %30, %31, %cst_21 {dimension_numbers = #tpu.dot_dimension_numbers<[2], [2], [1], [1], [0, 0, 0, 1, 1, 1], [0], [0]>} : vector<4x16x16xbf16>, vector<4x16x16xbf16>, vector<4x16x16xf32> -> vector<4x16x16xf32>
    %33 = arith.addf %32, %2 : vector<4x16x16xf32>
    %cst_22 = arith.constant dense<0xFF800000> : vector<4x16xf32>
    %34 = vector.multi_reduction <maximumf>, %33, %cst_22 [2] : vector<4x16x16xf32> to vector<4x16xf32>
    %35 = vector.shape_cast %34 : vector<4x16xf32> to vector<4x16x1xf32>
    %36 = vector.broadcast %35 : vector<4x16x1xf32> to vector<4x16x16xf32>
    %37 = arith.subf %33, %36 : vector<4x16x16xf32>
    %38 = math.exp %37 : vector<4x16x16xf32>
    %cst_23 = arith.constant dense<0.000000e+00> : vector<4x16xf32>
    %39 = vector.multi_reduction <add>, %38, %cst_23 [2] : vector<4x16x16xf32> to vector<4x16xf32>
    %40 = vector.shape_cast %39 : vector<4x16xf32> to vector<4x16x1xf32>
    %41 = tpu.reciprocal %40 {approx = true} : vector<4x16x1xf32> -> vector<4x16x1xf32>
    %42 = vector.broadcast %41 : vector<4x16x1xf32> to vector<4x16x16xf32>
    %43 = arith.mulf %38, %42 : vector<4x16x16xf32>
    %44 = arith.truncf %43 : vector<4x16x16xf32> to vector<4x16x16xbf16>
    %45 = arith.truncf %29 : vector<4x16x16xf32> to vector<4x16x16xbf16>
    %cst_24 = arith.constant dense<0.000000e+00> : vector<4x16x16xf32>
    %46 = tpu.matmul %44, %45, %cst_24 {dimension_numbers = #tpu.dot_dimension_numbers<[2], [1], [1], [2], [0, 0, 0, 1, 1, 2], [0], [0]>} : vector<4x16x16xbf16>, vector<4x16x16xbf16>, vector<4x16x16xf32> -> vector<4x16x16xf32>
    %47 = arith.truncf %46 : vector<4x16x16xf32> to vector<4x16x16xbf16>
    %cst_25 = arith.constant dense<0.000000e+00> : vector<4x16x64xf32>
    %48 = tpu.matmul %47, %20, %cst_25 {dimension_numbers = #tpu.dot_dimension_numbers<[2], [1], [1], [2], [0, 0, 0, 1, 1, 2], [0], [0]>} : vector<4x16x16xbf16>, vector<4x16x64xbf16>, vector<4x16x64xf32> -> vector<4x16x64xf32>
    %cst_26 = arith.constant dense<0.000000e+00> : vector<16x64xf32>
    %49 = vector.multi_reduction <add>, %48, %cst_26 [0] : vector<4x16x64xf32> to vector<16x64xf32>
    %50 = arith.addf %1, %49 : vector<16x64xf32>
    %c1 = arith.constant 1 : index
    %c0_27 = arith.constant 0 : index
    %51 = vector.load %arg6[%c1, %c0_27] : memref<4x64xf32, #tpu.memory_space<vmem>>, vector<1x64xf32>
    %c0_28 = arith.constant 0 : index
    %c0_29 = arith.constant 0 : index
    %52 = vector.load %arg9[%c0_28, %c0_29] : memref<128x128xbf16, #tpu.memory_space<vmem>>, vector<64x128xbf16>
    %c0_30 = arith.constant 0 : index
    %c0_31 = arith.constant 0 : index
    %53 = vector.load %arg10[%c0_30, %c0_31] : memref<256x64xbf16, #tpu.memory_space<vmem>>, vector<128x64xbf16>
    %54 = arith.mulf %50, %50 : vector<16x64xf32>
    %cst_32 = arith.constant dense<0.000000e+00> : vector<16xf32>
    %55 = vector.multi_reduction <add>, %54, %cst_32 [1] : vector<16x64xf32> to vector<16xf32>
    %56 = vector.shape_cast %55 : vector<16xf32> to vector<16x1xf32>
    %cst_33 = arith.constant 6.400000e+01 : f32
    %57 = vector.broadcast %cst_33 : f32 to vector<16x1xf32>
    %58 = arith.divf %56, %57 : vector<16x1xf32>
    %cst_34 = arith.constant 9.99999997E-7 : f32
    %59 = vector.broadcast %cst_34 : f32 to vector<16x1xf32>
    %60 = arith.addf %58, %59 : vector<16x1xf32>
    %61 = math.rsqrt %60 : vector<16x1xf32>
    %62 = vector.broadcast %61 : vector<16x1xf32> to vector<16x64xf32>
    %63 = arith.mulf %50, %62 : vector<16x64xf32>
    %64 = vector.broadcast %51 : vector<1x64xf32> to vector<16x64xf32>
    %65 = arith.mulf %63, %64 : vector<16x64xf32>
    %66 = arith.truncf %65 : vector<16x64xf32> to vector<16x64xbf16>
    %cst_35 = arith.constant dense<0.000000e+00> : vector<16x128xf32>
    %67 = tpu.matmul %66, %52, %cst_35 {dimension_numbers = #tpu.dot_dimension_numbers<[1], [0], [0], [1], [0, 0, 1, 1], [], []>} : vector<16x64xbf16>, vector<64x128xbf16>, vector<16x128xf32> -> vector<16x128xf32>
    %cst_36 = arith.constant 0.000000e+00 : f32
    %68 = vector.broadcast %cst_36 : f32 to vector<16x128xf32>
    %69 = arith.maximumf %67, %68 : vector<16x128xf32>
    %70 = arith.truncf %69 : vector<16x128xf32> to vector<16x128xbf16>
    %cst_37 = arith.constant dense<0.000000e+00> : vector<16x64xf32>
    %71 = tpu.matmul %70, %53, %cst_37 {dimension_numbers = #tpu.dot_dimension_numbers<[1], [0], [0], [1], [0, 0, 1, 1], [], []>} : vector<16x128xbf16>, vector<128x64xbf16>, vector<16x64xf32> -> vector<16x64xf32>
    %72 = arith.addf %50, %71 : vector<16x64xf32>
    %c2 = arith.constant 2 : index
    %c0_38 = arith.constant 0 : index
    %73 = vector.load %arg6[%c2, %c0_38] : memref<4x64xf32, #tpu.memory_space<vmem>>, vector<1x64xf32>
    %74 = arith.mulf %72, %72 : vector<16x64xf32>
    %cst_39 = arith.constant dense<0.000000e+00> : vector<16xf32>
    %75 = vector.multi_reduction <add>, %74, %cst_39 [1] : vector<16x64xf32> to vector<16xf32>
    %76 = vector.shape_cast %75 : vector<16xf32> to vector<16x1xf32>
    %cst_40 = arith.constant 6.400000e+01 : f32
    %77 = vector.broadcast %cst_40 : f32 to vector<16x1xf32>
    %78 = arith.divf %76, %77 : vector<16x1xf32>
    %cst_41 = arith.constant 9.99999997E-7 : f32
    %79 = vector.broadcast %cst_41 : f32 to vector<16x1xf32>
    %80 = arith.addf %78, %79 : vector<16x1xf32>
    %81 = math.rsqrt %80 : vector<16x1xf32>
    %82 = vector.broadcast %81 : vector<16x1xf32> to vector<16x64xf32>
    %83 = arith.mulf %72, %82 : vector<16x64xf32>
    %84 = vector.broadcast %73 : vector<1x64xf32> to vector<16x64xf32>
    %85 = arith.mulf %83, %84 : vector<16x64xf32>
    %86 = arith.truncf %85 : vector<16x64xf32> to vector<16x64xbf16>
    %c12 = arith.constant 12 : index
    %c0_42 = arith.constant 0 : index
    %c0_43 = arith.constant 0 : index
    %87 = vector.load %arg7[%c12, %c0_42, %c0_43] : memref<24x64x16xbf16, #tpu.memory_space<vmem>>, vector<4x64x16xbf16>
    %c16 = arith.constant 16 : index
    %c0_44 = arith.constant 0 : index
    %c0_45 = arith.constant 0 : index
    %88 = vector.load %arg7[%c16, %c0_44, %c0_45] : memref<24x64x16xbf16, #tpu.memory_space<vmem>>, vector<4x64x16xbf16>
    %c20 = arith.constant 20 : index
    %c0_46 = arith.constant 0 : index
    %c0_47 = arith.constant 0 : index
    %89 = vector.load %arg7[%c20, %c0_46, %c0_47] : memref<24x64x16xbf16, #tpu.memory_space<vmem>>, vector<4x64x16xbf16>
    %c4_48 = arith.constant 4 : index
    %c0_49 = arith.constant 0 : index
    %c0_50 = arith.constant 0 : index
    %90 = vector.load %arg8[%c4_48, %c0_49, %c0_50] : memref<8x16x64xbf16, #tpu.memory_space<vmem>>, vector<4x16x64xbf16>
    %91 = vector.shape_cast %86 : vector<16x64xbf16> to vector<1x16x64xbf16>
    %92 = vector.shape_cast %91 : vector<1x16x64xbf16> to vector<1x16x64xbf16>
    %93 = vector.broadcast %92 : vector<1x16x64xbf16> to vector<4x16x64xbf16>
    %94 = vector.shape_cast %86 : vector<16x64xbf16> to vector<1x16x64xbf16>
    %95 = vector.shape_cast %94 : vector<1x16x64xbf16> to vector<1x16x64xbf16>
    %96 = vector.broadcast %95 : vector<1x16x64xbf16> to vector<4x16x64xbf16>
    %cst_51 = arith.constant dense<0.000000e+00> : vector<4x16x16xf32>
    %97 = tpu.matmul %93, %87, %cst_51 {dimension_numbers = #tpu.dot_dimension_numbers<[2], [1], [1], [2], [0, 0, 0, 1, 1, 2], [0], [0]>} : vector<4x16x64xbf16>, vector<4x64x16xbf16>, vector<4x16x16xf32> -> vector<4x16x16xf32>
    %cst_52 = arith.constant dense<0.000000e+00> : vector<4x16x16xf32>
    %98 = tpu.matmul %96, %88, %cst_52 {dimension_numbers = #tpu.dot_dimension_numbers<[2], [1], [1], [2], [0, 0, 0, 1, 1, 2], [0], [0]>} : vector<4x16x64xbf16>, vector<4x64x16xbf16>, vector<4x16x16xf32> -> vector<4x16x16xf32>
    %cst_53 = arith.constant dense<0.000000e+00> : vector<4x16x16xf32>
    %99 = tpu.matmul %96, %89, %cst_53 {dimension_numbers = #tpu.dot_dimension_numbers<[2], [1], [1], [2], [0, 0, 0, 1, 1, 2], [0], [0]>} : vector<4x16x64xbf16>, vector<4x64x16xbf16>, vector<4x16x16xf32> -> vector<4x16x16xf32>
    %100 = arith.truncf %97 : vector<4x16x16xf32> to vector<4x16x16xbf16>
    %101 = arith.truncf %98 : vector<4x16x16xf32> to vector<4x16x16xbf16>
    %cst_54 = arith.constant dense<0.000000e+00> : vector<4x16x16xf32>
    %102 = tpu.matmul %100, %101, %cst_54 {dimension_numbers = #tpu.dot_dimension_numbers<[2], [2], [1], [1], [0, 0, 0, 1, 1, 1], [0], [0]>} : vector<4x16x16xbf16>, vector<4x16x16xbf16>, vector<4x16x16xf32> -> vector<4x16x16xf32>
    %103 = arith.addf %102, %2 : vector<4x16x16xf32>
    %cst_55 = arith.constant dense<0xFF800000> : vector<4x16xf32>
    %104 = vector.multi_reduction <maximumf>, %103, %cst_55 [2] : vector<4x16x16xf32> to vector<4x16xf32>
    %105 = vector.shape_cast %104 : vector<4x16xf32> to vector<4x16x1xf32>
    %106 = vector.broadcast %105 : vector<4x16x1xf32> to vector<4x16x16xf32>
    %107 = arith.subf %103, %106 : vector<4x16x16xf32>
    %108 = math.exp %107 : vector<4x16x16xf32>
    %cst_56 = arith.constant dense<0.000000e+00> : vector<4x16xf32>
    %109 = vector.multi_reduction <add>, %108, %cst_56 [2] : vector<4x16x16xf32> to vector<4x16xf32>
    %110 = vector.shape_cast %109 : vector<4x16xf32> to vector<4x16x1xf32>
    %111 = tpu.reciprocal %110 {approx = true} : vector<4x16x1xf32> -> vector<4x16x1xf32>
    %112 = vector.broadcast %111 : vector<4x16x1xf32> to vector<4x16x16xf32>
    %113 = arith.mulf %108, %112 : vector<4x16x16xf32>
    %114 = arith.truncf %113 : vector<4x16x16xf32> to vector<4x16x16xbf16>
    %115 = arith.truncf %99 : vector<4x16x16xf32> to vector<4x16x16xbf16>
    %cst_57 = arith.constant dense<0.000000e+00> : vector<4x16x16xf32>
    %116 = tpu.matmul %114, %115, %cst_57 {dimension_numbers = #tpu.dot_dimension_numbers<[2], [1], [1], [2], [0, 0, 0, 1, 1, 2], [0], [0]>} : vector<4x16x16xbf16>, vector<4x16x16xbf16>, vector<4x16x16xf32> -> vector<4x16x16xf32>
    %117 = arith.truncf %116 : vector<4x16x16xf32> to vector<4x16x16xbf16>
    %cst_58 = arith.constant dense<0.000000e+00> : vector<4x16x64xf32>
    %118 = tpu.matmul %117, %90, %cst_58 {dimension_numbers = #tpu.dot_dimension_numbers<[2], [1], [1], [2], [0, 0, 0, 1, 1, 2], [0], [0]>} : vector<4x16x16xbf16>, vector<4x16x64xbf16>, vector<4x16x64xf32> -> vector<4x16x64xf32>
    %cst_59 = arith.constant dense<0.000000e+00> : vector<16x64xf32>
    %119 = vector.multi_reduction <add>, %118, %cst_59 [0] : vector<4x16x64xf32> to vector<16x64xf32>
    %120 = arith.addf %72, %119 : vector<16x64xf32>
    %c3 = arith.constant 3 : index
    %c0_60 = arith.constant 0 : index
    %121 = vector.load %arg6[%c3, %c0_60] : memref<4x64xf32, #tpu.memory_space<vmem>>, vector<1x64xf32>
    %c64 = arith.constant 64 : index
    %c0_61 = arith.constant 0 : index
    %122 = vector.load %arg9[%c64, %c0_61] : memref<128x128xbf16, #tpu.memory_space<vmem>>, vector<64x128xbf16>
    %c128 = arith.constant 128 : index
    %c0_62 = arith.constant 0 : index
    %123 = vector.load %arg10[%c128, %c0_62] : memref<256x64xbf16, #tpu.memory_space<vmem>>, vector<128x64xbf16>
    %124 = arith.mulf %120, %120 : vector<16x64xf32>
    %cst_63 = arith.constant dense<0.000000e+00> : vector<16xf32>
    %125 = vector.multi_reduction <add>, %124, %cst_63 [1] : vector<16x64xf32> to vector<16xf32>
    %126 = vector.shape_cast %125 : vector<16xf32> to vector<16x1xf32>
    %cst_64 = arith.constant 6.400000e+01 : f32
    %127 = vector.broadcast %cst_64 : f32 to vector<16x1xf32>
    %128 = arith.divf %126, %127 : vector<16x1xf32>
    %cst_65 = arith.constant 9.99999997E-7 : f32
    %129 = vector.broadcast %cst_65 : f32 to vector<16x1xf32>
    %130 = arith.addf %128, %129 : vector<16x1xf32>
    %131 = math.rsqrt %130 : vector<16x1xf32>
    %132 = vector.broadcast %131 : vector<16x1xf32> to vector<16x64xf32>
    %133 = arith.mulf %120, %132 : vector<16x64xf32>
    %134 = vector.broadcast %121 : vector<1x64xf32> to vector<16x64xf32>
    %135 = arith.mulf %133, %134 : vector<16x64xf32>
    %136 = arith.truncf %135 : vector<16x64xf32> to vector<16x64xbf16>
    %cst_66 = arith.constant dense<0.000000e+00> : vector<16x128xf32>
    %137 = tpu.matmul %136, %122, %cst_66 {dimension_numbers = #tpu.dot_dimension_numbers<[1], [0], [0], [1], [0, 0, 1, 1], [], []>} : vector<16x64xbf16>, vector<64x128xbf16>, vector<16x128xf32> -> vector<16x128xf32>
    %cst_67 = arith.constant 0.000000e+00 : f32
    %138 = vector.broadcast %cst_67 : f32 to vector<16x128xf32>
    %139 = arith.maximumf %137, %138 : vector<16x128xf32>
    %140 = arith.truncf %139 : vector<16x128xf32> to vector<16x128xbf16>
    %cst_68 = arith.constant dense<0.000000e+00> : vector<16x64xf32>
    %141 = tpu.matmul %140, %123, %cst_68 {dimension_numbers = #tpu.dot_dimension_numbers<[1], [0], [0], [1], [0, 0, 1, 1], [], []>} : vector<16x128xbf16>, vector<128x64xbf16>, vector<16x64xf32> -> vector<16x64xf32>
    %142 = arith.addf %120, %141 : vector<16x64xf32>
    %c0_69 = arith.constant 0 : index
    %c0_70 = arith.constant 0 : index
    %143 = vector.load %arg18[%c0_69, %c0_70] : memref<1x64xf32, #tpu.memory_space<vmem>>, vector<1x64xf32>
    %144 = arith.mulf %142, %142 : vector<16x64xf32>
    %cst_71 = arith.constant dense<0.000000e+00> : vector<16xf32>
    %145 = vector.multi_reduction <add>, %144, %cst_71 [1] : vector<16x64xf32> to vector<16xf32>
    %146 = vector.shape_cast %145 : vector<16xf32> to vector<16x1xf32>
    %cst_72 = arith.constant 6.400000e+01 : f32
    %147 = vector.broadcast %cst_72 : f32 to vector<16x1xf32>
    %148 = arith.divf %146, %147 : vector<16x1xf32>
    %cst_73 = arith.constant 9.99999997E-7 : f32
    %149 = vector.broadcast %cst_73 : f32 to vector<16x1xf32>
    %150 = arith.addf %148, %149 : vector<16x1xf32>
    %151 = math.rsqrt %150 : vector<16x1xf32>
    %152 = vector.broadcast %151 : vector<16x1xf32> to vector<16x64xf32>
    %153 = arith.mulf %142, %152 : vector<16x64xf32>
    %154 = vector.broadcast %143 : vector<1x64xf32> to vector<16x64xf32>
    %155 = arith.mulf %153, %154 : vector<16x64xf32>
    %156 = vector.extract_strided_slice %155 {offsets = [0, 0], sizes = [1, 64], strides = [1, 1]} : vector<16x64xf32> to vector<1x64xf32>
    %157 = vector.extract_strided_slice %155 {offsets = [8, 0], sizes = [1, 64], strides = [1, 1]} : vector<16x64xf32> to vector<1x64xf32>
    %158 = tpu.concatenate %156, %157 in 0 : vector<1x64xf32>, vector<1x64xf32> -> vector<2x64xf32>
    %159 = arith.truncf %158 : vector<2x64xf32> to vector<2x64xbf16>
    %c0_74 = arith.constant 0 : index
    %c0_75 = arith.constant 0 : index
    %160 = vector.load %arg21[%c0_74, %c0_75] : memref<64x128xbf16, #tpu.memory_space<vmem>>, vector<64x128xbf16>
    %cst_76 = arith.constant dense<0.000000e+00> : vector<2x128xf32>
    %161 = tpu.matmul %159, %160, %cst_76 {dimension_numbers = #tpu.dot_dimension_numbers<[1], [0], [0], [1], [0, 0, 1, 1], [], []>} : vector<2x64xbf16>, vector<64x128xbf16>, vector<2x128xf32> -> vector<2x128xf32>
    %c0_77 = arith.constant 0 : index
    %c0_78 = arith.constant 0 : index
    %162 = vector.load %arg22[%c0_77, %c0_78] : memref<1x128xf32, #tpu.memory_space<vmem>>, vector<1x128xf32>
    %163 = vector.broadcast %162 : vector<1x128xf32> to vector<2x128xf32>
    %164 = arith.addf %161, %163 : vector<2x128xf32>
    %c0_79 = arith.constant 0 : index
    %c0_80 = arith.constant 0 : index
    %165 = vector.load %arg23[%c0_79, %c0_80] : memref<2x128xf32, #tpu.memory_space<vmem>>, vector<2x128xf32>
    tpu.vector_store %arg23[%c0_79, %c0_80], %164 {strides = array<i32>} : memref<2x128xf32, #tpu.memory_space<vmem>>, vector<2x128xf32>,
    %c0_81 = arith.constant 0 : index
    %c0_82 = arith.constant 0 : index
    %166 = vector.load %arg1[%c0_81, %c0_82] : memref<16x64xbf16, #tpu.memory_space<vmem>>, vector<16x64xbf16>
    %167 = arith.extf %166 : vector<16x64xbf16> to vector<16x64xf32>
    %c0_83 = arith.constant 0 : index
    %c0_84 = arith.constant 0 : index
    %c0_85 = arith.constant 0 : index
    %168 = vector.load %arg3[%c0_83, %c0_84, %c0_85] : memref<4x16x16xf32, #tpu.memory_space<vmem>>, vector<4x16x16xf32>
    %c0_86 = arith.constant 0 : index
    %c0_87 = arith.constant 0 : index
    %c0_88 = arith.constant 0 : index
    %169 = vector.load %arg4[%c0_86, %c0_87, %c0_88] : memref<4x16x16xf32, #tpu.memory_space<vmem>>, vector<4x16x16xf32>
    %170 = arith.truncf %155 : vector<16x64xf32> to vector<16x64xbf16>
    %c0_89 = arith.constant 0 : index
    %c0_90 = arith.constant 0 : index
    %171 = vector.load %arg11[%c0_89, %c0_90] : memref<6x64xf32, #tpu.memory_space<vmem>>, vector<1x64xf32>
    %172 = arith.mulf %167, %167 : vector<16x64xf32>
    %cst_91 = arith.constant dense<0.000000e+00> : vector<16xf32>
    %173 = vector.multi_reduction <add>, %172, %cst_91 [1] : vector<16x64xf32> to vector<16xf32>
    %174 = vector.shape_cast %173 : vector<16xf32> to vector<16x1xf32>
    %cst_92 = arith.constant 6.400000e+01 : f32
    %175 = vector.broadcast %cst_92 : f32 to vector<16x1xf32>
    %176 = arith.divf %174, %175 : vector<16x1xf32>
    %cst_93 = arith.constant 9.99999997E-7 : f32
    %177 = vector.broadcast %cst_93 : f32 to vector<16x1xf32>
    %178 = arith.addf %176, %177 : vector<16x1xf32>
    %179 = math.rsqrt %178 : vector<16x1xf32>
    %180 = vector.broadcast %179 : vector<16x1xf32> to vector<16x64xf32>
    %181 = arith.mulf %167, %180 : vector<16x64xf32>
    %182 = vector.broadcast %171 : vector<1x64xf32> to vector<16x64xf32>
    %183 = arith.mulf %181, %182 : vector<16x64xf32>
    %184 = arith.truncf %183 : vector<16x64xf32> to vector<16x64xbf16>
    %c0_94 = arith.constant 0 : index
    %c0_95 = arith.constant 0 : index
    %c0_96 = arith.constant 0 : index
    %185 = vector.load %arg12[%c0_94, %c0_95, %c0_96] : memref<24x64x16xbf16, #tpu.memory_space<vmem>>, vector<4x64x16xbf16>
    %c4_97 = arith.constant 4 : index
    %c0_98 = arith.constant 0 : index
    %c0_99 = arith.constant 0 : index
    %186 = vector.load %arg12[%c4_97, %c0_98, %c0_99] : memref<24x64x16xbf16, #tpu.memory_space<vmem>>, vector<4x64x16xbf16>
    %c8_100 = arith.constant 8 : index
    %c0_101 = arith.constant 0 : index
    %c0_102 = arith.constant 0 : index
    %187 = vector.load %arg12[%c8_100, %c0_101, %c0_102] : memref<24x64x16xbf16, #tpu.memory_space<vmem>>, vector<4x64x16xbf16>
    %c0_103 = arith.constant 0 : index
    %c0_104 = arith.constant 0 : index
    %c0_105 = arith.constant 0 : index
    %188 = vector.load %arg13[%c0_103, %c0_104, %c0_105] : memref<8x16x64xbf16, #tpu.memory_space<vmem>>, vector<4x16x64xbf16>
    %189 = vector.shape_cast %184 : vector<16x64xbf16> to vector<1x16x64xbf16>
    %190 = vector.shape_cast %189 : vector<1x16x64xbf16> to vector<1x16x64xbf16>
    %191 = vector.broadcast %190 : vector<1x16x64xbf16> to vector<4x16x64xbf16>
    %192 = vector.shape_cast %184 : vector<16x64xbf16> to vector<1x16x64xbf16>
    %193 = vector.shape_cast %192 : vector<1x16x64xbf16> to vector<1x16x64xbf16>
    %194 = vector.broadcast %193 : vector<1x16x64xbf16> to vector<4x16x64xbf16>
    %cst_106 = arith.constant dense<0.000000e+00> : vector<4x16x16xf32>
    %195 = tpu.matmul %191, %185, %cst_106 {dimension_numbers = #tpu.dot_dimension_numbers<[2], [1], [1], [2], [0, 0, 0, 1, 1, 2], [0], [0]>} : vector<4x16x64xbf16>, vector<4x64x16xbf16>, vector<4x16x16xf32> -> vector<4x16x16xf32>
    %cst_107 = arith.constant dense<0.000000e+00> : vector<4x16x16xf32>
    %196 = tpu.matmul %194, %186, %cst_107 {dimension_numbers = #tpu.dot_dimension_numbers<[2], [1], [1], [2], [0, 0, 0, 1, 1, 2], [0], [0]>} : vector<4x16x64xbf16>, vector<4x64x16xbf16>, vector<4x16x16xf32> -> vector<4x16x16xf32>
    %cst_108 = arith.constant dense<0.000000e+00> : vector<4x16x16xf32>
    %197 = tpu.matmul %194, %187, %cst_108 {dimension_numbers = #tpu.dot_dimension_numbers<[2], [1], [1], [2], [0, 0, 0, 1, 1, 2], [0], [0]>} : vector<4x16x64xbf16>, vector<4x64x16xbf16>, vector<4x16x16xf32> -> vector<4x16x16xf32>
    %198 = arith.truncf %195 : vector<4x16x16xf32> to vector<4x16x16xbf16>
    %199 = arith.truncf %196 : vector<4x16x16xf32> to vector<4x16x16xbf16>
    %cst_109 = arith.constant dense<0.000000e+00> : vector<4x16x16xf32>
    %200 = tpu.matmul %198, %199, %cst_109 {dimension_numbers = #tpu.dot_dimension_numbers<[2], [2], [1], [1], [0, 0, 0, 1, 1, 1], [0], [0]>} : vector<4x16x16xbf16>, vector<4x16x16xbf16>, vector<4x16x16xf32> -> vector<4x16x16xf32>
    %201 = arith.addf %200, %168 : vector<4x16x16xf32>
    %cst_110 = arith.constant dense<0xFF800000> : vector<4x16xf32>
    %202 = vector.multi_reduction <maximumf>, %201, %cst_110 [2] : vector<4x16x16xf32> to vector<4x16xf32>
    %203 = vector.shape_cast %202 : vector<4x16xf32> to vector<4x16x1xf32>
    %204 = vector.broadcast %203 : vector<4x16x1xf32> to vector<4x16x16xf32>
    %205 = arith.subf %201, %204 : vector<4x16x16xf32>
    %206 = math.exp %205 : vector<4x16x16xf32>
    %cst_111 = arith.constant dense<0.000000e+00> : vector<4x16xf32>
    %207 = vector.multi_reduction <add>, %206, %cst_111 [2] : vector<4x16x16xf32> to vector<4x16xf32>
    %208 = vector.shape_cast %207 : vector<4x16xf32> to vector<4x16x1xf32>
    %209 = tpu.reciprocal %208 {approx = true} : vector<4x16x1xf32> -> vector<4x16x1xf32>
    %210 = vector.broadcast %209 : vector<4x16x1xf32> to vector<4x16x16xf32>
    %211 = arith.mulf %206, %210 : vector<4x16x16xf32>
    %212 = arith.truncf %211 : vector<4x16x16xf32> to vector<4x16x16xbf16>
    %213 = arith.truncf %197 : vector<4x16x16xf32> to vector<4x16x16xbf16>
    %cst_112 = arith.constant dense<0.000000e+00> : vector<4x16x16xf32>
    %214 = tpu.matmul %212, %213, %cst_112 {dimension_numbers = #tpu.dot_dimension_numbers<[2], [1], [1], [2], [0, 0, 0, 1, 1, 2], [0], [0]>} : vector<4x16x16xbf16>, vector<4x16x16xbf16>, vector<4x16x16xf32> -> vector<4x16x16xf32>
    %215 = arith.truncf %214 : vector<4x16x16xf32> to vector<4x16x16xbf16>
    %cst_113 = arith.constant dense<0.000000e+00> : vector<4x16x64xf32>
    %216 = tpu.matmul %215, %188, %cst_113 {dimension_numbers = #tpu.dot_dimension_numbers<[2], [1], [1], [2], [0, 0, 0, 1, 1, 2], [0], [0]>} : vector<4x16x16xbf16>, vector<4x16x64xbf16>, vector<4x16x64xf32> -> vector<4x16x64xf32>
    %cst_114 = arith.constant dense<0.000000e+00> : vector<16x64xf32>
    %217 = vector.multi_reduction <add>, %216, %cst_114 [0] : vector<4x16x64xf32> to vector<16x64xf32>
    %218 = arith.addf %167, %217 : vector<16x64xf32>
    %c1_115 = arith.constant 1 : index
    %c0_116 = arith.constant 0 : index
    %219 = vector.load %arg11[%c1_115, %c0_116] : memref<6x64xf32, #tpu.memory_space<vmem>>, vector<1x64xf32>
    %220 = arith.mulf %218, %218 : vector<16x64xf32>
    %cst_117 = arith.constant dense<0.000000e+00> : vector<16xf32>
    %221 = vector.multi_reduction <add>, %220, %cst_117 [1] : vector<16x64xf32> to vector<16xf32>
    %222 = vector.shape_cast %221 : vector<16xf32> to vector<16x1xf32>
    %cst_118 = arith.constant 6.400000e+01 : f32
    %223 = vector.broadcast %cst_118 : f32 to vector<16x1xf32>
    %224 = arith.divf %222, %223 : vector<16x1xf32>
    %cst_119 = arith.constant 9.99999997E-7 : f32
    %225 = vector.broadcast %cst_119 : f32 to vector<16x1xf32>
    %226 = arith.addf %224, %225 : vector<16x1xf32>
    %227 = math.rsqrt %226 : vector<16x1xf32>
    %228 = vector.broadcast %227 : vector<16x1xf32> to vector<16x64xf32>
    %229 = arith.mulf %218, %228 : vector<16x64xf32>
    %230 = vector.broadcast %219 : vector<1x64xf32> to vector<16x64xf32>
    %231 = arith.mulf %229, %230 : vector<16x64xf32>
    %232 = arith.truncf %231 : vector<16x64xf32> to vector<16x64xbf16>
    %c0_120 = arith.constant 0 : index
    %c0_121 = arith.constant 0 : index
    %c0_122 = arith.constant 0 : index
    %233 = vector.load %arg14[%c0_120, %c0_121, %c0_122] : memref<24x64x16xbf16, #tpu.memory_space<vmem>>, vector<4x64x16xbf16>
    %c4_123 = arith.constant 4 : index
    %c0_124 = arith.constant 0 : index
    %c0_125 = arith.constant 0 : index
    %234 = vector.load %arg14[%c4_123, %c0_124, %c0_125] : memref<24x64x16xbf16, #tpu.memory_space<vmem>>, vector<4x64x16xbf16>
    %c8_126 = arith.constant 8 : index
    %c0_127 = arith.constant 0 : index
    %c0_128 = arith.constant 0 : index
    %235 = vector.load %arg14[%c8_126, %c0_127, %c0_128] : memref<24x64x16xbf16, #tpu.memory_space<vmem>>, vector<4x64x16xbf16>
    %c0_129 = arith.constant 0 : index
    %c0_130 = arith.constant 0 : index
    %c0_131 = arith.constant 0 : index
    %236 = vector.load %arg15[%c0_129, %c0_130, %c0_131] : memref<8x16x64xbf16, #tpu.memory_space<vmem>>, vector<4x16x64xbf16>
    %237 = vector.shape_cast %232 : vector<16x64xbf16> to vector<1x16x64xbf16>
    %238 = vector.shape_cast %237 : vector<1x16x64xbf16> to vector<1x16x64xbf16>
    %239 = vector.broadcast %238 : vector<1x16x64xbf16> to vector<4x16x64xbf16>
    %240 = vector.shape_cast %170 : vector<16x64xbf16> to vector<1x16x64xbf16>
    %241 = vector.shape_cast %240 : vector<1x16x64xbf16> to vector<1x16x64xbf16>
    %242 = vector.broadcast %241 : vector<1x16x64xbf16> to vector<4x16x64xbf16>
    %cst_132 = arith.constant dense<0.000000e+00> : vector<4x16x16xf32>
    %243 = tpu.matmul %239, %233, %cst_132 {dimension_numbers = #tpu.dot_dimension_numbers<[2], [1], [1], [2], [0, 0, 0, 1, 1, 2], [0], [0]>} : vector<4x16x64xbf16>, vector<4x64x16xbf16>, vector<4x16x16xf32> -> vector<4x16x16xf32>
    %cst_133 = arith.constant dense<0.000000e+00> : vector<4x16x16xf32>
    %244 = tpu.matmul %242, %234, %cst_133 {dimension_numbers = #tpu.dot_dimension_numbers<[2], [1], [1], [2], [0, 0, 0, 1, 1, 2], [0], [0]>} : vector<4x16x64xbf16>, vector<4x64x16xbf16>, vector<4x16x16xf32> -> vector<4x16x16xf32>
    %cst_134 = arith.constant dense<0.000000e+00> : vector<4x16x16xf32>
    %245 = tpu.matmul %242, %235, %cst_134 {dimension_numbers = #tpu.dot_dimension_numbers<[2], [1], [1], [2], [0, 0, 0, 1, 1, 2], [0], [0]>} : vector<4x16x64xbf16>, vector<4x64x16xbf16>, vector<4x16x16xf32> -> vector<4x16x16xf32>
    %246 = arith.truncf %243 : vector<4x16x16xf32> to vector<4x16x16xbf16>
    %247 = arith.truncf %244 : vector<4x16x16xf32> to vector<4x16x16xbf16>
    %cst_135 = arith.constant dense<0.000000e+00> : vector<4x16x16xf32>
    %248 = tpu.matmul %246, %247, %cst_135 {dimension_numbers = #tpu.dot_dimension_numbers<[2], [2], [1], [1], [0, 0, 0, 1, 1, 1], [0], [0]>} : vector<4x16x16xbf16>, vector<4x16x16xbf16>, vector<4x16x16xf32> -> vector<4x16x16xf32>
    %249 = arith.addf %248, %169 : vector<4x16x16xf32>
    %cst_136 = arith.constant dense<0xFF800000> : vector<4x16xf32>
    %250 = vector.multi_reduction <maximumf>, %249, %cst_136 [2] : vector<4x16x16xf32> to vector<4x16xf32>
    %251 = vector.shape_cast %250 : vector<4x16xf32> to vector<4x16x1xf32>
    %252 = vector.broadcast %251 : vector<4x16x1xf32> to vector<4x16x16xf32>
    %253 = arith.subf %249, %252 : vector<4x16x16xf32>
    %254 = math.exp %253 : vector<4x16x16xf32>
    %cst_137 = arith.constant dense<0.000000e+00> : vector<4x16xf32>
    %255 = vector.multi_reduction <add>, %254, %cst_137 [2] : vector<4x16x16xf32> to vector<4x16xf32>
    %256 = vector.shape_cast %255 : vector<4x16xf32> to vector<4x16x1xf32>
    %257 = tpu.reciprocal %256 {approx = true} : vector<4x16x1xf32> -> vector<4x16x1xf32>
    %258 = vector.broadcast %257 : vector<4x16x1xf32> to vector<4x16x16xf32>
    %259 = arith.mulf %254, %258 : vector<4x16x16xf32>
    %260 = arith.truncf %259 : vector<4x16x16xf32> to vector<4x16x16xbf16>
    %261 = arith.truncf %245 : vector<4x16x16xf32> to vector<4x16x16xbf16>
    %cst_138 = arith.constant dense<0.000000e+00> : vector<4x16x16xf32>
    %262 = tpu.matmul %260, %261, %cst_138 {dimension_numbers = #tpu.dot_dimension_numbers<[2], [1], [1], [2], [0, 0, 0, 1, 1, 2], [0], [0]>} : vector<4x16x16xbf16>, vector<4x16x16xbf16>, vector<4x16x16xf32> -> vector<4x16x16xf32>
    %263 = arith.truncf %262 : vector<4x16x16xf32> to vector<4x16x16xbf16>
    %cst_139 = arith.constant dense<0.000000e+00> : vector<4x16x64xf32>
    %264 = tpu.matmul %263, %236, %cst_139 {dimension_numbers = #tpu.dot_dimension_numbers<[2], [1], [1], [2], [0, 0, 0, 1, 1, 2], [0], [0]>} : vector<4x16x16xbf16>, vector<4x16x64xbf16>, vector<4x16x64xf32> -> vector<4x16x64xf32>
    %cst_140 = arith.constant dense<0.000000e+00> : vector<16x64xf32>
    %265 = vector.multi_reduction <add>, %264, %cst_140 [0] : vector<4x16x64xf32> to vector<16x64xf32>
    %266 = arith.addf %218, %265 : vector<16x64xf32>
    %c2_141 = arith.constant 2 : index
    %c0_142 = arith.constant 0 : index
    %267 = vector.load %arg11[%c2_141, %c0_142] : memref<6x64xf32, #tpu.memory_space<vmem>>, vector<1x64xf32>
    %c0_143 = arith.constant 0 : index
    %c0_144 = arith.constant 0 : index
    %268 = vector.load %arg16[%c0_143, %c0_144] : memref<128x128xbf16, #tpu.memory_space<vmem>>, vector<64x128xbf16>
    %c0_145 = arith.constant 0 : index
    %c0_146 = arith.constant 0 : index
    %269 = vector.load %arg17[%c0_145, %c0_146] : memref<256x64xbf16, #tpu.memory_space<vmem>>, vector<128x64xbf16>
    %270 = arith.mulf %266, %266 : vector<16x64xf32>
    %cst_147 = arith.constant dense<0.000000e+00> : vector<16xf32>
    %271 = vector.multi_reduction <add>, %270, %cst_147 [1] : vector<16x64xf32> to vector<16xf32>
    %272 = vector.shape_cast %271 : vector<16xf32> to vector<16x1xf32>
    %cst_148 = arith.constant 6.400000e+01 : f32
    %273 = vector.broadcast %cst_148 : f32 to vector<16x1xf32>
    %274 = arith.divf %272, %273 : vector<16x1xf32>
    %cst_149 = arith.constant 9.99999997E-7 : f32
    %275 = vector.broadcast %cst_149 : f32 to vector<16x1xf32>
    %276 = arith.addf %274, %275 : vector<16x1xf32>
    %277 = math.rsqrt %276 : vector<16x1xf32>
    %278 = vector.broadcast %277 : vector<16x1xf32> to vector<16x64xf32>
    %279 = arith.mulf %266, %278 : vector<16x64xf32>
    %280 = vector.broadcast %267 : vector<1x64xf32> to vector<16x64xf32>
    %281 = arith.mulf %279, %280 : vector<16x64xf32>
    %282 = arith.truncf %281 : vector<16x64xf32> to vector<16x64xbf16>
    %cst_150 = arith.constant dense<0.000000e+00> : vector<16x128xf32>
    %283 = tpu.matmul %282, %268, %cst_150 {dimension_numbers = #tpu.dot_dimension_numbers<[1], [0], [0], [1], [0, 0, 1, 1], [], []>} : vector<16x64xbf16>, vector<64x128xbf16>, vector<16x128xf32> -> vector<16x128xf32>
    %cst_151 = arith.constant 0.000000e+00 : f32
    %284 = vector.broadcast %cst_151 : f32 to vector<16x128xf32>
    %285 = arith.maximumf %283, %284 : vector<16x128xf32>
    %286 = arith.truncf %285 : vector<16x128xf32> to vector<16x128xbf16>
    %cst_152 = arith.constant dense<0.000000e+00> : vector<16x64xf32>
    %287 = tpu.matmul %286, %269, %cst_152 {dimension_numbers = #tpu.dot_dimension_numbers<[1], [0], [0], [1], [0, 0, 1, 1], [], []>} : vector<16x128xbf16>, vector<128x64xbf16>, vector<16x64xf32> -> vector<16x64xf32>
    %288 = arith.addf %266, %287 : vector<16x64xf32>
    %c3_153 = arith.constant 3 : index
    %c0_154 = arith.constant 0 : index
    %289 = vector.load %arg11[%c3_153, %c0_154] : memref<6x64xf32, #tpu.memory_space<vmem>>, vector<1x64xf32>
    %290 = arith.mulf %288, %288 : vector<16x64xf32>
    %cst_155 = arith.constant dense<0.000000e+00> : vector<16xf32>
    %291 = vector.multi_reduction <add>, %290, %cst_155 [1] : vector<16x64xf32> to vector<16xf32>
    %292 = vector.shape_cast %291 : vector<16xf32> to vector<16x1xf32>
    %cst_156 = arith.constant 6.400000e+01 : f32
    %293 = vector.broadcast %cst_156 : f32 to vector<16x1xf32>
    %294 = arith.divf %292, %293 : vector<16x1xf32>
    %cst_157 = arith.constant 9.99999997E-7 : f32
    %295 = vector.broadcast %cst_157 : f32 to vector<16x1xf32>
    %296 = arith.addf %294, %295 : vector<16x1xf32>
    %297 = math.rsqrt %296 : vector<16x1xf32>
    %298 = vector.broadcast %297 : vector<16x1xf32> to vector<16x64xf32>
    %299 = arith.mulf %288, %298 : vector<16x64xf32>
    %300 = vector.broadcast %289 : vector<1x64xf32> to vector<16x64xf32>
    %301 = arith.mulf %299, %300 : vector<16x64xf32>
    %302 = arith.truncf %301 : vector<16x64xf32> to vector<16x64xbf16>
    %c12_158 = arith.constant 12 : index
    %c0_159 = arith.constant 0 : index
    %c0_160 = arith.constant 0 : index
    %303 = vector.load %arg12[%c12_158, %c0_159, %c0_160] : memref<24x64x16xbf16, #tpu.memory_space<vmem>>, vector<4x64x16xbf16>
    %c16_161 = arith.constant 16 : index
    %c0_162 = arith.constant 0 : index
    %c0_163 = arith.constant 0 : index
    %304 = vector.load %arg12[%c16_161, %c0_162, %c0_163] : memref<24x64x16xbf16, #tpu.memory_space<vmem>>, vector<4x64x16xbf16>
    %c20_164 = arith.constant 20 : index
    %c0_165 = arith.constant 0 : index
    %c0_166 = arith.constant 0 : index
    %305 = vector.load %arg12[%c20_164, %c0_165, %c0_166] : memref<24x64x16xbf16, #tpu.memory_space<vmem>>, vector<4x64x16xbf16>
    %c4_167 = arith.constant 4 : index
    %c0_168 = arith.constant 0 : index
    %c0_169 = arith.constant 0 : index
    %306 = vector.load %arg13[%c4_167, %c0_168, %c0_169] : memref<8x16x64xbf16, #tpu.memory_space<vmem>>, vector<4x16x64xbf16>
    %307 = vector.shape_cast %302 : vector<16x64xbf16> to vector<1x16x64xbf16>
    %308 = vector.shape_cast %307 : vector<1x16x64xbf16> to vector<1x16x64xbf16>
    %309 = vector.broadcast %308 : vector<1x16x64xbf16> to vector<4x16x64xbf16>
    %310 = vector.shape_cast %302 : vector<16x64xbf16> to vector<1x16x64xbf16>
    %311 = vector.shape_cast %310 : vector<1x16x64xbf16> to vector<1x16x64xbf16>
    %312 = vector.broadcast %311 : vector<1x16x64xbf16> to vector<4x16x64xbf16>
    %cst_170 = arith.constant dense<0.000000e+00> : vector<4x16x16xf32>
    %313 = tpu.matmul %309, %303, %cst_170 {dimension_numbers = #tpu.dot_dimension_numbers<[2], [1], [1], [2], [0, 0, 0, 1, 1, 2], [0], [0]>} : vector<4x16x64xbf16>, vector<4x64x16xbf16>, vector<4x16x16xf32> -> vector<4x16x16xf32>
    %cst_171 = arith.constant dense<0.000000e+00> : vector<4x16x16xf32>
    %314 = tpu.matmul %312, %304, %cst_171 {dimension_numbers = #tpu.dot_dimension_numbers<[2], [1], [1], [2], [0, 0, 0, 1, 1, 2], [0], [0]>} : vector<4x16x64xbf16>, vector<4x64x16xbf16>, vector<4x16x16xf32> -> vector<4x16x16xf32>
    %cst_172 = arith.constant dense<0.000000e+00> : vector<4x16x16xf32>
    %315 = tpu.matmul %312, %305, %cst_172 {dimension_numbers = #tpu.dot_dimension_numbers<[2], [1], [1], [2], [0, 0, 0, 1, 1, 2], [0], [0]>} : vector<4x16x64xbf16>, vector<4x64x16xbf16>, vector<4x16x16xf32> -> vector<4x16x16xf32>
    %316 = arith.truncf %313 : vector<4x16x16xf32> to vector<4x16x16xbf16>
    %317 = arith.truncf %314 : vector<4x16x16xf32> to vector<4x16x16xbf16>
    %cst_173 = arith.constant dense<0.000000e+00> : vector<4x16x16xf32>
    %318 = tpu.matmul %316, %317, %cst_173 {dimension_numbers = #tpu.dot_dimension_numbers<[2], [2], [1], [1], [0, 0, 0, 1, 1, 1], [0], [0]>} : vector<4x16x16xbf16>, vector<4x16x16xbf16>, vector<4x16x16xf32> -> vector<4x16x16xf32>
    %319 = arith.addf %318, %168 : vector<4x16x16xf32>
    %cst_174 = arith.constant dense<0xFF800000> : vector<4x16xf32>
    %320 = vector.multi_reduction <maximumf>, %319, %cst_174 [2] : vector<4x16x16xf32> to vector<4x16xf32>
    %321 = vector.shape_cast %320 : vector<4x16xf32> to vector<4x16x1xf32>
    %322 = vector.broadcast %321 : vector<4x16x1xf32> to vector<4x16x16xf32>
    %323 = arith.subf %319, %322 : vector<4x16x16xf32>
    %324 = math.exp %323 : vector<4x16x16xf32>
    %cst_175 = arith.constant dense<0.000000e+00> : vector<4x16xf32>
    %325 = vector.multi_reduction <add>, %324, %cst_175 [2] : vector<4x16x16xf32> to vector<4x16xf32>
    %326 = vector.shape_cast %325 : vector<4x16xf32> to vector<4x16x1xf32>
    %327 = tpu.reciprocal %326 {approx = true} : vector<4x16x1xf32> -> vector<4x16x1xf32>
    %328 = vector.broadcast %327 : vector<4x16x1xf32> to vector<4x16x16xf32>
    %329 = arith.mulf %324, %328 : vector<4x16x16xf32>
    %330 = arith.truncf %329 : vector<4x16x16xf32> to vector<4x16x16xbf16>
    %331 = arith.truncf %315 : vector<4x16x16xf32> to vector<4x16x16xbf16>
    %cst_176 = arith.constant dense<0.000000e+00> : vector<4x16x16xf32>
    %332 = tpu.matmul %330, %331, %cst_176 {dimension_numbers = #tpu.dot_dimension_numbers<[2], [1], [1], [2], [0, 0, 0, 1, 1, 2], [0], [0]>} : vector<4x16x16xbf16>, vector<4x16x16xbf16>, vector<4x16x16xf32> -> vector<4x16x16xf32>
    %333 = arith.truncf %332 : vector<4x16x16xf32> to vector<4x16x16xbf16>
    %cst_177 = arith.constant dense<0.000000e+00> : vector<4x16x64xf32>
    %334 = tpu.matmul %333, %306, %cst_177 {dimension_numbers = #tpu.dot_dimension_numbers<[2], [1], [1], [2], [0, 0, 0, 1, 1, 2], [0], [0]>} : vector<4x16x16xbf16>, vector<4x16x64xbf16>, vector<4x16x64xf32> -> vector<4x16x64xf32>
    %cst_178 = arith.constant dense<0.000000e+00> : vector<16x64xf32>
    %335 = vector.multi_reduction <add>, %334, %cst_178 [0] : vector<4x16x64xf32> to vector<16x64xf32>
    %336 = arith.addf %288, %335 : vector<16x64xf32>
    %c4_179 = arith.constant 4 : index
    %c0_180 = arith.constant 0 : index
    %337 = vector.load %arg11[%c4_179, %c0_180] : memref<6x64xf32, #tpu.memory_space<vmem>>, vector<1x64xf32>
    %338 = arith.mulf %336, %336 : vector<16x64xf32>
    %cst_181 = arith.constant dense<0.000000e+00> : vector<16xf32>
    %339 = vector.multi_reduction <add>, %338, %cst_181 [1] : vector<16x64xf32> to vector<16xf32>
    %340 = vector.shape_cast %339 : vector<16xf32> to vector<16x1xf32>
    %cst_182 = arith.constant 6.400000e+01 : f32
    %341 = vector.broadcast %cst_182 : f32 to vector<16x1xf32>
    %342 = arith.divf %340, %341 : vector<16x1xf32>
    %cst_183 = arith.constant 9.99999997E-7 : f32
    %343 = vector.broadcast %cst_183 : f32 to vector<16x1xf32>
    %344 = arith.addf %342, %343 : vector<16x1xf32>
    %345 = math.rsqrt %344 : vector<16x1xf32>
    %346 = vector.broadcast %345 : vector<16x1xf32> to vector<16x64xf32>
    %347 = arith.mulf %336, %346 : vector<16x64xf32>
    %348 = vector.broadcast %337 : vector<1x64xf32> to vector<16x64xf32>
    %349 = arith.mulf %347, %348 : vector<16x64xf32>
    %350 = arith.truncf %349 : vector<16x64xf32> to vector<16x64xbf16>
    %c12_184 = arith.constant 12 : index
    %c0_185 = arith.constant 0 : index
    %c0_186 = arith.constant 0 : index
    %351 = vector.load %arg14[%c12_184, %c0_185, %c0_186] : memref<24x64x16xbf16, #tpu.memory_space<vmem>>, vector<4x64x16xbf16>
    %c16_187 = arith.constant 16 : index
    %c0_188 = arith.constant 0 : index
    %c0_189 = arith.constant 0 : index
    %352 = vector.load %arg14[%c16_187, %c0_188, %c0_189] : memref<24x64x16xbf16, #tpu.memory_space<vmem>>, vector<4x64x16xbf16>
    %c20_190 = arith.constant 20 : index
    %c0_191 = arith.constant 0 : index
    %c0_192 = arith.constant 0 : index
    %353 = vector.load %arg14[%c20_190, %c0_191, %c0_192] : memref<24x64x16xbf16, #tpu.memory_space<vmem>>, vector<4x64x16xbf16>
    %c4_193 = arith.constant 4 : index
    %c0_194 = arith.constant 0 : index
    %c0_195 = arith.constant 0 : index
    %354 = vector.load %arg15[%c4_193, %c0_194, %c0_195] : memref<8x16x64xbf16, #tpu.memory_space<vmem>>, vector<4x16x64xbf16>
    %355 = vector.shape_cast %350 : vector<16x64xbf16> to vector<1x16x64xbf16>
    %356 = vector.shape_cast %355 : vector<1x16x64xbf16> to vector<1x16x64xbf16>
    %357 = vector.broadcast %356 : vector<1x16x64xbf16> to vector<4x16x64xbf16>
    %358 = vector.shape_cast %170 : vector<16x64xbf16> to vector<1x16x64xbf16>
    %359 = vector.shape_cast %358 : vector<1x16x64xbf16> to vector<1x16x64xbf16>
    %360 = vector.broadcast %359 : vector<1x16x64xbf16> to vector<4x16x64xbf16>
    %cst_196 = arith.constant dense<0.000000e+00> : vector<4x16x16xf32>
    %361 = tpu.matmul %357, %351, %cst_196 {dimension_numbers = #tpu.dot_dimension_numbers<[2], [1], [1], [2], [0, 0, 0, 1, 1, 2], [0], [0]>} : vector<4x16x64xbf16>, vector<4x64x16xbf16>, vector<4x16x16xf32> -> vector<4x16x16xf32>
    %cst_197 = arith.constant dense<0.000000e+00> : vector<4x16x16xf32>
    %362 = tpu.matmul %360, %352, %cst_197 {dimension_numbers = #tpu.dot_dimension_numbers<[2], [1], [1], [2], [0, 0, 0, 1, 1, 2], [0], [0]>} : vector<4x16x64xbf16>, vector<4x64x16xbf16>, vector<4x16x16xf32> -> vector<4x16x16xf32>
    %cst_198 = arith.constant dense<0.000000e+00> : vector<4x16x16xf32>
    %363 = tpu.matmul %360, %353, %cst_198 {dimension_numbers = #tpu.dot_dimension_numbers<[2], [1], [1], [2], [0, 0, 0, 1, 1, 2], [0], [0]>} : vector<4x16x64xbf16>, vector<4x64x16xbf16>, vector<4x16x16xf32> -> vector<4x16x16xf32>
    %364 = arith.truncf %361 : vector<4x16x16xf32> to vector<4x16x16xbf16>
    %365 = arith.truncf %362 : vector<4x16x16xf32> to vector<4x16x16xbf16>
    %cst_199 = arith.constant dense<0.000000e+00> : vector<4x16x16xf32>
    %366 = tpu.matmul %364, %365, %cst_199 {dimension_numbers = #tpu.dot_dimension_numbers<[2], [2], [1], [1], [0, 0, 0, 1, 1, 1], [0], [0]>} : vector<4x16x16xbf16>, vector<4x16x16xbf16>, vector<4x16x16xf32> -> vector<4x16x16xf32>
    %367 = arith.addf %366, %169 : vector<4x16x16xf32>
    %cst_200 = arith.constant dense<0xFF800000> : vector<4x16xf32>
    %368 = vector.multi_reduction <maximumf>, %367, %cst_200 [2] : vector<4x16x16xf32> to vector<4x16xf32>
    %369 = vector.shape_cast %368 : vector<4x16xf32> to vector<4x16x1xf32>
    %370 = vector.broadcast %369 : vector<4x16x1xf32> to vector<4x16x16xf32>
    %371 = arith.subf %367, %370 : vector<4x16x16xf32>
    %372 = math.exp %371 : vector<4x16x16xf32>
    %cst_201 = arith.constant dense<0.000000e+00> : vector<4x16xf32>
    %373 = vector.multi_reduction <add>, %372, %cst_201 [2] : vector<4x16x16xf32> to vector<4x16xf32>
    %374 = vector.shape_cast %373 : vector<4x16xf32> to vector<4x16x1xf32>
    %375 = tpu.reciprocal %374 {approx = true} : vector<4x16x1xf32> -> vector<4x16x1xf32>
    %376 = vector.broadcast %375 : vector<4x16x1xf32> to vector<4x16x16xf32>
    %377 = arith.mulf %372, %376 : vector<4x16x16xf32>
    %378 = arith.truncf %377 : vector<4x16x16xf32> to vector<4x16x16xbf16>
    %379 = arith.truncf %363 : vector<4x16x16xf32> to vector<4x16x16xbf16>
    %cst_202 = arith.constant dense<0.000000e+00> : vector<4x16x16xf32>
    %380 = tpu.matmul %378, %379, %cst_202 {dimension_numbers = #tpu.dot_dimension_numbers<[2], [1], [1], [2], [0, 0, 0, 1, 1, 2], [0], [0]>} : vector<4x16x16xbf16>, vector<4x16x16xbf16>, vector<4x16x16xf32> -> vector<4x16x16xf32>
    %381 = arith.truncf %380 : vector<4x16x16xf32> to vector<4x16x16xbf16>
    %cst_203 = arith.constant dense<0.000000e+00> : vector<4x16x64xf32>
    %382 = tpu.matmul %381, %354, %cst_203 {dimension_numbers = #tpu.dot_dimension_numbers<[2], [1], [1], [2], [0, 0, 0, 1, 1, 2], [0], [0]>} : vector<4x16x16xbf16>, vector<4x16x64xbf16>, vector<4x16x64xf32> -> vector<4x16x64xf32>
    %cst_204 = arith.constant dense<0.000000e+00> : vector<16x64xf32>
    %383 = vector.multi_reduction <add>, %382, %cst_204 [0] : vector<4x16x64xf32> to vector<16x64xf32>
    %384 = arith.addf %336, %383 : vector<16x64xf32>
    %c5 = arith.constant 5 : index
    %c0_205 = arith.constant 0 : index
    %385 = vector.load %arg11[%c5, %c0_205] : memref<6x64xf32, #tpu.memory_space<vmem>>, vector<1x64xf32>
    %c64_206 = arith.constant 64 : index
    %c0_207 = arith.constant 0 : index
    %386 = vector.load %arg16[%c64_206, %c0_207] : memref<128x128xbf16, #tpu.memory_space<vmem>>, vector<64x128xbf16>
    %c128_208 = arith.constant 128 : index
    %c0_209 = arith.constant 0 : index
    %387 = vector.load %arg17[%c128_208, %c0_209] : memref<256x64xbf16, #tpu.memory_space<vmem>>, vector<128x64xbf16>
    %388 = arith.mulf %384, %384 : vector<16x64xf32>
    %cst_210 = arith.constant dense<0.000000e+00> : vector<16xf32>
    %389 = vector.multi_reduction <add>, %388, %cst_210 [1] : vector<16x64xf32> to vector<16xf32>
    %390 = vector.shape_cast %389 : vector<16xf32> to vector<16x1xf32>
    %cst_211 = arith.constant 6.400000e+01 : f32
    %391 = vector.broadcast %cst_211 : f32 to vector<16x1xf32>
    %392 = arith.divf %390, %391 : vector<16x1xf32>
    %cst_212 = arith.constant 9.99999997E-7 : f32
    %393 = vector.broadcast %cst_212 : f32 to vector<16x1xf32>
    %394 = arith.addf %392, %393 : vector<16x1xf32>
    %395 = math.rsqrt %394 : vector<16x1xf32>
    %396 = vector.broadcast %395 : vector<16x1xf32> to vector<16x64xf32>
    %397 = arith.mulf %384, %396 : vector<16x64xf32>
    %398 = vector.broadcast %385 : vector<1x64xf32> to vector<16x64xf32>
    %399 = arith.mulf %397, %398 : vector<16x64xf32>
    %400 = arith.truncf %399 : vector<16x64xf32> to vector<16x64xbf16>
    %cst_213 = arith.constant dense<0.000000e+00> : vector<16x128xf32>
    %401 = tpu.matmul %400, %386, %cst_213 {dimension_numbers = #tpu.dot_dimension_numbers<[1], [0], [0], [1], [0, 0, 1, 1], [], []>} : vector<16x64xbf16>, vector<64x128xbf16>, vector<16x128xf32> -> vector<16x128xf32>
    %cst_214 = arith.constant 0.000000e+00 : f32
    %402 = vector.broadcast %cst_214 : f32 to vector<16x128xf32>
    %403 = arith.maximumf %401, %402 : vector<16x128xf32>
    %404 = arith.truncf %403 : vector<16x128xf32> to vector<16x128xbf16>
    %cst_215 = arith.constant dense<0.000000e+00> : vector<16x64xf32>
    %405 = tpu.matmul %404, %387, %cst_215 {dimension_numbers = #tpu.dot_dimension_numbers<[1], [0], [0], [1], [0, 0, 1, 1], [], []>} : vector<16x128xbf16>, vector<128x64xbf16>, vector<16x64xf32> -> vector<16x64xf32>
    %406 = arith.addf %384, %405 : vector<16x64xf32>
    %c0_216 = arith.constant 0 : index
    %c0_217 = arith.constant 0 : index
    %407 = vector.load %arg19[%c0_216, %c0_217] : memref<1x64xf32, #tpu.memory_space<vmem>>, vector<1x64xf32>
    %408 = arith.mulf %406, %406 : vector<16x64xf32>
    %cst_218 = arith.constant dense<0.000000e+00> : vector<16xf32>
    %409 = vector.multi_reduction <add>, %408, %cst_218 [1] : vector<16x64xf32> to vector<16xf32>
    %410 = vector.shape_cast %409 : vector<16xf32> to vector<16x1xf32>
    %cst_219 = arith.constant 6.400000e+01 : f32
    %411 = vector.broadcast %cst_219 : f32 to vector<16x1xf32>
    %412 = arith.divf %410, %411 : vector<16x1xf32>
    %cst_220 = arith.constant 9.99999997E-7 : f32
    %413 = vector.broadcast %cst_220 : f32 to vector<16x1xf32>
    %414 = arith.addf %412, %413 : vector<16x1xf32>
    %415 = math.rsqrt %414 : vector<16x1xf32>
    %416 = vector.broadcast %415 : vector<16x1xf32> to vector<16x64xf32>
    %417 = arith.mulf %406, %416 : vector<16x64xf32>
    %418 = vector.broadcast %407 : vector<1x64xf32> to vector<16x64xf32>
    %419 = arith.mulf %417, %418 : vector<16x64xf32>
    %cst_221 = arith.constant 1.250000e-01 : f32
    %420 = vector.broadcast %cst_221 : f32 to vector<16x64xf32>
    %421 = arith.mulf %419, %420 : vector<16x64xf32>
    %422 = arith.truncf %421 : vector<16x64xf32> to vector<16x64xbf16>
    %c0_222 = arith.constant 0 : index
    %c0_223 = arith.constant 0 : index
    %423 = vector.load %arg20[%c0_222, %c0_223] : memref<128x64xbf16, #tpu.memory_space<vmem>>, vector<128x64xbf16>
    %cst_224 = arith.constant dense<0.000000e+00> : vector<16x128xf32>
    %424 = tpu.matmul %422, %423, %cst_224 {dimension_numbers = #tpu.dot_dimension_numbers<[1], [1], [0], [0], [0, 0, 1, 0], [], []>} : vector<16x64xbf16>, vector<128x64xbf16>, vector<16x128xf32> -> vector<16x128xf32>
    %c0_225 = arith.constant 0 : index
    %c0_226 = arith.constant 0 : index
    %425 = vector.load %arg5[%c0_225, %c0_226] : memref<16x1xi32, #tpu.memory_space<vmem>>, vector<16x1xi32>
    %cst_227 = arith.constant dense<0xFF800000> : vector<16xf32>
    %426 = vector.multi_reduction <maximumf>, %424, %cst_227 [1] : vector<16x128xf32> to vector<16xf32>
    %427 = vector.shape_cast %426 : vector<16xf32> to vector<16x1xf32>
    %428 = vector.broadcast %427 : vector<16x1xf32> to vector<16x128xf32>
    %429 = arith.subf %424, %428 : vector<16x128xf32>
    %430 = math.exp %429 : vector<16x128xf32>
    %cst_228 = arith.constant dense<0.000000e+00> : vector<16xf32>
    %431 = vector.multi_reduction <add>, %430, %cst_228 [1] : vector<16x128xf32> to vector<16xf32>
    %432 = vector.shape_cast %431 : vector<16xf32> to vector<16x1xf32>
    %433 = math.log %432 : vector<16x1xf32>
    %434 = arith.addf %427, %433 : vector<16x1xf32>
    %435 = tpu.iota {dimensions = array<i32: 1>} : vector<16x128xi32>
    %436 = vector.broadcast %425 : vector<16x1xi32> to vector<16x128xi32>
    %437 = arith.cmpi eq, %435, %436 : vector<16x128xi32>
    %cst_229 = arith.constant 0.000000e+00 : f32
    %438 = vector.broadcast %cst_229 : f32 to vector<16x128xf32>
    %439 = arith.select %437, %424, %438 : vector<16x128xi1>, vector<16x128xf32>
    %cst_230 = arith.constant dense<0.000000e+00> : vector<16xf32>
    %440 = vector.multi_reduction <add>, %439, %cst_230 [1] : vector<16x128xf32> to vector<16xf32>
    %441 = vector.shape_cast %440 : vector<16xf32> to vector<16x1xf32>
    %c-100_i32 = arith.constant -100 : i32
    %442 = vector.broadcast %c-100_i32 : i32 to vector<16x1xi32>
    %443 = arith.cmpi ne, %425, %442 : vector<16x1xi32>
    %444 = arith.extui %443 : vector<16x1xi1> to vector<16x1xi32>
    %445 = arith.sitofp %444 : vector<16x1xi32> to vector<16x1xf32>
    %446 = arith.subf %434, %441 : vector<16x1xf32>
    %447 = arith.mulf %446, %445 : vector<16x1xf32>
    %cst_231 = arith.constant dense<0.000000e+00> : vector<1xf32>
    %448 = vector.multi_reduction <add>, %447, %cst_231 [0] : vector<16x1xf32> to vector<1xf32>
    %449 = vector.shape_cast %448 : vector<1xf32> to vector<1x1xf32>
    %cst_232 = arith.constant dense<0.000000e+00> : vector<1xf32>
    %450 = vector.multi_reduction <add>, %445, %cst_232 [0] : vector<16x1xf32> to vector<1xf32>
    %451 = vector.shape_cast %450 : vector<1xf32> to vector<1x1xf32>
    %452 = tpu.iota {dimensions = array<i32: 1>} : vector<1x128xi32>
    %c0_i32 = arith.constant 0 : i32
    %453 = vector.broadcast %c0_i32 : i32 to vector<1x128xi32>
    %454 = arith.cmpi eq, %452, %453 : vector<1x128xi32>
    %cst_233 = arith.constant 0.000000e+00 : f32
    %455 = vector.shape_cast %449 : vector<1x1xf32> to vector<1x1xf32>
    %456 = vector.broadcast %455 : vector<1x1xf32> to vector<1x128xf32>
    %457 = vector.broadcast %cst_233 : f32 to vector<1x128xf32>
    %458 = arith.select %454, %456, %457 : vector<1x128xi1>, vector<1x128xf32>
    %c1_i32 = arith.constant 1 : i32
    %459 = vector.broadcast %c1_i32 : i32 to vector<1x128xi32>
    %460 = arith.cmpi eq, %452, %459 : vector<1x128xi32>
    %cst_234 = arith.constant 0.000000e+00 : f32
    %461 = vector.shape_cast %451 : vector<1x1xf32> to vector<1x1xf32>
    %462 = vector.broadcast %461 : vector<1x1xf32> to vector<1x128xf32>
    %463 = vector.broadcast %cst_234 : f32 to vector<1x128xf32>
    %464 = arith.select %460, %462, %463 : vector<1x128xi1>, vector<1x128xf32>
    %465 = arith.addf %458, %464 : vector<1x128xf32>
    %c0_235 = arith.constant 0 : index
    %c0_236 = arith.constant 0 : index
    %466 = vector.load %arg24[%c0_235, %c0_236] : memref<1x128xf32, #tpu.memory_space<vmem>>, vector<1x128xf32>
    tpu.vector_store %arg24[%c0_235, %c0_236], %465 {strides = array<i32>} : memref<1x128xf32, #tpu.memory_space<vmem>>, vector<1x128xf32>,
    return
  }
}

</mosaic_0001>

<bundles_post_ra>
// kernel: tile.14
= control target key start
LH: loop header
LB: loop body
LE: loop exit
PB: predicated region body
PF: predicated region fallthrough
CT: control target
= control target key end

     0   :  { %vm260_vm0 = vcmask 1047556   ;;  %s492_s15 = smov 8   ;;  %vm262_vm1 = vcmask 64512   ;;  %vm335_vm2 = vcmask 130112   ;;  %s783_s0 = inlined_call_operand.vmem [shape: f32[4,2,8,2,8], index: 0, kind: input, shape index: {}]   ;;  %s784_s1 = inlined_call_operand.vmem [shape: f32[4,16,16], index: 1, kind: output, shape index: {}]  }
   0x1   :  { %v470_v0 = vld [vmem:[%s783_s0 + $0xe] sm:$0x3]  ;;  %v471_v1 = vld [vmem:[%s783_s0 + $0xc] sm:$0x3]  ;;  %v472_v2 = vld [vmem:[%s783_s0 + $0xa] sm:$0x3] }
   0x2   :  { %231 = vst [vmem:[#allocation0 + $0x38] sm:$0x3] %v470_v0  ;;  %v473_v3 = vld [vmem:[%s783_s0 + $0x8] sm:$0x3]  ;;  %v474_v4 = vld [vmem:[%s783_s0 + $0x6] sm:$0x3] }
   0x3   :  { %235 = vst [vmem:[#allocation0 + $0x30] sm:$0x3] %v471_v1  ;;  %v475_v5 = vld [vmem:[%s783_s0 + $0x4] sm:$0x3]  ;;  %v476_v6 = vld [vmem:[%s783_s0 + $0x2] sm:$0x3] }
   0x4   :  { %239 = vst [vmem:[#allocation0 + $0x28] sm:$0x3] %v472_v2  ;;  %v256_v7 = vld [vmem:[%s783_s0] sm:$0x3]  ;;  %v462_v8 = vld [vmem:[%s783_s0 + $0x1e] sm:$0x3] }
   0x5   :  { %243 = vst [vmem:[#allocation0 + $0x20] sm:$0x3] %v473_v3  ;;  %v463_v9 = vld [vmem:[%s783_s0 + $0x1c] sm:$0x3]  ;;  %v464_v10 = vld [vmem:[%s783_s0 + $0x1a] sm:$0x3] }
   0x6   :  { %247 = vst [vmem:[#allocation0 + $0x18] sm:$0x3] %v474_v4  ;;  %v465_v11 = vld [vmem:[%s783_s0 + $0x18] sm:$0x3]  ;;  %v466_v12 = vld [vmem:[%s783_s0 + $0x16] sm:$0x3] }
   0x7   :  { %251 = vst [vmem:[#allocation0 + $0x10] sm:$0x3] %v475_v5  ;;  %v467_v13 = vld [vmem:[%s783_s0 + $0x14] sm:$0x3]  ;;  %v468_v14 = vld [vmem:[%s783_s0 + $0x12] sm:$0x3] }
   0x8   :  { %255 = vst [vmem:[#allocation0 + $0x8] sm:$0x3] %v476_v6  ;;  %v469_v15 = vld [vmem:[%s783_s0 + $0x10] sm:$0x3]  ;;  %v438_v17 = vld [vmem:[%s783_s0 + $0x4e] sm:$0x3] }
   0x9   :  { %257 = vst [vmem:[#allocation0] sm:$0x3] %v256_v7  ;;  %v439_v18 = vld [vmem:[%s783_s0 + $0x4c] sm:$0x3]  ;;  %v440_v21 = vld [vmem:[%s783_s0 + $0x4a] sm:$0x3] }
   0xa   :  { %199 = vst [vmem:[#allocation0 + $0x78] sm:$0x3] %v462_v8  ;;  %v441_v22 = vld [vmem:[%s783_s0 + $0x48] sm:$0x3]  ;;  %v442_v23 = vld [vmem:[%s783_s0 + $0x46] sm:$0x3] }
   0xb   :  { %203 = vst [vmem:[#allocation0 + $0x70] sm:$0x3] %v463_v9  ;;  %v443_v24 = vld [vmem:[%s783_s0 + $0x44] sm:$0x3]  ;;  %v444_v25 = vld [vmem:[%s783_s0 + $0x42] sm:$0x3] }
   0xc   :  { %207 = vst [vmem:[#allocation0 + $0x68] sm:$0x3] %v464_v10  ;;  %v330_v16 = vld [vmem:[#allocation0 + $0x1] ss:$8 sm:$0xf0]  }
   0xd   :  { %211 = vst [vmem:[#allocation0 + $0x60] sm:$0x3] %v465_v11  ;;  %v445_v26 = vld [vmem:[%s783_s0 + $0x40] sm:$0x3]  ;;  %v430_v28 = vld [vmem:[%s783_s0 + $0x5e] sm:$0x3] }
   0xe   :  { %215 = vst [vmem:[#allocation0 + $0x58] sm:$0x3] %v466_v12  ;;  %v431_v29 = vld [vmem:[%s783_s0 + $0x5c] sm:$0x3]  ;;  %v432_v32 = vld [vmem:[%s783_s0 + $0x5a] sm:$0x3] }
   0xf   :  { %219 = vst [vmem:[#allocation0 + $0x50] sm:$0x3] %v467_v13  ;;  %v433_v33 = vld [vmem:[%s783_s0 + $0x58] sm:$0x3]  ;;  %v434_v34 = vld [vmem:[%s783_s0 + $0x56] sm:$0x3] }
  0x10   :  { %v328_v19 = vld [vmem:[#allocation0 + $0x1] ss:$8 sm:$0xf]   ;;  %223 = vst [vmem:[#allocation0 + $0x48] sm:$0x3] %v468_v14 }
  0x11   :  { %v332_v20 = vsel %vm260_vm0, %v330_v16, %v328_v19  ;;  %227 = vst [vmem:[#allocation0 + $0x40] sm:$0x3] %v469_v15  ;;  %v435_v35 = vld [vmem:[%s783_s0 + $0x54] sm:$0x3]  ;;  %v436_v36 = vld [vmem:[%s783_s0 + $0x52] sm:$0x3] }
  0x12   :  { %333 = vrot.lane.b32.xlu0 %v332_v20, %s492_s15  ;;  %103 = vst [vmem:[#allocation0 + $0x138] sm:$0x3] %v438_v17  ;;  %v437_v37 = vld [vmem:[%s783_s0 + $0x50] sm:$0x3]  ;;  %v446_v39 = vld [vmem:[%s783_s0 + $0x3e] sm:$0x3] }
  0x13   :  { %107 = vst [vmem:[#allocation0 + $0x130] sm:$0x3] %v439_v18  ;;  %v447_v40 = vld [vmem:[%s783_s0 + $0x3c] sm:$0x3]  ;;  %v448_v43 = vld [vmem:[%s783_s0 + $0x3a] sm:$0x3] }
  0x14   :  { %111 = vst [vmem:[#allocation0 + $0x128] sm:$0x3] %v440_v21  ;;  %v351_v27 = vld [vmem:[#allocation0 + $0x41] ss:$8 sm:$0xf0]  }
  0x15   :  { %115 = vst [vmem:[#allocation0 + $0x120] sm:$0x3] %v441_v22  ;;  %v449_v44 = vld [vmem:[%s783_s0 + $0x38] sm:$0x3]  ;;  %v450_v45 = vld [vmem:[%s783_s0 + $0x36] sm:$0x3] }
  0x16   :  { %119 = vst [vmem:[#allocation0 + $0x118] sm:$0x3] %v442_v23  ;;  %v451_v46 = vld [vmem:[%s783_s0 + $0x34] sm:$0x3]  ;;  %v452_v47 = vld [vmem:[%s783_s0 + $0x32] sm:$0x3] }
  0x17   :  { %123 = vst [vmem:[#allocation0 + $0x110] sm:$0x3] %v443_v24  ;;  %v453_v48 = vld [vmem:[%s783_s0 + $0x30] sm:$0x3]  ;;  %v414_v50 = vld [vmem:[%s783_s0 + $0x7e] sm:$0x3] }
  0x18   :  { %v349_v30 = vld [vmem:[#allocation0 + $0x41] ss:$8 sm:$0xf]   ;;  %127 = vst [vmem:[#allocation0 + $0x108] sm:$0x3] %v444_v25 }
  0x19   :  { %v353_v31 = vsel %vm260_vm0, %v351_v27, %v349_v30  ;;  %131 = vst [vmem:[#allocation0 + $0x100] sm:$0x3] %v445_v26  ;;  %v415_v51 = vld [vmem:[%s783_s0 + $0x7c] sm:$0x3]  ;;  %v416_v54 = vld [vmem:[%s783_s0 + $0x7a] sm:$0x3] }
  0x1a   :  { %354 = vrot.lane.b32.xlu1 %v353_v31, %s492_s15  ;;  %71 = vst [vmem:[#allocation0 + $0x178] sm:$0x3] %v430_v28  ;;  %v417_v55 = vld [vmem:[%s783_s0 + $0x78] sm:$0x3]  ;;  %v418_v56 = vld [vmem:[%s783_s0 + $0x76] sm:$0x3] }
  0x1b   :  { %75 = vst [vmem:[#allocation0 + $0x170] sm:$0x3] %v431_v29  ;;  %v419_v57 = vld [vmem:[%s783_s0 + $0x74] sm:$0x3]  ;;  %v420_v58 = vld [vmem:[%s783_s0 + $0x72] sm:$0x3] }
  0x1c   :  { %79 = vst [vmem:[#allocation0 + $0x168] sm:$0x3] %v432_v32  ;;  %v340_v38 = vld [vmem:[#allocation0 + $0x101] ss:$8 sm:$0xf0]  }
  0x1d   :  { %83 = vst [vmem:[#allocation0 + $0x160] sm:$0x3] %v433_v33  ;;  %v421_v59 = vld [vmem:[%s783_s0 + $0x70] sm:$0x3]  ;;  %v454_v61 = vld [vmem:[%s783_s0 + $0x2e] sm:$0x3] }
  0x1e   :  { %87 = vst [vmem:[#allocation0 + $0x158] sm:$0x3] %v434_v34  ;;  %v455_v62 = vld [vmem:[%s783_s0 + $0x2c] sm:$0x3]  ;;  %v456_v1 = vld [vmem:[%s783_s0 + $0x2a] sm:$0x3] }
  0x1f   :  { %91 = vst [vmem:[#allocation0 + $0x150] sm:$0x3] %v435_v35  ;;  %v457_v2 = vld [vmem:[%s783_s0 + $0x28] sm:$0x3]  ;;  %v458_v3 = vld [vmem:[%s783_s0 + $0x26] sm:$0x3] }
  0x20   :  { %v338_v41 = vld [vmem:[#allocation0 + $0x101] ss:$8 sm:$0xf]   ;;  %95 = vst [vmem:[#allocation0 + $0x148] sm:$0x3] %v436_v36 }
  0x21   :  { %v342_v42 = vsel %vm260_vm0, %v340_v38, %v338_v41  ;;  %99 = vst [vmem:[#allocation0 + $0x140] sm:$0x3] %v437_v37  ;;  %v459_v4 = vld [vmem:[%s783_s0 + $0x24] sm:$0x3]  ;;  %v460_v5 = vld [vmem:[%s783_s0 + $0x22] sm:$0x3] }
  0x22   :  { %343 = vrot.lane.b32.xlu0 %v342_v42, %s492_s15  ;;  %135 = vst [vmem:[#allocation0 + $0xf8] sm:$0x3] %v446_v39  ;;  %v461_v6 = vld [vmem:[%s783_s0 + $0x20] sm:$0x3]  ;;  %v422_v8 = vld [vmem:[%s783_s0 + $0x6e] sm:$0x3] }
  0x23   :  { %139 = vst [vmem:[#allocation0 + $0xf0] sm:$0x3] %v447_v40  ;;  %v423_v9 = vld [vmem:[%s783_s0 + $0x6c] sm:$0x3]  ;;  %v424_v12 = vld [vmem:[%s783_s0 + $0x6a] sm:$0x3] }
  0x24   :  { %143 = vst [vmem:[#allocation0 + $0xe8] sm:$0x3] %v448_v43  ;;  %v362_v49 = vld [vmem:[#allocation0 + $0x141] ss:$8 sm:$0xf0]  }
  0x25   :  { %147 = vst [vmem:[#allocation0 + $0xe0] sm:$0x3] %v449_v44  ;;  %v425_v13 = vld [vmem:[%s783_s0 + $0x68] sm:$0x3]  ;;  %v426_v14 = vld [vmem:[%s783_s0 + $0x66] sm:$0x3] }
  0x26   :  { %151 = vst [vmem:[#allocation0 + $0xd8] sm:$0x3] %v450_v45  ;;  %v427_v15 = vld [vmem:[%s783_s0 + $0x64] sm:$0x3]  ;;  %v428_v16 = vld [vmem:[%s783_s0 + $0x62] sm:$0x3] }
  0x27   :  { %155 = vst [vmem:[#allocation0 + $0xd0] sm:$0x3] %v451_v46  ;;  %v429_v17 = vld [vmem:[%s783_s0 + $0x60] sm:$0x3] }
  0x28   :  { %v360_v52 = vld [vmem:[#allocation0 + $0x141] ss:$8 sm:$0xf]   ;;  %159 = vst [vmem:[#allocation0 + $0xc8] sm:$0x3] %v452_v47 }
  0x29   :  { %v364_v53 = vsel %vm260_vm0, %v362_v49, %v360_v52  ;;  %163 = vst [vmem:[#allocation0 + $0xc0] sm:$0x3] %v453_v48  ;;  %v258_v24 = vld [vmem:[#allocation0] ss:$8 sm:$0xf]  }
  0x2a   :  { %365 = vrot.lane.b32.xlu1 %v364_v53, %s492_s15  ;;  %7 = vst [vmem:[#allocation0 + $0x1f8] sm:$0x3] %v414_v50  ;;  %v259_v25 = vld [vmem:[#allocation0] ss:$8 sm:$0xf0]  }
  0x2b   :  { %11 = vst [vmem:[#allocation0 + $0x1f0] sm:$0x3] %v415_v51  ;;  %v261_v26 = vsel %vm260_vm0, %v259_v25, %v258_v24  ;;  %v265_v27 = vld [vmem:[#allocation0 + $0x40] ss:$8 sm:$0xf]  }
  0x2c   :  { %15 = vst [vmem:[#allocation0 + $0x1e8] sm:$0x3] %v416_v54  ;;  %v395_v60 = vld [vmem:[#allocation0 + $0xc1] ss:$8 sm:$0xf0]  }
  0x2d   :  { %19 = vst [vmem:[#allocation0 + $0x1e0] sm:$0x3] %v417_v55  ;;  %v267_v28 = vld [vmem:[#allocation0 + $0x40] ss:$8 sm:$0xf0]  }
  0x2e   :  { %23 = vst [vmem:[#allocation0 + $0x1d8] sm:$0x3] %v418_v56  ;;  %v269_v29 = vsel %vm260_vm0, %v267_v28, %v265_v27  ;;  %v292_v33 = vld [vmem:[#allocation0 + $0x100] ss:$8 sm:$0xf]  }
  0x2f   :  { %27 = vst [vmem:[#allocation0 + $0x1d0] sm:$0x3] %v419_v57  ;;  %v294_v34 = vld [vmem:[#allocation0 + $0x100] ss:$8 sm:$0xf0]  }
  0x30   :  { %v393_v63 = vld [vmem:[#allocation0 + $0xc1] ss:$8 sm:$0xf]   ;;  %31 = vst [vmem:[#allocation0 + $0x1c8] sm:$0x3] %v420_v58  ;;  %v296_v35 = vsel %vm260_vm0, %v294_v34, %v292_v33 }
  0x31   :  { %v397_v0 = vsel %vm260_vm0, %v395_v60, %v393_v63  ;;  %35 = vst [vmem:[#allocation0 + $0x1c0] sm:$0x3] %v421_v59  ;;  %v301_v36 = vld [vmem:[#allocation0 + $0x140] ss:$8 sm:$0xf]  }
  0x32   :  { %398 = vrot.lane.b32.xlu0 %v397_v0, %s492_s15  ;;  %167 = vst [vmem:[#allocation0 + $0xb8] sm:$0x3] %v454_v61  ;;  %v303_v37 = vld [vmem:[#allocation0 + $0x140] ss:$8 sm:$0xf0]  }
  0x33   :  { %171 = vst [vmem:[#allocation0 + $0xb0] sm:$0x3] %v455_v62  ;;  %v305_v38 = vsel %vm260_vm0, %v303_v37, %v301_v36  ;;  %v283_v39 = vld [vmem:[#allocation0 + $0xc0] ss:$8 sm:$0xf]  }
  0x34   :  { %175 = vst [vmem:[#allocation0 + $0xa8] sm:$0x3] %v456_v1  ;;  %v406_v7 = vld [vmem:[#allocation0 + $0x1c1] ss:$8 sm:$0xf0]  }
  0x35   :  { %179 = vst [vmem:[#allocation0 + $0xa0] sm:$0x3] %v457_v2  ;;  %v285_v40 = vld [vmem:[#allocation0 + $0xc0] ss:$8 sm:$0xf0]  }
  0x36   :  { %183 = vst [vmem:[#allocation0 + $0x98] sm:$0x3] %v458_v3  ;;  %v287_v41 = vsel %vm260_vm0, %v285_v40, %v283_v39  ;;  %v321_v47 = vld [vmem:[#allocation0 + $0x1c0] ss:$8 sm:$0xf0]  }
  0x37   :  { %187 = vst [vmem:[#allocation0 + $0x90] sm:$0x3] %v459_v4 }
  0x38   :  { %v404_v10 = vld [vmem:[#allocation0 + $0x1c1] ss:$8 sm:$0xf]   ;;  %191 = vst [vmem:[#allocation0 + $0x88] sm:$0x3] %v460_v5 }
  0x39   :  { %v408_v11 = vsel %vm260_vm0, %v406_v7, %v404_v10  ;;  %195 = vst [vmem:[#allocation0 + $0x80] sm:$0x3] %v461_v6  ;;  %v319_v46 = vld [vmem:[#allocation0 + $0x1c0] ss:$8 sm:$0xf]  }
  0x3a   :  { %409 = vrot.lane.b32.xlu1 %v408_v11, %s492_s15  ;;  %39 = vst [vmem:[#allocation0 + $0x1b8] sm:$0x3] %v422_v8  ;;  %v323_v48 = vsel %vm260_vm0, %v321_v47, %v319_v46 }
  0x3b   :  { %43 = vst [vmem:[#allocation0 + $0x1b0] sm:$0x3] %v423_v9 }
  0x3c   :  { %47 = vst [vmem:[#allocation0 + $0x1a8] sm:$0x3] %v424_v12  ;;  %v373_v18 = vld [vmem:[#allocation0 + $0x81] ss:$8 sm:$0xf0]  }
  0x3d   :  { %51 = vst [vmem:[#allocation0 + $0x1a0] sm:$0x3] %v425_v13  ;;  %v276_v31 = vld [vmem:[#allocation0 + $0x80] ss:$8 sm:$0xf0]  }
  0x3e   :  { %55 = vst [vmem:[#allocation0 + $0x198] sm:$0x3] %v426_v14 }
  0x3f   :  { %59 = vst [vmem:[#allocation0 + $0x190] sm:$0x3] %v427_v15 }
  0x40   :  { %v371_v19 = vld [vmem:[#allocation0 + $0x81] ss:$8 sm:$0xf]   ;;  %63 = vst [vmem:[#allocation0 + $0x188] sm:$0x3] %v428_v16 }
  0x41   :  { %v375_v20 = vsel %vm260_vm0, %v373_v18, %v371_v19  ;;  %67 = vst [vmem:[#allocation0 + $0x180] sm:$0x3] %v429_v17  ;;  %v274_v30 = vld [vmem:[#allocation0 + $0x80] ss:$8 sm:$0xf]  }
  0x42   :  { %376 = vrot.lane.b32.xlu2 %v375_v20, %s492_s15  ;;  %263 = vst.msk [vmem:[%s784_s1] sm:$0xff] %vm262_vm1, %v261_v26   ;;  %v278_v32 = vsel %vm260_vm0, %v276_v31, %v274_v30 }
  0x43   :  { %477 = vst.msk [vmem:[%s784_s1 + $0x8] sm:$0xff] %vm262_vm1, %v269_v29  }
  0x44   :  { %v384_v21 = vld [vmem:[#allocation0 + $0x181] ss:$8 sm:$0xf0]   ;;  %478 = vst.msk [vmem:[%s784_s1 + $0x10] sm:$0xff] %vm262_vm1, %v278_v32  }
  0x45   :  { %480 = vst.msk [vmem:[%s784_s1 + $0x20] sm:$0xff] %vm262_vm1, %v296_v35   ;;  %v312_v44 = vld [vmem:[#allocation0 + $0x180] ss:$8 sm:$0xf0]  }
  0x46   :  { %481 = vst.msk [vmem:[%s784_s1 + $0x28] sm:$0xff] %vm262_vm1, %v305_v38  }
  0x47   :  { %479 = vst.msk [vmem:[%s784_s1 + $0x18] sm:$0xff] %vm262_vm1, %v287_v41  }
  0x48   :  { %v382_v22 = vld [vmem:[#allocation0 + $0x181] ss:$8 sm:$0xf]   ;;  %v310_v43 = vld [vmem:[#allocation0 + $0x180] ss:$8 sm:$0xf]  }
  0x49   :  { %v386_v23 = vsel %vm260_vm0, %v384_v21, %v382_v22  ;;  %v314_v45 = vsel %vm260_vm0, %v312_v44, %v310_v43  ;;  %483 = vst.msk [vmem:[%s784_s1 + $0x38] sm:$0xff] %vm262_vm1, %v323_v48  }
  0x4a   :  { %387 = vrot.lane.b32.xlu2 %v386_v23, %s492_s15  ;;  %482 = vst.msk [vmem:[%s784_s1 + $0x30] sm:$0xff] %vm262_vm1, %v314_v45  }
  0x84   :  { %v334_v42 = vpop.permute.xlu0 %333  }
  0x85   :  { %336 = vst.msk [vmem:[%s784_s1] sm:$0xff] %vm335_vm2, %v334_v42  }
  0x8c   :  { %v355_v49 = vpop.permute.xlu1 %354  }
  0x8d   :  { %485 = vst.msk [vmem:[%s784_s1 + $0x8] sm:$0xff] %vm335_vm2, %v355_v49  }
  0x94   :  { %v344_v50 = vpop.permute.xlu0 %343  }
  0x95   :  { %484 = vst.msk [vmem:[%s784_s1 + $0x20] sm:$0xff] %vm335_vm2, %v344_v50  }
  0x9c   :  { %v377_v51 = vpop.permute.xlu2 %376   ;;  %v366_v52 = vpop.permute.xlu1 %365  }
  0x9d   :  { %487 = vst.msk [vmem:[%s784_s1 + $0x10] sm:$0xff] %vm335_vm2, %v377_v51  }
  0x9e   :  { %486 = vst.msk [vmem:[%s784_s1 + $0x28] sm:$0xff] %vm335_vm2, %v366_v52  }
  0xa4   :  { %v399_v53 = vpop.permute.xlu0 %398   ;;  %v388_v54 = vpop.permute.xlu2 %387  }
  0xa5   :  { %489 = vst.msk [vmem:[%s784_s1 + $0x18] sm:$0xff] %vm335_vm2, %v399_v53  }
  0xa6   :  { %488 = vst.msk [vmem:[%s784_s1 + $0x30] sm:$0xff] %vm335_vm2, %v388_v54  }
  0xac   :  { %v410_v55 = vpop.permute.xlu1 %409  }
  0xad   :  { %490 = vst.msk [vmem:[%s784_s1 + $0x38] sm:$0xff] %vm335_vm2, %v410_v55  }

// kernel: chessformer_forward.1
= control target key start
LH: loop header
LB: loop body
LE: loop exit
PB: predicated region body
PF: predicated region fallthrough
CT: control target
= control target key end

     0   :  { %s12677_s0 = inlined_call_operand.vmem [shape: bf16[16,64], index: 0, kind: input, shape index: {}]   ;;  %s12678_s1 = inlined_call_operand.vmem [shape: bf16[16,64], index: 1, kind: input, shape index: {}]   ;;  %s12679_s2 = inlined_call_operand.vmem [shape: f32[4,16,16], index: 2, kind: input, shape index: {}]   ;;  %s12680_s3 = inlined_call_operand.vmem [shape: f32[4,16,16], index: 3, kind: input, shape index: {}]   ;;  %s12681_s4 = inlined_call_operand.vmem [shape: f32[4,16,16], index: 4, kind: input, shape index: {}]   ;;  %s12682_s5 = inlined_call_operand.vmem [shape: s32[16,1], index: 5, kind: input, shape index: {}]   ;;  %s12683_s6 = inlined_call_operand.vmem [shape: f32[4,64], index: 6, kind: input, shape index: {}]   ;;  %s12684_s7 = inlined_call_operand.vmem [shape: bf16[24,64,16], index: 7, kind: input, shape index: {}]   ;;  %s12685_s8 = inlined_call_operand.vmem [shape: bf16[8,16,64], index: 8, kind: input, shape index: {}]   ;;  %s12686_s9 = inlined_call_operand.vmem [shape: bf16[128,128], index: 9, kind: input, shape index: {}]   ;;  %s12687_s10 = inlined_call_operand.vmem [shape: bf16[256,64], index: 10, kind: input, shape index: {}]   ;;  %s12688_s11 = inlined_call_operand.vmem [shape: f32[6,64], index: 11, kind: input, shape index: {}]   ;;  %s12689_s12 = inlined_call_operand.vmem [shape: bf16[24,64,16], index: 12, kind: input, shape index: {}]   ;;  %s12690_s13 = inlined_call_operand.vmem [shape: bf16[8,16,64], index: 13, kind: input, shape index: {}]   ;;  %s12691_s14 = inlined_call_operand.vmem [shape: bf16[24,64,16], index: 14, kind: input, shape index: {}]   ;;  %s12692_s15 = inlined_call_operand.vmem [shape: bf16[8,16,64], index: 15, kind: input, shape index: {}]   ;;  %s12693_s16 = inlined_call_operand.vmem [shape: bf16[128,128], index: 16, kind: input, shape index: {}]   ;;  %s12694_s17 = inlined_call_operand.vmem [shape: bf16[256,64], index: 17, kind: input, shape index: {}]   ;;  %s12695_s18 = inlined_call_operand.vmem [shape: f32[1,64], index: 18, kind: input, shape index: {}]   ;;  %s12696_s19 = inlined_call_operand.vmem [shape: f32[1,64], index: 19, kind: input, shape index: {}]   ;;  %s12697_s20 = inlined_call_operand.vmem [shape: bf16[128,64], index: 20, kind: input, shape index: {}]   ;;  %s12698_s21 = inlined_call_operand.vmem [shape: bf16[64,128], index: 21, kind: input, shape index: {}]   ;;  %s12699_s22 = inlined_call_operand.vmem [shape: f32[1,128], index: 22, kind: input, shape index: {}]   ;;  %s12700_s23 = inlined_call_operand.hbm [shape: f32[2,128], index: 23, kind: output, shape index: {0}]   ;;  %s12701_s24 = inlined_call_operand.vmem [shape: f32[1,128], index: 24, kind: output, shape index: {1}]  }
   0x1   :  { %12709 = sst [smem:[#allocation5_spill]] %s12677_s0 }
   0x2   :  { %12710 = sst [smem:[#allocation6_spill]] %s12678_s1 }
   0x3   :  { %12711 = sst [smem:[#allocation7_spill]] %s12679_s2 }
   0x4   :  { %12712 = sst [smem:[#allocation8_spill]] %s12680_s3 }
   0x5   :  { %12713 = sst [smem:[#allocation9_spill]] %s12681_s4 }
   0x6   :  { %12714 = sst [smem:[#allocation10_spill]] %s12682_s5 }
   0x7   :  { %12715 = sst [smem:[#allocation11_spill]] %s12683_s6 }
   0x8   :  { %12716 = sst [smem:[#allocation12_spill]] %s12684_s7 }
   0x9   :  { %12717 = sst [smem:[#allocation13_spill]] %s12685_s8 }
   0xa   :  { %s12718_s27 = sld [smem:[#allocation5_spill]]  ;;  %vm93_vm0 = vcmask 523264  }
  0x10   :  { %v10266_v0 = vld [vmem:[%s12718_s27] sm:$0xff]  }
  0x11   :  { %v10725_v1 = vunpack.c.l.bf16 %v10266_v0  ;;  %v10729_v3 = vunpack.c.h.bf16 %v10266_v0 }
  0x13   :  { %v91_v2 = vmul.f32 %v10725_v1, %v10725_v1 }
  0x15   :  { %v94_v4 = vsel %vm93_vm0, %v91_v2, 0.0 }
  0x16   :  { %30 = vsyncpa [#allocation3], 0  ;;  %95 = vadd.xlane.f32.xlu0 %v94_v4  ;;  %v92_v5 = vmul.f32 %v10729_v3, %v10729_v3  ;;  %v10593_v7 = vmov 64.0   ;;  %s12719_s2 = sld [smem:[#allocation12_spill]]  ;;  %vm734_vm8 = vcmask 130048  }
  0x17   :  { %10293 = vrcp.f32 %v10593_v7  ;;  %s12720_s1 = sld [smem:[#allocation11_spill]] }
  0x18   :  { %v97_v6 = vsel %vm93_vm0, %v92_v5, 0.0  ;;  %s12721_s30 = sld [smem:[#allocation7_spill]] }
  0x19   :  { %s12722_s5 = sld [smem:[#allocation13_spill]] }
  0x1a   :  { %s12728_s6 = sld [smem:[#allocation8_spill]] }
  0x1b   :  { %s12729_s25 = sld [smem:[#allocation9_spill]] }
  0x1c   :  { %v9896_v12 = vld [vmem:[%s12719_s2 + $0x18] sm:$0xff]  ;;  %v9895_v17 = vld [vmem:[%s12719_s2 + $0x10] sm:$0xff]  ;;  %v9894_v23 = vld [vmem:[%s12719_s2 + $0x8] sm:$0xff] }
  0x1d   :  { %v10294_v8 = vpop.eup %10293  ;;  %v9900_v13 = vld [vmem:[%s12719_s2 + $0x38] sm:$0xff]  ;;  %280 = vmatpush.bf16.msra.mxu2 %v9896_v12  ;;  %v9899_v18 = vld [vmem:[%s12719_s2 + $0x30] sm:$0xff]  ;;  %v9898_v24 = vld [vmem:[%s12719_s2 + $0x28] sm:$0xff] }
  0x1e   :  { %98 = vadd.xlane.f32.xlu0 %v97_v6  ;;  %v101_v9 = vmul.f32 64.0, %v10294_v8  ;;  %v9908_v14 = vld [vmem:[%s12719_s2 + $0x78] sm:$0xff]  ;;  %318 = vmatpush.bf16.msra.mxu1 %v9900_v13  ;;  %vm105_vm1 = vweird.f32 %v10294_v8  ;;  %v9907_v19 = vld [vmem:[%s12719_s2 + $0x70] sm:$0xff]  ;;  %v9906_v25 = vld [vmem:[%s12719_s2 + $0x68] sm:$0xff] }
  0x1f   :  { %v9912_v15 = vld [vmem:[%s12719_s2 + $0x98] sm:$0xff]  ;;  %394 = vmatpush.bf16.msra.mxu3 %v9908_v14  ;;  %v9911_v20 = vld [vmem:[%s12719_s2 + $0x90] sm:$0xff]  ;;  %v9910_v27 = vld [vmem:[%s12719_s2 + $0x88] sm:$0xff] }
  0x20   :  { %v102_v10 = vsub.f32 1.0, %v101_v9  ;;  %432 = vmatpush.bf16.msra.mxu0 %v9912_v15  ;;  %v9893_v29 = vld [vmem:[%s12719_s2] sm:$0xff]  ;;  %v9904_v35 = vld [vmem:[%s12719_s2 + $0x58] sm:$0xff]  ;;  %v9903_v41 = vld [vmem:[%s12719_s2 + $0x50] sm:$0xff] }
  0x21   :  { %281 = vmatpush.bf16.msra.mxu2 %v9895_v17  ;;  %v9897_v30 = vld [vmem:[%s12719_s2 + $0x20] sm:$0xff]  ;;  %v9916_v36 = vld [vmem:[%s12719_s2 + $0xb8] sm:$0xff]  ;;  %v9915_v42 = vld [vmem:[%s12719_s2 + $0xb0] sm:$0xff] }
  0x22   :  { %v103_v11 = vmul.f32 %v10294_v8, %v102_v10  ;;  %319 = vmatpush.bf16.msra.mxu1 %v9899_v18  ;;  %v9905_v31 = vld [vmem:[%s12719_s2 + $0x60] sm:$0xff]  ;;  %v9924_v37 = vld [vmem:[%s12719_s2 + $0xf8] sm:$0xff]  ;;  %v9923_v44 = vld [vmem:[%s12719_s2 + $0xf0] sm:$0xff] }
  0x23   :  { %395 = vmatpush.bf16.msra.mxu3 %v9907_v19  ;;  %v9909_v32 = vld [vmem:[%s12719_s2 + $0x80] sm:$0xff]  ;;  %v9928_v38 = vld [vmem:[%s12719_s2 + $0x118] sm:$0xff]  ;;  %v9927_v45 = vld [vmem:[%s12719_s2 + $0x110] sm:$0xff] }
  0x24   :  { %v104_v16 = vadd.f32 %v10294_v8, %v103_v11  ;;  %433 = vmatpush.bf16.msra.mxu0 %v9911_v20  ;;  %v9902_v47 = vld [vmem:[%s12719_s2 + $0x48] sm:$0xff]  ;;  %v9901_v54 = vld [vmem:[%s12719_s2 + $0x40] sm:$0xff]  ;;  %v9920_v14 = vld [vmem:[%s12719_s2 + $0xd8] sm:$0xff] }
  0x25   :  { %282 = vmatpush.bf16.msra.mxu2 %v9894_v23  ;;  %v9914_v48 = vld [vmem:[%s12719_s2 + $0xa8] sm:$0xff]  ;;  %v9913_v55 = vld [vmem:[%s12719_s2 + $0xa0] sm:$0xff]  ;;  %v9932_v15 = vld [vmem:[%s12719_s2 + $0x138] sm:$0xff] }
  0x26   :  { %v10759_v21 = vsel %vm105_vm1, %v10294_v8, %v104_v16  ;;  %320 = vmatpush.bf16.msra.mxu1 %v9898_v24  ;;  %v9922_v50 = vld [vmem:[%s12719_s2 + $0xe8] sm:$0xff]  ;;  %v9921_v58 = vld [vmem:[%s12719_s2 + $0xe0] sm:$0xff]  ;;  %v9940_v16 = vld [vmem:[%s12719_s2 + $0x178] sm:$0xff] }
  0x27   :  { %396 = vmatpush.bf16.msra.mxu3 %v9906_v25  ;;  %v9926_v51 = vld [vmem:[%s12719_s2 + $0x108] sm:$0xff]  ;;  %v9925_v59 = vld [vmem:[%s12719_s2 + $0x100] sm:$0xff]  ;;  %v9919_v17 = vld [vmem:[%s12719_s2 + $0xd0] sm:$0xff] }
  0x28   :  { %434 = vmatpush.bf16.msra.mxu0 %v9910_v27  ;;  %v10280_v63 = vld [vmem:[%s12720_s1] ss:$0 sm:$0xff]  ;;  %v9931_v18 = vld [vmem:[%s12719_s2 + $0x130] sm:$0xff]  ;;  %v9918_v20 = vld [vmem:[%s12719_s2 + $0xc8] sm:$0xff] }
  0x29   :  { %283 = vmatpush.bf16.msra.mxu2 %v9893_v29  ;;  %v9939_v19 = vld [vmem:[%s12719_s2 + $0x170] sm:$0xff]  ;;  %v9938_v23 = vld [vmem:[%s12719_s2 + $0x168] sm:$0xff]  ;;  %v9917_v24 = vld [vmem:[%s12719_s2 + $0xc0] sm:$0xff] }
  0x2a   :  { %321 = vmatpush.bf16.msra.mxu1 %v9897_v30  ;;  %v9929_v25 = vld [vmem:[%s12719_s2 + $0x120] sm:$0xff]  ;;  %v9936_v27 = vld [vmem:[%s12719_s2 + $0x158] sm:$0xff]  ;;  %v9934_v29 = vld [vmem:[%s12719_s2 + $0x148] sm:$0xff] }
  0x2b   :  { %397 = vmatpush.bf16.msra.mxu3 %v9905_v31  ;;  %v9933_v30 = vld [vmem:[%s12719_s2 + $0x140] sm:$0xff] }
  0x2c   :  { %435 = vmatpush.bf16.msra.mxu0 %v9909_v32 }
  0x2d   :  { %356 = vmatpush.bf16.msrb.mxu2 %v9904_v35 }
  0x2e   :  { %470 = vmatpush.bf16.msrb.mxu1 %v9916_v36 }
  0x2f   :  { %546 = vmatpush.bf16.msrb.mxu3 %v9924_v37 }
  0x30   :  { %584 = vmatpush.bf16.msrb.mxu0 %v9928_v38 }
  0x31   :  { %357 = vmatpush.bf16.msrb.mxu2 %v9903_v41 }
  0x32   :  { %471 = vmatpush.bf16.msrb.mxu1 %v9915_v42 }
  0x33   :  { %547 = vmatpush.bf16.msrb.mxu3 %v9923_v44 }
  0x34   :  { %585 = vmatpush.bf16.msrb.mxu0 %v9927_v45 }
  0x35   :  { %358 = vmatpush.bf16.msrb.mxu2 %v9902_v47 }
  0x36   :  { %472 = vmatpush.bf16.msrb.mxu1 %v9914_v48 }
  0x37   :  { %548 = vmatpush.bf16.msrb.mxu3 %v9922_v50 }
  0x38   :  { %586 = vmatpush.bf16.msrb.mxu0 %v9926_v51 }
  0x39   :  { %359 = vmatpush.bf16.msrb.mxu2 %v9901_v54 }
  0x3a   :  { %473 = vmatpush.bf16.msrb.mxu1 %v9913_v55 }
  0x3b   :  { %549 = vmatpush.bf16.msrb.mxu3 %v9921_v58 }
  0x3c   :  { %587 = vmatpush.bf16.msrb.mxu0 %v9925_v59 }
  0x89   :  { %v96_v22 = vpop.xlane.xlu0 %95 }
  0x8a   :  { %v107_v26 = vmul.f32 %v10759_v21, %v96_v22  ;;  %v9930_v22 = vld [vmem:[%s12719_s2 + $0x128] sm:$0xff] }
  0x8c   :  { %v109_v28 = vadd.f32 1e-06, %v107_v26  ;;  %v9937_v26 = vld [vmem:[%s12719_s2 + $0x160] sm:$0xff] }
  0x8e   :  { %10295 = vrsqrt.f32 %v109_v28  ;;  %vm117_vm3 = vweird.f32 %v109_v28 }
  0x91   :  { %v99_v33 = vpop.xlane.xlu0 %98 }
  0x92   :  { %v108_v34 = vmul.f32 %v10759_v21, %v99_v33 }
  0x94   :  { %v10296_v39 = vpop.eup %10295  ;;  %v110_v40 = vadd.f32 1e-06, %v108_v34 }
  0x95   :  { %v112_v43 = vmul.f32 %v10296_v39, %v109_v28  ;;  %vm118_vm2 = vweird.f32 %v10296_v39  ;;  %v9935_v28 = vld [vmem:[%s12719_s2 + $0x150] sm:$0xff] }
  0x96   :  { %10297 = vrsqrt.f32 %v110_v40  ;;  %vm119_vm4 = vmor %vm117_vm3, %vm118_vm2  ;;  %vm127_vm6 = vweird.f32 %v110_v40 }
  0x97   :  { %v113_v46 = vmul.f32 %v10296_v39, %v112_v43 }
  0x99   :  { %v114_v49 = vmul.f32 0.5, %v113_v46 }
  0x9b   :  { %v115_v52 = vsub.f32 1.5, %v114_v49 }
  0x9c   :  { %v10298_v53 = vpop.eup %10297 }
  0x9d   :  { %v116_v56 = vmul.f32 %v10296_v39, %v115_v52  ;;  %v122_v57 = vmul.f32 %v10298_v53, %v110_v40  ;;  %vm128_vm5 = vweird.f32 %v10298_v53 }
  0x9e   :  { %vm129_vm7 = vmor %vm127_vm6, %vm128_vm5 }
  0x9f   :  { %v120_v60 = vsel %vm119_vm4, %v10296_v39, %v116_v56  ;;  %v123_v61 = vmul.f32 %v10298_v53, %v122_v57 }
  0xa0   :  { %v131_v0 = vmul.f32 %v10725_v1, %v120_v60 }
  0xa1   :  { %v124_v62 = vmul.f32 0.5, %v123_v61 }
  0xa2   :  { %v134_v5 = vmul.f32 %v10280_v63, %v131_v0 }
  0xa3   :  { %v125_v2 = vsub.f32 1.5, %v124_v62 }
  0xa4   :  { %v136_v8 = vpack.c.bf16 %v134_v5, %v134_v5 }
  0xa5   :  { %v126_v4 = vmul.f32 %v10298_v53, %v125_v2 }
  0xa6   :  { %v246_v11 = vunpack.c.l.b16 %v136_v8 }
  0xa7   :  { %v130_v6 = vsel %vm129_vm7, %v10298_v53, %v126_v4 }
  0xa8   :  { %v132_v7 = vmul.f32 %v10729_v3, %v130_v6 }
  0xaa   :  { %v135_v9 = vmul.f32 %v10280_v63, %v132_v7 }
  0xac   :  { %v137_v10 = vpack.c.bf16 %v135_v9, %v135_v9 }
  0xae   :  { %v247_v12 = vunpack.c.l.b16 %v137_v10 }
  0xb0   :  { %v248_v13 = vpack.c.b16 %v247_v12, %v246_v11 }
  0xb2   :  { %7829 = vmatmul.msk.bf16.vlgmr.msra.gmra.mxu2 %vm93_vm0, %v248_v13  ;;  %7846 = vmatmul.msk.bf16.vlgmr.msra.gmra.mxu1 %vm93_vm0, %v248_v13 }
  0xb3   :  { %7880 = vmatmul.msk.bf16.vlgmr.msra.gmra.mxu3 %vm93_vm0, %v248_v13  ;;  %7897 = vmatmul.msk.bf16.vlgmr.msra.gmra.mxu0 %vm93_vm0, %v248_v13 }
  0xb4   :  { %508 = vmatpush.bf16.msra.mxu2 %v9920_v14  ;;  %622 = vmatpush.bf16.msra.mxu1 %v9932_v15 }
  0xb5   :  { %698 = vmatpush.bf16.msra.mxu3 %v9940_v16 }
  0xb8   :  { %509 = vmatpush.bf16.msra.mxu2 %v9919_v17  ;;  %623 = vmatpush.bf16.msra.mxu1 %v9931_v18 }
  0xb9   :  { %699 = vmatpush.bf16.msra.mxu3 %v9939_v19 }
  0xbc   :  { %510 = vmatpush.bf16.msra.mxu2 %v9918_v20  ;;  %624 = vmatpush.bf16.msra.mxu1 %v9930_v22 }
  0xbd   :  { %700 = vmatpush.bf16.msra.mxu3 %v9938_v23 }
  0xc0   :  { %511 = vmatpush.bf16.msra.mxu2 %v9917_v24  ;;  %625 = vmatpush.bf16.msra.mxu1 %v9929_v25 }
  0xc1   :  { %701 = vmatpush.bf16.msra.mxu3 %v9937_v26 }
  0xc2   :  { %7863 = vmatmul.msk.bf16.vlgmr.msrb.gmra.mxu2 %vm93_vm0, %v248_v13  ;;  %7914 = vmatmul.msk.bf16.vlgmr.msrb.gmra.mxu1 %vm93_vm0, %v248_v13 }
  0xc3   :  { %7948 = vmatmul.msk.bf16.vlgmr.msrb.gmra.mxu3 %vm93_vm0, %v248_v13  ;;  %7965 = vmatmul.msk.bf16.vlgmr.msrb.gmra.mxu0 %vm93_vm0, %v248_v13 }
  0xc4   :  { %660 = vmatpush.bf16.msrb.mxu2 %v9936_v27 }
  0xc8   :  { %661 = vmatpush.bf16.msrb.mxu2 %v9935_v28 }
  0xcc   :  { %662 = vmatpush.bf16.msrb.mxu2 %v9934_v29 }
  0xd0   :  { %663 = vmatpush.bf16.msrb.mxu2 %v9933_v30 }
  0xd2   :  { %7931 = vmatmul.msk.bf16.vlgmr.msra.gmra.mxu2 %vm93_vm0, %v248_v13  ;;  %7982 = vmatmul.msk.bf16.vlgmr.msra.gmra.mxu1 %vm93_vm0, %v248_v13 }
  0xd3   :  { %8016 = vmatmul.msk.bf16.vlgmr.msra.gmra.mxu3 %vm93_vm0, %v248_v13 }
  0xe2   :  { %7999 = vmatmul.msk.bf16.vlgmr.msrb.gmra.mxu2 %vm93_vm0, %v248_v13 }
 0x12f   :  { %v323_v31 = vpop.f32.mrf.mxu1 }
 0x130   :  { %v437_v32 = vpop.f32.mrf.mxu0  ;;  %v710_v7 = vpack.c.bf16 %v323_v31, %v323_v31 }
 0x131   :  { %v716_v35 = vpack.c.bf16 %v437_v32, %v437_v32 }
 0x132   :  { %v757_v15 = vunpack.c.l.b16 %v710_v7 }
 0x133   :  { %v731_v39 = vunpack.c.l.b16 %v716_v35 }
 0x135   :  { %v285_v33 = vpop.f32.mrf.mxu2 }
 0x136   :  { %v399_v34 = vpop.f32.mrf.mxu3  ;;  %v708_v45 = vpack.c.bf16 %v285_v33, %v285_v33 }
 0x137   :  { %v325_v36 = vpop.f32.mrf.mxu1  ;;  %v714_v19 = vpack.c.bf16 %v399_v34, %v399_v34 }
 0x138   :  { %v439_v37 = vpop.f32.mrf.mxu0  ;;  %v726_v50 = vunpack.c.l.b16 %v708_v45  ;;  %v711_v0 = vpack.c.bf16 %v325_v36, %v325_v36 }
 0x139   :  { %v717_v38 = vpack.c.bf16 %v439_v37, %v439_v37  ;;  %v817_v28 = vunpack.c.l.b16 %v714_v19 }
 0x13a   :  { %v758_v12 = vunpack.c.l.b16 %v711_v0 }
 0x13b   :  { %v732_v40 = vunpack.c.l.b16 %v717_v38 }
 0x13c   :  { %v759_v18 = vpack.c.b16 %v758_v12, %v757_v15 }
 0x13d   :  { %v733_v41 = vpack.c.b16 %v732_v40, %v731_v39  ;;  %v287_v42 = vpop.f32.mrf.mxu2 }
 0x13e   :  { %v709_v43 = vpack.c.bf16 %v287_v42, %v287_v42  ;;  %v401_v44 = vpop.f32.mrf.mxu3 }
 0x13f   :  { %v475_v46 = vpop.f32.mrf.mxu1  ;;  %v739_v47 = vsel %vm734_vm8, %v733_v41, 0  ;;  %v715_v16 = vpack.c.bf16 %v401_v44, %v401_v44 }
 0x140   :  { %v589_v48 = vpop.f32.mrf.mxu0  ;;  %748 = vmatpush.bf16.xpose.msra.mxu0 %v739_v47  ;;  %v727_v49 = vunpack.c.l.b16 %v709_v43  ;;  %v718_v53 = vpack.c.bf16 %v475_v46, %v475_v46 }
 0x141   :  { %v941_v55 = vpack.c.bf16 %v589_v48, %v589_v48  ;;  %v818_v25 = vunpack.c.l.b16 %v715_v16 }
 0x142   :  { %v728_v51 = vpack.c.b16 %v727_v49, %v726_v50  ;;  %v762_v60 = vunpack.c.l.b16 %v718_v53 }
 0x143   :  { %v956_v62 = vunpack.c.l.b16 %v941_v55  ;;  %v819_v31 = vpack.c.b16 %v818_v25, %v817_v28  ;;  %v83_v25 = vld [vmem:[%s12721_s30 + $0x8] sm:$0xff] }
 0x145   :  { %v10901_v52 = vpop.f32.mrf.mxu2 }
 0x146   :  { %v551_v54 = vpop.f32.mrf.mxu3  ;;  %v712_v46 = vpack.c.bf16 %v10901_v52, %v10901_v52  ;;  %v82_v52 = vld [vmem:[%s12721_s30] sm:$0xff] }
 0x147   :  { %8017 = vmatmul.msk.bf16.vlgmr.msra.gmra.mxu0 %vm734_vm8, %v728_v51  ;;  %v477_v56 = vpop.f32.mrf.mxu1  ;;  %v722_v4 = vpack.c.bf16 %v551_v54, %v551_v54 }
 0x148   :  { %v719_v57 = vpack.c.bf16 %v477_v56, %v477_v56  ;;  %v591_v58 = vpop.f32.mrf.mxu0  ;;  %v787_v50 = vunpack.c.l.b16 %v712_v46 }
 0x149   :  { %v942_v59 = vpack.c.bf16 %v591_v58, %v591_v58  ;;  %v822_v13 = vunpack.c.l.b16 %v722_v4  ;;  %v88_v4 = vld [vmem:[%s12721_s30 + $0x30] sm:$0xff] }
 0x14a   :  { %v763_v61 = vunpack.c.l.b16 %v719_v57 }
 0x14b   :  { %v957_v63 = vunpack.c.l.b16 %v942_v59 }
 0x14c   :  { %v764_v2 = vpack.c.b16 %v763_v61, %v762_v60 }
 0x14d   :  { %v958_v5 = vpack.c.b16 %v957_v63, %v956_v62  ;;  %v363_v6 = vpop.f32.mrf.mxu2  ;;  %v85_v63 = vld [vmem:[%s12721_s30 + $0x18] sm:$0xff] }
 0x14e   :  { %v553_v8 = vpop.f32.mrf.mxu3  ;;  %v769_v9 = vsel %vm734_vm8, %v764_v2, 0  ;;  %v713_v43 = vpack.c.bf16 %v363_v6, %v363_v6 }
 0x14f   :  { %v723_v10 = vpack.c.bf16 %v553_v8, %v553_v8  ;;  %970 = vmatpush.bf16.msrb.mxu0 %v958_v5  ;;  %v627_v11 = vpop.f32.mrf.mxu1  ;;  %778 = vmatpush.bf16.xpose.msrb.mxu1 %v769_v9  ;;  %v89_v9 = vld [vmem:[%s12721_s30 + $0x38] sm:$0xff] }
 0x150   :  { %v943_v23 = vpack.c.bf16 %v627_v11, %v627_v11  ;;  %v788_v49 = vunpack.c.l.b16 %v713_v43 }
 0x151   :  { %v823_v14 = vunpack.c.l.b16 %v723_v10 }
 0x152   :  { %v984_v29 = vunpack.c.l.b16 %v943_v23  ;;  %v789_v51 = vpack.c.b16 %v788_v49, %v787_v50 }
 0x153   :  { %v824_v17 = vpack.c.b16 %v823_v14, %v822_v13  ;;  %v84_v13 = vld [vmem:[%s12721_s30 + $0x10] sm:$0xff]  ;;  %v86_v14 = vld [vmem:[%s12721_s30 + $0x20] sm:$0xff] }
 0x155   :  { %v513_v20 = vpop.f32.mrf.mxu2  ;;  %v829_v22 = vsel %vm734_vm8, %v824_v17, 0 }
 0x156   :  { %v703_v24 = vpop.f32.mrf.mxu3  ;;  %838 = vmatpush.bf16.xpose.msrb.mxu3 %v829_v22  ;;  %8018 = vmatmul.msk.bf16.vlgmr.msrb.gmra.mxu1 %vm734_vm8, %v759_v18  ;;  %v720_v32 = vpack.c.bf16 %v513_v20, %v513_v20  ;;  %v87_v20 = vld [vmem:[%s12721_s30 + $0x28] sm:$0xff] }
 0x157   :  { %v629_v26 = vpop.f32.mrf.mxu1  ;;  %v947_v35 = vpack.c.bf16 %v703_v24, %v703_v24 }
 0x158   :  { %v944_v27 = vpack.c.bf16 %v629_v26, %v629_v26  ;;  %v792_v39 = vunpack.c.l.b16 %v720_v32 }
 0x159   :  { %v1040_v41 = vunpack.c.l.b16 %v947_v35 }
 0x15a   :  { %v985_v30 = vunpack.c.l.b16 %v944_v27 }
 0x15c   :  { %v986_v33 = vpack.c.b16 %v985_v30, %v984_v29 }
 0x15d   :  { %8020 = vmatmul.msk.bf16.vlgmr.msrb.gmra.mxu3 %vm734_vm8, %v819_v31  ;;  %v515_v34 = vpop.f32.mrf.mxu2 }
 0x15e   :  { %v721_v36 = vpack.c.bf16 %v515_v34, %v515_v34  ;;  %v705_v37 = vpop.f32.mrf.mxu3  ;;  %998 = vmatpush.bf16.msra.mxu1 %v986_v33 }
 0x15f   :  { %v948_v38 = vpack.c.bf16 %v705_v37, %v705_v37 }
 0x160   :  { %v793_v40 = vunpack.c.l.b16 %v721_v36 }
 0x161   :  { %v1041_v42 = vunpack.c.l.b16 %v948_v38 }
 0x162   :  { %v794_v44 = vpack.c.b16 %v793_v40, %v792_v39 }
 0x163   :  { %v1042_v45 = vpack.c.b16 %v1041_v42, %v1040_v41 }
 0x164   :  { %v799_v47 = vsel %vm734_vm8, %v794_v44, 0 }
 0x165   :  { %1054 = vmatpush.bf16.msra.mxu3 %v1042_v45  ;;  %v665_v48 = vpop.f32.mrf.mxu2  ;;  %808 = vmatpush.bf16.xpose.msra.mxu2 %v799_v47 }
 0x166   :  { %v945_v53 = vpack.c.bf16 %v665_v48, %v665_v48 }
 0x168   :  { %v1012_v56 = vunpack.c.l.b16 %v945_v53 }
 0x16c   :  { %8019 = vmatmul.msk.bf16.vlgmr.msra.gmra.mxu2 %vm734_vm8, %v789_v51 }
 0x16d   :  { %v667_v54 = vpop.f32.mrf.mxu2 }
 0x16e   :  { %v946_v55 = vpack.c.bf16 %v667_v54, %v667_v54 }
 0x170   :  { %v1013_v57 = vunpack.c.l.b16 %v946_v55 }
 0x172   :  { %v1014_v58 = vpack.c.b16 %v1013_v57, %v1012_v56 }
 0x174   :  { %1026 = vmatpush.bf16.msrb.mxu2 %v1014_v58 }
 0x1c4   :  { %v750_v59 = vpop.f32.mrf.mxu0 }
 0x1c5   :  { %v10915_v60 = vadd.f32 %v750_v59, %v82_v52 }
 0x1c7   :  { %v845_v61 = vsel %vm734_vm8, %v10915_v60, -inf }
 0x1c8   :  { %846 = vmax.xlane.f32.xlu0 %v845_v61 }
 0x1cc   :  { %v752_v26 = vpop.f32.mrf.mxu0 }
 0x1cd   :  { %v753_v27 = vadd.f32 %v752_v26, %v83_v25 }
 0x1cf   :  { %v848_v28 = vsel %vm734_vm8, %v753_v27, -inf }
 0x1d3   :  { %v780_v62 = vpop.f32.mrf.mxu1 }
 0x1d4   :  { %v781_v15 = vadd.f32 %v780_v62, %v84_v13 }
 0x1d6   :  { %v851_v19 = vsel %vm734_vm8, %v781_v15, -inf }
 0x1db   :  { %v782_v0 = vpop.f32.mrf.mxu1 }
 0x1dc   :  { %v10922_v2 = vadd.f32 %v782_v0, %v85_v63 }
 0x1de   :  { %v854_v5 = vsel %vm734_vm8, %v10922_v2, -inf }
 0x1df   :  { %855 = vmax.xlane.f32.xlu0 %v854_v5 }
 0x1e0   :  { %v840_v6 = vpop.f32.mrf.mxu3 }
 0x1e1   :  { %v841_v7 = vadd.f32 %v840_v6, %v88_v4 }
 0x1e3   :  { %v863_v8 = vsel %vm734_vm8, %v841_v7, -inf }
 0x1e4   :  { %864 = vmax.xlane.f32.xlu2 %v863_v8 }
 0x1e8   :  { %v842_v10 = vpop.f32.mrf.mxu3 }
 0x1e9   :  { %v843_v11 = vadd.f32 %v842_v10, %v89_v9 }
 0x1eb   :  { %v866_v12 = vsel %vm734_vm8, %v843_v11, -inf }
 0x1ec   :  { %867 = vmax.xlane.f32.xlu2 %v866_v12 }
 0x1ef   :  { %v810_v16 = vpop.f32.mrf.mxu2 }
 0x1f0   :  { %v811_v17 = vadd.f32 %v810_v16, %v86_v14 }
 0x1f2   :  { %v857_v18 = vsel %vm734_vm8, %v811_v17, -inf }
 0x1f3   :  { %858 = vmax.xlane.f32.xlu1 %v857_v18 }
 0x1f4   :  { %852 = vmax.xlane.f32.xlu2 %v851_v19 }
 0x1f7   :  { %v812_v22 = vpop.f32.mrf.mxu2 }
 0x1f8   :  { %v813_v23 = vadd.f32 %v812_v22, %v87_v20 }
 0x1fa   :  { %v860_v24 = vsel %vm734_vm8, %v813_v23, -inf }
 0x1fb   :  { %861 = vmax.xlane.f32.xlu1 %v860_v24 }
 0x203   :  { %849 = vmax.xlane.f32.xlu1 %v848_v28 }
 0x23b   :  { %v847_v39 = vpop.xlane.xlu0 %846 }
 0x23c   :  { %v869_v44 = vsub.f32 %v10915_v60, %v847_v39 }
 0x23e   :  { %v877_v49 = vmul.f32 1.442695, %v869_v44 }
 0x252   :  { %v856_v51 = vpop.xlane.xlu0 %855 }
 0x253   :  { %v872_v57 = vsub.f32 %v10922_v2, %v856_v51 }
 0x255   :  { %v883_v60 = vmul.f32 1.442695, %v872_v57 }
 0x257   :  { %v865_v29 = vpop.xlane.xlu2 %864 }
 0x258   :  { %v875_v30 = vsub.f32 %v841_v7, %v865_v29 }
 0x25a   :  { %v889_v31 = vmul.f32 1.442695, %v875_v30 }
 0x25c   :  { %10299 = vpow2.f32 %v889_v31 }
 0x25f   :  { %v868_v35 = vpop.xlane.xlu2 %867 }
 0x260   :  { %v876_v37 = vsub.f32 %v843_v11, %v868_v35 }
 0x262   :  { %v10950_v32 = vpop.eup %10299  ;;  %v891_v40 = vmul.f32 1.442695, %v876_v37 }
 0x263   :  { %v911_v33 = vsel %vm734_vm8, %v10950_v32, 0.0 }
 0x264   :  { %912 = vadd.xlane.f32.xlu0 %v911_v33 }
 0x266   :  { %v859_v34 = vpop.xlane.xlu1 %858 }
 0x267   :  { %v873_v36 = vsub.f32 %v811_v17, %v859_v34  ;;  %v853_v41 = vpop.xlane.xlu2 %852 }
 0x268   :  { %v871_v46 = vsub.f32 %v781_v15, %v853_v41 }
 0x269   :  { %v885_v38 = vmul.f32 1.442695, %v873_v36 }
 0x26a   :  { %v881_v50 = vmul.f32 1.442695, %v871_v46 }
 0x26b   :  { %10301 = vpow2.f32 %v885_v38 }
 0x26c   :  { %10303 = vpow2.f32 %v891_v40 }
 0x26e   :  { %v862_v42 = vpop.xlane.xlu1 %861 }
 0x26f   :  { %v874_v43 = vsub.f32 %v813_v23, %v862_v42 }
 0x271   :  { %v10302_v45 = vpop.eup %10301  ;;  %v887_v47 = vmul.f32 1.442695, %v874_v43 }
 0x272   :  { %v905_v48 = vsel %vm734_vm8, %v10302_v45, 0.0  ;;  %v10304_v54 = vpop.eup %10303 }
 0x273   :  { %10305 = vpow2.f32 %v887_v47  ;;  %906 = vadd.xlane.f32.xlu1 %v905_v48  ;;  %v914_v52 = vsel %vm734_vm8, %v10304_v54, 0.0 }
 0x274   :  { %10307 = vpow2.f32 %v877_v49 }
 0x275   :  { %10309 = vpow2.f32 %v881_v50 }
 0x276   :  { %v850_v53 = vpop.xlane.xlu1 %849 }
 0x277   :  { %v870_v55 = vsub.f32 %v753_v27, %v850_v53  ;;  %v9943_v53 = vld [vmem:[%s12722_s5 + $0x10] sm:$0xff] }
 0x278   :  { %1146 = vmatpush.bf16.msra.mxu2 %v9943_v53 }
 0x279   :  { %v10306_v56 = vpop.eup %10305  ;;  %v879_v58 = vmul.f32 1.442695, %v870_v55  ;;  %v9941_v55 = vld [vmem:[%s12722_s5] sm:$0xff] }
 0x27a   :  { %v908_v59 = vsel %vm734_vm8, %v10306_v56, 0.0  ;;  %v10308_v61 = vpop.eup %10307  ;;  %1090 = vmatpush.bf16.msra.mxu0 %v9941_v55  ;;  %v9945_v55 = vld [vmem:[%s12686_s9] sm:$0xff] }
 0x27b   :  { %10311 = vpow2.f32 %v879_v58  ;;  %915 = vadd.xlane.f32.xlu1 %v914_v52  ;;  %909 = vadd.xlane.f32.xlu2 %v908_v59  ;;  %v10310_v62 = vpop.eup %10309  ;;  %v893_v4 = vsel %vm734_vm8, %v10308_v61, 0.0 }
 0x27c   :  { %10313 = vpow2.f32 %v883_v60  ;;  %v899_v0 = vsel %vm734_vm8, %v10310_v62, 0.0 }
 0x281   :  { %v10312_v63 = vpop.eup %10311 }
 0x282   :  { %v896_v2 = vsel %vm734_vm8, %v10312_v63, 0.0  ;;  %v10314_v5 = vpop.eup %10313 }
 0x283   :  { %900 = vadd.xlane.f32.xlu1 %v899_v0  ;;  %894 = vadd.xlane.f32.xlu2 %v893_v4  ;;  %v902_v6 = vsel %vm734_vm8, %v10314_v5, 0.0 }
 0x284   :  { %897 = vadd.xlane.f32.xlu0 %v896_v2 }
 0x28b   :  { %903 = vadd.xlane.f32.xlu2 %v902_v6 }
 0x2d7   :  { %v913_v8 = vpop.xlane.xlu0 %912 }
 0x2e6   :  { %v907_v7 = vpop.xlane.xlu1 %906 }
 0x2e7   :  { %10315 = vrcp.f32 %v907_v7 }
 0x2e8   :  { %10317 = vrcp.f32 %v913_v8 }
 0x2ed   :  { %v10316_v11 = vpop.eup %10315 }
 0x2ee   :  { %v910_v9 = vpop.xlane.xlu2 %909  ;;  %v916_v10 = vpop.xlane.xlu1 %915  ;;  %v929_v13 = vmul.f32 %v10316_v11, %v10302_v45 }
 0x2ef   :  { %10319 = vrcp.f32 %v910_v9  ;;  %v10318_v12 = vpop.eup %10317 }
 0x2f0   :  { %10321 = vrcp.f32 %v916_v10  ;;  %v931_v14 = vmul.f32 %v10318_v12, %v10950_v32  ;;  %v937_v17 = vpack.c.bf16 %v929_v13, %v929_v13 }
 0x2f2   :  { %v939_v22 = vpack.c.bf16 %v931_v14, %v931_v14  ;;  %v1007_v27 = vunpack.c.l.b16 %v937_v17 }
 0x2f4   :  { %v1035_v29 = vunpack.c.l.b16 %v939_v22 }
 0x2f5   :  { %v10320_v15 = vpop.eup %10319 }
 0x2f6   :  { %v10322_v16 = vpop.eup %10321  ;;  %v930_v18 = vmul.f32 %v10320_v15, %v10306_v56  ;;  %v895_v19 = vpop.xlane.xlu2 %894  ;;  %v9942_v56 = vld [vmem:[%s12722_s5 + $0x8] sm:$0xff] }
 0x2f7   :  { %v901_v20 = vpop.xlane.xlu1 %900  ;;  %v932_v23 = vmul.f32 %v10322_v16, %v10304_v54  ;;  %10323 = vrcp.f32 %v895_v19  ;;  %v898_v24 = vpop.xlane.xlu0 %897  ;;  %v9944_v54 = vld [vmem:[%s12722_s5 + $0x18] sm:$0xff]  ;;  %1118 = vmatpush.bf16.msrb.mxu1 %v9942_v56 }
 0x2f8   :  { %v938_v25 = vpack.c.bf16 %v930_v18, %v930_v18  ;;  %10325 = vrcp.f32 %v898_v24  ;;  %1174 = vmatpush.bf16.msrb.mxu3 %v9944_v54 }
 0x2f9   :  { %v940_v26 = vpack.c.bf16 %v932_v23, %v932_v23  ;;  %10327 = vrcp.f32 %v901_v20 }
 0x2fa   :  { %v1008_v28 = vunpack.c.l.b16 %v938_v25 }
 0x2fb   :  { %v1036_v30 = vunpack.c.l.b16 %v940_v26 }
 0x2fc   :  { %v1009_v31 = vpack.c.b16 %v1008_v28, %v1007_v27 }
 0x2fd   :  { %v10324_v32 = vpop.eup %10323  ;;  %v1037_v33 = vpack.c.b16 %v1036_v30, %v1035_v29 }
 0x2fe   :  { %v10326_v35 = vpop.eup %10325  ;;  %v925_v34 = vmul.f32 %v10324_v32, %v10308_v61  ;;  %v904_v36 = vpop.xlane.xlu2 %903  ;;  %8023 = vmatmul.msk.bf16.vlgmr.msrb.gmra.mxu2 %vm734_vm8, %v1009_v31 }
 0x2ff   :  { %v10328_v37 = vpop.eup %10327  ;;  %v926_v38 = vmul.f32 %v10326_v35, %v10312_v63  ;;  %10329 = vrcp.f32 %v904_v36  ;;  %8024 = vmatmul.msk.bf16.vlgmr.msra.gmra.mxu3 %vm734_vm8, %v1037_v33 }
 0x300   :  { %v933_v39 = vpack.c.bf16 %v925_v34, %v925_v34  ;;  %v927_v42 = vmul.f32 %v10328_v37, %v10310_v62 }
 0x301   :  { %v934_v40 = vpack.c.bf16 %v926_v38, %v926_v38 }
 0x302   :  { %v951_v41 = vunpack.c.l.b16 %v933_v39  ;;  %v935_v46 = vpack.c.bf16 %v927_v42, %v927_v42 }
 0x303   :  { %v952_v43 = vunpack.c.l.b16 %v934_v40 }
 0x304   :  { %v979_v49 = vunpack.c.l.b16 %v935_v46 }
 0x305   :  { %v10330_v44 = vpop.eup %10329  ;;  %v953_v45 = vpack.c.b16 %v952_v43, %v951_v41 }
 0x306   :  { %v928_v47 = vmul.f32 %v10330_v44, %v10314_v5 }
 0x307   :  { %8021 = vmatmul.msk.bf16.vlgmr.msrb.gmra.mxu0 %vm734_vm8, %v953_v45 }
 0x308   :  { %v936_v48 = vpack.c.bf16 %v928_v47, %v928_v47 }
 0x30a   :  { %v980_v50 = vunpack.c.l.b16 %v936_v48 }
 0x30c   :  { %v981_v51 = vpack.c.b16 %v980_v50, %v979_v49  ;;  %v9948_v50 = vld [vmem:[%s12686_s9 + $0x18] sm:$0xff] }
 0x30d   :  { %1291 = vmatpush.bf16.msrb.mxu0 %v9948_v50  ;;  %v9966_v50 = vld [vmem:[%s12719_s2 + $0x1c8] sm:$0xff] }
 0x30e   :  { %8022 = vmatmul.msk.bf16.vlgmr.msra.gmra.mxu1 %vm734_vm8, %v981_v51  ;;  %v9947_v51 = vld [vmem:[%s12686_s9 + $0x10] sm:$0xff] }
 0x311   :  { %1292 = vmatpush.bf16.msrb.mxu0 %v9947_v51 }
 0x381   :  { %v1028_v57 = vpop.f32.mrf.mxu2 }
 0x382   :  { %v1056_v58 = vpop.f32.mrf.mxu3  ;;  %v1065_v59 = vpack.c.bf16 %v1028_v57, %v1028_v57  ;;  %v9956_v57 = vld [vmem:[%s12687_s10 + $0x38] sm:$0xff] }
 0x383   :  { %v1067_v60 = vpack.c.bf16 %v1056_v58, %v1056_v58  ;;  %1352 = vmatpush.bf16.msra.mxu1 %v9956_v57  ;;  %v9955_v58 = vld [vmem:[%s12687_s10 + $0x30] sm:$0xff] }
 0x384   :  { %v972_v52 = vpop.f32.mrf.mxu0  ;;  %v1127_v5 = vunpack.c.l.b16 %v1065_v59 }
 0x385   :  { %v1061_v0 = vpack.c.bf16 %v972_v52, %v972_v52  ;;  %v1155_v8 = vunpack.c.l.b16 %v1067_v60 }
 0x387   :  { %v1071_v12 = vunpack.c.l.b16 %v1061_v0  ;;  %1353 = vmatpush.bf16.msra.mxu1 %v9955_v58 }
 0x389   :  { %v1030_v61 = vpop.f32.mrf.mxu2 }
 0x38a   :  { %v1066_v62 = vpack.c.bf16 %v1030_v61, %v1030_v61  ;;  %v1058_v63 = vpop.f32.mrf.mxu3 }
 0x38b   :  { %v1068_v4 = vpack.c.bf16 %v1058_v63, %v1058_v63  ;;  %v1000_v2 = vpop.f32.mrf.mxu1 }
 0x38c   :  { %v1128_v6 = vunpack.c.l.b16 %v1066_v62  ;;  %v974_v7 = vpop.f32.mrf.mxu0  ;;  %v1063_v16 = vpack.c.bf16 %v1000_v2, %v1000_v2  ;;  %v9954_v62 = vld [vmem:[%s12687_s10 + $0x28] sm:$0xff] }
 0x38d   :  { %v1156_v9 = vunpack.c.l.b16 %v1068_v4  ;;  %v1062_v10 = vpack.c.bf16 %v974_v7, %v974_v7  ;;  %1354 = vmatpush.bf16.msra.mxu1 %v9954_v62  ;;  %v9953_v4 = vld [vmem:[%s12687_s10 + $0x20] sm:$0xff]  ;;  %v9952_v7 = vld [vmem:[%s12687_s10 + $0x18] sm:$0xff] }
 0x38e   :  { %v1129_v11 = vpack.c.b16 %v1128_v6, %v1127_v5  ;;  %v1099_v19 = vunpack.c.l.b16 %v1063_v16 }
 0x38f   :  { %v1157_v13 = vpack.c.b16 %v1156_v9, %v1155_v8  ;;  %v1072_v14 = vunpack.c.l.b16 %v1062_v10 }
 0x390   :  { %8039 = vmatmul.msk.bf16.vlgmr.msra.gmra.mxu2 %vm734_vm8, %v1129_v11 }
 0x391   :  { %v1073_v15 = vpack.c.b16 %v1072_v14, %v1071_v12  ;;  %8044 = vmatmul.msk.bf16.vlgmr.msrb.gmra.mxu3 %vm734_vm8, %v1157_v13  ;;  %1355 = vmatpush.bf16.msra.mxu1 %v9953_v4  ;;  %v9971_v4 = vld [vmem:[%s12719_s2 + $0x1f0] sm:$0xff] }
 0x393   :  { %8029 = vmatmul.msk.bf16.vlgmr.msra.gmra.mxu0 %vm734_vm8, %v1073_v15  ;;  %v1002_v17 = vpop.f32.mrf.mxu1  ;;  %v10281_v15 = vld [vmem:[%s12720_s1 + $0x1] ss:$0 sm:$0xff] }
 0x394   :  { %v1064_v18 = vpack.c.bf16 %v1002_v17, %v1002_v17 }
 0x395   :  { %1356 = vmatpush.bf16.msra.mxu1 %v9952_v7 }
 0x396   :  { %v1100_v20 = vunpack.c.l.b16 %v1064_v18 }
 0x398   :  { %v1101_v22 = vpack.c.b16 %v1100_v20, %v1099_v19 }
 0x39a   :  { %8034 = vmatmul.msk.bf16.vlgmr.msrb.gmra.mxu1 %vm734_vm8, %v1101_v22 }
 0x410   :  { %v1092_v23 = vpop.f32.mrf.mxu0 }
 0x411   :  { %v1181_v27 = vsel %vm93_vm0, %v1092_v23, 0.0  ;;  %v9951_v23 = vld [vmem:[%s12687_s10 + $0x10] sm:$0xff] }
 0x412   :  { %1357 = vmatpush.bf16.msra.mxu1 %v9951_v23 }
 0x413   :  { %v1148_v24 = vpop.f32.mrf.mxu2 }
 0x414   :  { %v1176_v25 = vpop.f32.mrf.mxu3  ;;  %v1184_v30 = vsel %vm93_vm0, %v1148_v24, 0.0  ;;  %v9950_v24 = vld [vmem:[%s12687_s10 + $0x8] sm:$0xff] }
 0x415   :  { %v1186_v32 = vsel %vm93_vm0, %v1176_v25, 0.0  ;;  %v9949_v25 = vld [vmem:[%s12687_s10] sm:$0xff] }
 0x416   :  { %1358 = vmatpush.bf16.msra.mxu1 %v9950_v24 }
 0x417   :  { %v1120_v26 = vpop.f32.mrf.mxu1 }
 0x418   :  { %v1182_v28 = vsel %vm93_vm0, %v1120_v26, 0.0  ;;  %v1094_v33 = vpop.f32.mrf.mxu0 }
 0x419   :  { %v1183_v29 = vadd.f32 %v1182_v28, %v1181_v27  ;;  %v1188_v38 = vsel %vm93_vm0, %v1094_v33, 0.0 }
 0x41a   :  { %1359 = vmatpush.bf16.msra.mxu1 %v9949_v25  ;;  %v10282_v25 = vld [vmem:[%s12720_s1 + $0x2] ss:$0 sm:$0xff] }
 0x41b   :  { %v1185_v31 = vadd.f32 %v1184_v30, %v1183_v29  ;;  %v1150_v34 = vpop.f32.mrf.mxu2 }
 0x41c   :  { %v1178_v40 = vpop.f32.mrf.mxu3  ;;  %v1191_v43 = vsel %vm93_vm0, %v1150_v34, 0.0 }
 0x41d   :  { %v1187_v35 = vadd.f32 %v1186_v32, %v1185_v31  ;;  %v1193_v46 = vsel %vm93_vm0, %v1178_v40, 0.0  ;;  %v9964_v40 = vld [vmem:[%s12719_s2 + $0x1b8] sm:$0xff] }
 0x41e   :  { %1590 = vmatpush.bf16.msra.mxu3 %v9964_v40  ;;  %v9988_v40 = vld [vmem:[%s12719_s2 + $0x278] sm:$0xff] }
 0x41f   :  { %v1122_v36 = vpop.f32.mrf.mxu1  ;;  %v10989_v37 = vadd.f32 %v10725_v1, %v1187_v35 }
 0x420   :  { %v1189_v39 = vsel %vm93_vm0, %v1122_v36, 0.0 }
 0x421   :  { %v1190_v41 = vadd.f32 %v1189_v39, %v1188_v38  ;;  %v1222_v42 = vmul.f32 %v10989_v37, %v10989_v37 }
 0x423   :  { %v1192_v44 = vadd.f32 %v1191_v43, %v1190_v41  ;;  %v1224_v45 = vsel %vm93_vm0, %v1222_v42, 0.0  ;;  %v9968_v41 = vld [vmem:[%s12719_s2 + $0x1d8] sm:$0xff]  ;;  %v9959_v43 = vld [vmem:[%s12719_s2 + $0x190] sm:$0xff] }
 0x424   :  { %1225 = vadd.xlane.f32.xlu0 %v1224_v45  ;;  %v9984_v42 = vld [vmem:[%s12719_s2 + $0x258] sm:$0xff]  ;;  %v9967_v45 = vld [vmem:[%s12719_s2 + $0x1d0] sm:$0xff] }
 0x425   :  { %v1194_v47 = vadd.f32 %v1193_v46, %v1192_v44  ;;  %1780 = vmatpush.bf16.msrb.mxu1 %v9984_v42  ;;  %v9963_v44 = vld [vmem:[%s12719_s2 + $0x1b0] sm:$0xff]  ;;  %v9996_v42 = vld [vmem:[%s12719_s2 + $0x2b8] sm:$0xff] }
 0x426   :  { %v9983_v46 = vld [vmem:[%s12719_s2 + $0x250] sm:$0xff]  ;;  %1591 = vmatpush.bf16.msra.mxu3 %v9963_v44 }
 0x427   :  { %v10999_v1 = vadd.f32 %v10729_v3, %v1194_v47  ;;  %v9946_v3 = vld [vmem:[%s12686_s9 + $0x8] sm:$0xff]  ;;  %v9991_v44 = vld [vmem:[%s12719_s2 + $0x290] sm:$0xff] }
 0x428   :  { %1293 = vmatpush.bf16.msrb.mxu0 %v9946_v3  ;;  %v9982_v3 = vld [vmem:[%s12719_s2 + $0x248] sm:$0xff] }
 0x429   :  { %v1223_v48 = vmul.f32 %v10999_v1, %v10999_v1  ;;  %1781 = vmatpush.bf16.msrb.mxu1 %v9983_v46  ;;  %v9986_v46 = vld [vmem:[%s12719_s2 + $0x268] sm:$0xff] }
 0x42b   :  { %v1227_v49 = vsel %vm93_vm0, %v1223_v48, 0.0  ;;  %v9958_v48 = vld [vmem:[%s12719_s2 + $0x188] sm:$0xff] }
 0x42c   :  { %1228 = vadd.xlane.f32.xlu1 %v1227_v49  ;;  %1294 = vmatpush.bf16.msrb.mxu0 %v9945_v55  ;;  %v9962_v49 = vld [vmem:[%s12719_s2 + $0x1a8] sm:$0xff]  ;;  %v9965_v55 = vld [vmem:[%s12719_s2 + $0x1c0] sm:$0xff] }
 0x42d   :  { %1592 = vmatpush.bf16.msra.mxu3 %v9962_v49  ;;  %1782 = vmatpush.bf16.msrb.mxu1 %v9982_v3  ;;  %v9989_v49 = vld [vmem:[%s12719_s2 + $0x280] sm:$0xff]  ;;  %v10003_v3 = vld [vmem:[%s12719_s2 + $0x2f0] sm:$0xff] }
 0x430   :  { %1628 = vmatpush.bf16.msra.mxu0 %v9968_v41  ;;  %v9992_v41 = vld [vmem:[%s12719_s2 + $0x298] sm:$0xff] }
 0x434   :  { %1629 = vmatpush.bf16.msra.mxu0 %v9967_v45  ;;  %v9995_v45 = vld [vmem:[%s12719_s2 + $0x2b0] sm:$0xff] }
 0x438   :  { %1630 = vmatpush.bf16.msra.mxu0 %v9966_v50  ;;  %v9993_v50 = vld [vmem:[%s12719_s2 + $0x2a0] sm:$0xff] }
 0x43c   :  { %1631 = vmatpush.bf16.msra.mxu0 %v9965_v55 }
 0x497   :  { %v1226_v53 = vpop.xlane.xlu0 %1225 }
 0x498   :  { %v1230_v54 = vmul.f32 %v1226_v53, %v10759_v21  ;;  %v9957_v53 = vld [vmem:[%s12719_s2 + $0x180] sm:$0xff] }
 0x49a   :  { %v1232_v56 = vadd.f32 1e-06, %v1230_v54  ;;  %v9961_v54 = vld [vmem:[%s12719_s2 + $0x1a0] sm:$0xff] }
 0x49b   :  { %1593 = vmatpush.bf16.msra.mxu3 %v9961_v54  ;;  %v10001_v54 = vld [vmem:[%s12719_s2 + $0x2e0] sm:$0xff] }
 0x49c   :  { %10331 = vrsqrt.f32 %v1232_v56  ;;  %vm1240_vm10 = vweird.f32 %v1232_v56 }
 0x49f   :  { %v1229_v52 = vpop.xlane.xlu1 %1228 }
 0x4a0   :  { %v1231_v59 = vmul.f32 %v1229_v52, %v10759_v21  ;;  %v9972_v52 = vld [vmem:[%s12719_s2 + $0x1f8] sm:$0xff] }
 0x4a2   :  { %v10332_v60 = vpop.eup %10331  ;;  %v1233_v61 = vadd.f32 1e-06, %v1231_v59  ;;  %v9976_v59 = vld [vmem:[%s12719_s2 + $0x218] sm:$0xff] }
 0x4a3   :  { %v1235_v63 = vmul.f32 %v10332_v60, %v1232_v56  ;;  %vm1241_vm9 = vweird.f32 %v10332_v60  ;;  %v9981_v56 = vld [vmem:[%s12719_s2 + $0x240] sm:$0xff]  ;;  %1704 = vmatpush.bf16.msrb.mxu3 %v9976_v59 }
 0x4a4   :  { %10333 = vrsqrt.f32 %v1233_v61  ;;  %vm1242_vm11 = vmor %vm1240_vm10, %vm1241_vm9  ;;  %vm1250_vm13 = vweird.f32 %v1233_v61  ;;  %1783 = vmatpush.bf16.msrb.mxu1 %v9981_v56 }
 0x4a5   :  { %v1236_v0 = vmul.f32 %v10332_v60, %v1235_v63  ;;  %v10000_v63 = vld [vmem:[%s12719_s2 + $0x2d8] sm:$0xff] }
 0x4a7   :  { %v1237_v2 = vmul.f32 0.5, %v1236_v0 }
 0x4a9   :  { %v1238_v5 = vsub.f32 1.5, %v1237_v2  ;;  %v9975_v2 = vld [vmem:[%s12719_s2 + $0x210] sm:$0xff] }
 0x4aa   :  { %v10334_v6 = vpop.eup %10333  ;;  %1705 = vmatpush.bf16.msrb.mxu3 %v9975_v2 }
 0x4ab   :  { %v1245_v8 = vmul.f32 %v10334_v6, %v1233_v61  ;;  %v1239_v9 = vmul.f32 %v10332_v60, %v1238_v5  ;;  %vm1251_vm12 = vweird.f32 %v10334_v6  ;;  %v9979_v5 = vld [vmem:[%s12719_s2 + $0x230] sm:$0xff] }
 0x4ac   :  { %vm1252_vm14 = vmor %vm1250_vm13, %vm1251_vm12 }
 0x4ad   :  { %v1246_v10 = vmul.f32 %v10334_v6, %v1245_v8  ;;  %v1243_v12 = vsel %vm1242_vm11, %v10332_v60, %v1239_v9  ;;  %v9980_v60 = vld [vmem:[%s12719_s2 + $0x238] sm:$0xff]  ;;  %v9970_v9 = vld [vmem:[%s12719_s2 + $0x1e8] sm:$0xff] }
 0x4ae   :  { %v1254_v16 = vmul.f32 %v1243_v12, %v10989_v37  ;;  %v9998_v12 = vld [vmem:[%s12719_s2 + $0x2c8] sm:$0xff] }
 0x4af   :  { %v1247_v11 = vmul.f32 0.5, %v1246_v10  ;;  %v9974_v10 = vld [vmem:[%s12719_s2 + $0x208] sm:$0xff] }
 0x4b0   :  { %v1257_v19 = vmul.f32 %v10281_v15, %v1254_v16  ;;  %1706 = vmatpush.bf16.msrb.mxu3 %v9974_v10 }
 0x4b1   :  { %v1248_v13 = vsub.f32 1.5, %v1247_v11  ;;  %v9978_v11 = vld [vmem:[%s12719_s2 + $0x228] sm:$0xff] }
 0x4b3   :  { %v1249_v14 = vmul.f32 %v10334_v6, %v1248_v13 }
 0x4b5   :  { %v1253_v17 = vsel %vm1252_vm14, %v10334_v6, %v1249_v14  ;;  %v9999_v6 = vld [vmem:[%s12719_s2 + $0x2d0] sm:$0xff] }
 0x4b6   :  { %v1255_v18 = vmul.f32 %v1253_v17, %v10999_v1  ;;  %v9969_v17 = vld [vmem:[%s12719_s2 + $0x1e0] sm:$0xff] }
 0x4b8   :  { %v1258_v20 = vmul.f32 %v10281_v15, %v1255_v18  ;;  %v9973_v18 = vld [vmem:[%s12719_s2 + $0x200] sm:$0xff] }
 0x4b9   :  { %1707 = vmatpush.bf16.msrb.mxu3 %v9973_v18 }
 0x4ba   :  { %v1259_v22 = vpack.c.bf16 %v1258_v20, %v1257_v19  ;;  %v9977_v19 = vld [vmem:[%s12719_s2 + $0x220] sm:$0xff] }
 0x4bb   :  { %v9997_v20 = vld [vmem:[%s12719_s2 + $0x2c0] sm:$0xff] }
 0x4bc   :  { %8061 = vmatmul.msk.bf16.vlgmr.msrb.gmra.mxu0 %vm93_vm0, %v1259_v22 }
 0x4bd   :  { %1742 = vmatpush.bf16.msrb.mxu0 %v9980_v60 }
 0x4c1   :  { %1743 = vmatpush.bf16.msrb.mxu0 %v9979_v5 }
 0x4c5   :  { %1744 = vmatpush.bf16.msrb.mxu0 %v9978_v11 }
 0x4c9   :  { %1745 = vmatpush.bf16.msrb.mxu0 %v9977_v19 }
 0x539   :  { %v1296_v26 = vpop.f32.mrf.mxu0 }
 0x53a   :  { %v1301_v28 = vmax.f32 %v1296_v26, 0.0 }
 0x541   :  { %v1298_v27 = vpop.f32.mrf.mxu0 }
 0x542   :  { %v1302_v29 = vmax.f32 %v1298_v27, 0.0 }
 0x544   :  { %v1303_v30 = vpack.c.bf16 %v1302_v29, %v1301_v28 }
 0x546   :  { %1360 = vmatmul.bf16.vlgmr.msra.gmra.mxu1 %v1303_v30 }
 0x547   :  { %1932 = vmatpush.bf16.msra.mxu1 %v10000_v63 }
 0x54b   :  { %1933 = vmatpush.bf16.msra.mxu1 %v9999_v6 }
 0x54f   :  { %1934 = vmatpush.bf16.msra.mxu1 %v9998_v12 }
 0x553   :  { %1935 = vmatpush.bf16.msra.mxu1 %v9997_v20 }
 0x5c3   :  { %v1361_v31 = vpop.f32.mrf.mxu1 }
 0x5c4   :  { %v11049_v32 = vadd.f32 %v1361_v31, %v10989_v37  ;;  %v9960_v37 = vld [vmem:[%s12719_s2 + $0x198] sm:$0xff] }
 0x5c5   :  { %1552 = vmatpush.bf16.msrb.mxu2 %v9960_v37 }
 0x5c6   :  { %v1369_v33 = vmul.f32 %v11049_v32, %v11049_v32 }
 0x5c8   :  { %v1371_v35 = vsel %vm93_vm0, %v1369_v33, 0.0 }
 0x5c9   :  { %1372 = vadd.xlane.f32.xlu2 %v1371_v35  ;;  %1553 = vmatpush.bf16.msrb.mxu2 %v9959_v43  ;;  %v9987_v43 = vld [vmem:[%s12719_s2 + $0x270] sm:$0xff] }
 0x5cb   :  { %v1363_v34 = vpop.f32.mrf.mxu1 }
 0x5cc   :  { %v11055_v36 = vadd.f32 %v1363_v34, %v10999_v1 }
 0x5cd   :  { %1554 = vmatpush.bf16.msrb.mxu2 %v9958_v48  ;;  %v9985_v48 = vld [vmem:[%s12719_s2 + $0x260] sm:$0xff] }
 0x5ce   :  { %v1370_v38 = vmul.f32 %v11055_v36, %v11055_v36 }
 0x5d0   :  { %v1374_v39 = vsel %vm93_vm0, %v1370_v38, 0.0 }
 0x5d1   :  { %1375 = vadd.xlane.f32.xlu0 %v1374_v39  ;;  %1555 = vmatpush.bf16.msrb.mxu2 %v9957_v53  ;;  %v10002_v53 = vld [vmem:[%s12719_s2 + $0x2e8] sm:$0xff] }
 0x5d5   :  { %1666 = vmatpush.bf16.msra.mxu2 %v9972_v52 }
 0x5d9   :  { %1667 = vmatpush.bf16.msra.mxu2 %v9971_v4 }
 0x5dd   :  { %1668 = vmatpush.bf16.msra.mxu2 %v9970_v9 }
 0x5e1   :  { %1669 = vmatpush.bf16.msra.mxu2 %v9969_v17 }
 0x63c   :  { %v1373_v47 = vpop.xlane.xlu2 %1372 }
 0x63d   :  { %v1377_v1 = vmul.f32 %v1373_v47, %v10759_v21  ;;  %v9990_v47 = vld [vmem:[%s12719_s2 + $0x288] sm:$0xff] }
 0x63f   :  { %v1379_v51 = vadd.f32 1e-06, %v1377_v1  ;;  %v9994_v1 = vld [vmem:[%s12719_s2 + $0x2a8] sm:$0xff] }
 0x641   :  { %10335 = vrsqrt.f32 %v1379_v51  ;;  %vm1387_vm1 = vweird.f32 %v1379_v51 }
 0x644   :  { %v1376_v57 = vpop.xlane.xlu0 %1375 }
 0x645   :  { %v1378_v58 = vmul.f32 %v1376_v57, %v10759_v21 }
 0x647   :  { %v10336_v61 = vpop.eup %10335  ;;  %v1380_v62 = vadd.f32 1e-06, %v1378_v58 }
 0x648   :  { %v1382_v0 = vmul.f32 %v10336_v61, %v1379_v51  ;;  %vm1388_vm15 = vweird.f32 %v10336_v61  ;;  %v10004_v51 = vld [vmem:[%s12719_s2 + $0x2f8] sm:$0xff]  ;;  %s12723_s2 = sld [smem:[#allocation6_spill]] }
 0x649   :  { %10337 = vrsqrt.f32 %v1380_v62  ;;  %vm1389_vm2 = vmor %vm1387_vm1, %vm1388_vm15  ;;  %vm1397_vm4 = vweird.f32 %v1380_v62 }
 0x64a   :  { %v1383_v7 = vmul.f32 %v10336_v61, %v1382_v0 }
 0x64c   :  { %v1384_v8 = vmul.f32 0.5, %v1383_v7 }
 0x64e   :  { %v1385_v13 = vsub.f32 1.5, %v1384_v8 }
 0x64f   :  { %v10338_v14 = vpop.eup %10337 }
 0x650   :  { %v1386_v15 = vmul.f32 %v10336_v61, %v1385_v13  ;;  %v1392_v16 = vmul.f32 %v10338_v14, %v1380_v62  ;;  %vm1398_vm3 = vweird.f32 %v10338_v14 }
 0x651   :  { %vm1399_vm5 = vmor %vm1397_vm4, %vm1398_vm3 }
 0x652   :  { %v1390_v22 = vsel %vm1389_vm2, %v10336_v61, %v1386_v15  ;;  %v1393_v23 = vmul.f32 %v10338_v14, %v1392_v16 }
 0x653   :  { %v1401_v26 = vmul.f32 %v1390_v22, %v11049_v32 }
 0x654   :  { %v1394_v24 = vmul.f32 0.5, %v1393_v23 }
 0x655   :  { %v1404_v29 = vmul.f32 %v10282_v25, %v1401_v26 }
 0x656   :  { %v1395_v27 = vsub.f32 1.5, %v1394_v24 }
 0x657   :  { %v1406_v33 = vpack.c.bf16 %v1404_v29, %v1404_v29 }
 0x658   :  { %v1396_v28 = vmul.f32 %v10338_v14, %v1395_v27 }
 0x659   :  { %v1518_v38 = vunpack.c.l.b16 %v1406_v33 }
 0x65a   :  { %v1400_v30 = vsel %vm1399_vm5, %v10338_v14, %v1396_v28 }
 0x65b   :  { %v1402_v31 = vmul.f32 %v1400_v30, %v11055_v36 }
 0x65d   :  { %v1405_v35 = vmul.f32 %v10282_v25, %v1402_v31 }
 0x65f   :  { %v1407_v34 = vpack.c.bf16 %v1405_v35, %v1405_v35 }
 0x661   :  { %v1519_v39 = vunpack.c.l.b16 %v1407_v34 }
 0x663   :  { %v1520_v37 = vpack.c.b16 %v1519_v39, %v1518_v38 }
 0x665   :  { %8214 = vmatmul.msk.bf16.vlgmr.msrb.gmra.mxu2 %vm93_vm0, %v1520_v37  ;;  %8231 = vmatmul.msk.bf16.vlgmr.msra.gmra.mxu3 %vm93_vm0, %v1520_v37 }
 0x666   :  { %8248 = vmatmul.msk.bf16.vlgmr.msra.gmra.mxu0 %vm93_vm0, %v1520_v37  ;;  %8316 = vmatmul.msk.bf16.vlgmr.msrb.gmra.mxu1 %vm93_vm0, %v1520_v37 }
 0x667   :  { %1818 = vmatpush.bf16.msrb.mxu2 %v9988_v40  ;;  %1856 = vmatpush.bf16.msra.mxu3 %v9992_v41 }
 0x668   :  { %1894 = vmatpush.bf16.msra.mxu0 %v9996_v42 }
 0x66b   :  { %1819 = vmatpush.bf16.msrb.mxu2 %v9987_v43  ;;  %1857 = vmatpush.bf16.msra.mxu3 %v9991_v44 }
 0x66c   :  { %1895 = vmatpush.bf16.msra.mxu0 %v9995_v45 }
 0x66f   :  { %1820 = vmatpush.bf16.msrb.mxu2 %v9986_v46  ;;  %1858 = vmatpush.bf16.msra.mxu3 %v9990_v47 }
 0x670   :  { %1896 = vmatpush.bf16.msra.mxu0 %v9994_v1 }
 0x673   :  { %1821 = vmatpush.bf16.msrb.mxu2 %v9985_v48  ;;  %1859 = vmatpush.bf16.msra.mxu3 %v9989_v49 }
 0x674   :  { %1897 = vmatpush.bf16.msra.mxu0 %v9993_v50 }
 0x675   :  { %8265 = vmatmul.msk.bf16.vlgmr.msra.gmra.mxu2 %vm93_vm0, %v1520_v37  ;;  %8282 = vmatmul.msk.bf16.vlgmr.msrb.gmra.mxu3 %vm93_vm0, %v1520_v37 }
 0x676   :  { %8299 = vmatmul.msk.bf16.vlgmr.msrb.gmra.mxu0 %vm93_vm0, %v1520_v37  ;;  %8384 = vmatmul.msk.bf16.vlgmr.msra.gmra.mxu1 %vm93_vm0, %v1520_v37 }
 0x677   :  { %1970 = vmatpush.bf16.msra.mxu2 %v10004_v51 }
 0x67b   :  { %1971 = vmatpush.bf16.msra.mxu2 %v10003_v3 }
 0x67f   :  { %1972 = vmatpush.bf16.msra.mxu2 %v10002_v53 }
 0x683   :  { %1973 = vmatpush.bf16.msra.mxu2 %v10001_v54 }
 0x685   :  { %8333 = vmatmul.msk.bf16.vlgmr.msrb.gmra.mxu2 %vm93_vm0, %v1520_v37  ;;  %8350 = vmatmul.msk.bf16.vlgmr.msra.gmra.mxu3 %vm93_vm0, %v1520_v37 }
 0x686   :  { %8367 = vmatmul.msk.bf16.vlgmr.msra.gmra.mxu0 %vm93_vm0, %v1520_v37 }
 0x695   :  { %8401 = vmatmul.msk.bf16.vlgmr.msra.gmra.mxu2 %vm93_vm0, %v1520_v37 }
 0x6e3   :  { %v1633_v55 = vpop.f32.mrf.mxu0  ;;  %v1785_v56 = vpop.f32.mrf.mxu1 }
 0x6e4   :  { %v1992_v52 = vpack.c.bf16 %v1785_v56, %v1785_v56  ;;  %v1984_v6 = vpack.c.bf16 %v1633_v55, %v1633_v55 }
 0x6e6   :  { %v2063_v62 = vunpack.c.l.b16 %v1992_v52  ;;  %v2058_v11 = vunpack.c.l.b16 %v1984_v6 }
 0x6e8   :  { %v1557_v57 = vpop.f32.mrf.mxu2  ;;  %v1595_v58 = vpop.f32.mrf.mxu3 }
 0x6e9   :  { %v1982_v35 = vpack.c.bf16 %v1595_v58, %v1595_v58  ;;  %v1980_v44 = vpack.c.bf16 %v1557_v57, %v1557_v57 }
 0x6eb   :  { %v1635_v59 = vpop.f32.mrf.mxu0  ;;  %v1787_v60 = vpop.f32.mrf.mxu1  ;;  %v2028_v43 = vunpack.c.l.b16 %v1982_v35  ;;  %v1998_v50 = vunpack.c.l.b16 %v1980_v44  ;;  %v10546_v35 = vld [vmem:[%s12721_s30 + $0x30] sm:$0xff] }
 0x6ec   :  { %v1993_v61 = vpack.c.bf16 %v1787_v60, %v1787_v60  ;;  %v1985_v0 = vpack.c.bf16 %v1635_v59, %v1635_v59 }
 0x6ee   :  { %v2064_v63 = vunpack.c.l.b16 %v1993_v61  ;;  %v2059_v10 = vunpack.c.l.b16 %v1985_v0 }
 0x6f0   :  { %v2065_v4 = vpack.c.b16 %v2064_v63, %v2063_v62  ;;  %v1559_v2 = vpop.f32.mrf.mxu2  ;;  %v1597_v5 = vpop.f32.mrf.mxu3  ;;  %v2060_v12 = vpack.c.b16 %v2059_v10, %v2058_v11 }
 0x6f1   :  { %v1983_v27 = vpack.c.bf16 %v1597_v5, %v1597_v5  ;;  %v1981_v41 = vpack.c.bf16 %v1559_v2, %v1559_v2 }
 0x6f2   :  { %v2070_v7 = vsel %vm734_vm8, %v2065_v4, 0 }
 0x6f3   :  { %v1747_v8 = vpop.f32.mrf.mxu0  ;;  %v1937_v9 = vpop.f32.mrf.mxu1  ;;  %2079 = vmatpush.bf16.xpose.msrb.mxu1 %v2070_v7  ;;  %v2029_v40 = vunpack.c.l.b16 %v1983_v27  ;;  %v1999_v48 = vunpack.c.l.b16 %v1981_v41  ;;  %v10547_v41 = vld [vmem:[%s12721_s30 + $0x28] sm:$0xff] }
 0x6f4   :  { %v1990_v15 = vpack.c.bf16 %v1747_v8, %v1747_v8  ;;  %v2216_v16 = vpack.c.bf16 %v1937_v9, %v1937_v9 }
 0x6f5   :  { %v2030_v46 = vpack.c.b16 %v2029_v40, %v2028_v43  ;;  %v2000_v53 = vpack.c.b16 %v1999_v48, %v1998_v50  ;;  %v10548_v43 = vld [vmem:[%s12721_s30 + $0x18] sm:$0xff]  ;;  %v10550_v50 = vld [vmem:[%s12721_s30 + $0x20] sm:$0xff] }
 0x6f6   :  { %v2033_v22 = vunpack.c.l.b16 %v1990_v15  ;;  %v2283_v23 = vunpack.c.l.b16 %v2216_v16 }
 0x6f8   :  { %v11224_v13 = vpop.f32.mrf.mxu2  ;;  %v1709_v14 = vpop.f32.mrf.mxu3 }
 0x6f9   :  { %v1988_v26 = vpack.c.bf16 %v1709_v14, %v1709_v14  ;;  %v1986_v7 = vpack.c.bf16 %v11224_v13, %v11224_v13  ;;  %v10543_v13 = vld [vmem:[%s12721_s30] sm:$0xff] }
 0x6fa   :  { %8404 = vmatmul.msk.bf16.vlgmr.msrb.gmra.mxu1 %vm734_vm8, %v2060_v12 }
 0x6fb   :  { %v1749_v17 = vpop.f32.mrf.mxu0  ;;  %v1939_v18 = vpop.f32.mrf.mxu1  ;;  %v2003_v38 = vunpack.c.l.b16 %v1988_v26  ;;  %v2088_v11 = vunpack.c.l.b16 %v1986_v7 }
 0x6fc   :  { %v1991_v19 = vpack.c.bf16 %v1749_v17, %v1749_v17  ;;  %v2217_v20 = vpack.c.bf16 %v1939_v18, %v1939_v18 }
 0x6fe   :  { %v2034_v24 = vunpack.c.l.b16 %v1991_v19  ;;  %v2284_v25 = vunpack.c.l.b16 %v2217_v20 }
 0x700   :  { %v2035_v28 = vpack.c.b16 %v2034_v24, %v2033_v22  ;;  %v2285_v29 = vpack.c.b16 %v2284_v25, %v2283_v23  ;;  %v1673_v30 = vpop.f32.mrf.mxu2  ;;  %v1711_v31 = vpop.f32.mrf.mxu3  ;;  %v10544_v25 = vld [vmem:[%s12721_s30 + $0x8] sm:$0xff] }
 0x701   :  { %v1989_v33 = vpack.c.bf16 %v1711_v31, %v1711_v31  ;;  %v1987_v2 = vpack.c.bf16 %v1673_v30, %v1673_v30  ;;  %v10545_v30 = vld [vmem:[%s12721_s30 + $0x10] sm:$0xff] }
 0x702   :  { %2297 = vmatpush.bf16.msra.mxu1 %v2285_v29  ;;  %v2040_v34 = vsel %vm734_vm8, %v2035_v28, 0 }
 0x703   :  { %v2004_v39 = vunpack.c.l.b16 %v1989_v33  ;;  %v1899_v37 = vpop.f32.mrf.mxu0  ;;  %2049 = vmatpush.bf16.xpose.msrb.mxu0 %v2040_v34  ;;  %v2089_v10 = vunpack.c.l.b16 %v1987_v2 }
 0x704   :  { %v2214_v49 = vpack.c.bf16 %v1899_v37, %v1899_v37 }
 0x705   :  { %v2005_v42 = vpack.c.b16 %v2004_v39, %v2003_v38  ;;  %v2090_v12 = vpack.c.b16 %v2089_v10, %v2088_v11 }
 0x706   :  { %v2255_v54 = vunpack.c.l.b16 %v2214_v49 }
 0x707   :  { %v2010_v45 = vsel %vm734_vm8, %v2005_v42, 0 }
 0x708   :  { %v1823_v47 = vpop.f32.mrf.mxu2  ;;  %v1861_v1 = vpop.f32.mrf.mxu3  ;;  %2019 = vmatpush.bf16.xpose.msrb.mxu3 %v2010_v45 }
 0x709   :  { %v1994_v56 = vpack.c.bf16 %v1823_v47, %v1823_v47  ;;  %v2212_v58 = vpack.c.bf16 %v1861_v1, %v1861_v1 }
 0x70a   :  { %8403 = vmatmul.msk.bf16.vlgmr.msrb.gmra.mxu0 %vm734_vm8, %v2030_v46  ;;  %v10549_v46 = vld [vmem:[%s12721_s30 + $0x38] sm:$0xff] }
 0x70b   :  { %v1901_v51 = vpop.f32.mrf.mxu0  ;;  %v2093_v62 = vunpack.c.l.b16 %v1994_v56  ;;  %v2227_v63 = vunpack.c.l.b16 %v2212_v58 }
 0x70c   :  { %v2215_v3 = vpack.c.bf16 %v1901_v51, %v1901_v51 }
 0x70e   :  { %v2256_v55 = vunpack.c.l.b16 %v2215_v3 }
 0x70f   :  { %8402 = vmatmul.msk.bf16.vlgmr.msrb.gmra.mxu3 %vm734_vm8, %v2000_v53 }
 0x710   :  { %v2257_v57 = vpack.c.b16 %v2256_v55, %v2255_v54  ;;  %v1825_v52 = vpop.f32.mrf.mxu2  ;;  %v1863_v59 = vpop.f32.mrf.mxu3 }
 0x711   :  { %v1995_v60 = vpack.c.bf16 %v1825_v52, %v1825_v52  ;;  %v2213_v61 = vpack.c.bf16 %v1863_v59, %v1863_v59 }
 0x712   :  { %2269 = vmatpush.bf16.msra.mxu0 %v2257_v57 }
 0x713   :  { %v2094_v0 = vunpack.c.l.b16 %v1995_v60  ;;  %v2228_v4 = vunpack.c.l.b16 %v2213_v61 }
 0x715   :  { %v2095_v5 = vpack.c.b16 %v2094_v0, %v2093_v62  ;;  %v2229_v6 = vpack.c.b16 %v2228_v4, %v2227_v63 }
 0x717   :  { %2241 = vmatpush.bf16.msra.mxu3 %v2229_v6  ;;  %v2100_v8 = vsel %vm734_vm8, %v2095_v5, 0 }
 0x718   :  { %v1975_v9 = vpop.f32.mrf.mxu2  ;;  %2109 = vmatpush.bf16.xpose.msrb.mxu2 %v2100_v8 }
 0x719   :  { %v2218_v14 = vpack.c.bf16 %v1975_v9, %v1975_v9 }
 0x71b   :  { %v2311_v17 = vunpack.c.l.b16 %v2218_v14 }
 0x71f   :  { %8405 = vmatmul.msk.bf16.vlgmr.msrb.gmra.mxu2 %vm734_vm8, %v2090_v12 }
 0x720   :  { %v1977_v15 = vpop.f32.mrf.mxu2 }
 0x721   :  { %v2219_v16 = vpack.c.bf16 %v1977_v15, %v1977_v15 }
 0x723   :  { %v2312_v18 = vunpack.c.l.b16 %v2219_v16 }
 0x725   :  { %v2313_v19 = vpack.c.b16 %v2312_v18, %v2311_v17 }
 0x727   :  { %2325 = vmatpush.bf16.msra.mxu2 %v2313_v19 }
 0x777   :  { %v2081_v27 = vpop.f32.mrf.mxu1 }
 0x778   :  { %v2082_v51 = vadd.f32 %v10550_v50, %v2081_v27 }
 0x77a   :  { %v2128_v3 = vsel %vm734_vm8, %v2082_v51, -inf }
 0x77f   :  { %v2083_v37 = vpop.f32.mrf.mxu1 }
 0x780   :  { %v2084_v42 = vadd.f32 %v10547_v41, %v2083_v37 }
 0x782   :  { %v2131_v1 = vsel %vm734_vm8, %v2084_v42, -inf }
 0x787   :  { %v2051_v28 = vpop.f32.mrf.mxu0 }
 0x788   :  { %v2052_v31 = vadd.f32 %v10545_v30, %v2051_v28 }
 0x78a   :  { %v2122_v38 = vsel %vm734_vm8, %v2052_v31, -inf }
 0x78f   :  { %v2053_v40 = vpop.f32.mrf.mxu0 }
 0x790   :  { %v2054_v44 = vadd.f32 %v10548_v43, %v2053_v40 }
 0x792   :  { %v2021_v20 = vpop.f32.mrf.mxu3  ;;  %v2125_v49 = vsel %vm734_vm8, %v2054_v44, -inf }
 0x793   :  { %v2022_v22 = vadd.f32 %v10543_v13, %v2021_v20 }
 0x795   :  { %v2116_v23 = vsel %vm734_vm8, %v2022_v22, -inf }
 0x796   :  { %2117 = vmax.xlane.f32.xlu1 %v2116_v23 }
 0x79a   :  { %v2023_v24 = vpop.f32.mrf.mxu3 }
 0x79b   :  { %v2024_v26 = vadd.f32 %v10544_v25, %v2023_v24 }
 0x79d   :  { %v2119_v29 = vsel %vm734_vm8, %v2024_v26, -inf }
 0x79e   :  { %2120 = vmax.xlane.f32.xlu2 %v2119_v29 }
 0x7a2   :  { %v2111_v33 = vpop.f32.mrf.mxu2 }
 0x7a3   :  { %v2112_v34 = vadd.f32 %v10546_v35, %v2111_v33 }
 0x7a5   :  { %v2134_v39 = vsel %vm734_vm8, %v2112_v34, -inf }
 0x7a6   :  { %2123 = vmax.xlane.f32.xlu2 %v2122_v38  ;;  %2135 = vmax.xlane.f32.xlu0 %v2134_v39 }
 0x7aa   :  { %v2113_v45 = vpop.f32.mrf.mxu2 }
 0x7ab   :  { %v2114_v47 = vadd.f32 %v10549_v46, %v2113_v45 }
 0x7ad   :  { %v2137_v48 = vsel %vm734_vm8, %v2114_v47, -inf }
 0x7ae   :  { %2132 = vmax.xlane.f32.xlu2 %v2131_v1  ;;  %2138 = vmax.xlane.f32.xlu1 %v2137_v48 }
 0x7af   :  { %2126 = vmax.xlane.f32.xlu0 %v2125_v49 }
 0x7b6   :  { %2129 = vmax.xlane.f32.xlu1 %v2128_v3 }
 0x809   :  { %v2118_v53 = vpop.xlane.xlu1 %2117 }
 0x80a   :  { %v2140_v54 = vsub.f32 %v2022_v22, %v2118_v53 }
 0x80c   :  { %v2148_v55 = vmul.f32 1.442695, %v2140_v54 }
 0x80e   :  { %10339 = vpow2.f32 %v2148_v55 }
 0x811   :  { %v2121_v56 = vpop.xlane.xlu2 %2120 }
 0x812   :  { %v2141_v58 = vsub.f32 %v2024_v26, %v2121_v56 }
 0x814   :  { %v10340_v57 = vpop.eup %10339  ;;  %v2150_v52 = vmul.f32 1.442695, %v2141_v58 }
 0x815   :  { %v2164_v59 = vsel %vm734_vm8, %v10340_v57, 0.0 }
 0x816   :  { %10341 = vpow2.f32 %v2150_v52  ;;  %2165 = vadd.xlane.f32.xlu0 %v2164_v59 }
 0x819   :  { %v2124_v60 = vpop.xlane.xlu2 %2123  ;;  %v2136_v61 = vpop.xlane.xlu0 %2135 }
 0x81a   :  { %v2142_v62 = vsub.f32 %v2052_v31, %v2124_v60  ;;  %v2146_v63 = vsub.f32 %v2112_v34, %v2136_v61 }
 0x81c   :  { %v10342_v0 = vpop.eup %10341  ;;  %v2152_v4 = vmul.f32 1.442695, %v2142_v62  ;;  %v2160_v2 = vmul.f32 1.442695, %v2146_v63 }
 0x81d   :  { %v2167_v5 = vsel %vm734_vm8, %v10342_v0, 0.0 }
 0x81e   :  { %10343 = vpow2.f32 %v2152_v4  ;;  %2168 = vadd.xlane.f32.xlu1 %v2167_v5 }
 0x81f   :  { %10345 = vpow2.f32 %v2160_v2 }
 0x821   :  { %v2133_v6 = vpop.xlane.xlu2 %2132  ;;  %v2139_v7 = vpop.xlane.xlu1 %2138 }
 0x822   :  { %v2145_v8 = vsub.f32 %v2084_v42, %v2133_v6  ;;  %v2147_v9 = vsub.f32 %v2114_v47, %v2139_v7  ;;  %v2127_v10 = vpop.xlane.xlu0 %2126 }
 0x823   :  { %v2143_v11 = vsub.f32 %v2054_v44, %v2127_v10 }
 0x824   :  { %v10344_v12 = vpop.eup %10343  ;;  %v2158_v14 = vmul.f32 1.442695, %v2145_v8  ;;  %v2162_v15 = vmul.f32 1.442695, %v2147_v9 }
 0x825   :  { %v10346_v16 = vpop.eup %10345  ;;  %v2154_v17 = vmul.f32 1.442695, %v2143_v11  ;;  %v2170_v18 = vsel %vm734_vm8, %v10344_v12, 0.0 }
 0x826   :  { %10347 = vpow2.f32 %v2158_v14  ;;  %2171 = vadd.xlane.f32.xlu1 %v2170_v18  ;;  %v2182_v19 = vsel %vm734_vm8, %v10346_v16, 0.0  ;;  %v10005_v14 = vld [vmem:[%s12722_s5 + $0x20] sm:$0xff] }
 0x827   :  { %10349 = vpow2.f32 %v2162_v15  ;;  %2183 = vadd.xlane.f32.xlu2 %v2182_v19  ;;  %2361 = vmatpush.bf16.msrb.mxu3 %v10005_v14  ;;  %v10006_v15 = vld [vmem:[%s12722_s5 + $0x28] sm:$0xff] }
 0x828   :  { %10351 = vpow2.f32 %v2154_v17  ;;  %2389 = vmatpush.bf16.msrb.mxu0 %v10006_v15  ;;  %v10007_v17 = vld [vmem:[%s12722_s5 + $0x30] sm:$0xff] }
 0x829   :  { %v2130_v20 = vpop.xlane.xlu1 %2129  ;;  %2417 = vmatpush.bf16.msrb.mxu1 %v10007_v17 }
 0x82a   :  { %v2144_v13 = vsub.f32 %v2082_v51, %v2130_v20 }
 0x82c   :  { %v10348_v22 = vpop.eup %10347  ;;  %v2156_v23 = vmul.f32 1.442695, %v2144_v13 }
 0x82d   :  { %v10350_v24 = vpop.eup %10349  ;;  %v2179_v25 = vsel %vm734_vm8, %v10348_v22, 0.0 }
 0x82e   :  { %v10352_v26 = vpop.eup %10351  ;;  %10353 = vpow2.f32 %v2156_v23  ;;  %2180 = vadd.xlane.f32.xlu1 %v2179_v25  ;;  %v2185_v27 = vsel %vm734_vm8, %v10350_v24, 0.0 }
 0x82f   :  { %2186 = vadd.xlane.f32.xlu0 %v2185_v27  ;;  %v2173_v28 = vsel %vm734_vm8, %v10352_v26, 0.0 }
 0x830   :  { %2174 = vadd.xlane.f32.xlu2 %v2173_v28 }
 0x834   :  { %v10354_v29 = vpop.eup %10353 }
 0x835   :  { %v2176_v30 = vsel %vm734_vm8, %v10354_v29, 0.0 }
 0x837   :  { %2177 = vadd.xlane.f32.xlu0 %v2176_v30 }
 0x889   :  { %v2166_v31 = vpop.xlane.xlu0 %2165 }
 0x88a   :  { %10355 = vrcp.f32 %v2166_v31 }
 0x890   :  { %v10356_v35 = vpop.eup %10355 }
 0x891   :  { %v2169_v33 = vpop.xlane.xlu1 %2168  ;;  %v2196_v34 = vmul.f32 %v10356_v35, %v10340_v57 }
 0x892   :  { %10357 = vrcp.f32 %v2169_v33 }
 0x893   :  { %v2204_v39 = vpack.c.bf16 %v2196_v34, %v2196_v34 }
 0x895   :  { %v2222_v43 = vunpack.c.l.b16 %v2204_v39 }
 0x898   :  { %v10358_v38 = vpop.eup %10357 }
 0x899   :  { %v2197_v37 = vmul.f32 %v10358_v38, %v10342_v0  ;;  %v2172_v40 = vpop.xlane.xlu1 %2171 }
 0x89a   :  { %v2184_v41 = vpop.xlane.xlu2 %2183 }
 0x89b   :  { %v2205_v42 = vpack.c.bf16 %v2197_v37, %v2197_v37  ;;  %10359 = vrcp.f32 %v2184_v41 }
 0x89c   :  { %10361 = vrcp.f32 %v2172_v40 }
 0x89d   :  { %v2223_v44 = vunpack.c.l.b16 %v2205_v42 }
 0x89f   :  { %v2224_v45 = vpack.c.b16 %v2223_v44, %v2222_v43 }
 0x8a1   :  { %8406 = vmatmul.msk.bf16.vlgmr.msra.gmra.mxu3 %vm734_vm8, %v2224_v45  ;;  %v2181_v46 = vpop.xlane.xlu1 %2180  ;;  %v10360_v1 = vpop.eup %10359 }
 0x8a2   :  { %v2187_v47 = vpop.xlane.xlu0 %2186  ;;  %v10362_v49 = vpop.eup %10361  ;;  %v2202_v50 = vmul.f32 %v10360_v1, %v10346_v16  ;;  %v10008_v16 = vld [vmem:[%s12722_s5 + $0x38] sm:$0xff]  ;;  %v10270_v1 = vld [vmem:[%s12723_s2] sm:$0xff]  }
 0x8a3   :  { %v2175_v48 = vpop.xlane.xlu2 %2174  ;;  %10363 = vrcp.f32 %v2187_v47  ;;  %v2198_v51 = vmul.f32 %v10362_v49, %v10344_v12  ;;  %2445 = vmatpush.bf16.msrb.mxu2 %v10008_v16 }
 0x8a4   :  { %10365 = vrcp.f32 %v2175_v48  ;;  %v2210_v54 = vpack.c.bf16 %v2202_v50, %v2202_v50  ;;  %v11298_v48 = vunpack.c.l.bf16 %v10270_v1 }
 0x8a5   :  { %10367 = vrcp.f32 %v2181_v46  ;;  %v2206_v57 = vpack.c.bf16 %v2198_v51, %v2198_v51 }
 0x8a6   :  { %v2306_v61 = vunpack.c.l.b16 %v2210_v54  ;;  %v2761_v49 = vmul.f32 %v11298_v48, %v11298_v48 }
 0x8a7   :  { %v2250_v0 = vunpack.c.l.b16 %v2206_v57 }
 0x8a8   :  { %v2763_v51 = vsel %vm93_vm0, %v2761_v49, 0.0  ;;  %v10025_v49 = vld [vmem:[%s12689_s12] sm:$0xff] }
 0x8a9   :  { %v10364_v3 = vpop.eup %10363  ;;  %2764 = vadd.xlane.f32.xlu1 %v2763_v51 }
 0x8aa   :  { %v10366_v53 = vpop.eup %10365  ;;  %v2203_v55 = vmul.f32 %v10364_v3, %v10350_v24  ;;  %v2178_v56 = vpop.xlane.xlu0 %2177 }
 0x8ab   :  { %v10368_v58 = vpop.eup %10367  ;;  %v2199_v52 = vmul.f32 %v10366_v53, %v10352_v26  ;;  %10369 = vrcp.f32 %v2178_v56 }
 0x8ac   :  { %v2211_v59 = vpack.c.bf16 %v2203_v55, %v2203_v55  ;;  %v2201_v62 = vmul.f32 %v10368_v58, %v10348_v22 }
 0x8ad   :  { %v2207_v60 = vpack.c.bf16 %v2199_v52, %v2199_v52 }
 0x8ae   :  { %v2307_v63 = vunpack.c.l.b16 %v2211_v59  ;;  %v2209_v7 = vpack.c.bf16 %v2201_v62, %v2201_v62 }
 0x8af   :  { %v2251_v4 = vunpack.c.l.b16 %v2207_v60 }
 0x8b0   :  { %v2308_v2 = vpack.c.b16 %v2307_v63, %v2306_v61  ;;  %v2279_v10 = vunpack.c.l.b16 %v2209_v7 }
 0x8b1   :  { %v10370_v5 = vpop.eup %10369  ;;  %v2252_v6 = vpack.c.b16 %v2251_v4, %v2250_v0 }
 0x8b2   :  { %v2200_v8 = vmul.f32 %v10370_v5, %v10354_v29  ;;  %8409 = vmatmul.msk.bf16.vlgmr.msra.gmra.mxu2 %vm734_vm8, %v2308_v2 }
 0x8b3   :  { %8407 = vmatmul.msk.bf16.vlgmr.msra.gmra.mxu0 %vm734_vm8, %v2252_v6 }
 0x8b4   :  { %v2208_v9 = vpack.c.bf16 %v2200_v8, %v2200_v8  ;;  %v11315_v8 = vunpack.c.h.bf16 %v10270_v1 }
 0x8b6   :  { %v2278_v11 = vunpack.c.l.b16 %v2208_v9  ;;  %v2762_v14 = vmul.f32 %v11315_v8, %v11315_v8 }
 0x8b8   :  { %v2280_v12 = vpack.c.b16 %v2279_v10, %v2278_v11  ;;  %v2766_v17 = vsel %vm93_vm0, %v2762_v14, 0.0 }
 0x8ba   :  { %8408 = vmatmul.msk.bf16.vlgmr.msra.gmra.mxu1 %vm734_vm8, %v2280_v12 }
 0x924   :  { %v2243_v18 = vpop.f32.mrf.mxu3 }
 0x925   :  { %v2332_v19 = vpack.c.bf16 %v2243_v18, %v2243_v18 }
 0x927   :  { %v2342_v22 = vunpack.c.l.b16 %v2332_v19  ;;  %v10012_v19 = vld [vmem:[%s12686_s9 + $0x38] sm:$0xff] }
 0x928   :  { %2562 = vmatpush.bf16.msra.mxu3 %v10012_v19 }
 0x92c   :  { %v2245_v20 = vpop.f32.mrf.mxu3 }
 0x92d   :  { %v2333_v13 = vpack.c.bf16 %v2245_v20, %v2245_v20  ;;  %v10011_v20 = vld [vmem:[%s12686_s9 + $0x30] sm:$0xff] }
 0x92e   :  { %2563 = vmatpush.bf16.msra.mxu3 %v10011_v20 }
 0x92f   :  { %v2343_v23 = vunpack.c.l.b16 %v2333_v13 }
 0x930   :  { %v2271_v24 = vpop.f32.mrf.mxu0 }
 0x931   :  { %v2344_v25 = vpack.c.b16 %v2343_v23, %v2342_v22  ;;  %v2334_v27 = vpack.c.bf16 %v2271_v24, %v2271_v24  ;;  %v10009_v23 = vld [vmem:[%s12686_s9 + $0x20] sm:$0xff] }
 0x933   :  { %8414 = vmatmul.msk.bf16.vlgmr.msrb.gmra.mxu3 %vm734_vm8, %v2344_v25  ;;  %v2370_v31 = vunpack.c.l.b16 %v2334_v27  ;;  %v2765_v25 = vpop.xlane.xlu1 %2764 }
 0x935   :  { %v2327_v26 = vpop.f32.mrf.mxu2 }
 0x936   :  { %v2338_v35 = vpack.c.bf16 %v2327_v26, %v2327_v26  ;;  %v2769_v26 = vmul.f32 %v2765_v25, %v10759_v21 }
 0x937   :  { %v2299_v28 = vpop.f32.mrf.mxu1 }
 0x938   :  { %v2273_v29 = vpop.f32.mrf.mxu0  ;;  %v2336_v39 = vpack.c.bf16 %v2299_v28, %v2299_v28  ;;  %v2426_v41 = vunpack.c.l.b16 %v2338_v35  ;;  %v2771_v28 = vadd.f32 1e-06, %v2769_v26  ;;  %v10027_v35 = vld [vmem:[%s12689_s12 + $0x10] sm:$0xff] }
 0x939   :  { %v2335_v30 = vpack.c.bf16 %v2273_v29, %v2273_v29 }
 0x93a   :  { %v2398_v44 = vunpack.c.l.b16 %v2336_v39  ;;  %vm2779_vm6 = vweird.f32 %v2771_v28 }
 0x93b   :  { %v2371_v33 = vunpack.c.l.b16 %v2335_v30  ;;  %v10028_v30 = vld [vmem:[%s12689_s12 + $0x18] sm:$0xff] }
 0x93c   :  { %2942 = vmatpush.bf16.msra.mxu2 %v10028_v30 }
 0x93d   :  { %v2372_v34 = vpack.c.b16 %v2371_v33, %v2370_v31  ;;  %v2329_v38 = vpop.f32.mrf.mxu2 }
 0x93e   :  { %v2339_v37 = vpack.c.bf16 %v2329_v38, %v2329_v38 }
 0x93f   :  { %8419 = vmatmul.msk.bf16.vlgmr.msrb.gmra.mxu0 %vm734_vm8, %v2372_v34  ;;  %v2301_v40 = vpop.f32.mrf.mxu1  ;;  %v10032_v34 = vld [vmem:[%s12689_s12 + $0x38] sm:$0xff] }
 0x940   :  { %v2427_v42 = vunpack.c.l.b16 %v2339_v37  ;;  %v2337_v43 = vpack.c.bf16 %v2301_v40, %v2301_v40  ;;  %2943 = vmatpush.bf16.msra.mxu2 %v10027_v35 }
 0x942   :  { %v2428_v45 = vpack.c.b16 %v2427_v42, %v2426_v41  ;;  %v2399_v46 = vunpack.c.l.b16 %v2337_v43  ;;  %v10031_v41 = vld [vmem:[%s12689_s12 + $0x30] sm:$0xff]  ;;  %v10026_v43 = vld [vmem:[%s12689_s12 + $0x8] sm:$0xff] }
 0x944   :  { %v2400_v47 = vpack.c.b16 %v2399_v46, %v2398_v44  ;;  %8429 = vmatmul.msk.bf16.vlgmr.msrb.gmra.mxu2 %vm734_vm8, %v2428_v45  ;;  %v10030_v46 = vld [vmem:[%s12689_s12 + $0x28] sm:$0xff] }
 0x945   :  { %2944 = vmatpush.bf16.msra.mxu2 %v10026_v43  ;;  %v10016_v43 = vld [vmem:[%s12687_s10 + $0x58] sm:$0xff] }
 0x946   :  { %8424 = vmatmul.msk.bf16.vlgmr.msrb.gmra.mxu1 %vm734_vm8, %v2400_v47 }
 0x949   :  { %2945 = vmatpush.bf16.msra.mxu2 %v10025_v49  ;;  %v10014_v49 = vld [vmem:[%s12687_s10 + $0x48] sm:$0xff] }
 0x9b6   :  { %v2363_v3 = vpop.f32.mrf.mxu3 }
 0x9b7   :  { %v2452_v55 = vsel %vm93_vm0, %v2363_v3, 0.0  ;;  %v10040_v3 = vld [vmem:[%s12689_s12 + $0x78] sm:$0xff] }
 0x9b8   :  { %3056 = vmatpush.bf16.msrb.mxu2 %v10040_v3  ;;  %v10047_v3 = vld [vmem:[%s12689_s12 + $0xb0] sm:$0xff] }
 0x9bc   :  { %v2391_v50 = vpop.f32.mrf.mxu0 }
 0x9bd   :  { %v2453_v53 = vsel %vm93_vm0, %v2391_v50, 0.0 }
 0x9be   :  { %v2454_v58 = vadd.f32 %v2453_v53, %v2452_v55  ;;  %v2365_v61 = vpop.f32.mrf.mxu3  ;;  %v10029_v55 = vld [vmem:[%s12689_s12 + $0x20] sm:$0xff] }
 0x9bf   :  { %v2459_v2 = vsel %vm93_vm0, %v2365_v61, 0.0  ;;  %v10039_v61 = vld [vmem:[%s12689_s12 + $0x70] sm:$0xff] }
 0x9c0   :  { %3057 = vmatpush.bf16.msrb.mxu2 %v10039_v61  ;;  %v10070_v61 = vld [vmem:[%s12689_s12 + $0x168] sm:$0xff] }
 0x9c3   :  { %v2419_v54 = vpop.f32.mrf.mxu1 }
 0x9c4   :  { %v2455_v56 = vsel %vm93_vm0, %v2419_v54, 0.0  ;;  %v2393_v57 = vpop.f32.mrf.mxu0 }
 0x9c5   :  { %v2456_v52 = vadd.f32 %v2455_v56, %v2454_v58  ;;  %v2460_v63 = vsel %vm93_vm0, %v2393_v57, 0.0 }
 0x9c6   :  { %v2461_v6 = vadd.f32 %v2460_v63, %v2459_v2 }
 0x9c7   :  { %v2447_v59 = vpop.f32.mrf.mxu2 }
 0x9c8   :  { %v2457_v60 = vsel %vm93_vm0, %v2447_v59, 0.0 }
 0x9c9   :  { %v2458_v62 = vadd.f32 %v2457_v60, %v2456_v52 }
 0x9cb   :  { %v11309_v0 = vadd.f32 %v2458_v62, %v11049_v32  ;;  %v2421_v4 = vpop.f32.mrf.mxu1 }
 0x9cc   :  { %v2462_v5 = vsel %vm93_vm0, %v2421_v4, 0.0 }
 0x9cd   :  { %v2493_v7 = vmul.f32 %v11309_v0, %v11309_v0  ;;  %v2463_v9 = vadd.f32 %v2462_v5, %v2461_v6 }
 0x9cf   :  { %v2449_v10 = vpop.f32.mrf.mxu2  ;;  %v2495_v11 = vsel %vm93_vm0, %v2493_v7, 0.0 }
 0x9d0   :  { %v2464_v12 = vsel %vm93_vm0, %v2449_v10, 0.0  ;;  %2496 = vadd.xlane.f32.xlu2 %v2495_v11  ;;  %v10020_v10 = vld [vmem:[%s12687_s10 + $0x78] sm:$0xff] }
 0x9d1   :  { %v2465_v32 = vadd.f32 %v2464_v12, %v2463_v9  ;;  %v10284_v9 = vld [vmem:[%s12688_s11] ss:$0 sm:$0xff]  ;;  %2623 = vmatpush.bf16.msra.mxu1 %v10020_v10 }
 0x9d3   :  { %v11322_v15 = vadd.f32 %v2465_v32, %v11055_v36  ;;  %v10010_v36 = vld [vmem:[%s12686_s9 + $0x28] sm:$0xff] }
 0x9d4   :  { %2564 = vmatpush.bf16.msra.mxu3 %v10010_v36  ;;  %v10038_v32 = vld [vmem:[%s12689_s12 + $0x68] sm:$0xff] }
 0x9d5   :  { %v2494_v16 = vmul.f32 %v11322_v15, %v11322_v15  ;;  %3058 = vmatpush.bf16.msrb.mxu2 %v10038_v32 }
 0x9d7   :  { %v2498_v18 = vsel %vm93_vm0, %v2494_v16, 0.0 }
 0x9d8   :  { %2499 = vadd.xlane.f32.xlu0 %v2498_v18  ;;  %2767 = vadd.xlane.f32.xlu2 %v2766_v17  ;;  %v10019_v17 = vld [vmem:[%s12687_s10 + $0x70] sm:$0xff]  ;;  %v10283_v18 = vld [vmem:[%s12720_s1 + $0x3] ss:$0 sm:$0xff] }
 0x9d9   :  { %2565 = vmatpush.bf16.msra.mxu3 %v10009_v23  ;;  %2624 = vmatpush.bf16.msra.mxu1 %v10019_v17 }
 0x9dd   :  { %2980 = vmatpush.bf16.msrb.mxu3 %v10032_v34 }
 0x9e1   :  { %2981 = vmatpush.bf16.msrb.mxu3 %v10031_v41 }
 0x9e5   :  { %2982 = vmatpush.bf16.msrb.mxu3 %v10030_v46  ;;  %v10054_v46 = vld [vmem:[%s12689_s12 + $0xe8] sm:$0xff] }
 0x9e9   :  { %2983 = vmatpush.bf16.msrb.mxu3 %v10029_v55 }
 0xa43   :  { %v2497_v13 = vpop.xlane.xlu2 %2496 }
 0xa44   :  { %v2501_v22 = vmul.f32 %v2497_v13, %v10759_v21 }
 0xa46   :  { %v2503_v24 = vadd.f32 1e-06, %v2501_v22 }
 0xa48   :  { %10371 = vrsqrt.f32 %v2503_v24  ;;  %vm2511_vm10 = vweird.f32 %v2503_v24 }
 0xa49   :  { %10373 = vrsqrt.f32 %v2771_v28 }
 0xa4b   :  { %v2500_v27 = vpop.xlane.xlu0 %2499  ;;  %v2768_v29 = vpop.xlane.xlu2 %2767 }
 0xa4c   :  { %v2502_v31 = vmul.f32 %v2500_v27, %v10759_v21  ;;  %v2770_v33 = vmul.f32 %v2768_v29, %v10759_v21  ;;  %v10018_v27 = vld [vmem:[%s12687_s10 + $0x68] sm:$0xff] }
 0xa4d   :  { %2625 = vmatpush.bf16.msra.mxu1 %v10018_v27 }
 0xa4e   :  { %v11353_v38 = vpop.eup %10371  ;;  %v11355_v39 = vadd.f32 1e-06, %v2502_v31  ;;  %v2772_v37 = vadd.f32 1e-06, %v2770_v33  ;;  %v10044_v31 = vld [vmem:[%s12689_s12 + $0x98] sm:$0xff] }
 0xa4f   :  { %v2506_v40 = vmul.f32 %v11353_v38, %v2503_v24  ;;  %v10374_v44 = vpop.eup %10373  ;;  %vm2512_vm9 = vweird.f32 %v11353_v38  ;;  %v10037_v24 = vld [vmem:[%s12689_s12 + $0x60] sm:$0xff] }
 0xa50   :  { %10375 = vrsqrt.f32 %v11355_v39  ;;  %v2774_v47 = vmul.f32 %v10374_v44, %v2771_v28  ;;  %vm2780_vm7 = vweird.f32 %v10374_v44  ;;  %vm11388_vm12 = vmor %vm2511_vm10, %vm2512_vm9  ;;  %vm2789_vm13 = vweird.f32 %v2772_v37  ;;  %3059 = vmatpush.bf16.msrb.mxu2 %v10037_v24 }
 0xa51   :  { %v2507_v42 = vmul.f32 %v11353_v38, %v2506_v40  ;;  %10377 = vrsqrt.f32 %v2772_v37  ;;  %vm11384_vm11 = vmor %vm2779_vm6, %vm2780_vm7  ;;  %vm2521_vm1 = vweird.f32 %v11355_v39  ;;  %v10056_v40 = vld [vmem:[%s12689_s12 + $0xf8] sm:$0xff] }
 0xa52   :  { %v2775_v51 = vmul.f32 %v10374_v44, %v2774_v47  ;;  %v10053_v47 = vld [vmem:[%s12689_s12 + $0xe0] sm:$0xff] }
 0xa53   :  { %v2508_v45 = vmul.f32 0.5, %v2507_v42  ;;  %v10042_v42 = vld [vmem:[%s12689_s12 + $0x88] sm:$0xff] }
 0xa54   :  { %v2776_v56 = vmul.f32 0.5, %v2775_v51  ;;  %v10048_v51 = vld [vmem:[%s12689_s12 + $0xb8] sm:$0xff] }
 0xa55   :  { %v2509_v1 = vsub.f32 1.5, %v2508_v45  ;;  %v10041_v45 = vld [vmem:[%s12689_s12 + $0x80] sm:$0xff]  ;;  %3132 = vmatpush.bf16.msra.mxu0 %v10048_v51 }
 0xa56   :  { %v10376_v50 = vpop.eup %10375  ;;  %v2777_v59 = vsub.f32 1.5, %v2776_v56  ;;  %v10060_v56 = vld [vmem:[%s12689_s12 + $0x118] sm:$0xff] }
 0xa57   :  { %v10378_v53 = vpop.eup %10377  ;;  %v2516_v54 = vmul.f32 %v10376_v50, %v11355_v39  ;;  %v2510_v57 = vmul.f32 %v11353_v38, %v2509_v1  ;;  %vm2522_vm15 = vweird.f32 %v10376_v50  ;;  %v10015_v1 = vld [vmem:[%s12687_s10 + $0x50] sm:$0xff] }
 0xa58   :  { %v2784_v58 = vmul.f32 %v10378_v53, %v2772_v37  ;;  %v2778_v2 = vmul.f32 %v10374_v44, %v2777_v59  ;;  %vm2790_vm14 = vweird.f32 %v10378_v53  ;;  %vm2523_vm3 = vmor %vm2521_vm1, %vm2522_vm15  ;;  %v10043_v37 = vld [vmem:[%s12689_s12 + $0x90] sm:$0xff] }
 0xa59   :  { %v2517_v52 = vmul.f32 %v10376_v50, %v2516_v54  ;;  %v2514_v6 = vsel %vm11388_vm12, %v11353_v38, %v2510_v57  ;;  %vm2791_vm2 = vmor %vm2789_vm13, %vm2790_vm14  ;;  %v10017_v38 = vld [vmem:[%s12687_s10 + $0x60] sm:$0xff]  ;;  %3133 = vmatpush.bf16.msra.mxu0 %v10047_v3  ;;  %v10059_v57 = vld [vmem:[%s12689_s12 + $0x110] sm:$0xff] }
 0xa5a   :  { %v2785_v60 = vmul.f32 %v10378_v53, %v2784_v58  ;;  %v2782_v11 = vsel %vm11384_vm11, %v10374_v44, %v2778_v2  ;;  %v2525_v19 = vmul.f32 %v2514_v6, %v11309_v0  ;;  %2626 = vmatpush.bf16.msra.mxu1 %v10017_v38  ;;  %v10055_v44 = vld [vmem:[%s12689_s12 + $0xf0] sm:$0xff]  ;;  %v10045_v54 = vld [vmem:[%s12689_s12 + $0xa0] sm:$0xff]  ;;  %v10072_v58 = vld [vmem:[%s12689_s12 + $0x178] sm:$0xff]  ;;  %vm2682_vm11 = vcmask 1040384  }
 0xa5b   :  { %v2518_v62 = vmul.f32 0.5, %v2517_v52  ;;  %v2793_v16 = vmul.f32 %v11298_v48, %v2782_v11  ;;  %v10071_v52 = vld [vmem:[%s12689_s12 + $0x170] sm:$0xff]  ;;  %v10057_v2 = vld [vmem:[%s12689_s12 + $0x100] sm:$0xff] }
 0xa5c   :  { %v2786_v5 = vmul.f32 0.5, %v2785_v60  ;;  %v2528_v28 = vmul.f32 %v10283_v18, %v2525_v19  ;;  %v10058_v60 = vld [vmem:[%s12689_s12 + $0x108] sm:$0xff] }
 0xa5d   :  { %v2519_v7 = vsub.f32 1.5, %v2518_v62  ;;  %v2796_v13 = vmul.f32 %v10284_v9, %v2793_v16 }
 0xa5e   :  { %v2787_v12 = vsub.f32 1.5, %v2786_v5  ;;  %2627 = vmatpush.bf16.msra.mxu1 %v10016_v43  ;;  %v10069_v5 = vld [vmem:[%s12689_s12 + $0x160] sm:$0xff]  ;;  %v10063_v43 = vld [vmem:[%s12689_s12 + $0x130] sm:$0xff] }
 0xa5f   :  { %v2520_v14 = vmul.f32 %v10376_v50, %v2519_v7  ;;  %v2798_v25 = vpack.c.bf16 %v2796_v13, %v2796_v13 }
 0xa60   :  { %v2788_v20 = vmul.f32 %v10378_v53, %v2787_v12 }
 0xa61   :  { %v2524_v36 = vsel %vm2523_vm3, %v10376_v50, %v2520_v14  ;;  %v2908_v35 = vunpack.c.l.b16 %v2798_v25  ;;  %v10013_v50 = vld [vmem:[%s12687_s10 + $0x40] sm:$0xff] }
 0xa62   :  { %v2526_v22 = vmul.f32 %v2524_v36, %v11322_v15  ;;  %v2792_v23 = vsel %vm2791_vm2, %v10378_v53, %v2788_v20  ;;  %2628 = vmatpush.bf16.msra.mxu1 %v10015_v1  ;;  %v10046_v53 = vld [vmem:[%s12689_s12 + $0xa8] sm:$0xff] }
 0xa63   :  { %v2794_v26 = vmul.f32 %v11315_v8, %v2792_v23  ;;  %3134 = vmatpush.bf16.msra.mxu0 %v10046_v53 }
 0xa64   :  { %v2529_v29 = vmul.f32 %v10283_v18, %v2526_v22 }
 0xa65   :  { %v2797_v30 = vmul.f32 %v10284_v9, %v2794_v26 }
 0xa66   :  { %v2530_v33 = vpack.c.bf16 %v2529_v29, %v2528_v28  ;;  %2629 = vmatpush.bf16.msra.mxu1 %v10014_v49 }
 0xa67   :  { %v2799_v34 = vpack.c.bf16 %v2797_v30, %v2797_v30  ;;  %3135 = vmatpush.bf16.msra.mxu0 %v10045_v54 }
 0xa68   :  { %8446 = vmatmul.msk.bf16.vlgmr.msra.gmra.mxu3 %vm93_vm0, %v2530_v33 }
 0xa69   :  { %v2909_v39 = vunpack.c.l.b16 %v2799_v34  ;;  %3094 = vmatpush.bf16.msra.mxu3 %v10044_v31 }
 0xa6a   :  { %2630 = vmatpush.bf16.msra.mxu1 %v10013_v50 }
 0xa6b   :  { %v11437_v41 = vpack.c.b16 %v2909_v39, %v2908_v35 }
 0xa6d   :  { %8576 = vmatmul.msk.bf16.vlgmr.msra.gmra.mxu2 %vm93_vm0, %v11437_v41  ;;  %3095 = vmatpush.bf16.msra.mxu3 %v10043_v37 }
 0xa6e   :  { %3208 = vmatpush.bf16.msra.mxu2 %v10056_v40  ;;  %8661 = vmatmul.msk.bf16.vlgmr.msra.gmra.mxu0 %vm93_vm0, %v11437_v41 }
 0xa71   :  { %3096 = vmatpush.bf16.msra.mxu3 %v10042_v42  ;;  %v10064_v42 = vld [vmem:[%s12689_s12 + $0x138] sm:$0xff] }
 0xa72   :  { %3209 = vmatpush.bf16.msra.mxu2 %v10055_v44  ;;  %3284 = vmatpush.bf16.msrb.mxu0 %v10064_v42  ;;  %v10062_v44 = vld [vmem:[%s12689_s12 + $0x128] sm:$0xff] }
 0xa75   :  { %3097 = vmatpush.bf16.msra.mxu3 %v10041_v45  ;;  %v10061_v45 = vld [vmem:[%s12689_s12 + $0x120] sm:$0xff] }
 0xa76   :  { %3210 = vmatpush.bf16.msra.mxu2 %v10054_v46  ;;  %3285 = vmatpush.bf16.msrb.mxu0 %v10063_v43 }
 0xa78   :  { %8593 = vmatmul.msk.bf16.vlgmr.msrb.gmra.mxu3 %vm93_vm0, %v11437_v41 }
 0xa79   :  { %3246 = vmatpush.bf16.msrb.mxu3 %v10060_v56 }
 0xa7a   :  { %3211 = vmatpush.bf16.msra.mxu2 %v10053_v47  ;;  %3286 = vmatpush.bf16.msrb.mxu0 %v10062_v44 }
 0xa7d   :  { %8627 = vmatmul.msk.bf16.vlgmr.msrb.gmra.mxu2 %vm93_vm0, %v11437_v41  ;;  %3247 = vmatpush.bf16.msrb.mxu3 %v10059_v57 }
 0xa7e   :  { %3360 = vmatpush.bf16.msrb.mxu2 %v10072_v58  ;;  %3287 = vmatpush.bf16.msrb.mxu0 %v10061_v45  ;;  %v10034_v45 = vld [vmem:[%s12689_s12 + $0x48] sm:$0xff] }
 0xa81   :  { %3248 = vmatpush.bf16.msrb.mxu3 %v10058_v60  ;;  %8729 = vmatmul.msk.bf16.vlgmr.msrb.gmra.mxu0 %vm93_vm0, %v11437_v41 }
 0xa82   :  { %3361 = vmatpush.bf16.msrb.mxu2 %v10071_v52 }
 0xa85   :  { %3249 = vmatpush.bf16.msrb.mxu3 %v10057_v2 }
 0xa86   :  { %3362 = vmatpush.bf16.msrb.mxu2 %v10070_v61 }
 0xa88   :  { %8644 = vmatmul.msk.bf16.vlgmr.msra.gmra.mxu3 %vm93_vm0, %v11437_v41 }
 0xa8a   :  { %3363 = vmatpush.bf16.msrb.mxu2 %v10069_v5 }
 0xa8d   :  { %8695 = vmatmul.msk.bf16.vlgmr.msra.gmra.mxu2 %vm93_vm0, %v11437_v41 }
 0xa98   :  { %8712 = vmatmul.msk.bf16.vlgmr.msrb.gmra.mxu3 %vm93_vm0, %v11437_v41 }
 0xa9d   :  { %8763 = vmatmul.msk.bf16.vlgmr.msrb.gmra.mxu2 %vm93_vm0, %v11437_v41 }
 0xaeb   :  { %v2567_v55 = vpop.f32.mrf.mxu3  ;;  %v3137_v54 = vpop.f32.mrf.mxu0 }
 0xaec   :  { %v2572_v62 = vmax.f32 %v2567_v55, 0.0 }
 0xaf0   :  { %v2947_v6 = vpop.f32.mrf.mxu2 }
 0xaf1   :  { %v3370_v25 = vpack.c.bf16 %v2947_v6, %v2947_v6 }
 0xaf3   :  { %v2569_v59 = vpop.f32.mrf.mxu3  ;;  %v3388_v31 = vunpack.c.l.b16 %v3370_v25  ;;  %v3139_v55 = vpop.f32.mrf.mxu0  ;;  %v10021_v25 = vld [vmem:[%s12698_s21] sm:$0xff] }
 0xaf4   :  { %v2573_v63 = vmax.f32 %v2569_v59, 0.0  ;;  %v3381_v56 = vpack.c.bf16 %v3139_v55, %v3139_v55 }
 0xaf6   :  { %v2574_v4 = vpack.c.bf16 %v2573_v63, %v2572_v62  ;;  %v3424_v57 = vunpack.c.l.b16 %v3381_v56  ;;  %v10285_v56 = vld [vmem:[%s12695_s18] ss:$0 sm:$0xff] }
 0xaf8   :  { %2631 = vmatmul.bf16.vlgmr.msra.gmra.mxu1 %v2574_v4  ;;  %v2949_v7 = vpop.f32.mrf.mxu2 }
 0xaf9   :  { %v3371_v26 = vpack.c.bf16 %v2949_v7, %v2949_v7  ;;  %v2742_v7 = vld [vmem:[%s12728_s6] sm:$0xff] }
 0xafb   :  { %v2985_v9 = vpop.f32.mrf.mxu3  ;;  %v3389_v33 = vunpack.c.l.b16 %v3371_v26 }
 0xafc   :  { %v3372_v52 = vpack.c.bf16 %v2985_v9, %v2985_v9 }
 0xafd   :  { %v3390_v37 = vpack.c.b16 %v3389_v33, %v3388_v31  ;;  %v10036_v31 = vld [vmem:[%s12689_s12 + $0x58] sm:$0xff] }
 0xafe   :  { %v3418_v61 = vunpack.c.l.b16 %v3372_v52 }
 0xb00   :  { %v3061_v10 = vpop.f32.mrf.mxu2 }
 0xb01   :  { %v3376_v27 = vpack.c.bf16 %v3061_v10, %v3061_v10 }
 0xb03   :  { %v2987_v11 = vpop.f32.mrf.mxu3  ;;  %v3478_v35 = vunpack.c.l.b16 %v3376_v27 }
 0xb04   :  { %v3373_v59 = vpack.c.bf16 %v2987_v11, %v2987_v11  ;;  %v10024_v11 = vld [vmem:[%s12698_s21 + $0x18] sm:$0xff] }
 0xb05   :  { %2728 = vmatpush.bf16.msrb.mxu1 %v10024_v11  ;;  %v10050_v11 = vld [vmem:[%s12689_s12 + $0xc8] sm:$0xff] }
 0xb06   :  { %v3419_v62 = vunpack.c.l.b16 %v3373_v59 }
 0xb08   :  { %v3063_v12 = vpop.f32.mrf.mxu2  ;;  %v3420_v63 = vpack.c.b16 %v3419_v62, %v3418_v61 }
 0xb09   :  { %v3377_v28 = vpack.c.bf16 %v3063_v12, %v3063_v12 }
 0xb0b   :  { %v3099_v32 = vpop.f32.mrf.mxu3  ;;  %v3479_v34 = vunpack.c.l.b16 %v3377_v28 }
 0xb0c   :  { %v3378_v18 = vpack.c.bf16 %v3099_v32, %v3099_v32 }
 0xb0d   :  { %v3480_v40 = vpack.c.b16 %v3479_v34, %v3478_v35 }
 0xb0e   :  { %v3393_v13 = vunpack.c.l.b16 %v3378_v18 }
 0xb10   :  { %v3213_v14 = vpop.f32.mrf.mxu2 }
 0xb11   :  { %v3384_v19 = vpack.c.bf16 %v3213_v14, %v3213_v14  ;;  %v10023_v14 = vld [vmem:[%s12698_s21 + $0x10] sm:$0xff] }
 0xb12   :  { %2729 = vmatpush.bf16.msrb.mxu1 %v10023_v14  ;;  %v10068_v14 = vld [vmem:[%s12689_s12 + $0x158] sm:$0xff] }
 0xb13   :  { %v3101_v16 = vpop.f32.mrf.mxu3  ;;  %v3483_v22 = vunpack.c.l.b16 %v3384_v19  ;;  %v10022_v19 = vld [vmem:[%s12698_s21 + $0x8] sm:$0xff] }
 0xb14   :  { %v3379_v20 = vpack.c.bf16 %v3101_v16, %v3101_v16 }
 0xb16   :  { %v3394_v23 = vunpack.c.l.b16 %v3379_v20  ;;  %2730 = vmatpush.bf16.msrb.mxu1 %v10022_v19 }
 0xb18   :  { %v3215_v17 = vpop.f32.mrf.mxu2  ;;  %v3395_v29 = vpack.c.b16 %v3394_v23, %v3393_v13 }
 0xb19   :  { %v3385_v36 = vpack.c.bf16 %v3215_v17, %v3215_v17  ;;  %v2749_v17 = vld [vmem:[%s12728_s6 + $0x38] sm:$0xff] }
 0xb1a   :  { %v3400_v38 = vsel %vm734_vm8, %v3395_v29, 0  ;;  %2731 = vmatpush.bf16.msrb.mxu1 %v10021_v25 }
 0xb1b   :  { %v3484_v24 = vunpack.c.l.b16 %v3385_v36  ;;  %3409 = vmatpush.bf16.xpose.msra.mxu3 %v3400_v38  ;;  %v3251_v4 = vpop.f32.mrf.mxu3  ;;  %v10035_v38 = vld [vmem:[%s12689_s12 + $0x50] sm:$0xff] }
 0xb1d   :  { %v3485_v30 = vpack.c.b16 %v3484_v24, %v3483_v22  ;;  %v3602_v22 = vpack.c.bf16 %v3251_v4, %v3251_v4 }
 0xb1e   :  { %3018 = vmatpush.bf16.msra.mxu1 %v10036_v31 }
 0xb1f   :  { %v3490_v39 = vsel %vm734_vm8, %v3485_v30, 0  ;;  %v3617_v26 = vunpack.c.l.b16 %v3602_v22 }
 0xb20   :  { %3499 = vmatpush.bf16.xpose.msra.mxu2 %v3490_v39  ;;  %v3365_v2 = vpop.f32.mrf.mxu2 }
 0xb21   :  { %v3608_v23 = vpack.c.bf16 %v3365_v2, %v3365_v2 }
 0xb22   :  { %8764 = vmatmul.msk.bf16.vlgmr.msra.gmra.mxu3 %vm734_vm8, %v3390_v37  ;;  %3019 = vmatpush.bf16.msra.mxu1 %v10035_v38 }
 0xb23   :  { %v3253_v5 = vpop.f32.mrf.mxu3  ;;  %v3701_v27 = vunpack.c.l.b16 %v3608_v23 }
 0xb24   :  { %v3603_v28 = vpack.c.bf16 %v3253_v5, %v3253_v5 }
 0xb26   :  { %v3618_v35 = vunpack.c.l.b16 %v3603_v28  ;;  %3020 = vmatpush.bf16.msra.mxu1 %v10034_v45 }
 0xb27   :  { %8767 = vmatmul.msk.bf16.vlgmr.msra.gmra.mxu2 %vm734_vm8, %v3480_v40 }
 0xb28   :  { %v3367_v6 = vpop.f32.mrf.mxu2  ;;  %v3619_v40 = vpack.c.b16 %v3618_v35, %v3617_v26 }
 0xb29   :  { %v3609_v29 = vpack.c.bf16 %v3367_v6, %v3367_v6 }
 0xb2a   :  { %3631 = vmatpush.bf16.msrb.mxu3 %v3619_v40 }
 0xb2b   :  { %v3702_v34 = vunpack.c.l.b16 %v3609_v29  ;;  %v2743_v29 = vld [vmem:[%s12728_s6 + $0x8] sm:$0xff] }
 0xb2d   :  { %v3703_v42 = vpack.c.b16 %v3702_v34, %v3701_v27 }
 0xb2f   :  { %3715 = vmatpush.bf16.msrb.mxu2 %v3703_v42 }
 0xb75   :  { %v2632_v46 = vpop.f32.mrf.mxu1 }
 0xb76   :  { %v11537_v47 = vadd.f32 %v2632_v46, %v11309_v0  ;;  %v3380_v0 = vpack.c.bf16 %v3137_v54, %v3137_v54 }
 0xb78   :  { %v2640_v1 = vmul.f32 %v11537_v47, %v11537_v47  ;;  %v3423_v58 = vunpack.c.l.b16 %v3380_v0 }
 0xb7a   :  { %v2642_v49 = vsel %vm93_vm0, %v2640_v1, 0.0  ;;  %v3425_v60 = vpack.c.b16 %v3424_v57, %v3423_v58 }
 0xb7b   :  { %2643 = vadd.xlane.f32.xlu1 %v2642_v49  ;;  %v10033_v49 = vld [vmem:[%s12689_s12 + $0x40] sm:$0xff] }
 0xb7c   :  { %3021 = vmatpush.bf16.msra.mxu1 %v10033_v49 }
 0xb7d   :  { %v2634_v50 = vpop.f32.mrf.mxu1 }
 0xb7e   :  { %v11543_v51 = vadd.f32 %v2634_v50, %v11322_v15  ;;  %v3430_v15 = vsel %vm734_vm8, %v3425_v60, 0 }
 0xb7f   :  { %3439 = vmatpush.bf16.xpose.msra.mxu0 %v3430_v15 }
 0xb80   :  { %v2641_v3 = vmul.f32 %v11543_v51, %v11543_v51 }
 0xb82   :  { %v2645_v53 = vsel %vm93_vm0, %v2641_v3, 0.0 }
 0xb83   :  { %2646 = vadd.xlane.f32.xlu0 %v2645_v53 }
 0xb86   :  { %8765 = vmatmul.msk.bf16.vlgmr.msra.gmra.mxu0 %vm734_vm8, %v3420_v63 }
 0xba5   :  { %v3411_v10 = vpop.f32.mrf.mxu3 }
 0xba6   :  { %v11558_v12 = vadd.f32 %v3411_v10, %v2742_v7 }
 0xba8   :  { %v3506_v32 = vsel %vm734_vm8, %v11558_v12, -inf }
 0xba9   :  { %3507 = vmax.xlane.f32.xlu2 %v3506_v32  ;;  %v10049_v32 = vld [vmem:[%s12689_s12 + $0xc0] sm:$0xff] }
 0xbaa   :  { %v11553_v9 = vpop.f32.mrf.mxu2 }
 0xbb2   :  { %v3503_v18 = vpop.f32.mrf.mxu2 }
 0xbb3   :  { %v11572_v36 = vadd.f32 %v3503_v18, %v2749_v17  ;;  %v10067_v17 = vld [vmem:[%s12689_s12 + $0x150] sm:$0xff]  ;;  %v10066_v18 = vld [vmem:[%s12689_s12 + $0x148] sm:$0xff] }
 0xbb5   :  { %v3527_v24 = vsel %vm734_vm8, %v11572_v36, -inf }
 0xbb6   :  { %3528 = vmax.xlane.f32.xlu2 %v3527_v24  ;;  %v2748_v24 = vld [vmem:[%s12728_s6 + $0x30] sm:$0xff] }
 0xbb7   :  { %v11630_v26 = vadd.f32 %v11553_v9, %v2748_v24  ;;  %v2744_v9 = vld [vmem:[%s12728_s6 + $0x10] sm:$0xff] }
 0xbb9   :  { %v3524_v28 = vsel %vm734_vm8, %v11630_v26, -inf }
 0xbba   :  { %3525 = vmax.xlane.f32.xlu1 %v3524_v28 }
 0xbee   :  { %v2644_v16 = vpop.xlane.xlu1 %2643 }
 0xbef   :  { %v2648_v20 = vmul.f32 %v2644_v16, %v10759_v21  ;;  %v3289_v16 = vpop.f32.mrf.mxu0 }
 0xbf0   :  { %v3604_v19 = vpack.c.bf16 %v3289_v16, %v3289_v16 }
 0xbf1   :  { %v2650_v13 = vadd.f32 1e-06, %v2648_v20 }
 0xbf2   :  { %v3645_v22 = vunpack.c.l.b16 %v3604_v19 }
 0xbf3   :  { %10379 = vrsqrt.f32 %v2650_v13  ;;  %vm2658_vm5 = vweird.f32 %v2650_v13 }
 0xbf6   :  { %v2647_v30 = vpop.xlane.xlu0 %2646 }
 0xbf7   :  { %v2649_v33 = vmul.f32 %v2647_v30, %v10759_v21  ;;  %v3291_v20 = vpop.f32.mrf.mxu0  ;;  %v3413_v30 = vpop.f32.mrf.mxu3 }
 0xbf8   :  { %v3605_v23 = vpack.c.bf16 %v3291_v20, %v3291_v20  ;;  %v3414_v31 = vadd.f32 %v3413_v30, %v2743_v29  ;;  %v2746_v20 = vld [vmem:[%s12728_s6 + $0x20] sm:$0xff] }
 0xbf9   :  { %v10380_v39 = vpop.eup %10379  ;;  %v2651_v37 = vadd.f32 1e-06, %v2649_v33 }
 0xbfa   :  { %v2653_v43 = vmul.f32 %v10380_v39, %v2650_v13  ;;  %vm2659_vm4 = vweird.f32 %v10380_v39  ;;  %v10065_v13 = vld [vmem:[%s12689_s12 + $0x140] sm:$0xff]  ;;  %v3646_v25 = vunpack.c.l.b16 %v3605_v23  ;;  %v3509_v33 = vsel %vm734_vm8, %v3414_v31, -inf }
 0xbfb   :  { %10381 = vrsqrt.f32 %v2651_v37  ;;  %vm2660_vm6 = vmor %vm2658_vm5, %vm2659_vm4  ;;  %vm2668_vm9 = vweird.f32 %v2651_v37  ;;  %3510 = vmax.xlane.f32.xlu0 %v3509_v33 }
 0xbfc   :  { %v2654_v44 = vmul.f32 %v10380_v39, %v2653_v43  ;;  %v3647_v27 = vpack.c.b16 %v3646_v25, %v3645_v22 }
 0xbfe   :  { %v2655_v46 = vmul.f32 0.5, %v2654_v44  ;;  %3659 = vmatpush.bf16.msrb.mxu0 %v3647_v27 }
 0xc00   :  { %v2656_v1 = vsub.f32 1.5, %v2655_v46 }
 0xc01   :  { %v10382_v50 = vpop.eup %10381 }
 0xc02   :  { %v2657_v3 = vmul.f32 %v10380_v39, %v2656_v1  ;;  %v2663_v53 = vmul.f32 %v10382_v50, %v2651_v37  ;;  %vm2669_vm7 = vweird.f32 %v10382_v50 }
 0xc03   :  { %vm2670_vm10 = vmor %vm2668_vm9, %vm2669_vm7  ;;  %v3441_v35 = vpop.f32.mrf.mxu0 }
 0xc04   :  { %v2661_v54 = vsel %vm2660_vm6, %v10380_v39, %v2657_v3  ;;  %v2664_v55 = vmul.f32 %v10382_v50, %v2663_v53  ;;  %v11645_v34 = vadd.f32 %v3441_v35, %v2744_v9  ;;  %v2745_v39 = vld [vmem:[%s12728_s6 + $0x18] sm:$0xff]  ;;  %v10286_v53 = vld [vmem:[%s12699_s22] ss:$0 sm:$0xff] }
 0xc05   :  { %v2672_v58 = vmul.f32 %v2661_v54, %v11537_v47  ;;  %v10052_v47 = vld [vmem:[%s12689_s12 + $0xd8] sm:$0xff] }
 0xc06   :  { %v2665_v0 = vmul.f32 0.5, %v2664_v55  ;;  %v3512_v38 = vsel %vm734_vm8, %v11645_v34, -inf }
 0xc07   :  { %v2677_v59 = vmul.f32 %v10285_v56, %v2672_v58  ;;  %3513 = vmax.xlane.f32.xlu0 %v3512_v38 }
 0xc08   :  { %v2666_v57 = vsub.f32 1.5, %v2665_v0 }
 0xc09   :  { %v2758_v62 = vpack.c.bf16 %v2677_v59, %v2677_v59 }
 0xc0a   :  { %v2667_v52 = vmul.f32 %v10382_v50, %v2666_v57 }
 0xc0b   :  { %v4166_v2 = vunpack.c.l.b16 %v2758_v62  ;;  %v3443_v42 = vpop.f32.mrf.mxu0 }
 0xc0c   :  { %v2671_v60 = vsel %vm2670_vm10, %v10382_v50, %v2667_v52 }
 0xc0d   :  { %v2673_v61 = vmul.f32 %v2671_v60, %v11543_v51  ;;  %v10051_v51 = vld [vmem:[%s12689_s12 + $0xd0] sm:$0xff] }
 0xc0f   :  { %v2678_v15 = vmul.f32 %v10285_v56, %v2673_v61 }
 0xc11   :  { %v2680_v63 = vrot.slane %v2678_v15, 7  ;;  %v2759_v4 = vpack.c.bf16 %v2678_v15, %v2678_v15 }
 0xc13   :  { %v4167_v5 = vunpack.c.l.b16 %v2759_v4  ;;  %v2683_v6 = vsel %vm2682_vm11, %v2677_v59, %v2680_v63 }
 0xc14   :  { %v2684_v7 = vpack.c.bf16 %v2683_v6, %v2683_v6 }
 0xc15   :  { %v11600_v10 = vpack.c.b16 %v4167_v5, %v4166_v2 }
 0xc16   :  { %8495 = vmatmul.msk.bf16.vlgmr.msrb.gmra.mxu1 %vm93_vm0, %v2684_v7 }
 0xc17   :  { %3170 = vmatpush.bf16.msrb.mxu1 %v10052_v47 }
 0xc1b   :  { %3171 = vmatpush.bf16.msrb.mxu1 %v10051_v51 }
 0xc1c   :  { %v3508_v37 = vpop.xlane.xlu2 %3507 }
 0xc1d   :  { %v3530_v40 = vsub.f32 %v11558_v12, %v3508_v37 }
 0xc1f   :  { %3172 = vmatpush.bf16.msrb.mxu1 %v10050_v11  ;;  %v3538_v43 = vmul.f32 1.442695, %v3530_v40 }
 0xc21   :  { %10383 = vpow2.f32 %v3538_v43 }
 0xc23   :  { %3173 = vmatpush.bf16.msrb.mxu1 %v10049_v32 }
 0xc26   :  { %8610 = vmatmul.msk.bf16.vlgmr.msra.gmra.mxu1 %vm93_vm0, %v11437_v41 }
 0xc27   :  { %3322 = vmatpush.bf16.msra.mxu1 %v10068_v14  ;;  %v11658_v1 = vpop.eup %10383 }
 0xc28   :  { %v3554_v50 = vsel %vm734_vm8, %v11658_v1, 0.0 }
 0xc29   :  { %v3529_v45 = vpop.xlane.xlu2 %3528 }
 0xc2a   :  { %v3537_v46 = vsub.f32 %v11572_v36, %v3529_v45 }
 0xc2b   :  { %3323 = vmatpush.bf16.msra.mxu1 %v10067_v17 }
 0xc2c   :  { %v3552_v49 = vmul.f32 1.442695, %v3537_v46 }
 0xc2e   :  { %10385 = vpow2.f32 %v3552_v49 }
 0xc2f   :  { %3324 = vmatpush.bf16.msra.mxu1 %v10066_v18 }
 0xc33   :  { %3325 = vmatpush.bf16.msra.mxu1 %v10065_v13  ;;  %v3526_v13 = vpop.xlane.xlu1 %3525 }
 0xc34   :  { %v11662_v12 = vpop.eup %10385  ;;  %v3536_v24 = vsub.f32 %v11630_v26, %v3526_v13 }
 0xc35   :  { %v3575_v3 = vsel %vm734_vm8, %v11662_v12, 0.0 }
 0xc36   :  { %8678 = vmatmul.msk.bf16.vlgmr.msrb.gmra.mxu1 %vm93_vm0, %v11437_v41  ;;  %v3550_v29 = vmul.f32 1.442695, %v3536_v24 }
 0xc46   :  { %8746 = vmatmul.msk.bf16.vlgmr.msra.gmra.mxu1 %vm93_vm0, %v11437_v41  ;;  %v11653_v41 = vadd.f32 %v3443_v42, %v2745_v39 }
 0xc48   :  { %v3515_v44 = vsel %vm734_vm8, %v11653_v41, -inf }
 0xc49   :  { %3516 = vmax.xlane.f32.xlu1 %v3515_v44 }
 0xc51   :  { %3555 = vadd.xlane.f32.xlu1 %v3554_v50 }
 0xc59   :  { %3576 = vadd.xlane.f32.xlu1 %v3575_v3 }
 0xc6e   :  { %v3511_v17 = vpop.xlane.xlu0 %3510 }
 0xc6f   :  { %v3531_v18 = vsub.f32 %v3414_v31, %v3511_v17  ;;  %v2747_v31 = vld [vmem:[%s12728_s6 + $0x28] sm:$0xff] }
 0xc71   :  { %v3540_v19 = vmul.f32 1.442695, %v3531_v18 }
 0xc73   :  { %10387 = vpow2.f32 %v3540_v19 }
 0xc74   :  { %10389 = vpow2.f32 %v3550_v29 }
 0xc79   :  { %v10388_v33 = vpop.eup %10387 }
 0xc7a   :  { %v3514_v22 = vpop.xlane.xlu0 %3513  ;;  %v10390_v40 = vpop.eup %10389 }
 0xc7b   :  { %v3532_v27 = vsub.f32 %v11645_v34, %v3514_v22  ;;  %v3557_v34 = vsel %vm734_vm8, %v10388_v33, 0.0  ;;  %v3572_v43 = vsel %vm734_vm8, %v10390_v40, 0.0 }
 0xc7d   :  { %v3542_v30 = vmul.f32 1.442695, %v3532_v27 }
 0xc7f   :  { %10391 = vpow2.f32 %v3542_v30  ;;  %v10073_v30 = vld [vmem:[%s12690_s13] sm:$0xff] }
 0xc80   :  { %3751 = vmatpush.bf16.msra.mxu3 %v10073_v30 }
 0xc85   :  { %v10392_v42 = vpop.eup %10391 }
 0xc86   :  { %v3560_v44 = vsel %vm734_vm8, %v10392_v42, 0.0 }
 0xc93   :  { %v2733_v54 = vpop.f32.mrf.mxu1 }
 0xc94   :  { %v2734_v36 = vadd.f32 %v10286_v53, %v2733_v54 }
 0xc96   :  { %2737 = vst [vmem:[#allocation2] sm:$0x3] %v2734_v36 }
 0xc9b   :  { %v2735_v55 = vpop.f32.mrf.mxu1 }
 0xca3   :  { %v3023_v0 = vpop.f32.mrf.mxu1 }
 0xca4   :  { %v3374_v63 = vpack.c.bf16 %v3023_v0, %v3023_v0 }
 0xca6   :  { %v3448_v6 = vunpack.c.l.b16 %v3374_v63 }
 0xcab   :  { %v3025_v56 = vpop.f32.mrf.mxu1 }
 0xcac   :  { %v3375_v62 = vpack.c.bf16 %v3025_v56, %v3025_v56 }
 0xcae   :  { %v3449_v5 = vunpack.c.l.b16 %v3375_v62 }
 0xcb0   :  { %v3450_v47 = vpack.c.b16 %v3449_v5, %v3448_v6 }
 0xcb3   :  { %v3175_v58 = vpop.f32.mrf.mxu1 }
 0xcb4   :  { %v3382_v57 = vpack.c.bf16 %v3175_v58, %v3175_v58 }
 0xcb6   :  { %v3453_v60 = vunpack.c.l.b16 %v3382_v57 }
 0xcbb   :  { %v3177_v52 = vpop.f32.mrf.mxu1 }
 0xcbc   :  { %v3383_v59 = vpack.c.bf16 %v3177_v52, %v3177_v52  ;;  %v3517_v35 = vpop.xlane.xlu1 %3516 }
 0xcbd   :  { %v3533_v26 = vsub.f32 %v11653_v41, %v3517_v35  ;;  %v10076_v35 = vld [vmem:[%s12690_s13 + $0x18] sm:$0xff] }
 0xcbe   :  { %v3454_v61 = vunpack.c.l.b16 %v3383_v59  ;;  %3835 = vmatpush.bf16.msra.mxu2 %v10076_v35 }
 0xcbf   :  { %v3544_v37 = vmul.f32 1.442695, %v3533_v26 }
 0xcc0   :  { %v3455_v15 = vpack.c.b16 %v3454_v61, %v3453_v60 }
 0xcc1   :  { %10393 = vpow2.f32 %v3544_v37 }
 0xcc2   :  { %v3460_v4 = vsel %vm734_vm8, %v3455_v15, 0 }
 0xcc3   :  { %v3327_v2 = vpop.f32.mrf.mxu1  ;;  %3469 = vmatpush.bf16.xpose.msrb.mxu1 %v3460_v4 }
 0xcc4   :  { %v3606_v7 = vpack.c.bf16 %v3327_v2, %v3327_v2  ;;  %v3556_v46 = vpop.xlane.xlu1 %3555 }
 0xcc5   :  { %10395 = vrcp.f32 %v3556_v46 }
 0xcc6   :  { %v3673_v32 = vunpack.c.l.b16 %v3606_v7 }
 0xcc7   :  { %v10394_v45 = vpop.eup %10393 }
 0xcc8   :  { %v3563_v41 = vsel %vm734_vm8, %v10394_v45, 0.0 }
 0xcca   :  { %8766 = vmatmul.msk.bf16.vlgmr.msrb.gmra.mxu1 %vm734_vm8, %v3450_v47 }
 0xccb   :  { %v3329_v51 = vpop.f32.mrf.mxu1  ;;  %v10396_v36 = vpop.eup %10395 }
 0xccc   :  { %v3607_v11 = vpack.c.bf16 %v3329_v51, %v3329_v51  ;;  %v3577_v55 = vpop.xlane.xlu1 %3576  ;;  %v3586_v57 = vmul.f32 %v10396_v36, %v11658_v1 }
 0xcce   :  { %v3674_v14 = vunpack.c.l.b16 %v3607_v11  ;;  %v3594_v60 = vpack.c.bf16 %v3586_v57, %v3586_v57 }
 0xcd0   :  { %v3675_v16 = vpack.c.b16 %v3674_v14, %v3673_v32  ;;  %v3612_v5 = vunpack.c.l.b16 %v3594_v60 }
 0xcd2   :  { %3687 = vmatpush.bf16.msra.mxu1 %v3675_v16 }
 0xd47   :  { %v3471_v23 = vpop.f32.mrf.mxu1 }
 0xd48   :  { %v3472_v25 = vadd.f32 %v3471_v23, %v2746_v20 }
 0xd4a   :  { %v3518_v28 = vsel %vm734_vm8, %v3472_v25, -inf }
 0xd4b   :  { %3519 = vmax.xlane.f32.xlu2 %v3518_v28 }
 0xd4f   :  { %v3473_v9 = vpop.f32.mrf.mxu1 }
 0xd50   :  { %v3474_v38 = vadd.f32 %v3473_v9, %v2747_v31 }
 0xd52   :  { %v3521_v39 = vsel %vm734_vm8, %v3474_v38, -inf }
 0xd53   :  { %3522 = vmax.xlane.f32.xlu0 %v3521_v39  ;;  %3558 = vadd.xlane.f32.xlu2 %v3557_v34  ;;  %v10074_v34 = vld [vmem:[%s12690_s13 + $0x8] sm:$0xff] }
 0xd54   :  { %3779 = vmatpush.bf16.msra.mxu0 %v10074_v34 }
 0xd5b   :  { %3573 = vadd.xlane.f32.xlu0 %v3572_v43  ;;  %3561 = vadd.xlane.f32.xlu2 %v3560_v44 }
 0xd63   :  { %3564 = vadd.xlane.f32.xlu0 %v3563_v41 }
 0xdbe   :  { %v3520_v49 = vpop.xlane.xlu2 %3519 }
 0xdbf   :  { %v3534_v50 = vsub.f32 %v3472_v25, %v3520_v49 }
 0xdc1   :  { %v3546_v3 = vmul.f32 1.442695, %v3534_v50 }
 0xdc3   :  { %10397 = vpow2.f32 %v3546_v3 }
 0xdc6   :  { %v3559_v53 = vpop.xlane.xlu2 %3558  ;;  %v3523_v54 = vpop.xlane.xlu0 %3522 }
 0xdc7   :  { %10399 = vrcp.f32 %v3559_v53  ;;  %v3535_v0 = vsub.f32 %v3474_v38, %v3523_v54 }
 0xdc8   :  { %10401 = vrcp.f32 %v3577_v55 }
 0xdc9   :  { %v10398_v56 = vpop.eup %10397  ;;  %v3548_v58 = vmul.f32 1.442695, %v3535_v0 }
 0xdca   :  { %v3566_v52 = vsel %vm734_vm8, %v10398_v56, 0.0 }
 0xdcb   :  { %10403 = vpow2.f32 %v3548_v58  ;;  %3567 = vadd.xlane.f32.xlu1 %v3566_v52 }
 0xdcd   :  { %v10400_v59 = vpop.eup %10399 }
 0xdce   :  { %v3587_v61 = vmul.f32 %v10400_v59, %v10388_v33  ;;  %v3562_v62 = vpop.xlane.xlu2 %3561  ;;  %v3574_v15 = vpop.xlane.xlu0 %3573 }
 0xdcf   :  { %v10402_v63 = vpop.eup %10401  ;;  %10405 = vrcp.f32 %v3574_v15 }
 0xdd0   :  { %v3595_v4 = vpack.c.bf16 %v3587_v61, %v3587_v61  ;;  %10407 = vrcp.f32 %v3562_v62  ;;  %v3593_v1 = vmul.f32 %v10402_v63, %v11662_v12  ;;  %v10075_v63 = vld [vmem:[%s12690_s13 + $0x10] sm:$0xff] }
 0xdd1   :  { %v10404_v2 = vpop.eup %10403  ;;  %3807 = vmatpush.bf16.msrb.mxu1 %v10075_v63 }
 0xdd2   :  { %v3613_v6 = vunpack.c.l.b16 %v3595_v4  ;;  %v3569_v47 = vsel %vm734_vm8, %v10404_v2, 0.0  ;;  %v3601_v14 = vpack.c.bf16 %v3593_v1, %v3593_v1 }
 0xdd3   :  { %3570 = vadd.xlane.f32.xlu2 %v3569_v47 }
 0xdd4   :  { %v3614_v7 = vpack.c.b16 %v3613_v6, %v3612_v5  ;;  %v3697_v19 = vunpack.c.l.b16 %v3601_v14 }
 0xdd5   :  { %v10406_v51 = vpop.eup %10405 }
 0xdd6   :  { %8768 = vmatmul.msk.bf16.vlgmr.msrb.gmra.mxu3 %vm734_vm8, %v3614_v7  ;;  %v3565_v11 = vpop.xlane.xlu0 %3564  ;;  %v10408_v32 = vpop.eup %10407  ;;  %v3592_v16 = vmul.f32 %v10406_v51, %v10390_v40 }
 0xdd7   :  { %10409 = vrcp.f32 %v3565_v11  ;;  %v3588_v18 = vmul.f32 %v10408_v32, %v10392_v42 }
 0xdd8   :  { %v3600_v17 = vpack.c.bf16 %v3592_v16, %v3592_v16 }
 0xdd9   :  { %v3596_v23 = vpack.c.bf16 %v3588_v18, %v3588_v18 }
 0xdda   :  { %v3696_v20 = vunpack.c.l.b16 %v3600_v17 }
 0xddb   :  { %v3640_v25 = vunpack.c.l.b16 %v3596_v23 }
 0xddc   :  { %v3698_v22 = vpack.c.b16 %v3697_v19, %v3696_v20 }
 0xddd   :  { %v10410_v13 = vpop.eup %10409 }
 0xdde   :  { %v3589_v24 = vmul.f32 %v10410_v13, %v10394_v45  ;;  %8771 = vmatmul.msk.bf16.vlgmr.msrb.gmra.mxu2 %vm734_vm8, %v3698_v22 }
 0xde0   :  { %v3597_v12 = vpack.c.bf16 %v3589_v24, %v3589_v24 }
 0xde2   :  { %v3641_v27 = vunpack.c.l.b16 %v3597_v12 }
 0xde4   :  { %v3642_v28 = vpack.c.b16 %v3641_v27, %v3640_v25 }
 0xde6   :  { %8769 = vmatmul.msk.bf16.vlgmr.msrb.gmra.mxu0 %vm734_vm8, %v3642_v28 }
 0xe3e   :  { %v3568_v29 = vpop.xlane.xlu1 %3567 }
 0xe3f   :  { %10411 = vrcp.f32 %v3568_v29 }
 0xe45   :  { %v10412_v33 = vpop.eup %10411 }
 0xe46   :  { %v3571_v31 = vpop.xlane.xlu2 %3570  ;;  %v3590_v9 = vmul.f32 %v10412_v33, %v10398_v56 }
 0xe47   :  { %10413 = vrcp.f32 %v3571_v31 }
 0xe48   :  { %v3598_v26 = vpack.c.bf16 %v3590_v9, %v3590_v9 }
 0xe4a   :  { %v3668_v40 = vunpack.c.l.b16 %v3598_v26 }
 0xe4d   :  { %v10414_v38 = vpop.eup %10413 }
 0xe4e   :  { %v3591_v39 = vmul.f32 %v10414_v38, %v10404_v2 }
 0xe50   :  { %v3599_v37 = vpack.c.bf16 %v3591_v39, %v3591_v39 }
 0xe52   :  { %v3669_v42 = vunpack.c.l.b16 %v3599_v37  ;;  %v10080_v37 = vld [vmem:[%s12691_s14 + $0x18] sm:$0xff] }
 0xe53   :  { %4040 = vmatpush.bf16.msrb.mxu3 %v10080_v37 }
 0xe54   :  { %v3670_v43 = vpack.c.b16 %v3669_v42, %v3668_v40  ;;  %v10084_v40 = vld [vmem:[%s12691_s14 + $0x38] sm:$0xff] }
 0xe55   :  { %v10088_v42 = vld [vmem:[%s12691_s14 + $0x58] sm:$0xff]  ;;  %4078 = vmatpush.bf16.msrb.mxu0 %v10084_v40 }
 0xe56   :  { %8770 = vmatmul.msk.bf16.vlgmr.msra.gmra.mxu1 %vm734_vm8, %v3670_v43  ;;  %v10079_v43 = vld [vmem:[%s12691_s14 + $0x10] sm:$0xff] }
 0xe57   :  { %4116 = vmatpush.bf16.msra.mxu1 %v10088_v42  ;;  %4041 = vmatpush.bf16.msrb.mxu3 %v10079_v43  ;;  %v10112_v42 = vld [vmem:[%s12691_s14 + $0x118] sm:$0xff] }
 0xe58   :  { %v10120_v43 = vld [vmem:[%s12691_s14 + $0x158] sm:$0xff] }
 0xe59   :  { %v3633_v44 = vpop.f32.mrf.mxu3 }
 0xe5a   :  { %v3722_v45 = vpack.c.bf16 %v3633_v44, %v3633_v44  ;;  %v10083_v44 = vld [vmem:[%s12691_s14 + $0x30] sm:$0xff] }
 0xe5b   :  { %4079 = vmatpush.bf16.msrb.mxu0 %v10083_v44  ;;  %v10124_v44 = vld [vmem:[%s12691_s14 + $0x178] sm:$0xff] }
 0xe5c   :  { %v3732_v3 = vunpack.c.l.b16 %v3722_v45  ;;  %v10087_v45 = vld [vmem:[%s12691_s14 + $0x50] sm:$0xff] }
 0xe5d   :  { %4117 = vmatpush.bf16.msra.mxu1 %v10087_v45  ;;  %v10111_v45 = vld [vmem:[%s12691_s14 + $0x110] sm:$0xff] }
 0xe61   :  { %v3635_v41 = vpop.f32.mrf.mxu3  ;;  %v3717_v49 = vpop.f32.mrf.mxu2 }
 0xe62   :  { %v3723_v46 = vpack.c.bf16 %v3635_v41, %v3635_v41  ;;  %v3728_v36 = vpack.c.bf16 %v3717_v49, %v3717_v49  ;;  %v10091_v41 = vld [vmem:[%s12691_s14 + $0x70] sm:$0xff] }
 0xe63   :  { %v3661_v50 = vpop.f32.mrf.mxu0 }
 0xe64   :  { %v3733_v53 = vunpack.c.l.b16 %v3723_v46  ;;  %v3724_v55 = vpack.c.bf16 %v3661_v50, %v3661_v50  ;;  %v3816_v52 = vunpack.c.l.b16 %v3728_v36  ;;  %v10078_v50 = vld [vmem:[%s12691_s14 + $0x8] sm:$0xff] }
 0xe65   :  { %4042 = vmatpush.bf16.msrb.mxu3 %v10078_v50  ;;  %v10110_v50 = vld [vmem:[%s12691_s14 + $0x108] sm:$0xff] }
 0xe66   :  { %v3734_v54 = vpack.c.b16 %v3733_v53, %v3732_v3  ;;  %v3760_v60 = vunpack.c.l.b16 %v3724_v55  ;;  %v10082_v3 = vld [vmem:[%s12691_s14 + $0x28] sm:$0xff]  ;;  %v10077_v55 = vld [vmem:[%s12691_s14] sm:$0xff] }
 0xe67   :  { %v10086_v53 = vld [vmem:[%s12691_s14 + $0x48] sm:$0xff]  ;;  %4080 = vmatpush.bf16.msrb.mxu0 %v10082_v3 }
 0xe68   :  { %8776 = vmatmul.msk.bf16.vlgmr.msra.gmra.mxu3 %vm734_vm8, %v3734_v54  ;;  %v10090_v54 = vld [vmem:[%s12691_s14 + $0x68] sm:$0xff]  ;;  %4118 = vmatpush.bf16.msra.mxu1 %v10086_v53 }
 0xe69   :  { %v3719_v0 = vpop.f32.mrf.mxu2  ;;  %4043 = vmatpush.bf16.msrb.mxu3 %v10077_v55  ;;  %v10114_v3 = vld [vmem:[%s12691_s14 + $0x128] sm:$0xff]  ;;  %v10113_v55 = vld [vmem:[%s12691_s14 + $0x120] sm:$0xff] }
 0xe6a   :  { %v3729_v56 = vpack.c.bf16 %v3719_v0, %v3719_v0  ;;  %v10081_v0 = vld [vmem:[%s12691_s14 + $0x20] sm:$0xff]  ;;  %v10118_v53 = vld [vmem:[%s12691_s14 + $0x148] sm:$0xff] }
 0xe6b   :  { %v3663_v58 = vpop.f32.mrf.mxu0  ;;  %4081 = vmatpush.bf16.msrb.mxu0 %v10081_v0  ;;  %v10117_v0 = vld [vmem:[%s12691_s14 + $0x140] sm:$0xff] }
 0xe6c   :  { %v3725_v57 = vpack.c.bf16 %v3663_v58, %v3663_v58  ;;  %v3817_v59 = vunpack.c.l.b16 %v3729_v56  ;;  %v10085_v56 = vld [vmem:[%s12691_s14 + $0x40] sm:$0xff] }
 0xe6d   :  { %v10089_v58 = vld [vmem:[%s12691_s14 + $0x60] sm:$0xff]  ;;  %4119 = vmatpush.bf16.msra.mxu1 %v10085_v56 }
 0xe6e   :  { %v3761_v61 = vunpack.c.l.b16 %v3725_v57  ;;  %v3818_v62 = vpack.c.b16 %v3817_v59, %v3816_v52  ;;  %v10096_v59 = vld [vmem:[%s12691_s14 + $0x98] sm:$0xff]  ;;  %v10121_v56 = vld [vmem:[%s12691_s14 + $0x160] sm:$0xff] }
 0xe6f   :  { %4200 = vmatpush.bf16.msra.mxu3 %v10096_v59 }
 0xe70   :  { %v3762_v15 = vpack.c.b16 %v3761_v61, %v3760_v60  ;;  %8791 = vmatmul.msk.bf16.vlgmr.msra.gmra.mxu2 %vm734_vm8, %v3818_v62  ;;  %v10100_v60 = vld [vmem:[%s12691_s14 + $0xb8] sm:$0xff] }
 0xe71   :  { %v10104_v61 = vld [vmem:[%s12691_s14 + $0xd8] sm:$0xff] }
 0xe72   :  { %8781 = vmatmul.msk.bf16.vlgmr.msra.gmra.mxu0 %vm734_vm8, %v3762_v15  ;;  %v10108_v62 = vld [vmem:[%s12691_s14 + $0xf8] sm:$0xff] }
 0xe73   :  { %4238 = vmatpush.bf16.msra.mxu0 %v10100_v60 }
 0xed3   :  { %v3689_v4 = vpop.f32.mrf.mxu1 }
 0xed4   :  { %v3726_v2 = vpack.c.bf16 %v3689_v4, %v3689_v4  ;;  %v10095_v4 = vld [vmem:[%s12691_s14 + $0x90] sm:$0xff] }
 0xed5   :  { %4201 = vmatpush.bf16.msra.mxu3 %v10095_v4 }
 0xed6   :  { %v3788_v47 = vunpack.c.l.b16 %v3726_v2  ;;  %v10099_v2 = vld [vmem:[%s12691_s14 + $0xb0] sm:$0xff] }
 0xed7   :  { %4239 = vmatpush.bf16.msra.mxu0 %v10099_v2 }
 0xedb   :  { %v3691_v5 = vpop.f32.mrf.mxu1 }
 0xedc   :  { %v3727_v6 = vpack.c.bf16 %v3691_v5, %v3691_v5 }
 0xede   :  { %v3789_v1 = vunpack.c.l.b16 %v3727_v6  ;;  %v10103_v6 = vld [vmem:[%s12691_s14 + $0xd0] sm:$0xff] }
 0xee0   :  { %v3790_v7 = vpack.c.b16 %v3789_v1, %v3788_v47  ;;  %v10107_v47 = vld [vmem:[%s12691_s14 + $0xf0] sm:$0xff] }
 0xee2   :  { %8786 = vmatmul.msk.bf16.vlgmr.msrb.gmra.mxu1 %vm734_vm8, %v3790_v7  ;;  %v10094_v7 = vld [vmem:[%s12691_s14 + $0x88] sm:$0xff] }
 0xee3   :  { %4276 = vmatpush.bf16.msrb.mxu1 %v10104_v61  ;;  %4202 = vmatpush.bf16.msra.mxu3 %v10094_v7 }
 0xee7   :  { %4277 = vmatpush.bf16.msrb.mxu1 %v10103_v6 }
 0xeeb   :  { %v3753_v11 = vpop.f32.mrf.mxu3 }
 0xeec   :  { %v3842_v16 = vsel %vm93_vm0, %v3753_v11, 0.0 }
 0xeef   :  { %v3781_v51 = vpop.f32.mrf.mxu0 }
 0xef0   :  { %v3843_v32 = vsel %vm93_vm0, %v3781_v51, 0.0  ;;  %v10098_v51 = vld [vmem:[%s12691_s14 + $0xa8] sm:$0xff] }
 0xef1   :  { %v3844_v17 = vadd.f32 %v3843_v32, %v3842_v16  ;;  %v10102_v32 = vld [vmem:[%s12691_s14 + $0xc8] sm:$0xff]  ;;  %4240 = vmatpush.bf16.msra.mxu0 %v10098_v51 }
 0xef2   :  { %4278 = vmatpush.bf16.msrb.mxu1 %v10102_v32 }
 0xef3   :  { %v3837_v14 = vpop.f32.mrf.mxu2  ;;  %v3755_v23 = vpop.f32.mrf.mxu3 }
 0xef4   :  { %v3847_v22 = vsel %vm93_vm0, %v3837_v14, 0.0  ;;  %v3849_v27 = vsel %vm93_vm0, %v3755_v23, 0.0  ;;  %v10106_v14 = vld [vmem:[%s12691_s14 + $0xe8] sm:$0xff]  ;;  %v10105_v23 = vld [vmem:[%s12691_s14 + $0xe0] sm:$0xff] }
 0xef7   :  { %v3783_v20 = vpop.f32.mrf.mxu0 }
 0xef8   :  { %v3850_v12 = vsel %vm93_vm0, %v3783_v20, 0.0 }
 0xef9   :  { %v3851_v28 = vadd.f32 %v3850_v12, %v3849_v27 }
 0xefb   :  { %v3839_v29 = vpop.f32.mrf.mxu2 }
 0xefc   :  { %v3854_v38 = vsel %vm93_vm0, %v3839_v29, 0.0 }
 0xf5f   :  { %v3809_v18 = vpop.f32.mrf.mxu1 }
 0xf60   :  { %v3845_v19 = vsel %vm93_vm0, %v3809_v18, 0.0  ;;  %v10093_v18 = vld [vmem:[%s12691_s14 + $0x80] sm:$0xff] }
 0xf61   :  { %v3846_v13 = vadd.f32 %v3845_v19, %v3844_v17  ;;  %v10097_v19 = vld [vmem:[%s12691_s14 + $0xa0] sm:$0xff]  ;;  %4203 = vmatpush.bf16.msra.mxu3 %v10093_v18 }
 0xf62   :  { %4241 = vmatpush.bf16.msra.mxu0 %v10097_v19 }
 0xf63   :  { %v3848_v24 = vadd.f32 %v3847_v22, %v3846_v13  ;;  %v10101_v22 = vld [vmem:[%s12691_s14 + $0xc0] sm:$0xff] }
 0xf64   :  { %4279 = vmatpush.bf16.msrb.mxu1 %v10101_v22 }
 0xf65   :  { %v11716_v25 = vadd.f32 %v11298_v48, %v3848_v24 }
 0xf67   :  { %v3811_v30 = vpop.f32.mrf.mxu1  ;;  %v3859_v31 = vmul.f32 %v11716_v25, %v11716_v25 }
 0xf68   :  { %v3852_v33 = vsel %vm93_vm0, %v3811_v30, 0.0 }
 0xf69   :  { %v3853_v9 = vadd.f32 %v3852_v33, %v3851_v28  ;;  %v3861_v35 = vsel %vm93_vm0, %v3859_v31, 0.0  ;;  %v10287_v28 = vld [vmem:[%s12688_s11 + $0x1] ss:$0 sm:$0xff] }
 0xf6a   :  { %3862 = vadd.xlane.f32.xlu0 %v3861_v35 }
 0xf6b   :  { %v3855_v26 = vadd.f32 %v3854_v38, %v3853_v9 }
 0xf6d   :  { %v11725_v48 = vadd.f32 %v11315_v8, %v3855_v26  ;;  %v10092_v8 = vld [vmem:[%s12691_s14 + $0x78] sm:$0xff] }
 0xf6e   :  { %4154 = vmatpush.bf16.msrb.mxu2 %v10092_v8  ;;  %v10116_v8 = vld [vmem:[%s12691_s14 + $0x138] sm:$0xff] }
 0xf6f   :  { %v3860_v39 = vmul.f32 %v11725_v48, %v11725_v48 }
 0xf71   :  { %v3864_v34 = vsel %vm93_vm0, %v3860_v39, 0.0 }
 0xf72   :  { %3865 = vadd.xlane.f32.xlu1 %v3864_v34  ;;  %4155 = vmatpush.bf16.msrb.mxu2 %v10091_v41  ;;  %v10115_v41 = vld [vmem:[%s12691_s14 + $0x130] sm:$0xff] }
 0xf76   :  { %4156 = vmatpush.bf16.msrb.mxu2 %v10090_v54  ;;  %v10122_v54 = vld [vmem:[%s12691_s14 + $0x168] sm:$0xff] }
 0xf7a   :  { %4157 = vmatpush.bf16.msrb.mxu2 %v10089_v58 }
 0xf7e   :  { %4314 = vmatpush.bf16.msra.mxu2 %v10108_v62 }
 0xf82   :  { %4315 = vmatpush.bf16.msra.mxu2 %v10107_v47 }
 0xf86   :  { %4316 = vmatpush.bf16.msra.mxu2 %v10106_v14 }
 0xf8a   :  { %4317 = vmatpush.bf16.msra.mxu2 %v10105_v23 }
 0xfdd   :  { %v3863_v46 = vpop.xlane.xlu0 %3862 }
 0xfde   :  { %v3867_v49 = vmul.f32 %v3863_v46, %v10759_v21  ;;  %v10119_v46 = vld [vmem:[%s12691_s14 + $0x150] sm:$0xff] }
 0xfe0   :  { %v3869_v36 = vadd.f32 1e-06, %v3867_v49  ;;  %v10123_v49 = vld [vmem:[%s12691_s14 + $0x170] sm:$0xff] }
 0xfe2   :  { %10415 = vrsqrt.f32 %v3869_v36  ;;  %vm3877_vm13 = vweird.f32 %v3869_v36 }
 0xfe5   :  { %v3866_v57 = vpop.xlane.xlu1 %3865 }
 0xfe6   :  { %v3868_v52 = vmul.f32 %v3866_v57, %v10759_v21 }
 0xfe8   :  { %v10416_v15 = vpop.eup %10415  ;;  %v3870_v63 = vadd.f32 1e-06, %v3868_v52 }
 0xfe9   :  { %v3872_v5 = vmul.f32 %v10416_v15, %v3869_v36  ;;  %vm3878_vm12 = vweird.f32 %v10416_v15  ;;  %v10109_v36 = vld [vmem:[%s12691_s14 + $0x100] sm:$0xff] }
 0xfea   :  { %10417 = vrsqrt.f32 %v3870_v63  ;;  %vm3879_vm14 = vmor %vm3877_vm13, %vm3878_vm12  ;;  %vm3887_vm1 = vweird.f32 %v3870_v63 }
 0xfeb   :  { %v3873_v1 = vmul.f32 %v10416_v15, %v3872_v5 }
 0xfed   :  { %v3874_v11 = vmul.f32 0.5, %v3873_v1 }
 0xfef   :  { %v3875_v16 = vsub.f32 1.5, %v3874_v11 }
 0xff0   :  { %v10418_v17 = vpop.eup %10417 }
 0xff1   :  { %v3876_v20 = vmul.f32 %v10416_v15, %v3875_v16  ;;  %v3882_v13 = vmul.f32 %v10418_v17, %v3870_v63  ;;  %vm3888_vm15 = vweird.f32 %v10418_v17 }
 0xff2   :  { %vm3889_vm2 = vmor %vm3887_vm1, %vm3888_vm15 }
 0xff3   :  { %v3880_v24 = vsel %vm3879_vm14, %v10416_v15, %v3876_v20  ;;  %v3883_v12 = vmul.f32 %v10418_v17, %v3882_v13 }
 0xff4   :  { %v3891_v29 = vmul.f32 %v3880_v24, %v11716_v25 }
 0xff5   :  { %v3884_v27 = vmul.f32 0.5, %v3883_v12 }
 0xff6   :  { %v3894_v33 = vmul.f32 %v10287_v28, %v3891_v29 }
 0xff7   :  { %v3885_v30 = vsub.f32 1.5, %v3884_v27 }
 0xff8   :  { %v3896_v38 = vpack.c.bf16 %v3894_v33, %v3894_v33 }
 0xff9   :  { %v3886_v31 = vmul.f32 %v10418_v17, %v3885_v30 }
 0xffa   :  { %v4006_v34 = vunpack.c.l.b16 %v3896_v38 }
 0xffb   :  { %v3890_v9 = vsel %vm3889_vm2, %v10418_v17, %v3886_v31 }
 0xffc   :  { %v3892_v35 = vmul.f32 %v3890_v9, %v11725_v48 }
 0xffe   :  { %v3895_v26 = vmul.f32 %v10287_v28, %v3892_v35 }
0x1000   :  { %v3897_v39 = vpack.c.bf16 %v3895_v26, %v3895_v26 }
0x1002   :  { %v4007_v37 = vunpack.c.l.b16 %v3897_v39 }
0x1004   :  { %v4008_v40 = vpack.c.b16 %v4007_v37, %v4006_v34 }
0x1006   :  { %8872 = vmatmul.msk.bf16.vlgmr.msrb.gmra.mxu3 %vm93_vm0, %v4008_v40  ;;  %8889 = vmatmul.msk.bf16.vlgmr.msrb.gmra.mxu0 %vm93_vm0, %v4008_v40 }
0x1007   :  { %8906 = vmatmul.msk.bf16.vlgmr.msra.gmra.mxu1 %vm93_vm0, %v4008_v40  ;;  %8923 = vmatmul.msk.bf16.vlgmr.msrb.gmra.mxu2 %vm93_vm0, %v4008_v40 }
0x1008   :  { %4352 = vmatpush.bf16.msrb.mxu3 %v10112_v42  ;;  %4390 = vmatpush.bf16.msrb.mxu0 %v10116_v8 }
0x1009   :  { %4428 = vmatpush.bf16.msra.mxu1 %v10120_v43  ;;  %4466 = vmatpush.bf16.msrb.mxu2 %v10124_v44 }
0x100c   :  { %4353 = vmatpush.bf16.msrb.mxu3 %v10111_v45  ;;  %4391 = vmatpush.bf16.msrb.mxu0 %v10115_v41 }
0x100d   :  { %4429 = vmatpush.bf16.msra.mxu1 %v10119_v46  ;;  %4467 = vmatpush.bf16.msrb.mxu2 %v10123_v49 }
0x1010   :  { %4354 = vmatpush.bf16.msrb.mxu3 %v10110_v50  ;;  %4392 = vmatpush.bf16.msrb.mxu0 %v10114_v3 }
0x1011   :  { %4430 = vmatpush.bf16.msra.mxu1 %v10118_v53  ;;  %4468 = vmatpush.bf16.msrb.mxu2 %v10122_v54 }
0x1014   :  { %4355 = vmatpush.bf16.msrb.mxu3 %v10109_v36  ;;  %4393 = vmatpush.bf16.msrb.mxu0 %v10113_v55 }
0x1015   :  { %4431 = vmatpush.bf16.msra.mxu1 %v10117_v0  ;;  %4469 = vmatpush.bf16.msrb.mxu2 %v10121_v56 }
0x1016   :  { %8940 = vmatmul.msk.bf16.vlgmr.msra.gmra.mxu3 %vm93_vm0, %v11600_v10  ;;  %8957 = vmatmul.msk.bf16.vlgmr.msra.gmra.mxu0 %vm93_vm0, %v11600_v10 }
0x1017   :  { %8974 = vmatmul.msk.bf16.vlgmr.msrb.gmra.mxu1 %vm93_vm0, %v11600_v10  ;;  %8991 = vmatmul.msk.bf16.vlgmr.msra.gmra.mxu2 %vm93_vm0, %v11600_v10 }
0x1026   :  { %9008 = vmatmul.msk.bf16.vlgmr.msrb.gmra.mxu3 %vm93_vm0, %v11600_v10  ;;  %9025 = vmatmul.msk.bf16.vlgmr.msrb.gmra.mxu0 %vm93_vm0, %v11600_v10 }
0x1027   :  { %9042 = vmatmul.msk.bf16.vlgmr.msra.gmra.mxu1 %vm93_vm0, %v11600_v10  ;;  %9059 = vmatmul.msk.bf16.vlgmr.msrb.gmra.mxu2 %vm93_vm0, %v11600_v10 }
0x1083   :  { %v4083_v58 = vpop.f32.mrf.mxu0 }
0x1084   :  { %v4121_v57 = vpop.f32.mrf.mxu1  ;;  %v4478_v12 = vpack.c.bf16 %v4083_v58, %v4083_v58 }
0x1085   :  { %v4480_v30 = vpack.c.bf16 %v4121_v57, %v4121_v57 }
0x1086   :  { %v4524_v42 = vunpack.c.l.b16 %v4478_v12  ;;  %v2750_v12 = vld [vmem:[%s12729_s25] sm:$0xff] }
0x1087   :  { %v4554_v44 = vunpack.c.l.b16 %v4480_v30 }
0x1089   :  { %v11901_v52 = vpop.f32.mrf.mxu3 }
0x108a   :  { %v11903_v59 = vpop.f32.mrf.mxu2  ;;  %v4476_v46 = vpack.c.bf16 %v11901_v52, %v11901_v52 }
0x108b   :  { %v4085_v60 = vpop.f32.mrf.mxu0  ;;  %v4482_v3 = vpack.c.bf16 %v11903_v59, %v11903_v59 }
0x108c   :  { %v4123_v61 = vpop.f32.mrf.mxu1  ;;  %v4479_v18 = vpack.c.bf16 %v4085_v60, %v4085_v60  ;;  %v4494_v60 = vunpack.c.l.b16 %v4476_v46 }
0x108d   :  { %v4481_v13 = vpack.c.bf16 %v4123_v61, %v4123_v61  ;;  %v4584_v59 = vunpack.c.l.b16 %v4482_v3 }
0x108e   :  { %v4525_v35 = vunpack.c.l.b16 %v4479_v18 }
0x108f   :  { %v4555_v34 = vunpack.c.l.b16 %v4481_v13 }
0x1090   :  { %v4526_v49 = vpack.c.b16 %v4525_v35, %v4524_v42  ;;  %v2753_v35 = vld [vmem:[%s12729_s25 + $0x18] sm:$0xff] }
0x1091   :  { %v4047_v62 = vpop.f32.mrf.mxu3  ;;  %v4556_v53 = vpack.c.b16 %v4555_v34, %v4554_v44 }
0x1092   :  { %v4161_v15 = vpop.f32.mrf.mxu2  ;;  %v4477_v8 = vpack.c.bf16 %v4047_v62, %v4047_v62 }
0x1093   :  { %v4243_v63 = vpop.f32.mrf.mxu0  ;;  %v4483_v45 = vpack.c.bf16 %v4161_v15, %v4161_v15 }
0x1094   :  { %v4281_v4 = vpop.f32.mrf.mxu1  ;;  %v4486_v5 = vpack.c.bf16 %v4243_v63, %v4243_v63  ;;  %v4495_v55 = vunpack.c.l.b16 %v4477_v8 }
0x1095   :  { %v4488_v47 = vpack.c.bf16 %v4281_v4, %v4281_v4  ;;  %v4585_v58 = vunpack.c.l.b16 %v4483_v45  ;;  %v2752_v45 = vld [vmem:[%s12729_s25 + $0x10] sm:$0xff] }
0x1096   :  { %v4529_v32 = vunpack.c.l.b16 %v4486_v5  ;;  %v4496_v63 = vpack.c.b16 %v4495_v55, %v4494_v60 }
0x1097   :  { %v4559_v16 = vunpack.c.l.b16 %v4488_v47  ;;  %v4586_v5 = vpack.c.b16 %v4585_v58, %v4584_v59 }
0x1099   :  { %v4205_v2 = vpop.f32.mrf.mxu3 }
0x109a   :  { %v4319_v6 = vpop.f32.mrf.mxu2  ;;  %v4484_v19 = vpack.c.bf16 %v4205_v2, %v4205_v2 }
0x109b   :  { %v4245_v1 = vpop.f32.mrf.mxu0  ;;  %v4490_v22 = vpack.c.bf16 %v4319_v6, %v4319_v6 }
0x109c   :  { %v4487_v7 = vpack.c.bf16 %v4245_v1, %v4245_v1  ;;  %v4283_v51 = vpop.f32.mrf.mxu1  ;;  %v4499_v38 = vunpack.c.l.b16 %v4484_v19 }
0x109d   :  { %v4489_v11 = vpack.c.bf16 %v4283_v51, %v4283_v51  ;;  %v4589_v37 = vunpack.c.l.b16 %v4490_v22 }
0x109e   :  { %v4530_v14 = vunpack.c.l.b16 %v4487_v7 }
0x109f   :  { %v4560_v17 = vunpack.c.l.b16 %v4489_v11 }
0x10a0   :  { %v4531_v20 = vpack.c.b16 %v4530_v14, %v4529_v32 }
0x10a1   :  { %v4561_v23 = vpack.c.b16 %v4560_v17, %v4559_v16  ;;  %v4207_v24 = vpop.f32.mrf.mxu3 }
0x10a2   :  { %v4485_v27 = vpack.c.bf16 %v4207_v24, %v4207_v24  ;;  %v4321_v28 = vpop.f32.mrf.mxu2  ;;  %v4536_v29 = vsel %vm734_vm8, %v4531_v20, 0 }
0x10a3   :  { %v4491_v31 = vpack.c.bf16 %v4321_v28, %v4321_v28  ;;  %v4395_v33 = vpop.f32.mrf.mxu0  ;;  %4545 = vmatpush.bf16.xpose.msra.mxu0 %v4536_v29  ;;  %v4566_v9 = vsel %vm734_vm8, %v4561_v23, 0 }
0x10a4   :  { %v4500_v26 = vunpack.c.l.b16 %v4485_v27  ;;  %v4433_v39 = vpop.f32.mrf.mxu1  ;;  %4575 = vmatpush.bf16.xpose.msrb.mxu1 %v4566_v9  ;;  %v4710_v0 = vpack.c.bf16 %v4395_v33, %v4395_v33  ;;  %v2756_v27 = vld [vmem:[%s12729_s25 + $0x30] sm:$0xff] }
0x10a5   :  { %v4590_v40 = vunpack.c.l.b16 %v4491_v31  ;;  %v4712_v57 = vpack.c.bf16 %v4433_v39, %v4433_v39  ;;  %v2757_v39 = vld [vmem:[%s12729_s25 + $0x38] sm:$0xff] }
0x10a6   :  { %v4501_v43 = vpack.c.b16 %v4500_v26, %v4499_v38  ;;  %v4751_v4 = vunpack.c.l.b16 %v4710_v0  ;;  %v2751_v26 = vld [vmem:[%s12729_s25 + $0x8] sm:$0xff] }
0x10a7   :  { %v4591_v41 = vpack.c.b16 %v4590_v40, %v4589_v37  ;;  %v4779_v6 = vunpack.c.l.b16 %v4712_v57 }
0x10a8   :  { %v4506_v50 = vsel %vm734_vm8, %v4501_v43, 0 }
0x10a9   :  { %v4357_v54 = vpop.f32.mrf.mxu3  ;;  %4515 = vmatpush.bf16.xpose.msra.mxu3 %v4506_v50  ;;  %v4596_v36 = vsel %vm734_vm8, %v4591_v41, 0 }
0x10aa   :  { %v4471_v56 = vpop.f32.mrf.mxu2  ;;  %4605 = vmatpush.bf16.xpose.msra.mxu2 %v4596_v36  ;;  %9061 = vmatmul.msk.bf16.vlgmr.msra.gmra.mxu0 %vm734_vm8, %v4526_v49  ;;  %v4708_v1 = vpack.c.bf16 %v4357_v54, %v4357_v54  ;;  %v2754_v49 = vld [vmem:[%s12729_s25 + $0x20] sm:$0xff]  ;;  %v2755_v54 = vld [vmem:[%s12729_s25 + $0x28] sm:$0xff] }
0x10ab   :  { %9062 = vmatmul.msk.bf16.vlgmr.msrb.gmra.mxu1 %vm734_vm8, %v4556_v53  ;;  %v4397_v52 = vpop.f32.mrf.mxu0  ;;  %v4714_v51 = vpack.c.bf16 %v4471_v56, %v4471_v56 }
0x10ac   :  { %v4711_v61 = vpack.c.bf16 %v4397_v52, %v4397_v52  ;;  %v4435_v62 = vpop.f32.mrf.mxu1  ;;  %v4723_v18 = vunpack.c.l.b16 %v4708_v1 }
0x10ad   :  { %v4713_v15 = vpack.c.bf16 %v4435_v62, %v4435_v62  ;;  %v4807_v20 = vunpack.c.l.b16 %v4714_v51 }
0x10ae   :  { %v4752_v2 = vunpack.c.l.b16 %v4711_v61 }
0x10af   :  { %v4780_v47 = vunpack.c.l.b16 %v4713_v15 }
0x10b0   :  { %v4753_v7 = vpack.c.b16 %v4752_v2, %v4751_v4  ;;  %9060 = vmatmul.msk.bf16.vlgmr.msra.gmra.mxu3 %vm734_vm8, %v4496_v63 }
0x10b1   :  { %v4781_v11 = vpack.c.b16 %v4780_v47, %v4779_v6  ;;  %9063 = vmatmul.msk.bf16.vlgmr.msra.gmra.mxu2 %vm734_vm8, %v4586_v5  ;;  %v4359_v32 = vpop.f32.mrf.mxu3 }
0x10b2   :  { %v4709_v14 = vpack.c.bf16 %v4359_v32, %v4359_v32  ;;  %v4473_v16 = vpop.f32.mrf.mxu2  ;;  %4765 = vmatpush.bf16.msrb.mxu0 %v4753_v7 }
0x10b3   :  { %v4715_v17 = vpack.c.bf16 %v4473_v16, %v4473_v16  ;;  %4793 = vmatpush.bf16.msra.mxu1 %v4781_v11 }
0x10b4   :  { %v4724_v19 = vunpack.c.l.b16 %v4709_v14 }
0x10b5   :  { %v4808_v13 = vunpack.c.l.b16 %v4715_v17 }
0x10b6   :  { %v4725_v22 = vpack.c.b16 %v4724_v19, %v4723_v18 }
0x10b7   :  { %v4809_v23 = vpack.c.b16 %v4808_v13, %v4807_v20 }
0x10b8   :  { %4737 = vmatpush.bf16.msrb.mxu3 %v4725_v22 }
0x10b9   :  { %4821 = vmatpush.bf16.msrb.mxu2 %v4809_v23 }
0x1127   :  { %v4547_v24 = vpop.f32.mrf.mxu0 }
0x1128   :  { %v4577_v8 = vpop.f32.mrf.mxu1  ;;  %v4548_v50 = vadd.f32 %v4547_v24, %v2752_v45 }
0x1129   :  { %v4578_v3 = vadd.f32 %v4577_v8, %v2754_v49 }
0x112a   :  { %v4618_v53 = vsel %vm734_vm8, %v4548_v50, -inf }
0x112b   :  { %v4624_v55 = vsel %vm734_vm8, %v4578_v3, -inf }
0x112f   :  { %v4549_v38 = vpop.f32.mrf.mxu0 }
0x1130   :  { %v4550_v34 = vadd.f32 %v4549_v38, %v2753_v35  ;;  %v4579_v36 = vpop.f32.mrf.mxu1 }
0x1131   :  { %v4580_v0 = vadd.f32 %v4579_v36, %v2755_v54 }
0x1132   :  { %v4621_v41 = vsel %vm734_vm8, %v4550_v34, -inf }
0x1133   :  { %v4517_v28 = vpop.f32.mrf.mxu3  ;;  %v4627_v56 = vsel %vm734_vm8, %v4580_v0, -inf }
0x1134   :  { %v4518_v29 = vadd.f32 %v4517_v28, %v2750_v12  ;;  %v4607_v30 = vpop.f32.mrf.mxu2 }
0x1135   :  { %v4608_v31 = vadd.f32 %v4607_v30, %v2756_v27 }
0x1136   :  { %v4612_v33 = vsel %vm734_vm8, %v4518_v29, -inf }
0x1137   :  { %v4630_v9 = vsel %vm734_vm8, %v4608_v31, -inf  ;;  %4613 = vmax.xlane.f32.xlu2 %v4612_v33 }
0x1138   :  { %4631 = vmax.xlane.f32.xlu1 %v4630_v9 }
0x113b   :  { %v4519_v37 = vpop.f32.mrf.mxu3 }
0x113c   :  { %v4520_v40 = vadd.f32 %v4519_v37, %v2751_v26  ;;  %v4609_v42 = vpop.f32.mrf.mxu2 }
0x113d   :  { %v4610_v43 = vadd.f32 %v4609_v42, %v2757_v39 }
0x113e   :  { %v4615_v44 = vsel %vm734_vm8, %v4520_v40, -inf }
0x113f   :  { %4616 = vmax.xlane.f32.xlu0 %v4615_v44  ;;  %v4633_v46 = vsel %vm734_vm8, %v4610_v43, -inf }
0x1140   :  { %4622 = vmax.xlane.f32.xlu1 %v4621_v41  ;;  %4634 = vmax.xlane.f32.xlu2 %v4633_v46 }
0x1147   :  { %4619 = vmax.xlane.f32.xlu0 %v4618_v53 }
0x1148   :  { %4625 = vmax.xlane.f32.xlu2 %v4624_v55 }
0x114f   :  { %4628 = vmax.xlane.f32.xlu0 %v4627_v56 }
0x11aa   :  { %v4614_v58 = vpop.xlane.xlu2 %4613 }
0x11ab   :  { %v4632_v57 = vpop.xlane.xlu1 %4631  ;;  %v4636_v52 = vsub.f32 %v4518_v29, %v4614_v58 }
0x11ac   :  { %v4642_v60 = vsub.f32 %v4608_v31, %v4632_v57 }
0x11ad   :  { %v4644_v61 = vmul.f32 1.442695, %v4636_v52 }
0x11ae   :  { %v4656_v62 = vmul.f32 1.442695, %v4642_v60 }
0x11af   :  { %10419 = vpow2.f32 %v4644_v61 }
0x11b0   :  { %10421 = vpow2.f32 %v4656_v62 }
0x11b2   :  { %v4617_v59 = vpop.xlane.xlu0 %4616 }
0x11b3   :  { %v4623_v15 = vpop.xlane.xlu1 %4622  ;;  %v4637_v63 = vsub.f32 %v4520_v40, %v4617_v59  ;;  %v4635_v4 = vpop.xlane.xlu2 %4634 }
0x11b4   :  { %v4639_v2 = vsub.f32 %v4550_v34, %v4623_v15  ;;  %v4643_v5 = vsub.f32 %v4610_v43, %v4635_v4 }
0x11b5   :  { %v10420_v6 = vpop.eup %10419  ;;  %v4646_v47 = vmul.f32 1.442695, %v4637_v63 }
0x11b6   :  { %v10422_v1 = vpop.eup %10421  ;;  %v4650_v7 = vmul.f32 1.442695, %v4639_v2  ;;  %v4658_v51 = vmul.f32 1.442695, %v4643_v5  ;;  %v4660_v11 = vsel %vm734_vm8, %v10420_v6, 0.0 }
0x11b7   :  { %10423 = vpow2.f32 %v4646_v47  ;;  %v4678_v32 = vsel %vm734_vm8, %v10422_v1, 0.0  ;;  %4661 = vadd.xlane.f32.xlu1 %v4660_v11 }
0x11b8   :  { %10425 = vpow2.f32 %v4650_v7  ;;  %4679 = vadd.xlane.f32.xlu0 %v4678_v32 }
0x11b9   :  { %10427 = vpow2.f32 %v4658_v51 }
0x11ba   :  { %v4620_v14 = vpop.xlane.xlu0 %4619 }
0x11bb   :  { %v4638_v16 = vsub.f32 %v4548_v50, %v4620_v14  ;;  %v4626_v17 = vpop.xlane.xlu2 %4625 }
0x11bc   :  { %v4640_v18 = vsub.f32 %v4578_v3, %v4626_v17 }
0x11bd   :  { %v10424_v19 = vpop.eup %10423  ;;  %v4648_v20 = vmul.f32 1.442695, %v4638_v16 }
0x11be   :  { %v10426_v13 = vpop.eup %10425  ;;  %v4652_v22 = vmul.f32 1.442695, %v4640_v18  ;;  %v4663_v23 = vsel %vm734_vm8, %v10424_v19, 0.0 }
0x11bf   :  { %v10428_v24 = vpop.eup %10427  ;;  %10429 = vpow2.f32 %v4648_v20  ;;  %v4669_v12 = vsel %vm734_vm8, %v10426_v13, 0.0  ;;  %4664 = vadd.xlane.f32.xlu2 %v4663_v23  ;;  %v10125_v20 = vld [vmem:[%s12692_s15] sm:$0xff]  ;;  %v10127_v23 = vld [vmem:[%s12692_s15 + $0x10] sm:$0xff] }
0x11c0   :  { %10431 = vpow2.f32 %v4652_v22  ;;  %4670 = vadd.xlane.f32.xlu0 %v4669_v12  ;;  %v4681_v27 = vsel %vm734_vm8, %v10428_v24, 0.0  ;;  %4857 = vmatpush.bf16.msra.mxu3 %v10125_v20  ;;  %v10126_v22 = vld [vmem:[%s12692_s15 + $0x8] sm:$0xff]  ;;  %v10131_v20 = vld [vmem:[%s12693_s16 + $0x10] sm:$0xff] }
0x11c1   :  { %4682 = vadd.xlane.f32.xlu1 %v4681_v27  ;;  %4885 = vmatpush.bf16.msra.mxu0 %v10126_v22 }
0x11c2   :  { %v4629_v28 = vpop.xlane.xlu0 %4628  ;;  %4913 = vmatpush.bf16.msrb.mxu1 %v10127_v23  ;;  %v10129_v23 = vld [vmem:[%s12693_s16] sm:$0xff] }
0x11c3   :  { %v4641_v29 = vsub.f32 %v4580_v0, %v4629_v28 }
0x11c5   :  { %v10430_v30 = vpop.eup %10429  ;;  %v4654_v31 = vmul.f32 1.442695, %v4641_v29 }
0x11c6   :  { %v10432_v33 = vpop.eup %10431  ;;  %v4666_v9 = vsel %vm734_vm8, %v10430_v30, 0.0 }
0x11c7   :  { %10433 = vpow2.f32 %v4654_v31  ;;  %4667 = vadd.xlane.f32.xlu2 %v4666_v9  ;;  %v4672_v35 = vsel %vm734_vm8, %v10432_v33, 0.0 }
0x11c9   :  { %4673 = vadd.xlane.f32.xlu1 %v4672_v35 }
0x11cd   :  { %v10434_v38 = vpop.eup %10433 }
0x11ce   :  { %v4675_v26 = vsel %vm734_vm8, %v10434_v38, 0.0 }
0x11cf   :  { %4676 = vadd.xlane.f32.xlu2 %v4675_v26 }
0x122a   :  { %v4662_v39 = vpop.xlane.xlu1 %4661 }
0x122b   :  { %v4680_v34 = vpop.xlane.xlu0 %4679  ;;  %10435 = vrcp.f32 %v4662_v39 }
0x122c   :  { %10437 = vrcp.f32 %v4680_v34 }
0x1231   :  { %v10436_v40 = vpop.eup %10435 }
0x1232   :  { %v4665_v37 = vpop.xlane.xlu2 %4664  ;;  %v10438_v43 = vpop.eup %10437  ;;  %v4692_v44 = vmul.f32 %v10436_v40, %v10420_v6 }
0x1233   :  { %v4671_v42 = vpop.xlane.xlu0 %4670  ;;  %10439 = vrcp.f32 %v4665_v37  ;;  %v4698_v45 = vmul.f32 %v10438_v43, %v10422_v1 }
0x1234   :  { %10441 = vrcp.f32 %v4671_v42  ;;  %v4683_v8 = vpop.xlane.xlu1 %4682  ;;  %v4700_v49 = vpack.c.bf16 %v4692_v44, %v4692_v44 }
0x1235   :  { %10443 = vrcp.f32 %v4683_v8  ;;  %v4706_v54 = vpack.c.bf16 %v4698_v45, %v4698_v45 }
0x1236   :  { %v4718_v56 = vunpack.c.l.b16 %v4700_v49 }
0x1237   :  { %v4802_v60 = vunpack.c.l.b16 %v4706_v54 }
0x1239   :  { %v10440_v41 = vpop.eup %10439 }
0x123a   :  { %v10442_v46 = vpop.eup %10441  ;;  %v4693_v50 = vmul.f32 %v10440_v41, %v10424_v19  ;;  %v4668_v3 = vpop.xlane.xlu2 %4667 }
0x123b   :  { %v10444_v53 = vpop.eup %10443  ;;  %10445 = vrcp.f32 %v4668_v3  ;;  %v4695_v58 = vmul.f32 %v10442_v46, %v10426_v13  ;;  %v10128_v13 = vld [vmem:[%s12692_s15 + $0x18] sm:$0xff] }
0x123c   :  { %v4699_v36 = vmul.f32 %v10444_v53, %v10428_v24  ;;  %v4701_v55 = vpack.c.bf16 %v4693_v50, %v4693_v50  ;;  %v4674_v0 = vpop.xlane.xlu1 %4673  ;;  %4941 = vmatpush.bf16.msra.mxu2 %v10128_v13 }
0x123d   :  { %10447 = vrcp.f32 %v4674_v0  ;;  %v4703_v15 = vpack.c.bf16 %v4695_v58, %v4695_v58 }
0x123e   :  { %v4707_v57 = vpack.c.bf16 %v4699_v36, %v4699_v36  ;;  %v4719_v52 = vunpack.c.l.b16 %v4701_v55 }
0x123f   :  { %v4747_v47 = vunpack.c.l.b16 %v4703_v15 }
0x1240   :  { %v4803_v61 = vunpack.c.l.b16 %v4707_v57  ;;  %v4720_v62 = vpack.c.b16 %v4719_v52, %v4718_v56 }
0x1241   :  { %v10446_v59 = vpop.eup %10445 }
0x1242   :  { %v4804_v63 = vpack.c.b16 %v4803_v61, %v4802_v60  ;;  %v4694_v4 = vmul.f32 %v10446_v59, %v10430_v30  ;;  %9064 = vmatmul.msk.bf16.vlgmr.msrb.gmra.mxu3 %vm734_vm8, %v4720_v62  ;;  %v4677_v2 = vpop.xlane.xlu2 %4676 }
0x1243   :  { %v10448_v5 = vpop.eup %10447  ;;  %10449 = vrcp.f32 %v4677_v2 }
0x1244   :  { %v4702_v6 = vpack.c.bf16 %v4694_v4, %v4694_v4  ;;  %9067 = vmatmul.msk.bf16.vlgmr.msrb.gmra.mxu2 %vm734_vm8, %v4804_v63  ;;  %v4696_v1 = vmul.f32 %v10448_v5, %v10432_v33 }
0x1246   :  { %v4746_v7 = vunpack.c.l.b16 %v4702_v6  ;;  %v4704_v32 = vpack.c.bf16 %v4696_v1, %v4696_v1 }
0x1248   :  { %v4748_v51 = vpack.c.b16 %v4747_v47, %v4746_v7  ;;  %v4774_v17 = vunpack.c.l.b16 %v4704_v32 }
0x1249   :  { %v10450_v11 = vpop.eup %10449 }
0x124a   :  { %v4697_v14 = vmul.f32 %v10450_v11, %v10434_v38  ;;  %9065 = vmatmul.msk.bf16.vlgmr.msrb.gmra.mxu0 %vm734_vm8, %v4748_v51 }
0x124c   :  { %v4705_v16 = vpack.c.bf16 %v4697_v14, %v4697_v14 }
0x124e   :  { %v4775_v18 = vunpack.c.l.b16 %v4705_v16 }
0x1250   :  { %v4776_v19 = vpack.c.b16 %v4775_v18, %v4774_v17 }
0x1252   :  { %9066 = vmatmul.msk.bf16.vlgmr.msra.gmra.mxu1 %vm734_vm8, %v4776_v19  ;;  %v10132_v19 = vld [vmem:[%s12693_s16 + $0x18] sm:$0xff] }
0x1253   :  { %5058 = vmatpush.bf16.msrb.mxu3 %v10132_v19  ;;  %v10146_v19 = vld [vmem:[%s12689_s12 + $0x1a8] sm:$0xff] }
0x1257   :  { %5059 = vmatpush.bf16.msrb.mxu3 %v10131_v20  ;;  %v10150_v20 = vld [vmem:[%s12689_s12 + $0x1c8] sm:$0xff] }
0x12c5   :  { %v4739_v24 = vpop.f32.mrf.mxu3 }
0x12c6   :  { %v4828_v28 = vpack.c.bf16 %v4739_v24, %v4739_v24 }
0x12c7   :  { %v4823_v12 = vpop.f32.mrf.mxu2  ;;  %v4767_v27 = vpop.f32.mrf.mxu0 }
0x12c8   :  { %v4834_v29 = vpack.c.bf16 %v4823_v12, %v4823_v12  ;;  %v4830_v31 = vpack.c.bf16 %v4767_v27, %v4767_v27  ;;  %v4838_v38 = vunpack.c.l.b16 %v4828_v28  ;;  %v10140_v12 = vld [vmem:[%s12694_s17 + $0x38] sm:$0xff]  ;;  %v10139_v27 = vld [vmem:[%s12694_s17 + $0x30] sm:$0xff] }
0x12c9   :  { %5119 = vmatpush.bf16.msrb.mxu0 %v10140_v12  ;;  %v10165_v12 = vld [vmem:[%s12689_s12 + $0x240] sm:$0xff] }
0x12ca   :  { %v4922_v40 = vunpack.c.l.b16 %v4834_v29  ;;  %v4866_v42 = vunpack.c.l.b16 %v4830_v31 }
0x12cd   :  { %v4741_v30 = vpop.f32.mrf.mxu3  ;;  %5120 = vmatpush.bf16.msrb.mxu0 %v10139_v27 }
0x12ce   :  { %v4829_v33 = vpack.c.bf16 %v4741_v30, %v4741_v30 }
0x12cf   :  { %v4825_v9 = vpop.f32.mrf.mxu2  ;;  %v4769_v35 = vpop.f32.mrf.mxu0 }
0x12d0   :  { %v4839_v26 = vunpack.c.l.b16 %v4829_v33  ;;  %v4835_v39 = vpack.c.bf16 %v4825_v9, %v4825_v9  ;;  %v4831_v34 = vpack.c.bf16 %v4769_v35, %v4769_v35  ;;  %v4795_v37 = vpop.f32.mrf.mxu1  ;;  %v10138_v33 = vld [vmem:[%s12694_s17 + $0x28] sm:$0xff] }
0x12d1   :  { %v4832_v46 = vpack.c.bf16 %v4795_v37, %v4795_v37  ;;  %5121 = vmatpush.bf16.msrb.mxu0 %v10138_v33  ;;  %v10136_v37 = vld [vmem:[%s12694_s17 + $0x18] sm:$0xff] }
0x12d2   :  { %v4840_v8 = vpack.c.b16 %v4839_v26, %v4838_v38  ;;  %v4923_v43 = vunpack.c.l.b16 %v4835_v39  ;;  %v4867_v44 = vunpack.c.l.b16 %v4831_v34  ;;  %v10137_v38 = vld [vmem:[%s12694_s17 + $0x20] sm:$0xff]  ;;  %v10184_v33 = vld [vmem:[%s12689_s12 + $0x2d8] sm:$0xff] }
0x12d3   :  { %v4894_v3 = vunpack.c.l.b16 %v4832_v46  ;;  %v10288_v46 = vld [vmem:[%s12688_s11 + $0x2] ss:$0 sm:$0xff] }
0x12d4   :  { %v4924_v45 = vpack.c.b16 %v4923_v43, %v4922_v40  ;;  %v4868_v41 = vpack.c.b16 %v4867_v44, %v4866_v42  ;;  %9072 = vmatmul.msk.bf16.vlgmr.msra.gmra.mxu3 %vm734_vm8, %v4840_v8 }
0x12d5   :  { %5122 = vmatpush.bf16.msrb.mxu0 %v10137_v38  ;;  %v10155_v38 = vld [vmem:[%s12689_s12 + $0x1f0] sm:$0xff] }
0x12d6   :  { %9087 = vmatmul.msk.bf16.vlgmr.msra.gmra.mxu2 %vm734_vm8, %v4924_v45  ;;  %9077 = vmatmul.msk.bf16.vlgmr.msra.gmra.mxu0 %vm734_vm8, %v4868_v41 }
0x12d8   :  { %v4797_v49 = vpop.f32.mrf.mxu1 }
0x12d9   :  { %v4833_v50 = vpack.c.bf16 %v4797_v49, %v4797_v49  ;;  %5123 = vmatpush.bf16.msrb.mxu0 %v10136_v37  ;;  %v10183_v37 = vld [vmem:[%s12689_s12 + $0x2d0] sm:$0xff] }
0x12db   :  { %v4895_v53 = vunpack.c.l.b16 %v4833_v50 }
0x12dd   :  { %v4896_v54 = vpack.c.b16 %v4895_v53, %v4894_v3 }
0x12df   :  { %9082 = vmatmul.msk.bf16.vlgmr.msrb.gmra.mxu1 %vm734_vm8, %v4896_v54 }
0x1353   :  { %v4887_v36 = vpop.f32.mrf.mxu0 }
0x1354   :  { %v4949_v58 = vsel %vm93_vm0, %v4887_v36, 0.0 }
0x1357   :  { %v4859_v55 = vpop.f32.mrf.mxu3 }
0x1358   :  { %v4948_v0 = vsel %vm93_vm0, %v4859_v55, 0.0  ;;  %v10135_v55 = vld [vmem:[%s12694_s17 + $0x10] sm:$0xff] }
0x1359   :  { %v4943_v56 = vpop.f32.mrf.mxu2  ;;  %v4950_v57 = vadd.f32 %v4949_v58, %v4948_v0  ;;  %5124 = vmatpush.bf16.msrb.mxu0 %v10135_v55  ;;  %v10134_v0 = vld [vmem:[%s12694_s17 + $0x8] sm:$0xff] }
0x135a   :  { %v4953_v62 = vsel %vm93_vm0, %v4943_v56, 0.0  ;;  %v10133_v56 = vld [vmem:[%s12694_s17] sm:$0xff] }
0x135b   :  { %v4889_v15 = vpop.f32.mrf.mxu0 }
0x135c   :  { %v4915_v52 = vpop.f32.mrf.mxu1  ;;  %v4956_v5 = vsel %vm93_vm0, %v4889_v15, 0.0 }
0x135d   :  { %v4951_v60 = vsel %vm93_vm0, %v4915_v52, 0.0  ;;  %5125 = vmatpush.bf16.msrb.mxu0 %v10134_v0 }
0x135e   :  { %v4952_v61 = vadd.f32 %v4951_v60, %v4950_v57 }
0x135f   :  { %v4861_v59 = vpop.f32.mrf.mxu3 }
0x1360   :  { %v4954_v63 = vadd.f32 %v4953_v62, %v4952_v61  ;;  %v4955_v4 = vsel %vm93_vm0, %v4861_v59, 0.0 }
0x1361   :  { %v4957_v6 = vadd.f32 %v4956_v5, %v4955_v4  ;;  %v4945_v47 = vpop.f32.mrf.mxu2  ;;  %5126 = vmatpush.bf16.msrb.mxu0 %v10133_v56 }
0x1362   :  { %v11983_v2 = vadd.f32 %v4954_v63, %v11716_v25  ;;  %v4960_v14 = vsel %vm93_vm0, %v4945_v47, 0.0 }
0x1364   :  { %v4917_v1 = vpop.f32.mrf.mxu1  ;;  %v4989_v7 = vmul.f32 %v11983_v2, %v11983_v2 }
0x1365   :  { %v4958_v51 = vsel %vm93_vm0, %v4917_v1, 0.0  ;;  %v10148_v1 = vld [vmem:[%s12689_s12 + $0x1b8] sm:$0xff] }
0x1366   :  { %v4959_v11 = vadd.f32 %v4958_v51, %v4957_v6  ;;  %v4991_v32 = vsel %vm93_vm0, %v4989_v7, 0.0  ;;  %v10152_v7 = vld [vmem:[%s12689_s12 + $0x1d8] sm:$0xff]  ;;  %5357 = vmatpush.bf16.msrb.mxu2 %v10148_v1 }
0x1367   :  { %4992 = vadd.xlane.f32.xlu0 %v4991_v32  ;;  %v10168_v51 = vld [vmem:[%s12689_s12 + $0x258] sm:$0xff]  ;;  %v10147_v32 = vld [vmem:[%s12689_s12 + $0x1b0] sm:$0xff] }
0x1368   :  { %v4961_v16 = vadd.f32 %v4960_v14, %v4959_v11  ;;  %5547 = vmatpush.bf16.msra.mxu0 %v10168_v51  ;;  %v10143_v11 = vld [vmem:[%s12689_s12 + $0x190] sm:$0xff]  ;;  %v10176_v51 = vld [vmem:[%s12689_s12 + $0x298] sm:$0xff] }
0x1369   :  { %v10151_v14 = vld [vmem:[%s12689_s12 + $0x1d0] sm:$0xff] }
0x136a   :  { %v11992_v25 = vadd.f32 %v4961_v16, %v11725_v48  ;;  %v10130_v48 = vld [vmem:[%s12693_s16 + $0x8] sm:$0xff]  ;;  %v10167_v16 = vld [vmem:[%s12689_s12 + $0x250] sm:$0xff]  ;;  %5358 = vmatpush.bf16.msrb.mxu2 %v10147_v32 }
0x136b   :  { %5060 = vmatpush.bf16.msrb.mxu3 %v10130_v48  ;;  %v10166_v48 = vld [vmem:[%s12689_s12 + $0x248] sm:$0xff]  ;;  %v10171_v32 = vld [vmem:[%s12689_s12 + $0x270] sm:$0xff] }
0x136c   :  { %v4990_v17 = vmul.f32 %v11992_v25, %v11992_v25  ;;  %5548 = vmatpush.bf16.msra.mxu0 %v10167_v16  ;;  %v10179_v16 = vld [vmem:[%s12689_s12 + $0x2b0] sm:$0xff] }
0x136e   :  { %v4994_v18 = vsel %vm93_vm0, %v4990_v17, 0.0  ;;  %5359 = vmatpush.bf16.msrb.mxu2 %v10146_v19  ;;  %v10169_v19 = vld [vmem:[%s12689_s12 + $0x260] sm:$0xff] }
0x136f   :  { %4995 = vadd.xlane.f32.xlu1 %v4994_v18  ;;  %5061 = vmatpush.bf16.msrb.mxu3 %v10129_v23  ;;  %v10142_v18 = vld [vmem:[%s12689_s12 + $0x188] sm:$0xff]  ;;  %v10145_v23 = vld [vmem:[%s12689_s12 + $0x1a0] sm:$0xff] }
0x1370   :  { %5549 = vmatpush.bf16.msra.mxu0 %v10166_v48  ;;  %v10177_v48 = vld [vmem:[%s12689_s12 + $0x2a0] sm:$0xff] }
0x1372   :  { %5360 = vmatpush.bf16.msrb.mxu2 %v10145_v23  ;;  %v10186_v23 = vld [vmem:[%s12689_s12 + $0x2e8] sm:$0xff] }
0x1373   :  { %5395 = vmatpush.bf16.msra.mxu3 %v10152_v7  ;;  %v10172_v7 = vld [vmem:[%s12689_s12 + $0x278] sm:$0xff] }
0x1374   :  { %5550 = vmatpush.bf16.msra.mxu0 %v10165_v12 }
0x1377   :  { %5396 = vmatpush.bf16.msra.mxu3 %v10151_v14  ;;  %v10175_v14 = vld [vmem:[%s12689_s12 + $0x290] sm:$0xff] }
0x137b   :  { %5397 = vmatpush.bf16.msra.mxu3 %v10150_v20  ;;  %v10173_v20 = vld [vmem:[%s12689_s12 + $0x280] sm:$0xff] }
0x13da   :  { %v4993_v13 = vpop.xlane.xlu0 %4992 }
0x13db   :  { %v4997_v22 = vmul.f32 %v4993_v13, %v10759_v21 }
0x13dd   :  { %v4999_v24 = vadd.f32 1e-06, %v4997_v22  ;;  %v10141_v22 = vld [vmem:[%s12689_s12 + $0x180] sm:$0xff] }
0x13df   :  { %10451 = vrsqrt.f32 %v4999_v24  ;;  %vm5007_vm4 = vweird.f32 %v4999_v24 }
0x13e2   :  { %v4996_v28 = vpop.xlane.xlu1 %4995 }
0x13e3   :  { %v4998_v29 = vmul.f32 %v4996_v28, %v10759_v21 }
0x13e5   :  { %v10452_v30 = vpop.eup %10451  ;;  %v5000_v31 = vadd.f32 1e-06, %v4998_v29  ;;  %v10156_v29 = vld [vmem:[%s12689_s12 + $0x1f8] sm:$0xff] }
0x13e6   :  { %v5002_v9 = vmul.f32 %v10452_v30, %v4999_v24  ;;  %vm5008_vm3 = vweird.f32 %v10452_v30  ;;  %v10149_v24 = vld [vmem:[%s12689_s12 + $0x1c0] sm:$0xff] }
0x13e7   :  { %10453 = vrsqrt.f32 %v5000_v31  ;;  %vm5009_vm5 = vmor %vm5007_vm4, %vm5008_vm3  ;;  %vm5017_vm7 = vweird.f32 %v5000_v31  ;;  %5398 = vmatpush.bf16.msra.mxu3 %v10149_v24  ;;  %v10185_v24 = vld [vmem:[%s12689_s12 + $0x2e0] sm:$0xff] }
0x13e8   :  { %v5003_v35 = vmul.f32 %v10452_v30, %v5002_v9 }
0x13ea   :  { %v5004_v26 = vmul.f32 0.5, %v5003_v35 }
0x13ec   :  { %v5005_v39 = vsub.f32 1.5, %v5004_v26  ;;  %v10159_v26 = vld [vmem:[%s12689_s12 + $0x210] sm:$0xff] }
0x13ed   :  { %v10454_v34 = vpop.eup %10453 }
0x13ee   :  { %v5012_v40 = vmul.f32 %v10454_v34, %v5000_v31  ;;  %v5006_v42 = vmul.f32 %v10452_v30, %v5005_v39  ;;  %vm5018_vm6 = vweird.f32 %v10454_v34  ;;  %v10164_v31 = vld [vmem:[%s12689_s12 + $0x238] sm:$0xff] }
0x13ef   :  { %vm5019_vm9 = vmor %vm5017_vm7, %vm5018_vm6 }
0x13f0   :  { %v5013_v8 = vmul.f32 %v10454_v34, %v5012_v40  ;;  %v5010_v44 = vsel %vm5009_vm5, %v10452_v30, %v5006_v42  ;;  %v10160_v30 = vld [vmem:[%s12689_s12 + $0x218] sm:$0xff]  ;;  %v10154_v42 = vld [vmem:[%s12689_s12 + $0x1e8] sm:$0xff] }
0x13f1   :  { %v5021_v49 = vmul.f32 %v5010_v44, %v11983_v2  ;;  %5471 = vmatpush.bf16.msra.mxu2 %v10160_v30  ;;  %v10162_v44 = vld [vmem:[%s12689_s12 + $0x228] sm:$0xff] }
0x13f2   :  { %v5014_v43 = vmul.f32 0.5, %v5013_v8  ;;  %v10158_v8 = vld [vmem:[%s12689_s12 + $0x208] sm:$0xff] }
0x13f3   :  { %v5024_v53 = vmul.f32 %v10288_v46, %v5021_v49  ;;  %v10153_v49 = vld [vmem:[%s12689_s12 + $0x1e0] sm:$0xff] }
0x13f4   :  { %v5015_v45 = vsub.f32 1.5, %v5014_v43 }
0x13f5   :  { %5472 = vmatpush.bf16.msra.mxu2 %v10159_v26 }
0x13f6   :  { %v5016_v41 = vmul.f32 %v10454_v34, %v5015_v45  ;;  %v10182_v45 = vld [vmem:[%s12689_s12 + $0x2c8] sm:$0xff] }
0x13f8   :  { %v5020_v50 = vsel %vm5019_vm9, %v10454_v34, %v5016_v41  ;;  %v10163_v34 = vld [vmem:[%s12689_s12 + $0x230] sm:$0xff] }
0x13f9   :  { %v5022_v3 = vmul.f32 %v5020_v50, %v11992_v25  ;;  %5473 = vmatpush.bf16.msra.mxu2 %v10158_v8  ;;  %v10157_v50 = vld [vmem:[%s12689_s12 + $0x200] sm:$0xff] }
0x13fb   :  { %v5025_v54 = vmul.f32 %v10288_v46, %v5022_v3 }
0x13fd   :  { %v5026_v36 = vpack.c.bf16 %v5025_v54, %v5024_v53  ;;  %v10161_v54 = vld [vmem:[%s12689_s12 + $0x220] sm:$0xff]  ;;  %5474 = vmatpush.bf16.msra.mxu2 %v10157_v50 }
0x13ff   :  { %9104 = vmatmul.msk.bf16.vlgmr.msrb.gmra.mxu3 %vm93_vm0, %v5026_v36  ;;  %v10181_v36 = vld [vmem:[%s12689_s12 + $0x2c0] sm:$0xff] }
0x1400   :  { %5509 = vmatpush.bf16.msrb.mxu3 %v10164_v31 }
0x1404   :  { %5510 = vmatpush.bf16.msrb.mxu3 %v10163_v34 }
0x1408   :  { %5511 = vmatpush.bf16.msrb.mxu3 %v10162_v44 }
0x140c   :  { %5512 = vmatpush.bf16.msrb.mxu3 %v10161_v54 }
0x1482   :  { %v5063_v58 = vpop.f32.mrf.mxu3 }
0x1483   :  { %v5068_v52 = vmax.f32 %v5063_v58, 0.0  ;;  %v10289_v58 = vld [vmem:[%s12688_s11 + $0x3] ss:$0 sm:$0xff] }
0x148a   :  { %v5065_v57 = vpop.f32.mrf.mxu3 }
0x148b   :  { %v5069_v60 = vmax.f32 %v5065_v57, 0.0 }
0x148d   :  { %v5070_v61 = vpack.c.bf16 %v5069_v60, %v5068_v52 }
0x148f   :  { %5127 = vmatmul.bf16.vlgmr.msrb.gmra.mxu0 %v5070_v61 }
0x1490   :  { %5699 = vmatpush.bf16.msrb.mxu0 %v10184_v33 }
0x1494   :  { %5700 = vmatpush.bf16.msrb.mxu0 %v10183_v37 }
0x1498   :  { %5701 = vmatpush.bf16.msrb.mxu0 %v10182_v45 }
0x149c   :  { %5702 = vmatpush.bf16.msrb.mxu0 %v10181_v36 }
0x150c   :  { %v5128_v62 = vpop.f32.mrf.mxu0 }
0x150d   :  { %v12042_v59 = vadd.f32 %v5128_v62, %v11983_v2  ;;  %v10144_v2 = vld [vmem:[%s12689_s12 + $0x198] sm:$0xff] }
0x150e   :  { %5319 = vmatpush.bf16.msra.mxu1 %v10144_v2 }
0x150f   :  { %v5136_v15 = vmul.f32 %v12042_v59, %v12042_v59 }
0x1511   :  { %v5138_v63 = vsel %vm93_vm0, %v5136_v15, 0.0 }
0x1512   :  { %5139 = vadd.xlane.f32.xlu2 %v5138_v63  ;;  %5320 = vmatpush.bf16.msra.mxu1 %v10143_v11  ;;  %v10180_v11 = vld [vmem:[%s12689_s12 + $0x2b8] sm:$0xff] }
0x1514   :  { %v5130_v4 = vpop.f32.mrf.mxu0 }
0x1515   :  { %v12048_v5 = vadd.f32 %v5130_v4, %v11992_v25 }
0x1516   :  { %5321 = vmatpush.bf16.msra.mxu1 %v10142_v18  ;;  %v10178_v18 = vld [vmem:[%s12689_s12 + $0x2a8] sm:$0xff] }
0x1517   :  { %v5137_v6 = vmul.f32 %v12048_v5, %v12048_v5 }
0x1519   :  { %v5141_v47 = vsel %vm93_vm0, %v5137_v6, 0.0 }
0x151a   :  { %5142 = vadd.xlane.f32.xlu0 %v5141_v47  ;;  %5322 = vmatpush.bf16.msra.mxu1 %v10141_v22  ;;  %v10187_v22 = vld [vmem:[%s12689_s12 + $0x2f0] sm:$0xff] }
0x151e   :  { %5433 = vmatpush.bf16.msrb.mxu1 %v10156_v29 }
0x1522   :  { %5434 = vmatpush.bf16.msrb.mxu1 %v10155_v38 }
0x1526   :  { %5435 = vmatpush.bf16.msrb.mxu1 %v10154_v42 }
0x152a   :  { %5436 = vmatpush.bf16.msrb.mxu1 %v10153_v49 }
0x1585   :  { %v5140_v25 = vpop.xlane.xlu2 %5139 }
0x1586   :  { %v5144_v17 = vmul.f32 %v5140_v25, %v10759_v21  ;;  %v10170_v25 = vld [vmem:[%s12689_s12 + $0x268] sm:$0xff] }
0x1588   :  { %v5146_v13 = vadd.f32 1e-06, %v5144_v17  ;;  %v10174_v17 = vld [vmem:[%s12689_s12 + $0x288] sm:$0xff] }
0x158a   :  { %10455 = vrsqrt.f32 %v5146_v13  ;;  %vm5154_vm11 = vweird.f32 %v5146_v13 }
0x158d   :  { %v5143_v27 = vpop.xlane.xlu0 %5142 }
0x158e   :  { %v5145_v28 = vmul.f32 %v5143_v27, %v10759_v21 }
0x1590   :  { %v10456_v9 = vpop.eup %10455  ;;  %v5147_v35 = vadd.f32 1e-06, %v5145_v28 }
0x1591   :  { %v5149_v39 = vmul.f32 %v10456_v9, %v5146_v13  ;;  %vm5155_vm10 = vweird.f32 %v10456_v9  ;;  %v10188_v13 = vld [vmem:[%s12689_s12 + $0x2f8] sm:$0xff] }
0x1592   :  { %10457 = vrsqrt.f32 %v5147_v35  ;;  %vm5156_vm12 = vmor %vm5154_vm11, %vm5155_vm10  ;;  %vm5164_vm14 = vweird.f32 %v5147_v35 }
0x1593   :  { %v5150_v40 = vmul.f32 %v10456_v9, %v5149_v39 }
0x1595   :  { %v5151_v43 = vmul.f32 0.5, %v5150_v40 }
0x1597   :  { %v5152_v41 = vsub.f32 1.5, %v5151_v43 }
0x1598   :  { %v10458_v46 = vpop.eup %10457 }
0x1599   :  { %v5153_v3 = vmul.f32 %v10456_v9, %v5152_v41  ;;  %v5159_v53 = vmul.f32 %v10458_v46, %v5147_v35  ;;  %vm5165_vm13 = vweird.f32 %v10458_v46 }
0x159a   :  { %vm5166_vm15 = vmor %vm5164_vm14, %vm5165_vm13 }
0x159b   :  { %v5157_v55 = vsel %vm5156_vm12, %v10456_v9, %v5153_v3  ;;  %v5160_v0 = vmul.f32 %v10458_v46, %v5159_v53 }
0x159c   :  { %v5168_v57 = vmul.f32 %v5157_v55, %v12042_v59 }
0x159d   :  { %v5161_v56 = vmul.f32 0.5, %v5160_v0 }
0x159e   :  { %v5171_v61 = vmul.f32 %v10289_v58, %v5168_v57 }
0x159f   :  { %v5162_v52 = vsub.f32 1.5, %v5161_v56 }
0x15a0   :  { %v5173_v63 = vpack.c.bf16 %v5171_v61, %v5171_v61 }
0x15a1   :  { %v5163_v60 = vmul.f32 %v10458_v46, %v5162_v52 }
0x15a2   :  { %v5285_v47 = vunpack.c.l.b16 %v5173_v63 }
0x15a3   :  { %v5167_v62 = vsel %vm5166_vm15, %v10458_v46, %v5163_v60 }
0x15a4   :  { %v5169_v15 = vmul.f32 %v5167_v62, %v12048_v5 }
0x15a6   :  { %v5172_v4 = vmul.f32 %v10289_v58, %v5169_v15 }
0x15a8   :  { %v5174_v6 = vpack.c.bf16 %v5172_v4, %v5172_v4 }
0x15aa   :  { %v5286_v2 = vunpack.c.l.b16 %v5174_v6 }
0x15ac   :  { %v5287_v1 = vpack.c.b16 %v5286_v2, %v5285_v47 }
0x15ae   :  { %9257 = vmatmul.msk.bf16.vlgmr.msra.gmra.mxu1 %vm93_vm0, %v5287_v1  ;;  %9274 = vmatmul.msk.bf16.vlgmr.msrb.gmra.mxu2 %vm93_vm0, %v5287_v1 }
0x15af   :  { %9291 = vmatmul.msk.bf16.vlgmr.msra.gmra.mxu3 %vm93_vm0, %v5287_v1  ;;  %9359 = vmatmul.msk.bf16.vlgmr.msra.gmra.mxu0 %vm93_vm0, %v5287_v1 }
0x15b0   :  { %5585 = vmatpush.bf16.msra.mxu1 %v10172_v7  ;;  %5623 = vmatpush.bf16.msrb.mxu2 %v10176_v51 }
0x15b1   :  { %5661 = vmatpush.bf16.msra.mxu3 %v10180_v11 }
0x15b4   :  { %5586 = vmatpush.bf16.msra.mxu1 %v10171_v32  ;;  %5624 = vmatpush.bf16.msrb.mxu2 %v10175_v14 }
0x15b5   :  { %5662 = vmatpush.bf16.msra.mxu3 %v10179_v16 }
0x15b8   :  { %5587 = vmatpush.bf16.msra.mxu1 %v10170_v25  ;;  %5625 = vmatpush.bf16.msrb.mxu2 %v10174_v17 }
0x15b9   :  { %5663 = vmatpush.bf16.msra.mxu3 %v10178_v18 }
0x15bc   :  { %5588 = vmatpush.bf16.msra.mxu1 %v10169_v19  ;;  %5626 = vmatpush.bf16.msrb.mxu2 %v10173_v20 }
0x15bd   :  { %5664 = vmatpush.bf16.msra.mxu3 %v10177_v48 }
0x15be   :  { %9308 = vmatmul.msk.bf16.vlgmr.msrb.gmra.mxu1 %vm93_vm0, %v5287_v1  ;;  %9325 = vmatmul.msk.bf16.vlgmr.msra.gmra.mxu2 %vm93_vm0, %v5287_v1 }
0x15bf   :  { %9342 = vmatmul.msk.bf16.vlgmr.msrb.gmra.mxu3 %vm93_vm0, %v5287_v1  ;;  %9427 = vmatmul.msk.bf16.vlgmr.msrb.gmra.mxu0 %vm93_vm0, %v5287_v1 }
0x15c0   :  { %5737 = vmatpush.bf16.msrb.mxu1 %v10188_v13 }
0x15c4   :  { %5738 = vmatpush.bf16.msrb.mxu1 %v10187_v22 }
0x15c8   :  { %5739 = vmatpush.bf16.msrb.mxu1 %v10186_v23 }
0x15cc   :  { %5740 = vmatpush.bf16.msrb.mxu1 %v10185_v24 }
0x15ce   :  { %9376 = vmatmul.msk.bf16.vlgmr.msra.gmra.mxu1 %vm93_vm0, %v5287_v1  ;;  %9393 = vmatmul.msk.bf16.vlgmr.msrb.gmra.mxu2 %vm93_vm0, %v5287_v1 }
0x15cf   :  { %9410 = vmatmul.msk.bf16.vlgmr.msra.gmra.mxu3 %vm93_vm0, %v5287_v1 }
0x15de   :  { %9444 = vmatmul.msk.bf16.vlgmr.msrb.gmra.mxu1 %vm93_vm0, %v5287_v1 }
0x162b   :  { %v5324_v12 = vpop.f32.mrf.mxu1 }
0x162c   :  { %v5552_v27 = vpop.f32.mrf.mxu0  ;;  %v5747_v51 = vpack.c.bf16 %v5324_v12, %v5324_v12 }
0x162d   :  { %v5759_v30 = vpack.c.bf16 %v5552_v27, %v5552_v27 }
0x162e   :  { %v5765_v48 = vunpack.c.l.b16 %v5747_v51  ;;  %v10555_v51 = vld [vmem:[%s12728_s6 + $0x18] sm:$0xff] }
0x162f   :  { %v5830_v35 = vunpack.c.l.b16 %v5759_v30 }
0x1631   :  { %v5362_v28 = vpop.f32.mrf.mxu2 }
0x1632   :  { %v5400_v29 = vpop.f32.mrf.mxu3  ;;  %v5749_v32 = vpack.c.bf16 %v5362_v28, %v5362_v28 }
0x1633   :  { %v5326_v31 = vpop.f32.mrf.mxu1  ;;  %v5751_v37 = vpack.c.bf16 %v5400_v29, %v5400_v29 }
0x1634   :  { %v5554_v33 = vpop.f32.mrf.mxu0  ;;  %v5748_v47 = vpack.c.bf16 %v5326_v31, %v5326_v31  ;;  %v5795_v22 = vunpack.c.l.b16 %v5749_v32 }
0x1635   :  { %v5760_v9 = vpack.c.bf16 %v5554_v33, %v5554_v33  ;;  %v5825_v45 = vunpack.c.l.b16 %v5751_v37 }
0x1636   :  { %v5766_v25 = vunpack.c.l.b16 %v5748_v47  ;;  %v10554_v47 = vld [vmem:[%s12728_s6 + $0x8] sm:$0xff] }
0x1637   :  { %v5831_v38 = vunpack.c.l.b16 %v5760_v9 }
0x1638   :  { %v5767_v23 = vpack.c.b16 %v5766_v25, %v5765_v48  ;;  %v10556_v25 = vld [vmem:[%s12728_s6 + $0x20] sm:$0xff] }
0x1639   :  { %v5832_v26 = vpack.c.b16 %v5831_v38, %v5830_v35  ;;  %v5364_v39 = vpop.f32.mrf.mxu2 }
0x163a   :  { %v5402_v34 = vpop.f32.mrf.mxu3  ;;  %v5750_v1 = vpack.c.bf16 %v5364_v39, %v5364_v39 }
0x163b   :  { %v5752_v40 = vpack.c.bf16 %v5402_v34, %v5402_v34  ;;  %v12216_v42 = vpop.f32.mrf.mxu1  ;;  %v5837_v8 = vsel %vm734_vm8, %v5832_v26, 0 }
0x163c   :  { %v5704_v43 = vpop.f32.mrf.mxu0  ;;  %5846 = vmatpush.bf16.xpose.msra.mxu0 %v5837_v8  ;;  %v5796_v19 = vunpack.c.l.b16 %v5750_v1  ;;  %v5753_v9 = vpack.c.bf16 %v12216_v42, %v12216_v42 }
0x163d   :  { %v5826_v44 = vunpack.c.l.b16 %v5752_v40  ;;  %v5983_v50 = vpack.c.bf16 %v5704_v43, %v5704_v43 }
0x163e   :  { %v5797_v12 = vpack.c.b16 %v5796_v19, %v5795_v22  ;;  %v10558_v22 = vld [vmem:[%s12728_s6 + $0x38] sm:$0xff] }
0x163f   :  { %v5827_v41 = vpack.c.b16 %v5826_v44, %v5825_v45  ;;  %v6050_v36 = vunpack.c.l.b16 %v5983_v50  ;;  %v5855_v45 = vunpack.c.l.b16 %v5753_v9 }
0x1641   :  { %v5476_v46 = vpop.f32.mrf.mxu2 }
0x1642   :  { %v5514_v49 = vpop.f32.mrf.mxu3  ;;  %v5755_v0 = vpack.c.bf16 %v5476_v46, %v5476_v46 }
0x1643   :  { %9447 = vmatmul.msk.bf16.vlgmr.msra.gmra.mxu0 %vm734_vm8, %v5827_v41  ;;  %v5440_v3 = vpop.f32.mrf.mxu1  ;;  %v5757_v56 = vpack.c.bf16 %v5514_v49, %v5514_v49 }
0x1644   :  { %v5706_v53 = vpop.f32.mrf.mxu0  ;;  %v5770_v15 = vunpack.c.l.b16 %v5755_v0  ;;  %v5754_v29 = vpack.c.bf16 %v5440_v3, %v5440_v3 }
0x1645   :  { %v5984_v54 = vpack.c.bf16 %v5706_v53, %v5706_v53  ;;  %v5800_v4 = vunpack.c.l.b16 %v5757_v56  ;;  %v10551_v56 = vld [vmem:[%s12728_s6] sm:$0xff] }
0x1646   :  { %v5856_v37 = vunpack.c.l.b16 %v5754_v29 }
0x1647   :  { %v6051_v55 = vunpack.c.l.b16 %v5984_v54 }
0x1648   :  { %v5857_v49 = vpack.c.b16 %v5856_v37, %v5855_v45 }
0x1649   :  { %v6052_v58 = vpack.c.b16 %v6051_v55, %v6050_v36  ;;  %v5478_v57 = vpop.f32.mrf.mxu2 }
0x164a   :  { %v5756_v52 = vpack.c.bf16 %v5478_v57, %v5478_v57  ;;  %v5516_v60 = vpop.f32.mrf.mxu3 }
0x164b   :  { %v5758_v61 = vpack.c.bf16 %v5516_v60, %v5516_v60  ;;  %6064 = vmatpush.bf16.msrb.mxu0 %v6052_v58  ;;  %v5590_v62 = vpop.f32.mrf.mxu1 }
0x164c   :  { %v5771_v63 = vunpack.c.l.b16 %v5756_v52  ;;  %v5761_v17 = vpack.c.bf16 %v5590_v62, %v5590_v62  ;;  %v10552_v52 = vld [vmem:[%s12728_s6 + $0x10] sm:$0xff] }
0x164d   :  { %v5801_v6 = vunpack.c.l.b16 %v5758_v61 }
0x164e   :  { %v5772_v2 = vpack.c.b16 %v5771_v63, %v5770_v15  ;;  %v5860_v24 = vunpack.c.l.b16 %v5761_v17  ;;  %v10553_v63 = vld [vmem:[%s12728_s6 + $0x28] sm:$0xff] }
0x164f   :  { %v5802_v7 = vpack.c.b16 %v5801_v6, %v5800_v4 }
0x1650   :  { %v5777_v11 = vsel %vm734_vm8, %v5772_v2, 0 }
0x1651   :  { %v5628_v14 = vpop.f32.mrf.mxu2  ;;  %5786 = vmatpush.bf16.xpose.msra.mxu2 %v5777_v11  ;;  %v5807_v16 = vsel %vm734_vm8, %v5802_v7, 0 }
0x1652   :  { %v5666_v18 = vpop.f32.mrf.mxu3  ;;  %5816 = vmatpush.bf16.xpose.msrb.mxu3 %v5807_v16  ;;  %v5979_v30 = vpack.c.bf16 %v5628_v14, %v5628_v14 }
0x1653   :  { %v5592_v20 = vpop.f32.mrf.mxu1  ;;  %v5981_v31 = vpack.c.bf16 %v5666_v18, %v5666_v18  ;;  %v10557_v18 = vld [vmem:[%s12728_s6 + $0x30] sm:$0xff] }
0x1654   :  { %v5762_v13 = vpack.c.bf16 %v5592_v20, %v5592_v20  ;;  %v5994_v40 = vunpack.c.l.b16 %v5979_v30 }
0x1655   :  { %v6022_v43 = vunpack.c.l.b16 %v5981_v31 }
0x1656   :  { %v5861_v27 = vunpack.c.l.b16 %v5762_v13 }
0x1658   :  { %v5862_v28 = vpack.c.b16 %v5861_v27, %v5860_v24  ;;  %9445 = vmatmul.msk.bf16.vlgmr.msra.gmra.mxu2 %vm734_vm8, %v5767_v23 }
0x1659   :  { %9446 = vmatmul.msk.bf16.vlgmr.msrb.gmra.mxu3 %vm734_vm8, %v5797_v12  ;;  %v5630_v33 = vpop.f32.mrf.mxu2 }
0x165a   :  { %v5980_v35 = vpack.c.bf16 %v5630_v33, %v5630_v33  ;;  %v5668_v38 = vpop.f32.mrf.mxu3  ;;  %v5867_v26 = vsel %vm734_vm8, %v5862_v28, 0 }
0x165b   :  { %v5982_v39 = vpack.c.bf16 %v5668_v38, %v5668_v38  ;;  %v5742_v34 = vpop.f32.mrf.mxu1  ;;  %5876 = vmatpush.bf16.xpose.msra.mxu1 %v5867_v26 }
0x165c   :  { %v5995_v8 = vunpack.c.l.b16 %v5980_v35  ;;  %v5985_v50 = vpack.c.bf16 %v5742_v34, %v5742_v34 }
0x165d   :  { %v6023_v44 = vunpack.c.l.b16 %v5982_v39 }
0x165e   :  { %v5996_v41 = vpack.c.b16 %v5995_v8, %v5994_v40  ;;  %v6078_v53 = vunpack.c.l.b16 %v5985_v50 }
0x165f   :  { %v6024_v46 = vpack.c.b16 %v6023_v44, %v6022_v43 }
0x1660   :  { %6008 = vmatpush.bf16.msrb.mxu2 %v5996_v41 }
0x1661   :  { %6036 = vmatpush.bf16.msra.mxu3 %v6024_v46 }
0x1662   :  { %9448 = vmatmul.msk.bf16.vlgmr.msra.gmra.mxu1 %vm734_vm8, %v5857_v49 }
0x1663   :  { %v5744_v42 = vpop.f32.mrf.mxu1 }
0x1664   :  { %v5986_v3 = vpack.c.bf16 %v5744_v42, %v5744_v42 }
0x1666   :  { %v6079_v54 = vunpack.c.l.b16 %v5986_v3 }
0x1668   :  { %v6080_v36 = vpack.c.b16 %v6079_v54, %v6078_v53 }
0x166a   :  { %6092 = vmatpush.bf16.msrb.mxu1 %v6080_v36 }
0x16c0   :  { %v5848_v55 = vpop.f32.mrf.mxu0 }
0x16c1   :  { %v5849_v17 = vadd.f32 %v10556_v25, %v5848_v55 }
0x16c3   :  { %v5895_v20 = vsel %vm734_vm8, %v5849_v17, -inf }
0x16c8   :  { %v5850_v15 = vpop.f32.mrf.mxu0 }
0x16c9   :  { %v5851_v4 = vadd.f32 %v10553_v63, %v5850_v15 }
0x16cb   :  { %v5898_v14 = vsel %vm734_vm8, %v5851_v4, -inf }
0x16db   :  { %v5788_v0 = vpop.f32.mrf.mxu2 }
0x16dc   :  { %v5789_v58 = vadd.f32 %v10551_v56, %v5788_v0  ;;  %v5818_v57 = vpop.f32.mrf.mxu3 }
0x16dd   :  { %v5819_v60 = vadd.f32 %v10552_v52, %v5818_v57 }
0x16de   :  { %v5883_v61 = vsel %vm734_vm8, %v5789_v58, -inf }
0x16df   :  { %v5889_v62 = vsel %vm734_vm8, %v5819_v60, -inf  ;;  %5884 = vmax.xlane.f32.xlu1 %v5883_v61  ;;  %v5878_v7 = vpop.f32.mrf.mxu1 }
0x16e0   :  { %5890 = vmax.xlane.f32.xlu0 %v5889_v62  ;;  %v5879_v19 = vadd.f32 %v10557_v18, %v5878_v7 }
0x16e2   :  { %v5901_v13 = vsel %vm734_vm8, %v5879_v19, -inf }
0x16e3   :  { %v5790_v6 = vpop.f32.mrf.mxu2 }
0x16e4   :  { %v5791_v2 = vadd.f32 %v10554_v47, %v5790_v6  ;;  %v5820_v1 = vpop.f32.mrf.mxu3 }
0x16e5   :  { %v5821_v11 = vadd.f32 %v10555_v51, %v5820_v1 }
0x16e6   :  { %v5886_v32 = vsel %vm734_vm8, %v5791_v2, -inf }
0x16e7   :  { %5887 = vmax.xlane.f32.xlu2 %v5886_v32  ;;  %v5892_v16 = vsel %vm734_vm8, %v5821_v11, -inf  ;;  %v5880_v48 = vpop.f32.mrf.mxu1 }
0x16e8   :  { %5899 = vmax.xlane.f32.xlu0 %v5898_v14  ;;  %5893 = vmax.xlane.f32.xlu1 %v5892_v16  ;;  %v5881_v23 = vadd.f32 %v10558_v22, %v5880_v48 }
0x16ea   :  { %v5904_v24 = vsel %vm734_vm8, %v5881_v23, -inf }
0x16ef   :  { %5896 = vmax.xlane.f32.xlu2 %v5895_v20 }
0x16f0   :  { %5902 = vmax.xlane.f32.xlu1 %v5901_v13 }
0x16f7   :  { %5905 = vmax.xlane.f32.xlu2 %v5904_v24 }
0x1752   :  { %v5885_v27 = vpop.xlane.xlu1 %5884 }
0x1753   :  { %v5891_v12 = vpop.xlane.xlu0 %5890  ;;  %v5907_v29 = vsub.f32 %v5789_v58, %v5885_v27 }
0x1754   :  { %v5909_v30 = vsub.f32 %v5819_v60, %v5891_v12 }
0x1755   :  { %v5915_v28 = vmul.f32 1.442695, %v5907_v29 }
0x1756   :  { %v5919_v31 = vmul.f32 1.442695, %v5909_v30 }
0x1757   :  { %10459 = vpow2.f32 %v5915_v28 }
0x1758   :  { %10461 = vpow2.f32 %v5919_v31 }
0x175a   :  { %v5888_v33 = vpop.xlane.xlu2 %5887 }
0x175b   :  { %v5900_v9 = vpop.xlane.xlu0 %5899  ;;  %v5908_v35 = vsub.f32 %v5791_v2, %v5888_v33  ;;  %v5894_v38 = vpop.xlane.xlu1 %5893 }
0x175c   :  { %v5912_v26 = vsub.f32 %v5851_v4, %v5900_v9  ;;  %v5910_v39 = vsub.f32 %v5821_v11, %v5894_v38 }
0x175d   :  { %v10460_v34 = vpop.eup %10459  ;;  %v5917_v37 = vmul.f32 1.442695, %v5908_v35 }
0x175e   :  { %v10462_v40 = vpop.eup %10461  ;;  %v5925_v8 = vmul.f32 1.442695, %v5912_v26  ;;  %v5921_v43 = vmul.f32 1.442695, %v5910_v39  ;;  %v5931_v44 = vsel %vm734_vm8, %v10460_v34, 0.0 }
0x175f   :  { %10463 = vpow2.f32 %v5917_v37  ;;  %5932 = vadd.xlane.f32.xlu0 %v5931_v44  ;;  %v5937_v45 = vsel %vm734_vm8, %v10462_v40, 0.0 }
0x1760   :  { %10465 = vpow2.f32 %v5925_v8  ;;  %5938 = vadd.xlane.f32.xlu2 %v5937_v45 }
0x1761   :  { %10467 = vpow2.f32 %v5921_v43 }
0x1762   :  { %v5897_v41 = vpop.xlane.xlu2 %5896 }
0x1763   :  { %v5911_v46 = vsub.f32 %v5849_v17, %v5897_v41  ;;  %v5903_v49 = vpop.xlane.xlu1 %5902 }
0x1764   :  { %v5913_v50 = vsub.f32 %v5879_v19, %v5903_v49 }
0x1765   :  { %v10464_v42 = vpop.eup %10463  ;;  %v5923_v3 = vmul.f32 1.442695, %v5911_v46 }
0x1766   :  { %v10466_v53 = vpop.eup %10465  ;;  %v5927_v54 = vmul.f32 1.442695, %v5913_v50  ;;  %v5934_v36 = vsel %vm734_vm8, %v10464_v42, 0.0 }
0x1767   :  { %v10468_v55 = vpop.eup %10467  ;;  %10469 = vpow2.f32 %v5923_v3  ;;  %v5946_v0 = vsel %vm734_vm8, %v10466_v53, 0.0  ;;  %5935 = vadd.xlane.f32.xlu1 %v5934_v36  ;;  %v10189_v3 = vld [vmem:[%s12690_s13 + $0x20] sm:$0xff]  ;;  %v10192_v36 = vld [vmem:[%s12690_s13 + $0x38] sm:$0xff] }
0x1768   :  { %10471 = vpow2.f32 %v5927_v54  ;;  %v5940_v56 = vsel %vm734_vm8, %v10468_v55, 0.0  ;;  %5947 = vadd.xlane.f32.xlu2 %v5946_v0  ;;  %6128 = vmatpush.bf16.msra.mxu2 %v10189_v3  ;;  %v10191_v54 = vld [vmem:[%s12690_s13 + $0x30] sm:$0xff]  ;;  %v10200_v3 = vld [vmem:[%s12691_s14 + $0x1b8] sm:$0xff] }
0x1769   :  { %5941 = vadd.xlane.f32.xlu0 %v5940_v56  ;;  %6184 = vmatpush.bf16.msra.mxu0 %v10191_v54  ;;  %v10195_v54 = vld [vmem:[%s12691_s14 + $0x190] sm:$0xff] }
0x176a   :  { %v5906_v58 = vpop.xlane.xlu2 %5905  ;;  %6212 = vmatpush.bf16.msra.mxu1 %v10192_v36  ;;  %v10199_v36 = vld [vmem:[%s12691_s14 + $0x1b0] sm:$0xff] }
0x176b   :  { %v5914_v57 = vsub.f32 %v5881_v23, %v5906_v58 }
0x176d   :  { %v10470_v52 = vpop.eup %10469  ;;  %v5929_v60 = vmul.f32 1.442695, %v5914_v57 }
0x176e   :  { %v10472_v61 = vpop.eup %10471  ;;  %v5943_v62 = vsel %vm734_vm8, %v10470_v52, 0.0 }
0x176f   :  { %10473 = vpow2.f32 %v5929_v60  ;;  %5944 = vadd.xlane.f32.xlu1 %v5943_v62  ;;  %v5949_v15 = vsel %vm734_vm8, %v10472_v61, 0.0 }
0x1771   :  { %5950 = vadd.xlane.f32.xlu0 %v5949_v15 }
0x1775   :  { %v10474_v63 = vpop.eup %10473 }
0x1776   :  { %v5952_v4 = vsel %vm734_vm8, %v10474_v63, 0.0 }
0x1777   :  { %5953 = vadd.xlane.f32.xlu1 %v5952_v4 }
0x17d2   :  { %v5933_v6 = vpop.xlane.xlu0 %5932 }
0x17d3   :  { %v5939_v47 = vpop.xlane.xlu2 %5938  ;;  %10475 = vrcp.f32 %v5933_v6 }
0x17d4   :  { %10477 = vrcp.f32 %v5939_v47 }
0x17d9   :  { %v10476_v1 = vpop.eup %10475 }
0x17da   :  { %v5936_v2 = vpop.xlane.xlu1 %5935  ;;  %v10478_v11 = vpop.eup %10477  ;;  %v5963_v32 = vmul.f32 %v10476_v1, %v10460_v34 }
0x17db   :  { %v5948_v7 = vpop.xlane.xlu2 %5947  ;;  %10479 = vrcp.f32 %v5936_v2  ;;  %v5965_v14 = vmul.f32 %v10478_v11, %v10462_v40 }
0x17dc   :  { %v5942_v51 = vpop.xlane.xlu0 %5941  ;;  %10481 = vrcp.f32 %v5948_v7  ;;  %v5971_v17 = vpack.c.bf16 %v5963_v32, %v5963_v32 }
0x17dd   :  { %10483 = vrcp.f32 %v5942_v51  ;;  %v5973_v48 = vpack.c.bf16 %v5965_v14, %v5965_v14 }
0x17de   :  { %v5989_v24 = vunpack.c.l.b16 %v5971_v17 }
0x17df   :  { %v6017_v30 = vunpack.c.l.b16 %v5973_v48 }
0x17e1   :  { %v10480_v16 = vpop.eup %10479 }
0x17e2   :  { %v10482_v25 = vpop.eup %10481  ;;  %v5964_v18 = vmul.f32 %v10480_v16, %v10464_v42  ;;  %v5945_v19 = vpop.xlane.xlu1 %5944 }
0x17e3   :  { %v10484_v20 = vpop.eup %10483  ;;  %10485 = vrcp.f32 %v5945_v19  ;;  %v5968_v12 = vmul.f32 %v10482_v25, %v10466_v53  ;;  %v10190_v53 = vld [vmem:[%s12690_s13 + $0x28] sm:$0xff] }
0x17e4   :  { %v5966_v13 = vmul.f32 %v10484_v20, %v10468_v55  ;;  %v5972_v22 = vpack.c.bf16 %v5964_v18, %v5964_v18  ;;  %v5951_v23 = vpop.xlane.xlu0 %5950  ;;  %6156 = vmatpush.bf16.msrb.mxu3 %v10190_v53  ;;  %v10204_v53 = vld [vmem:[%s12691_s14 + $0x1d8] sm:$0xff] }
0x17e5   :  { %10487 = vrcp.f32 %v5951_v23  ;;  %v5976_v35 = vpack.c.bf16 %v5968_v12, %v5968_v12 }
0x17e6   :  { %v5974_v27 = vpack.c.bf16 %v5966_v13, %v5966_v13  ;;  %v5990_v29 = vunpack.c.l.b16 %v5972_v22 }
0x17e7   :  { %v6046_v37 = vunpack.c.l.b16 %v5976_v35 }
0x17e8   :  { %v6018_v28 = vunpack.c.l.b16 %v5974_v27  ;;  %v5991_v31 = vpack.c.b16 %v5990_v29, %v5989_v24 }
0x17e9   :  { %v10486_v33 = vpop.eup %10485 }
0x17ea   :  { %v6019_v9 = vpack.c.b16 %v6018_v28, %v6017_v30  ;;  %v5967_v38 = vmul.f32 %v10486_v33, %v10470_v52  ;;  %9449 = vmatmul.msk.bf16.vlgmr.msrb.gmra.mxu2 %vm734_vm8, %v5991_v31  ;;  %v5954_v26 = vpop.xlane.xlu1 %5953 }
0x17eb   :  { %v10488_v39 = vpop.eup %10487  ;;  %10489 = vrcp.f32 %v5954_v26 }
0x17ec   :  { %v5975_v34 = vpack.c.bf16 %v5967_v38, %v5967_v38  ;;  %9450 = vmatmul.msk.bf16.vlgmr.msra.gmra.mxu3 %vm734_vm8, %v6019_v9  ;;  %v5969_v40 = vmul.f32 %v10488_v39, %v10472_v61 }
0x17ed   :  { %6457 = vmatpush.bf16.msra.mxu3 %v10200_v3 }
0x17ee   :  { %v6045_v8 = vunpack.c.l.b16 %v5975_v34  ;;  %v5977_v45 = vpack.c.bf16 %v5969_v40, %v5969_v40 }
0x17f0   :  { %v6047_v43 = vpack.c.b16 %v6046_v37, %v6045_v8  ;;  %v6073_v49 = vunpack.c.l.b16 %v5977_v45 }
0x17f1   :  { %v10490_v44 = vpop.eup %10489  ;;  %6458 = vmatpush.bf16.msra.mxu3 %v10199_v36  ;;  %v10240_v36 = vld [vmem:[%s12691_s14 + $0x2f8] sm:$0xff] }
0x17f2   :  { %v5970_v41 = vmul.f32 %v10490_v44, %v10474_v63  ;;  %9451 = vmatmul.msk.bf16.vlgmr.msrb.gmra.mxu0 %vm734_vm8, %v6047_v43 }
0x17f3   :  { %6495 = vmatpush.bf16.msrb.mxu0 %v10204_v53  ;;  %v10228_v53 = vld [vmem:[%s12691_s14 + $0x298] sm:$0xff] }
0x17f4   :  { %v5978_v46 = vpack.c.bf16 %v5970_v41, %v5970_v41 }
0x17f6   :  { %v6074_v50 = vunpack.c.l.b16 %v5978_v46 }
0x17f8   :  { %v6075_v42 = vpack.c.b16 %v6074_v50, %v6073_v49 }
0x17fa   :  { %9452 = vmatmul.msk.bf16.vlgmr.msrb.gmra.mxu1 %vm734_vm8, %v6075_v42  ;;  %v10196_v42 = vld [vmem:[%s12691_s14 + $0x198] sm:$0xff] }
0x17fb   :  { %6419 = vmatpush.bf16.msrb.mxu2 %v10196_v42 }
0x17ff   :  { %6420 = vmatpush.bf16.msrb.mxu2 %v10195_v54  ;;  %v10236_v54 = vld [vmem:[%s12691_s14 + $0x2d8] sm:$0xff] }
0x186d   :  { %v6010_v55 = vpop.f32.mrf.mxu2 }
0x186e   :  { %v6099_v58 = vpack.c.bf16 %v6010_v55, %v6010_v55  ;;  %v10203_v55 = vld [vmem:[%s12691_s14 + $0x1d0] sm:$0xff] }
0x186f   :  { %v6038_v0 = vpop.f32.mrf.mxu3  ;;  %v6066_v56 = vpop.f32.mrf.mxu0  ;;  %6496 = vmatpush.bf16.msrb.mxu0 %v10203_v55  ;;  %v10227_v55 = vld [vmem:[%s12691_s14 + $0x290] sm:$0xff] }
0x1870   :  { %v6101_v57 = vpack.c.bf16 %v6038_v0, %v6038_v0  ;;  %v6103_v60 = vpack.c.bf16 %v6066_v56, %v6066_v56  ;;  %v6109_v63 = vunpack.c.l.b16 %v6099_v58  ;;  %v10207_v0 = vld [vmem:[%s12691_s14 + $0x1f0] sm:$0xff]  ;;  %v10194_v58 = vld [vmem:[%s12691_s14 + $0x188] sm:$0xff] }
0x1871   :  { %6421 = vmatpush.bf16.msrb.mxu2 %v10194_v58  ;;  %v10239_v58 = vld [vmem:[%s12691_s14 + $0x2f0] sm:$0xff] }
0x1872   :  { %v6137_v1 = vunpack.c.l.b16 %v6101_v57  ;;  %v6165_v7 = vunpack.c.l.b16 %v6103_v60  ;;  %v10198_v57 = vld [vmem:[%s12691_s14 + $0x1a8] sm:$0xff] }
0x1873   :  { %6459 = vmatpush.bf16.msra.mxu3 %v10198_v57  ;;  %v10226_v57 = vld [vmem:[%s12691_s14 + $0x288] sm:$0xff] }
0x1875   :  { %v6012_v52 = vpop.f32.mrf.mxu2 }
0x1876   :  { %v6100_v61 = vpack.c.bf16 %v6012_v52, %v6012_v52  ;;  %v10202_v52 = vld [vmem:[%s12691_s14 + $0x1c8] sm:$0xff] }
0x1877   :  { %v6040_v62 = vpop.f32.mrf.mxu3  ;;  %v6068_v15 = vpop.f32.mrf.mxu0  ;;  %6497 = vmatpush.bf16.msrb.mxu0 %v10202_v52  ;;  %v10230_v52 = vld [vmem:[%s12691_s14 + $0x2a8] sm:$0xff] }
0x1878   :  { %v6110_v4 = vunpack.c.l.b16 %v6100_v61  ;;  %v6102_v6 = vpack.c.bf16 %v6040_v62, %v6040_v62  ;;  %v6104_v47 = vpack.c.bf16 %v6068_v15, %v6068_v15  ;;  %v6094_v2 = vpop.f32.mrf.mxu1  ;;  %v10206_v61 = vld [vmem:[%s12691_s14 + $0x1e8] sm:$0xff]  ;;  %v10193_v15 = vld [vmem:[%s12691_s14 + $0x180] sm:$0xff] }
0x1879   :  { %v6105_v25 = vpack.c.bf16 %v6094_v2, %v6094_v2  ;;  %6422 = vmatpush.bf16.msrb.mxu2 %v10193_v15  ;;  %v10229_v15 = vld [vmem:[%s12691_s14 + $0x2a0] sm:$0xff] }
0x187a   :  { %v6111_v51 = vpack.c.b16 %v6110_v4, %v6109_v63  ;;  %v6138_v11 = vunpack.c.l.b16 %v6102_v6  ;;  %v6166_v32 = vunpack.c.l.b16 %v6104_v47  ;;  %v10197_v63 = vld [vmem:[%s12691_s14 + $0x1a0] sm:$0xff] }
0x187b   :  { %v6193_v19 = vunpack.c.l.b16 %v6105_v25  ;;  %v10201_v4 = vld [vmem:[%s12691_s14 + $0x1c0] sm:$0xff]  ;;  %6460 = vmatpush.bf16.msra.mxu3 %v10197_v63  ;;  %v10215_v25 = vld [vmem:[%s12691_s14 + $0x230] sm:$0xff] }
0x187c   :  { %v6139_v14 = vpack.c.b16 %v6138_v11, %v6137_v1  ;;  %v6167_v16 = vpack.c.b16 %v6166_v32, %v6165_v7  ;;  %9457 = vmatmul.msk.bf16.vlgmr.msra.gmra.mxu2 %vm734_vm8, %v6111_v51  ;;  %v10205_v6 = vld [vmem:[%s12691_s14 + $0x1e0] sm:$0xff]  ;;  %6498 = vmatpush.bf16.msrb.mxu0 %v10201_v4  ;;  %v10212_v1 = vld [vmem:[%s12691_s14 + $0x218] sm:$0xff] }
0x187d   :  { %v10216_v7 = vld [vmem:[%s12691_s14 + $0x238] sm:$0xff]  ;;  %6571 = vmatpush.bf16.msra.mxu2 %v10212_v1  ;;  %v10233_v63 = vld [vmem:[%s12691_s14 + $0x2c0] sm:$0xff] }
0x187e   :  { %9462 = vmatmul.msk.bf16.vlgmr.msrb.gmra.mxu3 %vm734_vm8, %v6139_v14  ;;  %9467 = vmatmul.msk.bf16.vlgmr.msra.gmra.mxu0 %vm734_vm8, %v6167_v16  ;;  %v10220_v51 = vld [vmem:[%s12691_s14 + $0x258] sm:$0xff]  ;;  %v10211_v16 = vld [vmem:[%s12691_s14 + $0x210] sm:$0xff]  ;;  %v10237_v4 = vld [vmem:[%s12691_s14 + $0x2e0] sm:$0xff] }
0x187f   :  { %v10224_v11 = vld [vmem:[%s12691_s14 + $0x278] sm:$0xff]  ;;  %6609 = vmatpush.bf16.msrb.mxu3 %v10216_v7 }
0x1880   :  { %v6096_v17 = vpop.f32.mrf.mxu1  ;;  %6647 = vmatpush.bf16.msra.mxu0 %v10220_v51 }
0x1881   :  { %v6106_v18 = vpack.c.bf16 %v6096_v17, %v6096_v17  ;;  %6572 = vmatpush.bf16.msra.mxu2 %v10211_v16 }
0x1883   :  { %v6194_v20 = vunpack.c.l.b16 %v6106_v18  ;;  %v10219_v18 = vld [vmem:[%s12691_s14 + $0x250] sm:$0xff]  ;;  %6610 = vmatpush.bf16.msrb.mxu3 %v10215_v25 }
0x1884   :  { %6648 = vmatpush.bf16.msra.mxu0 %v10219_v18 }
0x1885   :  { %v6195_v48 = vpack.c.b16 %v6194_v20, %v6193_v19  ;;  %v10223_v19 = vld [vmem:[%s12691_s14 + $0x270] sm:$0xff] }
0x1887   :  { %9472 = vmatmul.msk.bf16.vlgmr.msra.gmra.mxu1 %vm734_vm8, %v6195_v48  ;;  %v10210_v48 = vld [vmem:[%s12691_s14 + $0x208] sm:$0xff] }
0x1888   :  { %6573 = vmatpush.bf16.msra.mxu2 %v10210_v48 }
0x18fb   :  { %v6186_v13 = vpop.f32.mrf.mxu0 }
0x18fc   :  { %v6222_v29 = vsel %vm93_vm0, %v6186_v13, 0.0  ;;  %v10214_v13 = vld [vmem:[%s12691_s14 + $0x228] sm:$0xff] }
0x18fd   :  { %6611 = vmatpush.bf16.msrb.mxu3 %v10214_v13 }
0x18ff   :  { %v6130_v22 = vpop.f32.mrf.mxu2 }
0x1900   :  { %v6219_v23 = vsel %vm93_vm0, %v6130_v22, 0.0 }
0x1901   :  { %v6158_v24 = vpop.f32.mrf.mxu3 }
0x1902   :  { %v6220_v27 = vsel %vm93_vm0, %v6158_v24, 0.0  ;;  %v10222_v24 = vld [vmem:[%s12691_s14 + $0x268] sm:$0xff] }
0x1903   :  { %v6221_v12 = vadd.f32 %v6220_v27, %v6219_v23  ;;  %v6188_v38 = vpop.f32.mrf.mxu0  ;;  %v10218_v23 = vld [vmem:[%s12691_s14 + $0x248] sm:$0xff] }
0x1904   :  { %v6214_v30 = vpop.f32.mrf.mxu1  ;;  %v6229_v8 = vsel %vm93_vm0, %v6188_v38, 0.0  ;;  %6649 = vmatpush.bf16.msra.mxu0 %v10218_v23 }
0x1905   :  { %v6223_v28 = vadd.f32 %v6222_v29, %v6221_v12  ;;  %v6224_v31 = vsel %vm93_vm0, %v6214_v30, 0.0  ;;  %v10209_v29 = vld [vmem:[%s12691_s14 + $0x200] sm:$0xff] }
0x1906   :  { %v10213_v30 = vld [vmem:[%s12691_s14 + $0x220] sm:$0xff]  ;;  %6574 = vmatpush.bf16.msra.mxu2 %v10209_v29 }
0x1907   :  { %v6225_v33 = vadd.f32 %v6224_v31, %v6223_v28  ;;  %v6132_v9 = vpop.f32.mrf.mxu2  ;;  %6612 = vmatpush.bf16.msrb.mxu3 %v10213_v30 }
0x1908   :  { %v6226_v35 = vsel %vm93_vm0, %v6132_v9, 0.0  ;;  %v10221_v9 = vld [vmem:[%s12691_s14 + $0x260] sm:$0xff] }
0x1909   :  { %v12294_v26 = vadd.f32 %v6225_v33, %v12042_v59  ;;  %v6160_v39 = vpop.f32.mrf.mxu3  ;;  %v10217_v33 = vld [vmem:[%s12691_s14 + $0x240] sm:$0xff] }
0x190a   :  { %v6227_v34 = vsel %vm93_vm0, %v6160_v39, 0.0  ;;  %6650 = vmatpush.bf16.msra.mxu0 %v10217_v33 }
0x190b   :  { %v6228_v37 = vadd.f32 %v6227_v34, %v6226_v35  ;;  %v6236_v40 = vmul.f32 %v12294_v26, %v12294_v26  ;;  %v10290_v34 = vld [vmem:[%s12688_s11 + $0x4] ss:$0 sm:$0xff] }
0x190c   :  { %v6216_v43 = vpop.f32.mrf.mxu1 }
0x190d   :  { %v6230_v44 = vadd.f32 %v6229_v8, %v6228_v37  ;;  %v6231_v45 = vsel %vm93_vm0, %v6216_v43, 0.0  ;;  %v6238_v41 = vsel %vm93_vm0, %v6236_v40, 0.0 }
0x190e   :  { %6239 = vadd.xlane.f32.xlu2 %v6238_v41 }
0x190f   :  { %v6232_v46 = vadd.f32 %v6231_v45, %v6230_v44 }
0x1911   :  { %v12303_v59 = vadd.f32 %v6232_v46, %v12048_v5  ;;  %v10208_v5 = vld [vmem:[%s12691_s14 + $0x1f8] sm:$0xff] }
0x1912   :  { %6533 = vmatpush.bf16.msrb.mxu1 %v10208_v5  ;;  %v10232_v5 = vld [vmem:[%s12691_s14 + $0x2b8] sm:$0xff] }
0x1913   :  { %v6237_v49 = vmul.f32 %v12303_v59, %v12303_v59 }
0x1915   :  { %v6241_v50 = vsel %vm93_vm0, %v6237_v49, 0.0 }
0x1916   :  { %6242 = vadd.xlane.f32.xlu0 %v6241_v50  ;;  %6534 = vmatpush.bf16.msrb.mxu1 %v10207_v0  ;;  %v10231_v0 = vld [vmem:[%s12691_s14 + $0x2b0] sm:$0xff] }
0x191a   :  { %6535 = vmatpush.bf16.msrb.mxu1 %v10206_v61  ;;  %v10238_v61 = vld [vmem:[%s12691_s14 + $0x2e8] sm:$0xff] }
0x191e   :  { %6536 = vmatpush.bf16.msrb.mxu1 %v10205_v6 }
0x1922   :  { %6685 = vmatpush.bf16.msra.mxu1 %v10224_v11 }
0x1926   :  { %6686 = vmatpush.bf16.msra.mxu1 %v10223_v19 }
0x192a   :  { %6687 = vmatpush.bf16.msra.mxu1 %v10222_v24 }
0x192e   :  { %6688 = vmatpush.bf16.msra.mxu1 %v10221_v9 }
0x1981   :  { %v6240_v56 = vpop.xlane.xlu2 %6239 }
0x1982   :  { %v6244_v60 = vmul.f32 %v6240_v56, %v10759_v21  ;;  %v10235_v56 = vld [vmem:[%s12691_s14 + $0x2d0] sm:$0xff] }
0x1984   :  { %v6246_v62 = vadd.f32 1e-06, %v6244_v60  ;;  %v10234_v60 = vld [vmem:[%s12691_s14 + $0x2c8] sm:$0xff] }
0x1986   :  { %10491 = vrsqrt.f32 %v6246_v62  ;;  %vm6254_vm2 = vweird.f32 %v6246_v62 }
0x1989   :  { %v6243_v47 = vpop.xlane.xlu0 %6242 }
0x198a   :  { %v6245_v2 = vmul.f32 %v6243_v47, %v10759_v21 }
0x198c   :  { %v10492_v32 = vpop.eup %10491  ;;  %v6247_v14 = vadd.f32 1e-06, %v6245_v2 }
0x198d   :  { %v6249_v17 = vmul.f32 %v10492_v32, %v6246_v62  ;;  %vm6255_vm1 = vweird.f32 %v10492_v32  ;;  %v10225_v62 = vld [vmem:[%s12691_s14 + $0x280] sm:$0xff] }
0x198e   :  { %10493 = vrsqrt.f32 %v6247_v14  ;;  %vm6256_vm3 = vmor %vm6254_vm2, %vm6255_vm1  ;;  %vm6264_vm5 = vweird.f32 %v6247_v14 }
0x198f   :  { %v6250_v20 = vmul.f32 %v10492_v32, %v6249_v17 }
0x1991   :  { %v6251_v22 = vmul.f32 0.5, %v6250_v20 }
0x1993   :  { %v6252_v27 = vsub.f32 1.5, %v6251_v22 }
0x1994   :  { %v10494_v12 = vpop.eup %10493 }
0x1995   :  { %v6253_v28 = vmul.f32 %v10492_v32, %v6252_v27  ;;  %v6259_v31 = vmul.f32 %v10494_v12, %v6247_v14  ;;  %vm6265_vm4 = vweird.f32 %v10494_v12 }
0x1996   :  { %vm6266_vm6 = vmor %vm6264_vm5, %vm6265_vm4 }
0x1997   :  { %v6257_v35 = vsel %vm6256_vm3, %v10492_v32, %v6253_v28  ;;  %v6260_v38 = vmul.f32 %v10494_v12, %v6259_v31 }
0x1998   :  { %v6268_v37 = vmul.f32 %v6257_v35, %v12294_v26 }
0x1999   :  { %v6261_v39 = vmul.f32 0.5, %v6260_v38 }
0x199a   :  { %v6271_v43 = vmul.f32 %v10290_v34, %v6268_v37 }
0x199b   :  { %v6262_v40 = vsub.f32 1.5, %v6261_v39 }
0x199c   :  { %v6273_v41 = vpack.c.bf16 %v6271_v43, %v6271_v43 }
0x199d   :  { %v6263_v8 = vmul.f32 %v10494_v12, %v6262_v40 }
0x199e   :  { %v6385_v50 = vunpack.c.l.b16 %v6273_v41 }
0x199f   :  { %v6267_v44 = vsel %vm6266_vm6, %v10494_v12, %v6263_v8  ;;  %vm7694_vm6 = vcmask 7168  }
0x19a0   :  { %v6269_v45 = vmul.f32 %v6267_v44, %v12303_v59 }
0x19a2   :  { %v6272_v46 = vmul.f32 %v10290_v34, %v6269_v45 }
0x19a4   :  { %v6274_v49 = vpack.c.bf16 %v6272_v46, %v6272_v46 }
0x19a6   :  { %v6386_v42 = vunpack.c.l.b16 %v6274_v49 }
0x19a8   :  { %v6387_v3 = vpack.c.b16 %v6386_v42, %v6385_v50 }
0x19aa   :  { %9593 = vmatmul.msk.bf16.vlgmr.msrb.gmra.mxu2 %vm93_vm0, %v6387_v3  ;;  %9610 = vmatmul.msk.bf16.vlgmr.msra.gmra.mxu3 %vm93_vm0, %v6387_v3 }
0x19ab   :  { %9627 = vmatmul.msk.bf16.vlgmr.msrb.gmra.mxu0 %vm93_vm0, %v6387_v3  ;;  %9644 = vmatmul.msk.bf16.vlgmr.msrb.gmra.mxu1 %vm93_vm0, %v6387_v3 }
0x19ac   :  { %6723 = vmatpush.bf16.msrb.mxu2 %v10228_v53  ;;  %6761 = vmatpush.bf16.msra.mxu3 %v10232_v5 }
0x19ad   :  { %6799 = vmatpush.bf16.msrb.mxu0 %v10236_v54  ;;  %6837 = vmatpush.bf16.msrb.mxu1 %v10240_v36 }
0x19b0   :  { %6724 = vmatpush.bf16.msrb.mxu2 %v10227_v55  ;;  %6762 = vmatpush.bf16.msra.mxu3 %v10231_v0 }
0x19b1   :  { %6800 = vmatpush.bf16.msrb.mxu0 %v10235_v56  ;;  %6838 = vmatpush.bf16.msrb.mxu1 %v10239_v58 }
0x19b4   :  { %6725 = vmatpush.bf16.msrb.mxu2 %v10226_v57  ;;  %6763 = vmatpush.bf16.msra.mxu3 %v10230_v52 }
0x19b5   :  { %6801 = vmatpush.bf16.msrb.mxu0 %v10234_v60  ;;  %6839 = vmatpush.bf16.msrb.mxu1 %v10238_v61 }
0x19b8   :  { %6726 = vmatpush.bf16.msrb.mxu2 %v10225_v62  ;;  %6764 = vmatpush.bf16.msra.mxu3 %v10229_v15 }
0x19b9   :  { %6802 = vmatpush.bf16.msrb.mxu0 %v10233_v63  ;;  %6840 = vmatpush.bf16.msrb.mxu1 %v10237_v4 }
0x19ba   :  { %9661 = vmatmul.msk.bf16.vlgmr.msra.gmra.mxu2 %vm93_vm0, %v11600_v10  ;;  %9678 = vmatmul.msk.bf16.vlgmr.msrb.gmra.mxu3 %vm93_vm0, %v11600_v10 }
0x19bb   :  { %9695 = vmatmul.msk.bf16.vlgmr.msra.gmra.mxu0 %vm93_vm0, %v11600_v10  ;;  %9712 = vmatmul.msk.bf16.vlgmr.msra.gmra.mxu1 %vm93_vm0, %v11600_v10 }
0x19ca   :  { %9729 = vmatmul.msk.bf16.vlgmr.msrb.gmra.mxu2 %vm93_vm0, %v11600_v10  ;;  %9746 = vmatmul.msk.bf16.vlgmr.msra.gmra.mxu3 %vm93_vm0, %v11600_v10 }
0x19cb   :  { %9763 = vmatmul.msk.bf16.vlgmr.msrb.gmra.mxu0 %vm93_vm0, %v11600_v10  ;;  %9780 = vmatmul.msk.bf16.vlgmr.msrb.gmra.mxu1 %vm93_vm0, %v11600_v10 }
0x1a28   :  { %v6500_v6 = vpop.f32.mrf.mxu0  ;;  %v6538_v47 = vpop.f32.mrf.mxu1 }
0x1a29   :  { %v6851_v34 = vpack.c.bf16 %v6500_v6, %v6500_v6  ;;  %v6853_v37 = vpack.c.bf16 %v6538_v47, %v6538_v47 }
0x1a2b   :  { %v6925_v36 = vunpack.c.l.b16 %v6851_v34  ;;  %v6955_v55 = vunpack.c.l.b16 %v6853_v37  ;;  %v10560_v34 = vld [vmem:[%s12729_s25 + $0x10] sm:$0xff] }
0x1a2d   :  { %v12479_v2 = vpop.f32.mrf.mxu2  ;;  %v12481_v1 = vpop.f32.mrf.mxu3 }
0x1a2e   :  { %v6847_v0 = vpack.c.bf16 %v12479_v2, %v12479_v2  ;;  %v6849_v56 = vpack.c.bf16 %v12481_v1, %v12481_v1 }
0x1a30   :  { %v6502_v7 = vpop.f32.mrf.mxu0  ;;  %v6540_v51 = vpop.f32.mrf.mxu1  ;;  %v6865_v47 = vunpack.c.l.b16 %v6847_v0  ;;  %v6895_v2 = vunpack.c.l.b16 %v6849_v56  ;;  %v10565_v56 = vld [vmem:[%s12729_s25 + $0x30] sm:$0xff] }
0x1a31   :  { %v6852_v30 = vpack.c.bf16 %v6502_v7, %v6502_v7  ;;  %v6854_v28 = vpack.c.bf16 %v6540_v51, %v6540_v51 }
0x1a33   :  { %v6926_v50 = vunpack.c.l.b16 %v6852_v30  ;;  %v6956_v42 = vunpack.c.l.b16 %v6854_v28 }
0x1a35   :  { %v6426_v11 = vpop.f32.mrf.mxu2  ;;  %v6464_v32 = vpop.f32.mrf.mxu3  ;;  %v6927_v52 = vpack.c.b16 %v6926_v50, %v6925_v36  ;;  %v6957_v60 = vpack.c.b16 %v6956_v42, %v6955_v55  ;;  %v10563_v42 = vld [vmem:[%s12729_s25 + $0x18] sm:$0xff]  ;;  %v10564_v55 = vld [vmem:[%s12729_s25 + $0x20] sm:$0xff] }
0x1a36   :  { %v6848_v3 = vpack.c.bf16 %v6426_v11, %v6426_v11  ;;  %v6850_v53 = vpack.c.bf16 %v6464_v32, %v6464_v32 }
0x1a38   :  { %v6652_v14 = vpop.f32.mrf.mxu0  ;;  %v6690_v16 = vpop.f32.mrf.mxu1  ;;  %v6866_v15 = vunpack.c.l.b16 %v6848_v3  ;;  %v6896_v63 = vunpack.c.l.b16 %v6850_v53 }
0x1a39   :  { %v6859_v18 = vpack.c.bf16 %v6652_v14, %v6652_v14  ;;  %v6861_v19 = vpack.c.bf16 %v6690_v16, %v6690_v16 }
0x1a3a   :  { %v6867_v32 = vpack.c.b16 %v6866_v15, %v6865_v47  ;;  %v6897_v14 = vpack.c.b16 %v6896_v63, %v6895_v2 }
0x1a3b   :  { %v6930_v22 = vunpack.c.l.b16 %v6859_v18  ;;  %v6960_v23 = vunpack.c.l.b16 %v6861_v19 }
0x1a3d   :  { %v6576_v25 = vpop.f32.mrf.mxu2  ;;  %v6614_v17 = vpop.f32.mrf.mxu3 }
0x1a3e   :  { %v6855_v12 = vpack.c.bf16 %v6576_v25, %v6576_v25  ;;  %v6857_v29 = vpack.c.bf16 %v6614_v17, %v6614_v17 }
0x1a40   :  { %v6654_v20 = vpop.f32.mrf.mxu0  ;;  %v6692_v48 = vpop.f32.mrf.mxu1  ;;  %v6870_v43 = vunpack.c.l.b16 %v6855_v12  ;;  %v6900_v44 = vunpack.c.l.b16 %v6857_v29 }
0x1a41   :  { %v6860_v13 = vpack.c.bf16 %v6654_v20, %v6654_v20  ;;  %v6862_v10 = vpack.c.bf16 %v6692_v48, %v6692_v48 }
0x1a43   :  { %v6931_v24 = vunpack.c.l.b16 %v6860_v13  ;;  %v6961_v27 = vunpack.c.l.b16 %v6862_v10 }
0x1a45   :  { %v6932_v31 = vpack.c.b16 %v6931_v24, %v6930_v22  ;;  %v6962_v33 = vpack.c.b16 %v6961_v27, %v6960_v23  ;;  %v6578_v9 = vpop.f32.mrf.mxu2  ;;  %v6616_v35 = vpop.f32.mrf.mxu3 }
0x1a46   :  { %v6856_v38 = vpack.c.bf16 %v6578_v9, %v6578_v9  ;;  %v6858_v39 = vpack.c.bf16 %v6616_v35, %v6616_v35 }
0x1a47   :  { %v6937_v40 = vsel %vm734_vm8, %v6932_v31, 0  ;;  %v6967_v8 = vsel %vm734_vm8, %v6962_v33, 0 }
0x1a48   :  { %v6871_v45 = vunpack.c.l.b16 %v6856_v38  ;;  %v6901_v41 = vunpack.c.l.b16 %v6858_v39  ;;  %v6804_v46 = vpop.f32.mrf.mxu0  ;;  %v6842_v49 = vpop.f32.mrf.mxu1  ;;  %6946 = vmatpush.bf16.xpose.msra.mxu0 %v6937_v40  ;;  %6976 = vmatpush.bf16.xpose.msra.mxu1 %v6967_v8  ;;  %v10559_v38 = vld [vmem:[%s12729_s25] sm:$0xff] }
0x1a49   :  { %v7083_v4 = vpack.c.bf16 %v6804_v46, %v6804_v46  ;;  %v7085_v6 = vpack.c.bf16 %v6842_v49, %v6842_v49  ;;  %v10562_v49 = vld [vmem:[%s12729_s25 + $0x8] sm:$0xff] }
0x1a4a   :  { %v6872_v5 = vpack.c.b16 %v6871_v45, %v6870_v43  ;;  %v6902_v54 = vpack.c.b16 %v6901_v41, %v6900_v44  ;;  %v10561_v44 = vld [vmem:[%s12729_s25 + $0x28] sm:$0xff] }
0x1a4b   :  { %v7150_v16 = vunpack.c.l.b16 %v7083_v4  ;;  %v7178_v25 = vunpack.c.l.b16 %v7085_v6 }
0x1a4c   :  { %v6877_v58 = vsel %vm734_vm8, %v6872_v5, 0  ;;  %v6907_v57 = vsel %vm734_vm8, %v6902_v54, 0 }
0x1a4d   :  { %v6728_v61 = vpop.f32.mrf.mxu2  ;;  %v6766_v62 = vpop.f32.mrf.mxu3  ;;  %6886 = vmatpush.bf16.xpose.msra.mxu2 %v6877_v58  ;;  %6916 = vmatpush.bf16.xpose.msrb.mxu3 %v6907_v57 }
0x1a4e   :  { %v7079_v19 = vpack.c.bf16 %v6728_v61, %v6728_v61  ;;  %v7081_v20 = vpack.c.bf16 %v6766_v62, %v6766_v62  ;;  %v10566_v61 = vld [vmem:[%s12729_s25 + $0x38] sm:$0xff]  ;;  %s12730_s25 = sld [smem:[#allocation10_spill]] }
0x1a4f   :  { %9783 = vmatmul.msk.bf16.vlgmr.msra.gmra.mxu0 %vm734_vm8, %v6927_v52  ;;  %9784 = vmatmul.msk.bf16.vlgmr.msra.gmra.mxu1 %vm734_vm8, %v6957_v60 }
0x1a50   :  { %v6806_v1 = vpop.f32.mrf.mxu0  ;;  %v6844_v7 = vpop.f32.mrf.mxu1  ;;  %v7094_v27 = vunpack.c.l.b16 %v7079_v19  ;;  %v7122_v12 = vunpack.c.l.b16 %v7081_v20 }
0x1a51   :  { %v7084_v51 = vpack.c.bf16 %v6806_v1, %v6806_v1  ;;  %v7086_v11 = vpack.c.bf16 %v6844_v7, %v6844_v7 }
0x1a53   :  { %v7151_v17 = vunpack.c.l.b16 %v7084_v51  ;;  %v7179_v18 = vunpack.c.l.b16 %v7086_v11 }
0x1a54   :  { %9781 = vmatmul.msk.bf16.vlgmr.msra.gmra.mxu2 %vm734_vm8, %v6867_v32  ;;  %9782 = vmatmul.msk.bf16.vlgmr.msrb.gmra.mxu3 %vm734_vm8, %v6897_v14 }
0x1a55   :  { %v7152_v48 = vpack.c.b16 %v7151_v17, %v7150_v16  ;;  %v7180_v13 = vpack.c.b16 %v7179_v18, %v7178_v25  ;;  %v6730_v10 = vpop.f32.mrf.mxu2  ;;  %v6768_v22 = vpop.f32.mrf.mxu3 }
0x1a56   :  { %v7080_v23 = vpack.c.bf16 %v6730_v10, %v6730_v10  ;;  %v7082_v24 = vpack.c.bf16 %v6768_v22, %v6768_v22 }
0x1a57   :  { %7164 = vmatpush.bf16.msrb.mxu0 %v7152_v48  ;;  %7192 = vmatpush.bf16.msrb.mxu1 %v7180_v13 }
0x1a58   :  { %v7095_v29 = vunpack.c.l.b16 %v7080_v23  ;;  %v7123_v30 = vunpack.c.l.b16 %v7082_v24 }
0x1a5a   :  { %v7096_v28 = vpack.c.b16 %v7095_v29, %v7094_v27  ;;  %v7124_v31 = vpack.c.b16 %v7123_v30, %v7122_v12 }
0x1a5c   :  { %7108 = vmatpush.bf16.msrb.mxu2 %v7096_v28  ;;  %7136 = vmatpush.bf16.msra.mxu3 %v7124_v31 }
0x1acc   :  { %v6948_v33 = vpop.f32.mrf.mxu0  ;;  %v6978_v53 = vpop.f32.mrf.mxu1 }
0x1acd   :  { %v6949_v0 = vadd.f32 %v10564_v55, %v6948_v33  ;;  %v6979_v58 = vadd.f32 %v10565_v56, %v6978_v53 }
0x1acf   :  { %v6995_v57 = vsel %vm734_vm8, %v6949_v0, -inf  ;;  %v7001_v60 = vsel %vm734_vm8, %v6979_v58, -inf }
0x1ad4   :  { %v6950_v43 = vpop.f32.mrf.mxu0  ;;  %v6980_v52 = vpop.f32.mrf.mxu1 }
0x1ad5   :  { %v6951_v45 = vadd.f32 %v10561_v44, %v6950_v43  ;;  %v6981_v62 = vadd.f32 %v10566_v61, %v6980_v52 }
0x1ad7   :  { %v6888_v9 = vpop.f32.mrf.mxu2  ;;  %v6918_v35 = vpop.f32.mrf.mxu3  ;;  %v6998_v5 = vsel %vm734_vm8, %v6951_v45, -inf  ;;  %v7004_v15 = vsel %vm734_vm8, %v6981_v62, -inf }
0x1ad8   :  { %v6889_v39 = vadd.f32 %v10559_v38, %v6888_v9  ;;  %v6919_v37 = vadd.f32 %v10560_v34, %v6918_v35 }
0x1ada   :  { %v6989_v40 = vsel %vm734_vm8, %v6919_v37, -inf  ;;  %v6983_v8 = vsel %vm734_vm8, %v6889_v39, -inf }
0x1adb   :  { %6990 = vmax.xlane.f32.xlu0 %v6989_v40  ;;  %6984 = vmax.xlane.f32.xlu1 %v6983_v8 }
0x1adf   :  { %v6890_v41 = vpop.f32.mrf.mxu2  ;;  %v6920_v46 = vpop.f32.mrf.mxu3 }
0x1ae0   :  { %v6891_v50 = vadd.f32 %v10562_v49, %v6890_v41  ;;  %v6921_v3 = vadd.f32 %v10563_v42, %v6920_v46 }
0x1ae2   :  { %v6986_v54 = vsel %vm734_vm8, %v6891_v50, -inf  ;;  %v6992_v36 = vsel %vm734_vm8, %v6921_v3, -inf }
0x1ae3   :  { %6999 = vmax.xlane.f32.xlu0 %v6998_v5  ;;  %6987 = vmax.xlane.f32.xlu2 %v6986_v54 }
0x1ae4   :  { %6993 = vmax.xlane.f32.xlu1 %v6992_v36 }
0x1aeb   :  { %6996 = vmax.xlane.f32.xlu2 %v6995_v57 }
0x1aec   :  { %7002 = vmax.xlane.f32.xlu1 %v7001_v60 }
0x1af3   :  { %7005 = vmax.xlane.f32.xlu2 %v7004_v15 }
0x1b4e   :  { %v6991_v63 = vpop.xlane.xlu0 %6990  ;;  %v6985_v4 = vpop.xlane.xlu1 %6984 }
0x1b4f   :  { %v7009_v6 = vsub.f32 %v6919_v37, %v6991_v63  ;;  %v7007_v47 = vsub.f32 %v6889_v39, %v6985_v4 }
0x1b51   :  { %v7019_v2 = vmul.f32 1.442695, %v7009_v6  ;;  %v7015_v1 = vmul.f32 1.442695, %v7007_v47 }
0x1b53   :  { %10495 = vpow2.f32 %v7019_v2 }
0x1b54   :  { %10497 = vpow2.f32 %v7015_v1 }
0x1b56   :  { %v7000_v7 = vpop.xlane.xlu0 %6999  ;;  %v6988_v51 = vpop.xlane.xlu2 %6987 }
0x1b57   :  { %v7012_v11 = vsub.f32 %v6951_v45, %v7000_v7  ;;  %v7008_v32 = vsub.f32 %v6891_v50, %v6988_v51  ;;  %v6994_v14 = vpop.xlane.xlu1 %6993 }
0x1b58   :  { %v7010_v16 = vsub.f32 %v6921_v3, %v6994_v14 }
0x1b59   :  { %v10496_v25 = vpop.eup %10495  ;;  %v7025_v17 = vmul.f32 1.442695, %v7012_v11  ;;  %v7017_v18 = vmul.f32 1.442695, %v7008_v32 }
0x1b5a   :  { %v10498_v19 = vpop.eup %10497  ;;  %v7021_v20 = vmul.f32 1.442695, %v7010_v16  ;;  %v7037_v48 = vsel %vm734_vm8, %v10496_v25, 0.0 }
0x1b5b   :  { %10499 = vpow2.f32 %v7025_v17  ;;  %7038 = vadd.xlane.f32.xlu2 %v7037_v48  ;;  %v7031_v13 = vsel %vm734_vm8, %v10498_v19, 0.0 }
0x1b5c   :  { %10501 = vpow2.f32 %v7017_v18  ;;  %7032 = vadd.xlane.f32.xlu0 %v7031_v13 }
0x1b5d   :  { %10503 = vpow2.f32 %v7021_v20 }
0x1b5e   :  { %v6997_v10 = vpop.xlane.xlu2 %6996 }
0x1b5f   :  { %v7011_v22 = vsub.f32 %v6949_v0, %v6997_v10  ;;  %v7003_v23 = vpop.xlane.xlu1 %7002 }
0x1b60   :  { %v7013_v24 = vsub.f32 %v6979_v58, %v7003_v23 }
0x1b61   :  { %v10500_v27 = vpop.eup %10499  ;;  %v7023_v12 = vmul.f32 1.442695, %v7011_v22 }
0x1b62   :  { %v10502_v29 = vpop.eup %10501  ;;  %v7027_v30 = vmul.f32 1.442695, %v7013_v24  ;;  %v7046_v28 = vsel %vm734_vm8, %v10500_v27, 0.0 }
0x1b63   :  { %v10504_v31 = vpop.eup %10503  ;;  %10505 = vpow2.f32 %v7023_v12  ;;  %7047 = vadd.xlane.f32.xlu2 %v7046_v28  ;;  %v7034_v33 = vsel %vm734_vm8, %v10502_v29, 0.0  ;;  %v10242_v12 = vld [vmem:[%s12692_s15 + $0x28] sm:$0xff] }
0x1b64   :  { %10507 = vpow2.f32 %v7027_v30  ;;  %7035 = vadd.xlane.f32.xlu1 %v7034_v33  ;;  %v7040_v9 = vsel %vm734_vm8, %v10504_v31, 0.0  ;;  %7256 = vmatpush.bf16.msrb.mxu3 %v10242_v12  ;;  %v10244_v30 = vld [vmem:[%s12692_s15 + $0x38] sm:$0xff]  ;;  %v10245_v12 = vld [vmem:[%s12693_s16 + $0x20] sm:$0xff] }
0x1b65   :  { %7041 = vadd.xlane.f32.xlu0 %v7040_v9  ;;  %7312 = vmatpush.bf16.msra.mxu1 %v10244_v30 }
0x1b66   :  { %v7006_v35 = vpop.xlane.xlu2 %7005 }
0x1b67   :  { %v7014_v38 = vsub.f32 %v6981_v62, %v7006_v35 }
0x1b69   :  { %v10506_v39 = vpop.eup %10505  ;;  %v7029_v34 = vmul.f32 1.442695, %v7014_v38 }
0x1b6a   :  { %v10508_v37 = vpop.eup %10507  ;;  %v7043_v40 = vsel %vm734_vm8, %v10506_v39, 0.0 }
0x1b6b   :  { %10509 = vpow2.f32 %v7029_v34  ;;  %v7049_v8 = vsel %vm734_vm8, %v10508_v37, 0.0 }
0x1b6c   :  { %7044 = vadd.xlane.f32.xlu1 %v7043_v40 }
0x1b6d   :  { %7050 = vadd.xlane.f32.xlu0 %v7049_v8 }
0x1b71   :  { %v10510_v43 = vpop.eup %10509 }
0x1b72   :  { %v7052_v44 = vsel %vm734_vm8, %v10510_v43, 0.0 }
0x1b74   :  { %7053 = vadd.xlane.f32.xlu1 %v7052_v44 }
0x1bce   :  { %v7039_v45 = vpop.xlane.xlu2 %7038 }
0x1bcf   :  { %v7033_v41 = vpop.xlane.xlu0 %7032 }
0x1bd0   :  { %10511 = vrcp.f32 %v7033_v41 }
0x1bd1   :  { %10513 = vrcp.f32 %v7039_v45 }
0x1bd6   :  { %v7048_v46 = vpop.xlane.xlu2 %7047  ;;  %v10512_v50 = vpop.eup %10511 }
0x1bd7   :  { %v7036_v49 = vpop.xlane.xlu1 %7035  ;;  %v10514_v3 = vpop.eup %10513  ;;  %v7063_v53 = vmul.f32 %v10512_v50, %v10498_v19 }
0x1bd8   :  { %v7042_v42 = vpop.xlane.xlu0 %7041  ;;  %10515 = vrcp.f32 %v7036_v49  ;;  %v7065_v5 = vmul.f32 %v10514_v3, %v10496_v25 }
0x1bd9   :  { %10517 = vrcp.f32 %v7042_v42  ;;  %v7071_v55 = vpack.c.bf16 %v7063_v53, %v7063_v53 }
0x1bda   :  { %10519 = vrcp.f32 %v7048_v46  ;;  %v7073_v57 = vpack.c.bf16 %v7065_v5, %v7065_v5 }
0x1bdb   :  { %v7089_v15 = vunpack.c.l.b16 %v7071_v55 }
0x1bdc   :  { %v7117_v6 = vunpack.c.l.b16 %v7073_v57 }
0x1bde   :  { %v10516_v54 = vpop.eup %10515 }
0x1bdf   :  { %v10518_v36 = vpop.eup %10517  ;;  %v7064_v0 = vmul.f32 %v10516_v54, %v10502_v29  ;;  %v7045_v56 = vpop.xlane.xlu1 %7044  ;;  %v10243_v29 = vld [vmem:[%s12692_s15 + $0x30] sm:$0xff] }
0x1be0   :  { %v10520_v58 = vpop.eup %10519  ;;  %v7066_v52 = vmul.f32 %v10518_v36, %v10504_v31  ;;  %v7051_v60 = vpop.xlane.xlu0 %7050  ;;  %10521 = vrcp.f32 %v7045_v56  ;;  %7284 = vmatpush.bf16.msra.mxu0 %v10243_v29 }
0x1be1   :  { %v7072_v61 = vpack.c.bf16 %v7064_v0, %v7064_v0  ;;  %10523 = vrcp.f32 %v7051_v60  ;;  %v7068_v63 = vmul.f32 %v10520_v58, %v10500_v27  ;;  %v10241_v27 = vld [vmem:[%s12692_s15 + $0x20] sm:$0xff] }
0x1be2   :  { %v7074_v62 = vpack.c.bf16 %v7066_v52, %v7066_v52  ;;  %7228 = vmatpush.bf16.msra.mxu2 %v10241_v27 }
0x1be3   :  { %v7090_v4 = vunpack.c.l.b16 %v7072_v61  ;;  %v7076_v51 = vpack.c.bf16 %v7068_v63, %v7068_v63 }
0x1be4   :  { %v7118_v47 = vunpack.c.l.b16 %v7074_v62 }
0x1be5   :  { %v7091_v2 = vpack.c.b16 %v7090_v4, %v7089_v15  ;;  %v7146_v25 = vunpack.c.l.b16 %v7076_v51 }
0x1be6   :  { %v10522_v1 = vpop.eup %10521  ;;  %v7119_v7 = vpack.c.b16 %v7118_v47, %v7117_v6 }
0x1be7   :  { %v7067_v11 = vmul.f32 %v10522_v1, %v10506_v39  ;;  %9785 = vmatmul.msk.bf16.vlgmr.msrb.gmra.mxu2 %vm734_vm8, %v7091_v2  ;;  %v7054_v32 = vpop.xlane.xlu1 %7053  ;;  %v10524_v14 = vpop.eup %10523 }
0x1be8   :  { %9786 = vmatmul.msk.bf16.vlgmr.msra.gmra.mxu3 %vm734_vm8, %v7119_v7  ;;  %10525 = vrcp.f32 %v7054_v32  ;;  %v7069_v17 = vmul.f32 %v10524_v14, %v10508_v37 }
0x1be9   :  { %v7075_v16 = vpack.c.bf16 %v7067_v11, %v7067_v11 }
0x1bea   :  { %v7077_v48 = vpack.c.bf16 %v7069_v17, %v7069_v17 }
0x1beb   :  { %v7145_v18 = vunpack.c.l.b16 %v7075_v16 }
0x1bec   :  { %v7173_v22 = vunpack.c.l.b16 %v7077_v48 }
0x1bed   :  { %v7147_v19 = vpack.c.b16 %v7146_v25, %v7145_v18 }
0x1bee   :  { %v10526_v20 = vpop.eup %10525 }
0x1bef   :  { %v7070_v13 = vmul.f32 %v10526_v20, %v10510_v43  ;;  %9787 = vmatmul.msk.bf16.vlgmr.msrb.gmra.mxu0 %vm734_vm8, %v7147_v19 }
0x1bf1   :  { %v7078_v10 = vpack.c.bf16 %v7070_v13, %v7070_v13 }
0x1bf3   :  { %v7174_v23 = vunpack.c.l.b16 %v7078_v10 }
0x1bf5   :  { %v7175_v24 = vpack.c.b16 %v7174_v23, %v7173_v22  ;;  %v10248_v23 = vld [vmem:[%s12693_s16 + $0x38] sm:$0xff] }
0x1bf6   :  { %7429 = vmatpush.bf16.msrb.mxu2 %v10248_v23 }
0x1bf7   :  { %9788 = vmatmul.msk.bf16.vlgmr.msrb.gmra.mxu1 %vm734_vm8, %v7175_v24  ;;  %v10247_v24 = vld [vmem:[%s12693_s16 + $0x30] sm:$0xff] }
0x1bfa   :  { %7430 = vmatpush.bf16.msrb.mxu2 %v10247_v24 }
0x1c6a   :  { %v7110_v28 = vpop.f32.mrf.mxu2 }
0x1c6b   :  { %v7138_v31 = vpop.f32.mrf.mxu3  ;;  %v7199_v9 = vpack.c.bf16 %v7110_v28, %v7110_v28  ;;  %v10256_v28 = vld [vmem:[%s12694_s17 + $0x78] sm:$0xff] }
0x1c6c   :  { %v7166_v33 = vpop.f32.mrf.mxu0  ;;  %v7201_v35 = vpack.c.bf16 %v7138_v31, %v7138_v31  ;;  %7490 = vmatpush.bf16.msra.mxu3 %v10256_v28  ;;  %v10255_v31 = vld [vmem:[%s12694_s17 + $0x70] sm:$0xff]  ;;  %v7646_v28 = vld [vmem:[%s12730_s25] sm:$0xff] }
0x1c6d   :  { %v7203_v39 = vpack.c.bf16 %v7166_v33, %v7166_v33  ;;  %v7209_v44 = vunpack.c.l.b16 %v7199_v9  ;;  %vm7684_vm4 = vcmp.ne.s32.totalorder %v7646_v28, 4294967196 }
0x1c6e   :  { %v7237_v46 = vunpack.c.l.b16 %v7201_v35 }
0x1c6f   :  { %v7265_v50 = vunpack.c.l.b16 %v7203_v39  ;;  %v10254_v39 = vld [vmem:[%s12694_s17 + $0x68] sm:$0xff] }
0x1c70   :  { %7491 = vmatpush.bf16.msra.mxu3 %v10255_v31 }
0x1c72   :  { %v7112_v38 = vpop.f32.mrf.mxu2 }
0x1c73   :  { %v7200_v34 = vpack.c.bf16 %v7112_v38, %v7112_v38  ;;  %v7140_v37 = vpop.f32.mrf.mxu3 }
0x1c74   :  { %v7202_v40 = vpack.c.bf16 %v7140_v37, %v7140_v37  ;;  %v7168_v8 = vpop.f32.mrf.mxu0  ;;  %v7194_v43 = vpop.f32.mrf.mxu1  ;;  %7492 = vmatpush.bf16.msra.mxu3 %v10254_v39 }
0x1c75   :  { %v7210_v45 = vunpack.c.l.b16 %v7200_v34  ;;  %v7204_v41 = vpack.c.bf16 %v7168_v8, %v7168_v8  ;;  %v7205_v54 = vpack.c.bf16 %v7194_v43, %v7194_v43 }
0x1c76   :  { %v7238_v49 = vunpack.c.l.b16 %v7202_v40  ;;  %v10253_v40 = vld [vmem:[%s12694_s17 + $0x60] sm:$0xff] }
0x1c77   :  { %v7211_v42 = vpack.c.b16 %v7210_v45, %v7209_v44  ;;  %v7266_v3 = vunpack.c.l.b16 %v7204_v41  ;;  %v7293_v0 = vunpack.c.l.b16 %v7205_v54  ;;  %v10252_v45 = vld [vmem:[%s12694_s17 + $0x58] sm:$0xff] }
0x1c78   :  { %v7239_v53 = vpack.c.b16 %v7238_v49, %v7237_v46  ;;  %7493 = vmatpush.bf16.msra.mxu3 %v10253_v40 }
0x1c79   :  { %v7267_v5 = vpack.c.b16 %v7266_v3, %v7265_v50  ;;  %9793 = vmatmul.msk.bf16.vlgmr.msra.gmra.mxu2 %vm734_vm8, %v7211_v42 }
0x1c7a   :  { %9798 = vmatmul.msk.bf16.vlgmr.msrb.gmra.mxu3 %vm734_vm8, %v7239_v53 }
0x1c7b   :  { %9803 = vmatmul.msk.bf16.vlgmr.msra.gmra.mxu0 %vm734_vm8, %v7267_v5  ;;  %v10291_v5 = vld [vmem:[%s12688_s11 + $0x5] ss:$0 sm:$0xff]  ;;  %s7736_s11 = sshll.u32 %s12700_s23, 4  ;;  %s7737_s11 = int_to_ptr.hbm [resolvable:$true] %s7736_s11 }
0x1c7c   :  { %v7196_v36 = vpop.f32.mrf.mxu1  ;;  %7494 = vmatpush.bf16.msra.mxu3 %v10252_v45 }
0x1c7d   :  { %v7206_v55 = vpack.c.bf16 %v7196_v36, %v7196_v36 }
0x1c7f   :  { %v7294_v56 = vunpack.c.l.b16 %v7206_v55 }
0x1c81   :  { %v7295_v58 = vpack.c.b16 %v7294_v56, %v7293_v0 }
0x1c83   :  { %9808 = vmatmul.msk.bf16.vlgmr.msra.gmra.mxu1 %vm734_vm8, %v7295_v58 }
0x1cf8   :  { %v7286_v57 = vpop.f32.mrf.mxu0 }
0x1cf9   :  { %v7322_v63 = vsel %vm93_vm0, %v7286_v57, 0.0  ;;  %v10251_v57 = vld [vmem:[%s12694_s17 + $0x50] sm:$0xff] }
0x1cfa   :  { %7495 = vmatpush.bf16.msra.mxu3 %v10251_v57 }
0x1cfc   :  { %v7230_v52 = vpop.f32.mrf.mxu2 }
0x1cfd   :  { %v7319_v60 = vsel %vm93_vm0, %v7230_v52, 0.0  ;;  %v7258_v61 = vpop.f32.mrf.mxu3  ;;  %v10250_v52 = vld [vmem:[%s12694_s17 + $0x48] sm:$0xff] }
0x1cfe   :  { %v7320_v62 = vsel %vm93_vm0, %v7258_v61, 0.0  ;;  %7496 = vmatpush.bf16.msra.mxu3 %v10250_v52 }
0x1cff   :  { %v7321_v15 = vadd.f32 %v7320_v62, %v7319_v60  ;;  %v10249_v60 = vld [vmem:[%s12694_s17 + $0x40] sm:$0xff] }
0x1d00   :  { %v7314_v4 = vpop.f32.mrf.mxu1  ;;  %v7288_v7 = vpop.f32.mrf.mxu0 }
0x1d01   :  { %v7323_v6 = vadd.f32 %v7322_v63, %v7321_v15  ;;  %v7324_v47 = vsel %vm93_vm0, %v7314_v4, 0.0  ;;  %v7329_v17 = vsel %vm93_vm0, %v7288_v7, 0.0  ;;  %v10262_v7 = vld [vmem:[%s12697_s20 + $0x28] sm:$0xff] }
0x1d02   :  { %7497 = vmatpush.bf16.msra.mxu3 %v10249_v60 }
0x1d03   :  { %v7325_v2 = vadd.f32 %v7324_v47, %v7323_v6  ;;  %v10264_v6 = vld [vmem:[%s12697_s20 + $0x38] sm:$0xff] }
0x1d04   :  { %v7232_v1 = vpop.f32.mrf.mxu2  ;;  %v7630_v47 = vsel %vm93_vm0, %v10264_v6, 0 }
0x1d05   :  { %v12560_v51 = vadd.f32 %v7325_v2, %v12294_v26  ;;  %v7326_v11 = vsel %vm93_vm0, %v7232_v1, 0.0  ;;  %v7260_v32 = vpop.f32.mrf.mxu3  ;;  %7632 = vmatpush.bf16.xpose.msrb.mxu0 %v7630_v47  ;;  %v10263_v2 = vld [vmem:[%s12697_s20 + $0x30] sm:$0xff] }
0x1d06   :  { %v7327_v14 = vsel %vm93_vm0, %v7260_v32, 0.0  ;;  %v7627_v1 = vsel %vm93_vm0, %v10263_v2, 0 }
0x1d07   :  { %v7328_v16 = vadd.f32 %v7327_v14, %v7326_v11  ;;  %v7360_v25 = vmul.f32 %v12560_v51, %v12560_v51  ;;  %v7624_v11 = vsel %vm93_vm0, %v10262_v7, 0 }
0x1d08   :  { %v7316_v18 = vpop.f32.mrf.mxu1 }
0x1d09   :  { %v7330_v19 = vadd.f32 %v7329_v17, %v7328_v16  ;;  %v7331_v20 = vsel %vm93_vm0, %v7316_v18, 0.0  ;;  %v7362_v48 = vsel %vm93_vm0, %v7360_v25, 0.0  ;;  %v10261_v16 = vld [vmem:[%s12697_s20 + $0x20] sm:$0xff] }
0x1d0a   :  { %7363 = vadd.xlane.f32.xlu2 %v7362_v48  ;;  %v7621_v18 = vsel %vm93_vm0, %v10261_v16, 0 }
0x1d0b   :  { %v7332_v26 = vadd.f32 %v7331_v20, %v7330_v19 }
0x1d0d   :  { %v12570_v13 = vadd.f32 %v7332_v26, %v12303_v59  ;;  %v10246_v59 = vld [vmem:[%s12693_s16 + $0x28] sm:$0xff]  ;;  %7633 = vmatpush.bf16.xpose.msrb.mxu0 %v7627_v1 }
0x1d0e   :  { %7431 = vmatpush.bf16.msrb.mxu2 %v10246_v59  ;;  %v10257_v59 = vld [vmem:[%s12697_s20] sm:$0xff] }
0x1d0f   :  { %v7361_v10 = vmul.f32 %v12570_v13, %v12570_v13 }
0x1d11   :  { %v7365_v22 = vsel %vm93_vm0, %v7361_v10, 0.0 }
0x1d12   :  { %7366 = vadd.xlane.f32.xlu0 %v7365_v22  ;;  %7432 = vmatpush.bf16.msrb.mxu2 %v10245_v12  ;;  %v10259_v22 = vld [vmem:[%s12697_s20 + $0x10] sm:$0xff] }
0x1d13   :  { %v7615_v23 = vsel %vm93_vm0, %v10259_v22, 0 }
0x1d15   :  { %7634 = vmatpush.bf16.xpose.msrb.mxu0 %v7624_v11 }
0x1d1d   :  { %7635 = vmatpush.bf16.xpose.msrb.mxu0 %v7621_v18 }
0x1d7d   :  { %v7364_v27 = vpop.xlane.xlu2 %7363 }
0x1d7e   :  { %v7368_v29 = vmul.f32 %v7364_v27, %v10759_v21  ;;  %v7609_v27 = vsel %vm93_vm0, %v10257_v59, 0 }
0x1d80   :  { %v7370_v30 = vadd.f32 1e-06, %v7368_v29 }
0x1d82   :  { %10527 = vrsqrt.f32 %v7370_v30  ;;  %vm7378_vm7 = vweird.f32 %v7370_v30 }
0x1d85   :  { %v7367_v33 = vpop.xlane.xlu0 %7366 }
0x1d86   :  { %v7369_v9 = vmul.f32 %v7367_v33, %v10759_v21  ;;  %v10594_v33 = vmov 0  }
0x1d87   :  { %10277 = vset.pattern.permute.xlu2 %v10594_v33  ;;  %10278 = vset.pattern.permute.xlu0 %v10594_v33 }
0x1d88   :  { %v10528_v35 = vpop.eup %10527  ;;  %v7371_v38 = vadd.f32 1e-06, %v7369_v9  ;;  %10279 = vset.pattern.permute.xlu1 %v10594_v33 }
0x1d89   :  { %v7373_v34 = vmul.f32 %v10528_v35, %v7370_v30  ;;  %vm7379_vm8 = vweird.f32 %v10528_v35 }
0x1d8a   :  { %10529 = vrsqrt.f32 %v7371_v38  ;;  %vm7380_vm9 = vmor %vm7378_vm7, %vm7379_vm8  ;;  %vm7388_vm11 = vweird.f32 %v7371_v38 }
0x1d8b   :  { %v7374_v37 = vmul.f32 %v10528_v35, %v7373_v34 }
0x1d8d   :  { %v7375_v8 = vmul.f32 0.5, %v7374_v37 }
0x1d8f   :  { %v7376_v43 = vsub.f32 1.5, %v7375_v8 }
0x1d90   :  { %v10530_v44 = vpop.eup %10529 }
0x1d91   :  { %v7383_v41 = vmul.f32 %v10530_v44, %v7371_v38  ;;  %v7377_v46 = vmul.f32 %v10528_v35, %v7376_v43  ;;  %vm7389_vm10 = vweird.f32 %v10530_v44 }
0x1d92   :  { %vm7390_vm12 = vmor %vm7388_vm11, %vm7389_vm10 }
0x1d93   :  { %v7384_v49 = vmul.f32 %v10530_v44, %v7383_v41  ;;  %v7381_v42 = vsel %vm7380_vm9, %v10528_v35, %v7377_v46 }
0x1d94   :  { %v7392_v54 = vmul.f32 %v7381_v42, %v12560_v51 }
0x1d95   :  { %v7385_v50 = vmul.f32 0.5, %v7384_v49 }
0x1d96   :  { %v7395_v0 = vmul.f32 %v10291_v5, %v7392_v54 }
0x1d97   :  { %v7386_v3 = vsub.f32 1.5, %v7385_v50 }
0x1d99   :  { %v7387_v53 = vmul.f32 %v10530_v44, %v7386_v3 }
0x1d9b   :  { %v7391_v36 = vsel %vm7390_vm12, %v10530_v44, %v7387_v53 }
0x1d9c   :  { %v7393_v55 = vmul.f32 %v7391_v36, %v12570_v13 }
0x1d9e   :  { %v7396_v56 = vmul.f32 %v10291_v5, %v7393_v55 }
0x1da0   :  { %v7397_v58 = vpack.c.bf16 %v7396_v56, %v7395_v0  ;;  %v7647_v56 = vld [vmem:[%s12730_s25 + $0x8] sm:$0xff] }
0x1da1   :  { %vm7685_vm5 = vcmp.ne.s32.totalorder %v7647_v56, 4294967196 }
0x1da2   :  { %9825 = vmatmul.msk.bf16.vlgmr.msrb.gmra.mxu2 %vm93_vm0, %v7397_v58  ;;  %v10595_v58 = vmov 0.0  }
0x1da3   :  { %v9891_v57 = vsel %vm7684_vm4, 1.0, %v10595_v58  ;;  %v9892_v52 = vsel %vm7685_vm5, 1.0, %v10595_v58 }
0x1da4   :  { %v7704_v60 = vsel %vm7694_vm6, %v9891_v57, 0.0 }
0x1e25   :  { %v7434_v61 = vpop.f32.mrf.mxu2 }
0x1e26   :  { %v7439_v15 = vmax.f32 %v7434_v61, 0.0  ;;  %v7705_v61 = vsel %vm7694_vm6, %v9892_v52, 0.0 }
0x1e2d   :  { %v7436_v62 = vpop.f32.mrf.mxu2 }
0x1e2e   :  { %v7440_v63 = vmax.f32 %v7436_v62, 0.0 }
0x1e30   :  { %v7441_v4 = vpack.c.bf16 %v7440_v63, %v7439_v15  ;;  %v7706_v15 = vadd.f32 %v7705_v61, %v7704_v60 }
0x1e32   :  { %7498 = vmatmul.bf16.vlgmr.msra.gmra.mxu3 %v7441_v4  ;;  %v7707_v63 = vrot.slane %v7706_v15, 4 }
0x1e34   :  { %v7708_v6 = vadd.f32 %v7707_v63, %v7706_v15 }
0x1e36   :  { %v7709_v47 = vrot.slane %v7708_v6, 2 }
0x1e38   :  { %v7710_v2 = vadd.f32 %v7709_v47, %v7708_v6 }
0x1e3a   :  { %v7711_v1 = vrot.slane %v7710_v2, 1 }
0x1e3c   :  { %v7712_v7 = vadd.f32 %v7711_v1, %v7710_v2 }
0x1eb5   :  { %v7499_v32 = vpop.f32.mrf.mxu3 }
0x1eb6   :  { %v7504_v14 = vadd.f32 %v7499_v32, %v12560_v51  ;;  %v10260_v51 = vld [vmem:[%s12697_s20 + $0x18] sm:$0xff] }
0x1eb7   :  { %v7618_v10 = vsel %vm93_vm0, %v10260_v51, 0 }
0x1eb8   :  { %v7507_v25 = vmul.f32 %v7504_v14, %v7504_v14  ;;  %7636 = vmatpush.bf16.xpose.msrb.mxu0 %v7618_v10 }
0x1eba   :  { %v7509_v17 = vsel %vm93_vm0, %v7507_v25, 0.0 }
0x1ebb   :  { %7510 = vadd.xlane.f32.xlu1 %v7509_v17 }
0x1ebd   :  { %v7501_v19 = vpop.f32.mrf.mxu3 }
0x1ebe   :  { %v7505_v20 = vadd.f32 %v7501_v19, %v12570_v13  ;;  %v10258_v13 = vld [vmem:[%s12697_s20 + $0x8] sm:$0xff]  ;;  %v7668_v19 = vlaneseq }
0x1ebf   :  { %v7612_v24 = vsel %vm93_vm0, %v10258_v13, 0 }
0x1ec0   :  { %v7508_v48 = vmul.f32 %v7505_v20, %v7505_v20  ;;  %7637 = vmatpush.bf16.xpose.msrb.mxu0 %v7615_v23 }
0x1ec2   :  { %v7512_v26 = vsel %vm93_vm0, %v7508_v48, 0.0 }
0x1ec3   :  { %7513 = vadd.xlane.f32.xlu2 %v7512_v26 }
0x1ec8   :  { %7638 = vmatpush.bf16.xpose.msrb.mxu0 %v7612_v24 }
0x1ed0   :  { %7639 = vmatpush.bf16.xpose.msrb.mxu0 %v7609_v27 }
0x1edb   :  { %7671 = vperm.xlu2 %10277, %v7646_v28  }
0x1f2e   :  { %v7511_v12 = vpop.xlane.xlu1 %7510 }
0x1f2f   :  { %v7515_v29 = vmul.f32 %v7511_v12, %v10759_v21 }
0x1f31   :  { %v7517_v30 = vadd.f32 1e-06, %v7515_v29 }
0x1f33   :  { %10531 = vrsqrt.f32 %v7517_v30  ;;  %vm7525_vm14 = vweird.f32 %v7517_v30 }
0x1f36   :  { %v7514_v31 = vpop.xlane.xlu2 %7513 }
0x1f37   :  { %v7516_v9 = vmul.f32 %v7514_v31, %v10759_v21  ;;  %v10292_v21 = vld [vmem:[%s12696_s19] ss:$0 sm:$0xff]  ;;  %s10596_s19 = smov [#allocation2]  }
0x1f38   :  { %s7734_s3 = sshll.u32 %s10596_s19, 4  ;;  %s7735_s3 = int_to_ptr.vmem [resolvable:$true] %s7734_s3 }
0x1f39   :  { %v10532_v35 = vpop.eup %10531  ;;  %v7518_v38 = vadd.f32 1e-06, %v7516_v9  ;;  %7739 = dma.vmem_to_hbm [thread:$0]  %s7735_s3, 32, %s7737_s11, [#allocation3]  }
0x1f3a   :  { %v7520_v39 = vmul.f32 %v10532_v35, %v7517_v30  ;;  %vm7526_vm13 = vweird.f32 %v10532_v35 }
0x1f3b   :  { %10533 = vrsqrt.f32 %v7518_v38  ;;  %vm7527_vm15 = vmor %vm7525_vm14, %vm7526_vm13  ;;  %vm7535_vm2 = vweird.f32 %v7518_v38 }
0x1f3c   :  { %v7521_v34 = vmul.f32 %v10532_v35, %v7520_v39 }
0x1f3e   :  { %v7522_v37 = vmul.f32 0.5, %v7521_v34  ;;  %v7672_v51 = vpop.permute.xlu2 %7671 }
0x1f40   :  { %v7523_v40 = vsub.f32 1.5, %v7522_v37 }
0x1f41   :  { %v10534_v8 = vpop.eup %10533 }
0x1f42   :  { %v7524_v43 = vmul.f32 %v10532_v35, %v7523_v40  ;;  %v7530_v44 = vmul.f32 %v10534_v8, %v7518_v38  ;;  %vm7536_vm1 = vweird.f32 %v10534_v8 }
0x1f43   :  { %vm7537_vm3 = vmor %vm7535_vm2, %vm7536_vm1 }
0x1f44   :  { %v7531_v45 = vmul.f32 %v10534_v8, %v7530_v44  ;;  %v7528_v41 = vsel %vm7527_vm15, %v10532_v35, %v7524_v43 }
0x1f45   :  { %v7539_v50 = vmul.f32 %v7528_v41, %v7504_v14 }
0x1f46   :  { %v7532_v46 = vmul.f32 0.5, %v7531_v45 }
0x1f47   :  { %v7544_v53 = vmul.f32 %v10292_v21, %v7539_v50 }
0x1f48   :  { %v7533_v49 = vsub.f32 1.5, %v7532_v46 }
0x1f49   :  { %v7546_v36 = vmul.f32 0.125, %v7544_v53 }
0x1f4a   :  { %v7534_v42 = vmul.f32 %v10534_v8, %v7533_v49 }
0x1f4c   :  { %v7538_v3 = vsel %vm7537_vm3, %v10534_v8, %v7534_v42 }
0x1f4d   :  { %v7540_v5 = vmul.f32 %v7538_v3, %v7505_v20  ;;  %v7669_v20 = vand.u32 127, %v7668_v19 }
0x1f4f   :  { %v7545_v54 = vmul.f32 %v10292_v21, %v7540_v5  ;;  %vm7676_vm8 = vcmp.eq.s32.totalorder %v7669_v20, %v7672_v51  ;;  %vm7720_vm7 = vcmp.eq.s32.totalorder %v7669_v20, 1  ;;  %vm7713_vm9 = vcmp.eq.s32.totalorder %v7669_v20, 0 }
0x1f51   :  { %v7547_v55 = vmul.f32 0.125, %v7545_v54 }
0x1f53   :  { %v7548_v0 = vpack.c.bf16 %v7547_v55, %v7546_v36 }
0x1f55   :  { %9890 = vmatmul.msk.bf16.vlgmr.msrb.gmra.mxu0 %vm93_vm0, %v7548_v0 }
0x1fd2   :  { %v7641_v62 = vpop.f32.mrf.mxu0 }
0x1fd3   :  { %7648 = vmax.xlane.f32.xlu0 %v7641_v62  ;;  %v7678_v22 = vsel %vm7676_vm8, %v7641_v62, 0.0 }
0x1fda   :  { %v7643_v4 = vpop.f32.mrf.mxu0 }
0x1fdb   :  { %7650 = vmax.xlane.f32.xlu1 %v7643_v4 }
0x1fe7   :  { %7674 = vperm.xlu0 %10278, %v7647_v56  }
0x1fef   :  { %7723 = vperm.xlu0 %10278, %v7712_v7  }
0x2046   :  { %v7649_v11 = vpop.xlane.xlu0 %7648 }
0x2047   :  { %v7652_v32 = vsub.f32 %v7641_v62, %v7649_v11 }
0x2049   :  { %v7654_v14 = vmul.f32 1.442695, %v7652_v32 }
0x204b   :  { %10535 = vpow2.f32 %v7654_v14 }
0x204e   :  { %v7651_v16 = vpop.xlane.xlu1 %7650 }
0x204f   :  { %v7653_v25 = vsub.f32 %v7643_v4, %v7651_v16 }
0x2051   :  { %v10536_v17 = vpop.eup %10535  ;;  %v7656_v18 = vmul.f32 1.442695, %v7653_v25 }
0x2052   :  { %7658 = vadd.xlane.f32.xlu1 %v10536_v17 }
0x2053   :  { %10537 = vpow2.f32 %v7656_v18 }
0x2059   :  { %v10538_v48 = vpop.eup %10537  ;;  %v7675_v26 = vpop.permute.xlu0 %7674 }
0x205a   :  { %vm7677_vm0 = vcmp.eq.s32.totalorder %v7669_v20, %v7675_v26  ;;  %7660 = vadd.xlane.f32.xlu1 %v10538_v48 }
0x205b   :  { %v7679_v10 = vsel %vm7677_vm0, %v7643_v4, 0.0 }
0x205c   :  { %7682 = vadd.xlane.f32.xlu2 %v7679_v10 }
0x2061   :  { %v7724_v46 = vpop.permute.xlu0 %7723 }
0x2062   :  { %7680 = vadd.xlane.f32.xlu1 %v7678_v22  ;;  %v7726_v21 = vsel %vm7720_vm7, %v7724_v46, 0.0 }
0x20c5   :  { %v7659_v23 = vpop.xlane.xlu1 %7658 }
0x20c6   :  { %10539 = vlog2.f32 %v7659_v23 }
0x20cc   :  { %v10540_v13 = vpop.eup %10539 }
0x20cd   :  { %v7661_v24 = vpop.xlane.xlu1 %7660  ;;  %v7663_v59 = vmul.f32 0.6931472, %v10540_v13 }
0x20ce   :  { %10541 = vlog2.f32 %v7661_v24 }
0x20cf   :  { %v7666_v12 = vadd.f32 %v7663_v59, %v7649_v11  ;;  %v7683_v33 = vpop.xlane.xlu2 %7682 }
0x20d4   :  { %v10542_v27 = vpop.eup %10541 }
0x20d5   :  { %v7665_v29 = vmul.f32 0.6931472, %v10542_v27  ;;  %v7681_v30 = vpop.xlane.xlu1 %7680 }
0x20d6   :  { %v7690_v28 = vsub.f32 %v7666_v12, %v7681_v30 }
0x20d7   :  { %v7667_v31 = vadd.f32 %v7665_v29, %v7651_v16 }
0x20d8   :  { %v7692_v35 = vmul.f32 %v9891_v57, %v7690_v28 }
0x20d9   :  { %v7691_v9 = vsub.f32 %v7667_v31, %v7683_v33 }
0x20da   :  { %v7695_v34 = vsel %vm7694_vm6, %v7692_v35, 0.0 }
0x20db   :  { %v7693_v38 = vmul.f32 %v9892_v52, %v7691_v9 }
0x20dd   :  { %v7696_v39 = vsel %vm7694_vm6, %v7693_v38, 0.0 }
0x20de   :  { %v7697_v37 = vadd.f32 %v7696_v39, %v7695_v34 }
0x20e0   :  { %v7698_v40 = vrot.slane %v7697_v37, 4 }
0x20e2   :  { %v7699_v8 = vadd.f32 %v7698_v40, %v7697_v37 }
0x20e4   :  { %v7700_v43 = vrot.slane %v7699_v8, 2 }
0x20e6   :  { %v7701_v44 = vadd.f32 %v7700_v43, %v7699_v8 }
0x20e8   :  { %v7702_v45 = vrot.slane %v7701_v44, 1 }
0x20ea   :  { %v7703_v41 = vadd.f32 %v7702_v45, %v7701_v44 }
0x20ec   :  { %7716 = vperm.xlu1 %10279, %v7703_v41  }
0x215e   :  { %v7717_v49 = vpop.permute.xlu1 %7716 }
0x215f   :  { %v7719_v50 = vsel %vm7713_vm9, %v7717_v49, 0.0 }
0x2160   :  { %v7727_v42 = vadd.f32 %v7726_v21, %v7719_v50 }
0x2162   :  { %7728 = vst [vmem:[%s12701_s24] sm:$0x1] %v7727_v42 }
0x2163   :  { %10591 = dma.done.wait [#allocation3], 32  }
0x2164   :  { %10592 = vsyncadd [#allocation3], 4294967264 }
0x2165   :  { %7748 = vsyncpa [#allocation3], 1 }

</bundles_post_ra>
